<compile_context>
chip_gen: v7x
topology: tpu7x:2x2x1
jax: 0.10.0
libtpu: 0.0.40
codegen_flags: <defaults>
</compile_context>

<pallas_src>
import math
from functools import partial

import jax
import jax.numpy as jnp
from jax.experimental import pallas as pl
from jax.experimental.pallas import tpu as pltpu

_NT_DIMS = (((1,), (1,)), ((), ()))  # contract the last dim of both operands (q @ k^T)


# ----------------------------- shared math helpers ---------------------------------
def _layer_norm(x, g, eps=1e-5):
    # matches the custom LayerNorm: no bias, unbiased=False variance, eps=1e-5 (f32)
    mean = jnp.mean(x, axis=-1, keepdims=True)
    var = jnp.mean(jnp.square(x - mean), axis=-1, keepdims=True)
    return (x - mean) * jax.lax.rsqrt(var + eps) * g


def _l2norm_rsqrt(x):
    # F.normalize(t, dim=-1) == t * rsqrt(max(sum(t^2), 1e-24)); rsqrt runs on the EUP
    ss = jnp.sum(jnp.square(x), axis=-1, keepdims=True)
    return x * jax.lax.rsqrt(jnp.maximum(ss, 1e-24))


def _l2norm_ref(x):
    # reference mirrors F.normalize literally: t / max(||t||, 1e-12)
    norm = jnp.sqrt(jnp.sum(jnp.square(x), axis=-1, keepdims=True))
    return x / jnp.maximum(norm, 1e-12)


def _gelu_tanh(x):
    # TODO(synk): torch nn.GELU() is erf-exact; tanh approximation used here (and in the
    # in-file reference) because lax.erf lowering inside Mosaic is not guaranteed.
    c = 0.7978845608028654  # sqrt(2/pi)
    return 0.5 * x * (1.0 + jnp.tanh(c * (x + 0.044715 * x * x * x)))


# kernel input order (all stacked with a leading depth axis)
_PARAM_ORDER = ("g_attn", "wq", "wkv", "nk", "nv", "qs", "ks", "wout",
                "g_out", "g_ff1", "w1", "g_ff2", "w2")


# ----------------------------------- kernel ----------------------------------------
def _make_kernel(heads, dim_head, n_tokens, kv_chunk, precision):
    dh = dim_head
    n = n_tokens
    hn = heads * n
    dot = partial(jnp.dot, precision=precision, preferred_element_type=jnp.float32)

    def kernel(x_ref, g_attn, wq, wkv, nk, nv, qs, ks, wout,
               g_out, g_ff1, w1, g_ff2, w2, o_ref, xs_ref):
        d = pl.program_id(1)  # layer index (depth grid axis, "arbitrary")

        @pl.when(d == 0)
        def _():
            # on-chip 'b c h w -> b (h w) c': tokens on sublanes, channels on lanes
            xs_ref[...] = x_ref[0].T

        x = xs_ref[...]                                        # (n, dim) f32

        # ------------- attention: multi-query, QK-norm, learned null kv -------------
        xn = _layer_norm(x, g_attn[0])
        kv = dot(xn, wkv[0])                                   # (n, 2*dh): [k | v]
        k_m = _l2norm_rsqrt(kv[:, :dh]) * ks[0]                # (n, dh)
        v_m = kv[:, dh:]                                       # (n, dh)
        nk_n = _l2norm_rsqrt(nk[0]) * ks[0]                    # (1, dh)
        nv_v = nv[0]                                           # (1, dh)

        # all heads' q in ONE GEMM, then stacked along sublanes (k/v shared by all heads)
        q2d = dot(xn, wq[0])                                   # (n, heads*dh)
        q_all = jnp.concatenate(
            [q2d[:, h * dh:(h + 1) * dh] for h in range(heads)], axis=0)  # (hn, dh)
        q_all = _l2norm_rsqrt(q_all) * qs[0]                   # softmax scale folded in qs

        # online softmax over kv chunks; null kv folded into the initial m/l/acc state
        m = jnp.sum(q_all * nk_n, axis=-1, keepdims=True)      # (hn, 1) null logit
        l = jnp.ones_like(m)                                   # exp(null - m) == 1
        acc = jnp.broadcast_to(nv_v, (hn, dh))                 # 1 * nv
        for c0 in range(0, n, kv_chunk):
            k_c = k_m[c0:c0 + kv_chunk]
            v_c = v_m[c0:c0 + kv_chunk]
            s = jax.lax.dot_general(q_all, k_c, _NT_DIMS, precision=precision,
                                    preferred_element_type=jnp.float32)   # (hn, ck)
            m_new = jnp.maximum(m, jnp.max(s, axis=-1, keepdims=True))
            alpha = jnp.exp(m - m_new)
            p = jnp.exp(s - m_new)
            l = alpha * l + jnp.sum(p, axis=-1, keepdims=True)
            acc = alpha * acc + dot(p, v_c)
            m = m_new
        out_all = acc * pl.reciprocal(l, approx=False)         # (hn, dh)

        # un-stack heads back onto lanes -> (n, inner); ONE output-projection GEMM
        out2d = jnp.concatenate(
            [out_all[h * n:(h + 1) * n, :] for h in range(heads)], axis=1)
        x = _layer_norm(dot(out2d, wout[0]), g_out[0]) + x     # to_out + residual

        # --------------------------------- feed-forward -----------------------------
        xn = _layer_norm(x, g_ff1[0])
        hdn = _gelu_tanh(dot(xn, w1[0]))
        hdn = _layer_norm(hdn, g_ff2[0])
        x = dot(hdn, w2[0]) + x

        xs_ref[...] = x                                        # carry across depth axis

        @pl.when(d == pl.num_programs(1) - 1)
        def _():
            o_ref[0] = x.T                                     # back to (C, HW)

    return kernel


# ---------------------------------- wrapper -----------------------------------------
class TransformerBlockPallas:
    """Imagen TransformerBlock: depth x (Attention + FeedForward), NCHW in / NCHW out."""

    def __init__(self, dim, *, depth=1, heads=8, dim_head=32, ff_mult=2,
                 context_dim=None, key=None,
                 mxu_precision=jax.lax.Precision.HIGHEST):
        assert context_dim is None, "context path (to_context) not implemented"
        self.dim = dim
        self.depth = depth
        self.heads = heads
        self.dim_head = dim_head
        self.inner = heads * dim_head
        self.hidden = int(dim * ff_mult)
        self.scale = 8.0                      # Attention default scale=8
        # NOTE: drop to Precision.DEFAULT (single bf16 MXU pass) for ~3-6x GEMM throughput
        # if the accuracy budget allows; HIGHEST matches PyTorch f32 semantics.
        self.precision = mxu_precision

        key = key if key is not None else jax.random.PRNGKey(0)
        bq = 1.0 / math.sqrt(dim)
        bo = 1.0 / math.sqrt(self.inner)
        bh = 1.0 / math.sqrt(self.hidden)
        self.layers = []
        for _ in range(depth):
            key, *ks = jax.random.split(key, 15)
            ks = iter(ks)
            u = jax.random.uniform
            p = {
                "g_attn":  u(next(ks), (1, dim), jnp.float32, 0.5, 1.5),
                "wq":      u(next(ks), (heads, dim, dim_head), jnp.float32, -bq, bq),
                "wk":      u(next(ks), (dim, dim_head), jnp.float32, -bq, bq),
                "wv":      u(next(ks), (dim, dim_head), jnp.float32, -bq, bq),
                "nk":      jax.random.normal(next(ks), (1, dim_head), jnp.float32),
                "nv":      jax.random.normal(next(ks), (1, dim_head), jnp.float32),
                "q_scale": u(next(ks), (1, dim_head), jnp.float32, 0.5, 1.5),
                "k_scale": u(next(ks), (1, dim_head), jnp.float32, 0.5, 1.5),
                "wout":    u(next(ks), (heads, dim_head, dim), jnp.float32, -bo, bo),
                "g_out":   u(next(ks), (1, dim), jnp.float32, 0.5, 1.5),
                "g_ff1":   u(next(ks), (1, dim), jnp.float32, 0.5, 1.5),
                "w1":      u(next(ks), (dim, self.hidden), jnp.float32, -bq, bq),
                "g_ff2":   u(next(ks), (1, self.hidden), jnp.float32, 0.5, 1.5),
                "w2":      u(next(ks), (self.hidden, dim), jnp.float32, -bh, bh),
            }
            self.layers.append(p)

    def __call__(self, x_nchw):
        B, C, H, W = x_nchw.shape
        assert C == self.dim
        n = H * W
        dim, dh, heads = self.dim, self.dim_head, self.heads
        inner, hidden = self.inner, self.hidden
        # free reshape (no HBM transpose); the b c h w -> b (h w) c rearrange is on-chip
        x = x_nchw.reshape(B, C, n).astype(jnp.float32)

        # ---- stack / merge per-layer params at trace time (leading depth axis) ----
        def stk(fn):
            return jnp.stack([fn(p) for p in self.layers])

        merged = {
            "g_attn": stk(lambda p: p["g_attn"]),
            # per-head (dim, dh) blocks concatenated along lanes -> single q GEMM
            "wq":     stk(lambda p: jnp.transpose(p["wq"], (1, 0, 2)).reshape(dim, inner)),
            # fused k|v projection (Linear(dim, 2*dh) in the reference module)
            "wkv":    stk(lambda p: jnp.concatenate([p["wk"], p["wv"]], axis=1)),
            "nk":     stk(lambda p: p["nk"]),
            "nv":     stk(lambda p: p["nv"]),
            # fold the attention scale (8.0) into q_scale: removes heads*n*n VPU multiplies
            "qs":     stk(lambda p: p["q_scale"] * self.scale),
            "ks":     stk(lambda p: p["k_scale"]),
            "wout":   stk(lambda p: p["wout"].reshape(inner, dim)),
            "g_out":  stk(lambda p: p["g_out"]),
            "g_ff1":  stk(lambda p: p["g_ff1"]),
            "w1":     stk(lambda p: p["w1"]),
            "g_ff2":  stk(lambda p: p["g_ff2"]),
            "w2":     stk(lambda p: p["w2"]),
        }
        weights = [merged[k] for k in _PARAM_ORDER]

        # kv tile for the online softmax (bounds the live sim/p footprint)
        kv_chunk = next((c for c in (512, 256, 128) if n % c == 0), n)

        kernel = _make_kernel(heads, dh, n, kv_chunk, self.precision)

        def _wmap(b, d):          # weights: stream layer d only
            return (d, 0, 0)

        in_specs = [pl.BlockSpec((1, C, n), lambda b, d: (b, 0, 0))]
        in_specs += [pl.BlockSpec((1,) + w.shape[1:], _wmap) for w in weights]

        # advisory cost estimate so XLA schedules surrounding ops around the call
        per_layer_flops = (
            2 * n * dim * inner                   # q projection
            + 4 * n * dim * dh                    # fused k|v projection
            + 4 * heads * n * n * dh              # qk^T and attn @ v
            + 2 * n * inner * dim                 # output projection
            + 4 * n * dim * hidden)               # feed-forward
        flops = int(B * self.depth * per_layer_flops)
        transc = int(B * self.depth * (heads * n * (n + 1) + n * hidden))
        wbytes = sum(int(w.size) * 4 for w in weights)
        bytes_accessed = int(2 * B * C * n * 4 + wbytes)

        out = pl.pallas_call(
            kernel,
            out_shape=jax.ShapeDtypeStruct((B, C, n), jnp.float32),
            grid=(B, self.depth),                 # batch parallel, depth streamed
            in_specs=in_specs,
            out_specs=pl.BlockSpec((1, C, n), lambda b, d: (b, 0, 0)),
            scratch_shapes=[pltpu.VMEM((n, C), jnp.float32)],   # token activations carry
            compiler_params=pltpu.CompilerParams(
                dimension_semantics=("parallel", "arbitrary"),
                # explicit scoped limit (defaults are 16/32 MiB); leaves headroom on v7x
                vmem_limit_bytes=48 * 1024 * 1024),
            cost_estimate=pl.CostEstimate(
                flops=flops, transcendentals=transc, bytes_accessed=bytes_accessed),
        )(x, *weights)
        return out.reshape(B, C, H, W)


# --------------------------------- reference ----------------------------------------
def reference(block, x_nchw):
    """Pure-JAX mirror of the PyTorch TransformerBlock.forward (context=None)."""
    B, C, H, W = x_nchw.shape
    heads, dh, scale = block.heads, block.dim_head, block.scale
    hi = jax.lax.Precision.HIGHEST
    x = jnp.transpose(x_nchw, (0, 2, 3, 1)).reshape(B, H * W, C).astype(jnp.float32)
    for p in block.layers:
        # ---- Attention ----
        xn = _layer_norm(x, p["g_attn"])
        q = jnp.einsum("bnd,hdk->bhnk", xn, p["wq"], precision=hi)
        k = jnp.einsum("bnd,dk->bnk", xn, p["wk"], precision=hi)
        v = jnp.einsum("bnd,dk->bnk", xn, p["wv"], precision=hi)
        nk = jnp.broadcast_to(p["nk"][None], (B, 1, dh))
        nv = jnp.broadcast_to(p["nv"][None], (B, 1, dh))
        k = jnp.concatenate([nk, k], axis=1)
        v = jnp.concatenate([nv, v], axis=1)
        q = _l2norm_ref(q) * p["q_scale"][0]
        k = _l2norm_ref(k) * p["k_scale"][0]
        sim = jnp.einsum("bhid,bjd->bhij", q, k, precision=hi) * scale
        attn = jax.nn.softmax(sim, axis=-1)
        out = jnp.einsum("bhij,bjd->bhid", attn, v, precision=hi)
        out = jnp.transpose(out, (0, 2, 1, 3)).reshape(B, H * W, heads * dh)
        wout = p["wout"].reshape(heads * dh, block.dim)
        out = jnp.einsum("bni,io->bno", out, wout, precision=hi)
        x = _layer_norm(out, p["g_out"]) + x
        # ---- FeedForward ----
        xn = _layer_norm(x, p["g_ff1"])
        hdn = _gelu_tanh(jnp.einsum("bnd,dk->bnk", xn, p["w1"], precision=hi))
        hdn = _layer_norm(hdn, p["g_ff2"])
        x = jnp.einsum("bnk,kd->bnd", hdn, p["w2"], precision=hi) + x
    x = x.reshape(B, H, W, C)
    return jnp.transpose(x, (0, 3, 1, 2))


if __name__ == "__main__":
    key = jax.random.PRNGKey(0)
    kx, kp = jax.random.split(key)

    B, dim, H, W = 2, 32, 8, 8          # tokens n = 64
    x = jax.random.normal(kx, (B, dim, H, W), dtype=jnp.float32)

    # depth=2 exercises the depth grid axis / per-layer weight streaming path
    block = TransformerBlockPallas(dim=dim, depth=2, heads=4, dim_head=32,
                                   ff_mult=2, key=kp)

    out = jax.block_until_ready(block(x))
    assert out.shape == (B, dim, H, W), out.shape

    ref = jax.block_until_ready(reference(block, x))
    err = float(jnp.max(jnp.abs(out - ref)))
    assert jnp.allclose(out, ref, atol=1e-4, rtol=1e-4), err

    print("KERNEL_OK")
</pallas_src>

<mosaic_0001>
module attributes {stable_mosaic.version = 11 : i64} {
  func.func @kernel(%arg0: i32, %arg1: i32, %arg2: memref<1x32x64xf32, #tpu.memory_space<vmem>>, %arg3: memref<1x1x32xf32, #tpu.memory_space<vmem>>, %arg4: memref<1x32x128xf32, #tpu.memory_space<vmem>>, %arg5: memref<1x32x64xf32, #tpu.memory_space<vmem>>, %arg6: memref<1x1x32xf32, #tpu.memory_space<vmem>>, %arg7: memref<1x1x32xf32, #tpu.memory_space<vmem>>, %arg8: memref<1x1x32xf32, #tpu.memory_space<vmem>>, %arg9: memref<1x1x32xf32, #tpu.memory_space<vmem>>, %arg10: memref<1x128x32xf32, #tpu.memory_space<vmem>>, %arg11: memref<1x1x32xf32, #tpu.memory_space<vmem>>, %arg12: memref<1x1x32xf32, #tpu.memory_space<vmem>>, %arg13: memref<1x32x64xf32, #tpu.memory_space<vmem>>, %arg14: memref<1x1x64xf32, #tpu.memory_space<vmem>>, %arg15: memref<1x64x32xf32, #tpu.memory_space<vmem>>, %arg16: memref<1x32x64xf32, #tpu.memory_space<vmem>>, %arg17: memref<64x32xf32, #tpu.memory_space<vmem>>) attributes {dimension_semantics = [#tpu.dimension_semantics<parallel>, #tpu.dimension_semantics<arbitrary>], iteration_bounds = array<i64: 2, 2>, scalar_prefetch = 0 : i64, scratch_operands = 1 : i64, tpu.core_type = #tpu.core_type<tc>, window_params = [{transform_indices = @transform_0, window_bounds = array<i64: 1, 32, 64>}, {transform_indices = @transform_1, window_bounds = array<i64: 1, 1, 32>}, {transform_indices = @transform_2, window_bounds = array<i64: 1, 32, 128>}, {transform_indices = @transform_3, window_bounds = array<i64: 1, 32, 64>}, {transform_indices = @transform_4, window_bounds = array<i64: 1, 1, 32>}, {transform_indices = @transform_5, window_bounds = array<i64: 1, 1, 32>}, {transform_indices = @transform_6, window_bounds = array<i64: 1, 1, 32>}, {transform_indices = @transform_7, window_bounds = array<i64: 1, 1, 32>}, {transform_indices = @transform_8, window_bounds = array<i64: 1, 128, 32>}, {transform_indices = @transform_9, window_bounds = array<i64: 1, 1, 32>}, {transform_indices = @transform_10, window_bounds = array<i64: 1, 1, 32>}, {transform_indices = @transform_11, window_bounds = array<i64: 1, 32, 64>}, {transform_indices = @transform_12, window_bounds = array<i64: 1, 1, 64>}, {transform_indices = @transform_13, window_bounds = array<i64: 1, 64, 32>}, {transform_indices = @transform_14, window_bounds = array<i64: 1, 32, 64>}]} {
    %c0_i32 = arith.constant 0 : i32
    %0 = arith.cmpi eq, %arg1, %c0_i32 : i32
    %1 = arith.extui %0 : i1 to i32
    %c0_i32_0 = arith.constant 0 : i32
    %2 = arith.cmpi ne, %1, %c0_i32_0 : i32
    scf.if %2 {
      %c0_87 = arith.constant 0 : index
      %c0_88 = arith.constant 0 : index
      %c0_89 = arith.constant 0 : index
      %204 = vector.load %arg2[%c0_87, %c0_88, %c0_89] : memref<1x32x64xf32, #tpu.memory_space<vmem>>, vector<1x32x64xf32>
      %205 = vector.shape_cast %204 : vector<1x32x64xf32> to vector<32x64xf32>
      %206 = tpu.transpose %205, [1, 0] : vector<32x64xf32> -> vector<64x32xf32>
      %c0_90 = arith.constant 0 : index
      %c0_91 = arith.constant 0 : index
      %207 = vector.load %arg17[%c0_90, %c0_91] : memref<64x32xf32, #tpu.memory_space<vmem>>, vector<64x32xf32>
      tpu.vector_store %arg17[%c0_90, %c0_91], %206 {strides = array<i32>} : memref<64x32xf32, #tpu.memory_space<vmem>>, vector<64x32xf32>,
    } else {
    }
    %c0 = arith.constant 0 : index
    %c0_1 = arith.constant 0 : index
    %3 = vector.load %arg17[%c0, %c0_1] : memref<64x32xf32, #tpu.memory_space<vmem>>, vector<64x32xf32>
    %c0_2 = arith.constant 0 : index
    %c0_3 = arith.constant 0 : index
    %c0_4 = arith.constant 0 : index
    %4 = vector.load %arg3[%c0_2, %c0_3, %c0_4] : memref<1x1x32xf32, #tpu.memory_space<vmem>>, vector<1x1x32xf32>
    %5 = vector.shape_cast %4 : vector<1x1x32xf32> to vector<1x32xf32>
    %cst = arith.constant dense<0.000000e+00> : vector<64xf32>
    %6 = vector.multi_reduction <add>, %3, %cst [1] : vector<64x32xf32> to vector<64xf32>
    %7 = vector.shape_cast %6 : vector<64xf32> to vector<64x1xf32>
    %cst_5 = arith.constant 3.200000e+01 : f32
    %8 = vector.broadcast %cst_5 : f32 to vector<64x1xf32>
    %9 = arith.divf %7, %8 : vector<64x1xf32>
    %10 = vector.broadcast %9 : vector<64x1xf32> to vector<64x32xf32>
    %11 = arith.subf %3, %10 : vector<64x32xf32>
    %12 = arith.mulf %11, %11 : vector<64x32xf32>
    %cst_6 = arith.constant dense<0.000000e+00> : vector<64xf32>
    %13 = vector.multi_reduction <add>, %12, %cst_6 [1] : vector<64x32xf32> to vector<64xf32>
    %14 = vector.shape_cast %13 : vector<64xf32> to vector<64x1xf32>
    %cst_7 = arith.constant 3.200000e+01 : f32
    %15 = vector.broadcast %cst_7 : f32 to vector<64x1xf32>
    %16 = arith.divf %14, %15 : vector<64x1xf32>
    %17 = vector.broadcast %9 : vector<64x1xf32> to vector<64x32xf32>
    %18 = arith.subf %3, %17 : vector<64x32xf32>
    %cst_8 = arith.constant 9.99999974E-6 : f32
    %19 = vector.broadcast %cst_8 : f32 to vector<64x1xf32>
    %20 = arith.addf %16, %19 : vector<64x1xf32>
    %21 = math.rsqrt %20 : vector<64x1xf32>
    %22 = vector.broadcast %21 : vector<64x1xf32> to vector<64x32xf32>
    %23 = arith.mulf %18, %22 : vector<64x32xf32>
    %24 = vector.broadcast %5 : vector<1x32xf32> to vector<64x32xf32>
    %25 = arith.mulf %23, %24 : vector<64x32xf32>
    %c0_9 = arith.constant 0 : index
    %c0_10 = arith.constant 0 : index
    %c0_11 = arith.constant 0 : index
    %26 = vector.load %arg5[%c0_9, %c0_10, %c0_11] : memref<1x32x64xf32, #tpu.memory_space<vmem>>, vector<1x32x64xf32>
    %27 = vector.shape_cast %26 : vector<1x32x64xf32> to vector<32x64xf32>
    %cst_12 = arith.constant dense<0.000000e+00> : vector<64x64xf32>
    %28 = tpu.matmul %25, %27, %cst_12 {dimension_numbers = #tpu.dot_dimension_numbers<[1], [0], [0], [1], [0, 0, 1, 1], [], []>, precision = #tpu.contract_precision<fp32>} : vector<64x32xf32>, vector<32x64xf32>, vector<64x64xf32> -> vector<64x64xf32>
    %29 = vector.extract_strided_slice %28 {offsets = [0, 0], sizes = [64, 32], strides = [1, 1]} : vector<64x64xf32> to vector<64x32xf32>
    %30 = arith.mulf %29, %29 : vector<64x32xf32>
    %cst_13 = arith.constant dense<0.000000e+00> : vector<64xf32>
    %31 = vector.multi_reduction <add>, %30, %cst_13 [1] : vector<64x32xf32> to vector<64xf32>
    %32 = vector.shape_cast %31 : vector<64xf32> to vector<64x1xf32>
    %cst_14 = arith.constant 1.000000e-24 : f32
    %33 = vector.broadcast %cst_14 : f32 to vector<64x1xf32>
    %34 = arith.maximumf %32, %33 : vector<64x1xf32>
    %35 = math.rsqrt %34 : vector<64x1xf32>
    %36 = vector.broadcast %35 : vector<64x1xf32> to vector<64x32xf32>
    %37 = arith.mulf %29, %36 : vector<64x32xf32>
    %c0_15 = arith.constant 0 : index
    %c0_16 = arith.constant 0 : index
    %c0_17 = arith.constant 0 : index
    %38 = vector.load %arg9[%c0_15, %c0_16, %c0_17] : memref<1x1x32xf32, #tpu.memory_space<vmem>>, vector<1x1x32xf32>
    %39 = vector.shape_cast %38 : vector<1x1x32xf32> to vector<1x32xf32>
    %40 = vector.broadcast %39 : vector<1x32xf32> to vector<64x32xf32>
    %41 = arith.mulf %37, %40 : vector<64x32xf32>
    %42 = vector.extract_strided_slice %28 {offsets = [0, 32], sizes = [64, 32], strides = [1, 1]} : vector<64x64xf32> to vector<64x32xf32>
    %c0_18 = arith.constant 0 : index
    %c0_19 = arith.constant 0 : index
    %c0_20 = arith.constant 0 : index
    %43 = vector.load %arg6[%c0_18, %c0_19, %c0_20] : memref<1x1x32xf32, #tpu.memory_space<vmem>>, vector<1x1x32xf32>
    %44 = vector.shape_cast %43 : vector<1x1x32xf32> to vector<1x32xf32>
    %45 = arith.mulf %44, %44 : vector<1x32xf32>
    %cst_21 = arith.constant dense<0.000000e+00> : vector<1xf32>
    %46 = vector.multi_reduction <add>, %45, %cst_21 [1] : vector<1x32xf32> to vector<1xf32>
    %47 = vector.shape_cast %46 : vector<1xf32> to vector<1x1xf32>
    %cst_22 = arith.constant 1.000000e-24 : f32
    %48 = vector.broadcast %cst_22 : f32 to vector<1x1xf32>
    %49 = arith.maximumf %47, %48 : vector<1x1xf32>
    %50 = math.rsqrt %49 : vector<1x1xf32>
    %51 = vector.broadcast %50 : vector<1x1xf32> to vector<1x32xf32>
    %52 = arith.mulf %44, %51 : vector<1x32xf32>
    %c0_23 = arith.constant 0 : index
    %c0_24 = arith.constant 0 : index
    %c0_25 = arith.constant 0 : index
    %53 = vector.load %arg9[%c0_23, %c0_24, %c0_25] : memref<1x1x32xf32, #tpu.memory_space<vmem>>, vector<1x1x32xf32>
    %54 = vector.shape_cast %53 : vector<1x1x32xf32> to vector<1x32xf32>
    %55 = arith.mulf %52, %54 : vector<1x32xf32>
    %c0_26 = arith.constant 0 : index
    %c0_27 = arith.constant 0 : index
    %c0_28 = arith.constant 0 : index
    %56 = vector.load %arg7[%c0_26, %c0_27, %c0_28] : memref<1x1x32xf32, #tpu.memory_space<vmem>>, vector<1x1x32xf32>
    %57 = vector.shape_cast %56 : vector<1x1x32xf32> to vector<1x32xf32>
    %c0_29 = arith.constant 0 : index
    %c0_30 = arith.constant 0 : index
    %c0_31 = arith.constant 0 : index
    %58 = vector.load %arg4[%c0_29, %c0_30, %c0_31] : memref<1x32x128xf32, #tpu.memory_space<vmem>>, vector<1x32x128xf32>
    %59 = vector.shape_cast %58 : vector<1x32x128xf32> to vector<32x128xf32>
    %cst_32 = arith.constant dense<0.000000e+00> : vector<64x128xf32>
    %60 = tpu.matmul %25, %59, %cst_32 {dimension_numbers = #tpu.dot_dimension_numbers<[1], [0], [0], [1], [0, 0, 1, 1], [], []>, precision = #tpu.contract_precision<fp32>} : vector<64x32xf32>, vector<32x128xf32>, vector<64x128xf32> -> vector<64x128xf32>
    %61 = vector.extract_strided_slice %60 {offsets = [0, 0], sizes = [64, 32], strides = [1, 1]} : vector<64x128xf32> to vector<64x32xf32>
    %62 = vector.extract_strided_slice %60 {offsets = [0, 32], sizes = [64, 32], strides = [1, 1]} : vector<64x128xf32> to vector<64x32xf32>
    %63 = vector.extract_strided_slice %60 {offsets = [0, 64], sizes = [64, 32], strides = [1, 1]} : vector<64x128xf32> to vector<64x32xf32>
    %64 = vector.extract_strided_slice %60 {offsets = [0, 96], sizes = [64, 32], strides = [1, 1]} : vector<64x128xf32> to vector<64x32xf32>
    %65 = tpu.concatenate %61, %62, %63, %64 in 0 : vector<64x32xf32>, vector<64x32xf32>, vector<64x32xf32>, vector<64x32xf32> -> vector<256x32xf32>
    %66 = arith.mulf %65, %65 : vector<256x32xf32>
    %cst_33 = arith.constant dense<0.000000e+00> : vector<256xf32>
    %67 = vector.multi_reduction <add>, %66, %cst_33 [1] : vector<256x32xf32> to vector<256xf32>
    %68 = vector.shape_cast %67 : vector<256xf32> to vector<256x1xf32>
    %cst_34 = arith.constant 1.000000e-24 : f32
    %69 = vector.broadcast %cst_34 : f32 to vector<256x1xf32>
    %70 = arith.maximumf %68, %69 : vector<256x1xf32>
    %71 = math.rsqrt %70 : vector<256x1xf32>
    %72 = vector.broadcast %71 : vector<256x1xf32> to vector<256x32xf32>
    %73 = arith.mulf %65, %72 : vector<256x32xf32>
    %c0_35 = arith.constant 0 : index
    %c0_36 = arith.constant 0 : index
    %c0_37 = arith.constant 0 : index
    %74 = vector.load %arg8[%c0_35, %c0_36, %c0_37] : memref<1x1x32xf32, #tpu.memory_space<vmem>>, vector<1x1x32xf32>
    %75 = vector.shape_cast %74 : vector<1x1x32xf32> to vector<1x32xf32>
    %76 = vector.broadcast %75 : vector<1x32xf32> to vector<256x32xf32>
    %77 = arith.mulf %73, %76 : vector<256x32xf32>
    %78 = vector.broadcast %55 : vector<1x32xf32> to vector<256x32xf32>
    %79 = arith.mulf %77, %78 : vector<256x32xf32>
    %cst_38 = arith.constant dense<0.000000e+00> : vector<256xf32>
    %80 = vector.multi_reduction <add>, %79, %cst_38 [1] : vector<256x32xf32> to vector<256xf32>
    %81 = vector.shape_cast %80 : vector<256xf32> to vector<256x1xf32>
    %cst_39 = arith.constant 1.000000e+00 : f32
    %82 = vector.broadcast %cst_39 : f32 to vector<256x1xf32>
    %83 = vector.shape_cast %57 : vector<1x32xf32> to vector<1x32xf32>
    %84 = vector.broadcast %83 : vector<1x32xf32> to vector<256x32xf32>
    %cst_40 = arith.constant dense<0.000000e+00> : vector<256x64xf32>
    %85 = tpu.matmul %77, %41, %cst_40 {dimension_numbers = #tpu.dot_dimension_numbers<[1], [1], [0], [0], [0, 0, 1, 0], [], []>, precision = #tpu.contract_precision<fp32>} : vector<256x32xf32>, vector<64x32xf32>, vector<256x64xf32> -> vector<256x64xf32>
    %cst_41 = arith.constant dense<0xFF800000> : vector<256xf32>
    %86 = vector.multi_reduction <maximumf>, %85, %cst_41 [1] : vector<256x64xf32> to vector<256xf32>
    %87 = vector.shape_cast %86 : vector<256xf32> to vector<256x1xf32>
    %88 = arith.maximumf %81, %87 : vector<256x1xf32>
    %89 = arith.subf %81, %88 : vector<256x1xf32>
    %90 = math.exp %89 : vector<256x1xf32>
    %91 = vector.broadcast %88 : vector<256x1xf32> to vector<256x64xf32>
    %92 = arith.subf %85, %91 : vector<256x64xf32>
    %93 = math.exp %92 : vector<256x64xf32>
    %94 = arith.mulf %90, %82 : vector<256x1xf32>
    %cst_42 = arith.constant dense<0.000000e+00> : vector<256xf32>
    %95 = vector.multi_reduction <add>, %93, %cst_42 [1] : vector<256x64xf32> to vector<256xf32>
    %96 = vector.shape_cast %95 : vector<256xf32> to vector<256x1xf32>
    %97 = arith.addf %94, %96 : vector<256x1xf32>
    %98 = vector.broadcast %90 : vector<256x1xf32> to vector<256x32xf32>
    %99 = arith.mulf %98, %84 : vector<256x32xf32>
    %cst_43 = arith.constant dense<0.000000e+00> : vector<256x32xf32>
    %100 = tpu.matmul %93, %42, %cst_43 {dimension_numbers = #tpu.dot_dimension_numbers<[1], [0], [0], [1], [0, 0, 1, 1], [], []>, precision = #tpu.contract_precision<fp32>} : vector<256x64xf32>, vector<64x32xf32>, vector<256x32xf32> -> vector<256x32xf32>
    %101 = arith.addf %99, %100 : vector<256x32xf32>
    %102 = tpu.reciprocal %97 : vector<256x1xf32> -> vector<256x1xf32>
    %103 = vector.broadcast %102 : vector<256x1xf32> to vector<256x32xf32>
    %104 = arith.mulf %101, %103 : vector<256x32xf32>
    %105 = vector.extract_strided_slice %104 {offsets = [0, 0], sizes = [64, 32], strides = [1, 1]} : vector<256x32xf32> to vector<64x32xf32>
    %106 = vector.extract_strided_slice %104 {offsets = [64, 0], sizes = [64, 32], strides = [1, 1]} : vector<256x32xf32> to vector<64x32xf32>
    %107 = vector.extract_strided_slice %104 {offsets = [128, 0], sizes = [64, 32], strides = [1, 1]} : vector<256x32xf32> to vector<64x32xf32>
    %108 = vector.extract_strided_slice %104 {offsets = [192, 0], sizes = [64, 32], strides = [1, 1]} : vector<256x32xf32> to vector<64x32xf32>
    %109 = tpu.concatenate %105, %106, %107, %108 in 1 : vector<64x32xf32>, vector<64x32xf32>, vector<64x32xf32>, vector<64x32xf32> -> vector<64x128xf32>
    %c0_44 = arith.constant 0 : index
    %c0_45 = arith.constant 0 : index
    %c0_46 = arith.constant 0 : index
    %110 = vector.load %arg10[%c0_44, %c0_45, %c0_46] : memref<1x128x32xf32, #tpu.memory_space<vmem>>, vector<1x128x32xf32>
    %111 = vector.shape_cast %110 : vector<1x128x32xf32> to vector<128x32xf32>
    %cst_47 = arith.constant dense<0.000000e+00> : vector<64x32xf32>
    %112 = tpu.matmul %109, %111, %cst_47 {dimension_numbers = #tpu.dot_dimension_numbers<[1], [0], [0], [1], [0, 0, 1, 1], [], []>, precision = #tpu.contract_precision<fp32>} : vector<64x128xf32>, vector<128x32xf32>, vector<64x32xf32> -> vector<64x32xf32>
    %c0_48 = arith.constant 0 : index
    %c0_49 = arith.constant 0 : index
    %c0_50 = arith.constant 0 : index
    %113 = vector.load %arg11[%c0_48, %c0_49, %c0_50] : memref<1x1x32xf32, #tpu.memory_space<vmem>>, vector<1x1x32xf32>
    %114 = vector.shape_cast %113 : vector<1x1x32xf32> to vector<1x32xf32>
    %cst_51 = arith.constant dense<0.000000e+00> : vector<64xf32>
    %115 = vector.multi_reduction <add>, %112, %cst_51 [1] : vector<64x32xf32> to vector<64xf32>
    %116 = vector.shape_cast %115 : vector<64xf32> to vector<64x1xf32>
    %cst_52 = arith.constant 3.200000e+01 : f32
    %117 = vector.broadcast %cst_52 : f32 to vector<64x1xf32>
    %118 = arith.divf %116, %117 : vector<64x1xf32>
    %119 = vector.broadcast %118 : vector<64x1xf32> to vector<64x32xf32>
    %120 = arith.subf %112, %119 : vector<64x32xf32>
    %121 = arith.mulf %120, %120 : vector<64x32xf32>
    %cst_53 = arith.constant dense<0.000000e+00> : vector<64xf32>
    %122 = vector.multi_reduction <add>, %121, %cst_53 [1] : vector<64x32xf32> to vector<64xf32>
    %123 = vector.shape_cast %122 : vector<64xf32> to vector<64x1xf32>
    %cst_54 = arith.constant 3.200000e+01 : f32
    %124 = vector.broadcast %cst_54 : f32 to vector<64x1xf32>
    %125 = arith.divf %123, %124 : vector<64x1xf32>
    %126 = vector.broadcast %118 : vector<64x1xf32> to vector<64x32xf32>
    %127 = arith.subf %112, %126 : vector<64x32xf32>
    %cst_55 = arith.constant 9.99999974E-6 : f32
    %128 = vector.broadcast %cst_55 : f32 to vector<64x1xf32>
    %129 = arith.addf %125, %128 : vector<64x1xf32>
    %130 = math.rsqrt %129 : vector<64x1xf32>
    %131 = vector.broadcast %130 : vector<64x1xf32> to vector<64x32xf32>
    %132 = arith.mulf %127, %131 : vector<64x32xf32>
    %133 = vector.broadcast %114 : vector<1x32xf32> to vector<64x32xf32>
    %134 = arith.mulf %132, %133 : vector<64x32xf32>
    %135 = arith.addf %134, %3 : vector<64x32xf32>
    %c0_56 = arith.constant 0 : index
    %c0_57 = arith.constant 0 : index
    %c0_58 = arith.constant 0 : index
    %136 = vector.load %arg12[%c0_56, %c0_57, %c0_58] : memref<1x1x32xf32, #tpu.memory_space<vmem>>, vector<1x1x32xf32>
    %137 = vector.shape_cast %136 : vector<1x1x32xf32> to vector<1x32xf32>
    %cst_59 = arith.constant dense<0.000000e+00> : vector<64xf32>
    %138 = vector.multi_reduction <add>, %135, %cst_59 [1] : vector<64x32xf32> to vector<64xf32>
    %139 = vector.shape_cast %138 : vector<64xf32> to vector<64x1xf32>
    %cst_60 = arith.constant 3.200000e+01 : f32
    %140 = vector.broadcast %cst_60 : f32 to vector<64x1xf32>
    %141 = arith.divf %139, %140 : vector<64x1xf32>
    %142 = vector.broadcast %141 : vector<64x1xf32> to vector<64x32xf32>
    %143 = arith.subf %135, %142 : vector<64x32xf32>
    %144 = arith.mulf %143, %143 : vector<64x32xf32>
    %cst_61 = arith.constant dense<0.000000e+00> : vector<64xf32>
    %145 = vector.multi_reduction <add>, %144, %cst_61 [1] : vector<64x32xf32> to vector<64xf32>
    %146 = vector.shape_cast %145 : vector<64xf32> to vector<64x1xf32>
    %cst_62 = arith.constant 3.200000e+01 : f32
    %147 = vector.broadcast %cst_62 : f32 to vector<64x1xf32>
    %148 = arith.divf %146, %147 : vector<64x1xf32>
    %149 = vector.broadcast %141 : vector<64x1xf32> to vector<64x32xf32>
    %150 = arith.subf %135, %149 : vector<64x32xf32>
    %cst_63 = arith.constant 9.99999974E-6 : f32
    %151 = vector.broadcast %cst_63 : f32 to vector<64x1xf32>
    %152 = arith.addf %148, %151 : vector<64x1xf32>
    %153 = math.rsqrt %152 : vector<64x1xf32>
    %154 = vector.broadcast %153 : vector<64x1xf32> to vector<64x32xf32>
    %155 = arith.mulf %150, %154 : vector<64x32xf32>
    %156 = vector.broadcast %137 : vector<1x32xf32> to vector<64x32xf32>
    %157 = arith.mulf %155, %156 : vector<64x32xf32>
    %c0_64 = arith.constant 0 : index
    %c0_65 = arith.constant 0 : index
    %c0_66 = arith.constant 0 : index
    %158 = vector.load %arg13[%c0_64, %c0_65, %c0_66] : memref<1x32x64xf32, #tpu.memory_space<vmem>>, vector<1x32x64xf32>
    %159 = vector.shape_cast %158 : vector<1x32x64xf32> to vector<32x64xf32>
    %cst_67 = arith.constant dense<0.000000e+00> : vector<64x64xf32>
    %160 = tpu.matmul %157, %159, %cst_67 {dimension_numbers = #tpu.dot_dimension_numbers<[1], [0], [0], [1], [0, 0, 1, 1], [], []>, precision = #tpu.contract_precision<fp32>} : vector<64x32xf32>, vector<32x64xf32>, vector<64x64xf32> -> vector<64x64xf32>
    %cst_68 = arith.constant 5.000000e-01 : f32
    %161 = vector.broadcast %cst_68 : f32 to vector<64x64xf32>
    %162 = arith.mulf %161, %160 : vector<64x64xf32>
    %cst_69 = arith.constant 4.471500e-02 : f32
    %163 = vector.broadcast %cst_69 : f32 to vector<64x64xf32>
    %164 = arith.mulf %163, %160 : vector<64x64xf32>
    %165 = arith.mulf %164, %160 : vector<64x64xf32>
    %166 = arith.mulf %165, %160 : vector<64x64xf32>
    %167 = arith.addf %160, %166 : vector<64x64xf32>
    %cst_70 = arith.constant 0.797884583 : f32
    %168 = vector.broadcast %cst_70 : f32 to vector<64x64xf32>
    %169 = arith.mulf %168, %167 : vector<64x64xf32>
    %170 = math.tanh %169 : vector<64x64xf32>
    %cst_71 = arith.constant 1.000000e+00 : f32
    %171 = vector.broadcast %cst_71 : f32 to vector<64x64xf32>
    %172 = arith.addf %171, %170 : vector<64x64xf32>
    %173 = arith.mulf %162, %172 : vector<64x64xf32>
    %c0_72 = arith.constant 0 : index
    %c0_73 = arith.constant 0 : index
    %c0_74 = arith.constant 0 : index
    %174 = vector.load %arg14[%c0_72, %c0_73, %c0_74] : memref<1x1x64xf32, #tpu.memory_space<vmem>>, vector<1x1x64xf32>
    %175 = vector.shape_cast %174 : vector<1x1x64xf32> to vector<1x64xf32>
    %cst_75 = arith.constant dense<0.000000e+00> : vector<64xf32>
    %176 = vector.multi_reduction <add>, %173, %cst_75 [1] : vector<64x64xf32> to vector<64xf32>
    %177 = vector.shape_cast %176 : vector<64xf32> to vector<64x1xf32>
    %cst_76 = arith.constant 6.400000e+01 : f32
    %178 = vector.broadcast %cst_76 : f32 to vector<64x1xf32>
    %179 = arith.divf %177, %178 : vector<64x1xf32>
    %180 = vector.broadcast %179 : vector<64x1xf32> to vector<64x64xf32>
    %181 = arith.subf %173, %180 : vector<64x64xf32>
    %182 = arith.mulf %181, %181 : vector<64x64xf32>
    %cst_77 = arith.constant dense<0.000000e+00> : vector<64xf32>
    %183 = vector.multi_reduction <add>, %182, %cst_77 [1] : vector<64x64xf32> to vector<64xf32>
    %184 = vector.shape_cast %183 : vector<64xf32> to vector<64x1xf32>
    %cst_78 = arith.constant 6.400000e+01 : f32
    %185 = vector.broadcast %cst_78 : f32 to vector<64x1xf32>
    %186 = arith.divf %184, %185 : vector<64x1xf32>
    %187 = vector.broadcast %179 : vector<64x1xf32> to vector<64x64xf32>
    %188 = arith.subf %173, %187 : vector<64x64xf32>
    %cst_79 = arith.constant 9.99999974E-6 : f32
    %189 = vector.broadcast %cst_79 : f32 to vector<64x1xf32>
    %190 = arith.addf %186, %189 : vector<64x1xf32>
    %191 = math.rsqrt %190 : vector<64x1xf32>
    %192 = vector.broadcast %191 : vector<64x1xf32> to vector<64x64xf32>
    %193 = arith.mulf %188, %192 : vector<64x64xf32>
    %194 = vector.broadcast %175 : vector<1x64xf32> to vector<64x64xf32>
    %195 = arith.mulf %193, %194 : vector<64x64xf32>
    %c0_80 = arith.constant 0 : index
    %c0_81 = arith.constant 0 : index
    %c0_82 = arith.constant 0 : index
    %196 = vector.load %arg15[%c0_80, %c0_81, %c0_82] : memref<1x64x32xf32, #tpu.memory_space<vmem>>, vector<1x64x32xf32>
    %197 = vector.shape_cast %196 : vector<1x64x32xf32> to vector<64x32xf32>
    %cst_83 = arith.constant dense<0.000000e+00> : vector<64x32xf32>
    %198 = tpu.matmul %195, %197, %cst_83 {dimension_numbers = #tpu.dot_dimension_numbers<[1], [0], [0], [1], [0, 0, 1, 1], [], []>, precision = #tpu.contract_precision<fp32>} : vector<64x64xf32>, vector<64x32xf32>, vector<64x32xf32> -> vector<64x32xf32>
    %199 = arith.addf %198, %135 : vector<64x32xf32>
    %c0_84 = arith.constant 0 : index
    %c0_85 = arith.constant 0 : index
    %200 = vector.load %arg17[%c0_84, %c0_85] : memref<64x32xf32, #tpu.memory_space<vmem>>, vector<64x32xf32>
    tpu.vector_store %arg17[%c0_84, %c0_85], %199 {strides = array<i32>} : memref<64x32xf32, #tpu.memory_space<vmem>>, vector<64x32xf32>,
    %c1_i32 = arith.constant 1 : i32
    %201 = arith.cmpi eq, %arg1, %c1_i32 : i32
    %202 = arith.extui %201 : i1 to i32
    %c0_i32_86 = arith.constant 0 : i32
    %203 = arith.cmpi ne, %202, %c0_i32_86 : i32
    scf.if %203 {
      %204 = tpu.transpose %199, [1, 0] : vector<64x32xf32> -> vector<32x64xf32>
      %c0_87 = arith.constant 0 : index
      %c0_88 = arith.constant 0 : index
      %c0_89 = arith.constant 0 : index
      %205 = vector.load %arg16[%c0_87, %c0_88, %c0_89] : memref<1x32x64xf32, #tpu.memory_space<vmem>>, vector<1x32x64xf32>
      %206 = vector.shape_cast %205 : vector<1x32x64xf32> to vector<32x64xf32>
      %207 = vector.shape_cast %204 : vector<32x64xf32> to vector<1x32x64xf32>
      tpu.vector_store %arg16[%c0_87, %c0_88, %c0_89], %207 {strides = array<i32>} : memref<1x32x64xf32, #tpu.memory_space<vmem>>, vector<1x32x64xf32>,
    } else {
    }
    return
  }
  func.func @transform_0(%arg0: i32, %arg1: i32) -> (i32, i32, i32) {
    %c0_i32 = arith.constant 0 : i32
    %c0_i32_0 = arith.constant 0 : i32
    %c0_i32_1 = arith.constant 0 : i32
    return %arg0, %c0_i32, %c0_i32_0 : i32, i32, i32
  }
  func.func @transform_1(%arg0: i32, %arg1: i32) -> (i32, i32, i32) {
    %c0_i32 = arith.constant 0 : i32
    %c0_i32_0 = arith.constant 0 : i32
    %c0_i32_1 = arith.constant 0 : i32
    return %arg1, %c0_i32, %c0_i32_0 : i32, i32, i32
  }
  func.func @transform_2(%arg0: i32, %arg1: i32) -> (i32, i32, i32) {
    %c0_i32 = arith.constant 0 : i32
    %c0_i32_0 = arith.constant 0 : i32
    %c0_i32_1 = arith.constant 0 : i32
    return %arg1, %c0_i32, %c0_i32_0 : i32, i32, i32
  }
  func.func @transform_3(%arg0: i32, %arg1: i32) -> (i32, i32, i32) {
    %c0_i32 = arith.constant 0 : i32
    %c0_i32_0 = arith.constant 0 : i32
    %c0_i32_1 = arith.constant 0 : i32
    return %arg1, %c0_i32, %c0_i32_0 : i32, i32, i32
  }
  func.func @transform_4(%arg0: i32, %arg1: i32) -> (i32, i32, i32) {
    %c0_i32 = arith.constant 0 : i32
    %c0_i32_0 = arith.constant 0 : i32
    %c0_i32_1 = arith.constant 0 : i32
    return %arg1, %c0_i32, %c0_i32_0 : i32, i32, i32
  }
  func.func @transform_5(%arg0: i32, %arg1: i32) -> (i32, i32, i32) {
    %c0_i32 = arith.constant 0 : i32
    %c0_i32_0 = arith.constant 0 : i32
    %c0_i32_1 = arith.constant 0 : i32
    return %arg1, %c0_i32, %c0_i32_0 : i32, i32, i32
  }
  func.func @transform_6(%arg0: i32, %arg1: i32) -> (i32, i32, i32) {
    %c0_i32 = arith.constant 0 : i32
    %c0_i32_0 = arith.constant 0 : i32
    %c0_i32_1 = arith.constant 0 : i32
    return %arg1, %c0_i32, %c0_i32_0 : i32, i32, i32
  }
  func.func @transform_7(%arg0: i32, %arg1: i32) -> (i32, i32, i32) {
    %c0_i32 = arith.constant 0 : i32
    %c0_i32_0 = arith.constant 0 : i32
    %c0_i32_1 = arith.constant 0 : i32
    return %arg1, %c0_i32, %c0_i32_0 : i32, i32, i32
  }
  func.func @transform_8(%arg0: i32, %arg1: i32) -> (i32, i32, i32) {
    %c0_i32 = arith.constant 0 : i32
    %c0_i32_0 = arith.constant 0 : i32
    %c0_i32_1 = arith.constant 0 : i32
    return %arg1, %c0_i32, %c0_i32_0 : i32, i32, i32
  }
  func.func @transform_9(%arg0: i32, %arg1: i32) -> (i32, i32, i32) {
    %c0_i32 = arith.constant 0 : i32
    %c0_i32_0 = arith.constant 0 : i32
    %c0_i32_1 = arith.constant 0 : i32
    return %arg1, %c0_i32, %c0_i32_0 : i32, i32, i32
  }
  func.func @transform_10(%arg0: i32, %arg1: i32) -> (i32, i32, i32) {
    %c0_i32 = arith.constant 0 : i32
    %c0_i32_0 = arith.constant 0 : i32
    %c0_i32_1 = arith.constant 0 : i32
    return %arg1, %c0_i32, %c0_i32_0 : i32, i32, i32
  }
  func.func @transform_11(%arg0: i32, %arg1: i32) -> (i32, i32, i32) {
    %c0_i32 = arith.constant 0 : i32
    %c0_i32_0 = arith.constant 0 : i32
    %c0_i32_1 = arith.constant 0 : i32
    return %arg1, %c0_i32, %c0_i32_0 : i32, i32, i32
  }
  func.func @transform_12(%arg0: i32, %arg1: i32) -> (i32, i32, i32) {
    %c0_i32 = arith.constant 0 : i32
    %c0_i32_0 = arith.constant 0 : i32
    %c0_i32_1 = arith.constant 0 : i32
    return %arg1, %c0_i32, %c0_i32_0 : i32, i32, i32
  }
  func.func @transform_13(%arg0: i32, %arg1: i32) -> (i32, i32, i32) {
    %c0_i32 = arith.constant 0 : i32
    %c0_i32_0 = arith.constant 0 : i32
    %c0_i32_1 = arith.constant 0 : i32
    return %arg1, %c0_i32, %c0_i32_0 : i32, i32, i32
  }
  func.func @transform_14(%arg0: i32, %arg1: i32) -> (i32, i32, i32) {
    %c0_i32 = arith.constant 0 : i32
    %c0_i32_0 = arith.constant 0 : i32
    %c0_i32_1 = arith.constant 0 : i32
    return %arg0, %c0_i32, %c0_i32_0 : i32, i32, i32
  }
}

</mosaic_0001>

<bundles_post_ra>
// kernel: tpu_custom_call.1
= control target key start
LH: loop header
LB: loop body
LE: loop exit
PB: predicated region body
PF: predicated region fallthrough
CT: control target
= control target key end

     0   :  { %s19719_s0 = inlined_call_operand.vmem [shape: f32[2,32,64], index: 0, kind: input, shape index: {}]   ;;  %s19720_s1 = inlined_call_operand.vmem [shape: f32[2,1,32], index: 1, kind: input, shape index: {}]   ;;  %s19721_s2 = inlined_call_operand.vmem [shape: f32[2,32,128], index: 2, kind: input, shape index: {}]   ;;  %s19722_s3 = inlined_call_operand.vmem [shape: f32[2,32,64], index: 3, kind: input, shape index: {}]   ;;  %s19723_s4 = inlined_call_operand.vmem [shape: f32[2,1,32], index: 4, kind: input, shape index: {}]   ;;  %s19724_s5 = inlined_call_operand.vmem [shape: f32[2,1,32], index: 5, kind: input, shape index: {}]   ;;  %s19725_s6 = inlined_call_operand.vmem [shape: f32[2,1,32], index: 6, kind: input, shape index: {}]   ;;  %s19726_s7 = inlined_call_operand.vmem [shape: f32[2,1,32], index: 7, kind: input, shape index: {}]   ;;  %s19727_s8 = inlined_call_operand.vmem [shape: f32[2,128,32], index: 8, kind: input, shape index: {}]   ;;  %s19728_s9 = inlined_call_operand.vmem [shape: f32[2,1,32], index: 9, kind: input, shape index: {}]   ;;  %s19729_s10 = inlined_call_operand.vmem [shape: f32[2,1,32], index: 10, kind: input, shape index: {}]   ;;  %s19730_s11 = inlined_call_operand.vmem [shape: f32[2,32,64], index: 11, kind: input, shape index: {}]   ;;  %s19731_s12 = inlined_call_operand.vmem [shape: f32[2,1,64], index: 12, kind: input, shape index: {}]   ;;  %s19732_s13 = inlined_call_operand.vmem [shape: f32[2,64,32], index: 13, kind: input, shape index: {}]   ;;  %s19733_s14 = inlined_call_operand.hbm [shape: f32[2,32,64], index: 14, kind: output, shape index: {}]  }
   0x1   :  { %20143 = sst [smem:[#allocation136_spill]] %s19719_s0 }
   0x2   :  { %20144 = sst [smem:[#allocation137_spill]] %s19721_s2 }
   0x3   :  { %20145 = sst [smem:[#allocation138_spill]] %s19722_s3 }
   0x4   :  { %20146 = sst [smem:[#allocation139_spill]] %s19724_s5 }
   0x5   :  { %20147 = sst [smem:[#allocation140_spill]] %s19726_s7 }
   0x6   :  { %20148 = sst [smem:[#allocation141_spill]] %s19727_s8 }
   0x7   :  { %20149 = sst [smem:[#allocation142_spill]] %s19732_s13 }
   0x8   :  { %20150 = sst [smem:[#allocation143_spill]] %s19733_s14 }
   0x9   :  { %19 = vsyncpa [#allocation4], 0 }
   0xa   :  { %21 = vsyncpa [#allocation4 + $0x1], 0  ;;  %s15375_s29 = smov 0   ;;  %s15377_s30 = smov 0  }
   0xb   :  { %s15379_s15 = smov 0   ;;  %s15381_s16 = smov 0  }
   0xc   :  { %s15383_s17 = smov 0   ;;  %s15385_s18 = smov 0  }
   0xd   :  { %s15387_s19 = smov 0   ;;  %s15389_s20 = smov 0  }
   0xe LB: > { %20151 = sst [smem:[#allocation6_spill]] %s15264_s29  ;;  %s11070_s21 = sadd.s32 4294967295, %s15292_s20   ;;  %s15292_s20 = sphi %s15389_s20, %s27_s20   ;;  %s15288_s19 = sphi %s15387_s19, %s20764_s19   ;;  %s15284_s18 = sphi %s15385_s18, %s20763_s18   ;;  %s15280_s17 = sphi %s15383_s17, %s20762_s17   ;;  %s15276_s16 = sphi %s15381_s16, %s20761_s16   ;;  %s15272_s15 = sphi %s15379_s15, %s20760_s15   ;;  %s15268_s30 = sphi %s15377_s30, %s20759_s30   ;;  %s15264_s29 = sphi %s15375_s29, %s20758_s29  }
   0xf   : > { %20152 = sst [smem:[#allocation7_spill]] %s15268_s30  ;;  %s11071_s22 = sadd.s32 4294967294, %s15292_s20  }
  0x10   : > { %20153 = sst [smem:[#allocation8_spill]] %s15272_s15  ;;  %s36_s23 = sadd.s32 1, %s15284_s18 }
  0x11   : > { %20154 = sst [smem:[#allocation9_spill]] %s15276_s16  ;;  %p37_p0 = scmp.ge.s32.totalorder %s36_s23, 2 }
  0x12   : > { %20155 = sst [smem:[#allocation10_spill]] %s15280_s17  ;;  %s39_s24 = sadd.s32 1, %s15288_s19 }
  0x13   : > { %20156 = sst [smem:[#allocation11_spill]] %s15284_s18  ;;  %p420_p1 = scmp.ne.s32.totalorder %s15272_s15, %s15268_s30 }
  0x14   : > { %20157 = sst [smem:[#allocation12_spill]] %s15288_s19  ;;  %p421_p2 = scmp.eq.s32.totalorder %s11070_s21, 3 }
  0x15   : > { %20158 = sst [smem:[#allocation13_spill]] %s15292_s20  ;;  %s20766_s23 = smov (%p37_p0, %s36_s23), 0 }
  0x16   : > { %20159 = sst [smem:[#allocation14_spill]] %s20766_s23  ;;  %s20768_s24 = smov (!%p37_p0, %s39_s24), %s15288_s19 }
  0x17   : > { %p15424_p3 = por %p421_p2, %p420_p1  ;;  %p426_p4 = scmp.ne.s32.totalorder %s15268_s30, %s15264_s29 }
  0x18   : > { %p41_p5 = scmp.ge.s32.totalorder %s20768_s24, 2  ;;  %p427_p6 = scmp.eq.s32.totalorder %s11071_s22, 3 }
  0x19   : > { %s20160_s25 = scalar_select %p15424_p3, 1, 0 }
  0x1a   : > { %p11074_p7 = scmp.ge.s32.totalorder %s15292_s20, 1  ;;  %p541_p8 = scmp.lt.s32.totalorder %s15292_s20, 5 }
  0x1b   : > { %20161 = sst [smem:[#allocation15_spill]] %s20160_s25  ;;  %s20770_s24 = smov (%p41_p5, %s20768_s24), 0 }
  0x1c   : > { %20162 = sst [smem:[#allocation16_spill]] %s20770_s24  ;;  %p15434_p9 = por %p427_p6, %p426_p4 }
  0x1d   : > { %p542_p10 = pnand %p11074_p7, %p541_p8  ;;  %s407_s27 = ssub.s32 %s15288_s19, %s20770_s24 }
  0x1e   : > { %s20163_s26 = scalar_select %p15434_p9, 1, 0 }
  0x1f   : > { %s410_s28 = sadd.s32 1, %s15272_s15  ;;  %p408_p11 = scmp.eq.s32.totalorder %s407_s27, 0 }
  0x20   : > { %20164 = sst [smem:[#allocation17_spill]] %s20163_s26  ;;  %545 = sbr.rel (%p542_p10) target bundleno = 4876 (0x130c), region = 76 }
  0x21   : > { %s15442_s21 = scalar_select %p408_p11, %s15272_s15, %s410_s28  }
  0x23   : > { %20165 = sst [smem:[#allocation18_spill]] %s15442_s21 }
  0x27   : > { %s19737_s22 = sand.u32 1, %s15268_s30   ;;  %p636_p12 = scmp.lt.s32.totalorder %s15280_s17, 1 }
  0x28   : > { %s11075_s23 = sshll.u32 %s19737_s22, 5  ;;  %p641_p13 = scmp.lt.s32.totalorder %s15276_s16, 1 }
  0x29   : > { %s637_s18 = scalar_select %p636_p12, %s15280_s17, 1 }
  0x2a   : > { %s15451_s26 = scalar_select %p641_p13, %s15276_s16, 1 }
  0x2b   : > { %s11101_s27 = sshll.u32 %s637_s18, 5  ;;  %s20166_s0 = sld [smem:[#allocation136_spill]] }
  0x2c   : > { %s11102_s29 = sshll.u32 %s15451_s26, 5  ;;  %s20167_s2 = sld [smem:[#allocation137_spill]] }
  0x2d   : > { %s20168_s3 = sld [smem:[#allocation138_spill]]  ;;  %s20170_s7 = sld [smem:[#allocation140_spill]] }
  0x2e   : > { %s11104_s30 = sshll.u32 %s15451_s26, 7  ;;  %s20171_s8 = sld [smem:[#allocation141_spill]] }
  0x2f   : > { %s676_s15 = scalar_lea.vmem %s19729_s10, %s15451_s26  ;;  %s15506_s14 = scalar_lea.vmem %s19730_s11, %s11102_s29 }
  0x30   : > { %s684_s5 = scalar_lea.vmem %s19731_s12, %s15451_s26  ;;  %s20174_s18 = sld [smem:[#allocation9_spill]] }
  0x31   : > { %s640_s22 = scalar_lea.vmem %s20166_s0, %s11101_s27  ;;  %s673_s27 = scalar_lea.vmem %s19728_s9, %s15451_s26 }
  0x32   : > { %s15468_s16 = scalar_lea.vmem %s20167_s2, %s11102_s29  ;;  %s11106_s2 = sshll.u32 %s15451_s26, 6 }
  0x33   : > { %s15473_s24 = scalar_lea.vmem %s20168_s3, %s11102_s29  ;;  %s15487_s25 = scalar_lea.vmem %s20170_s7, %s15451_s26 }
  0x34   : > { %s15493_s13 = scalar_lea.vmem %s20171_s8, %s11104_s30  ;;  %s20173_s8 = sld [smem:[#allocation142_spill]] }
  0x35   : > { %20172 = sst [smem:[#allocation19_spill]] %s15493_s13  ;;  %s15518_s3 = scalar_lea.vmem [#allocation3], %s11075_s23 }
  0x36   : > { %p11088_p0 = scmp.ne.s32.totalorder %s20174_s18, 0 }
  0x37   : > { %v694_v0 = vld [vmem:[%s640_s22] sm:$0xff] (!%p11088_p0)  ;;  %v695_v1 = vld [vmem:[%s640_s22 + $0x8] sm:$0xff] (!%p11088_p0)  ;;  %v696_v2 = vld [vmem:[%s640_s22 + $0x10] sm:$0xff] (!%p11088_p0)  ;;  %vm730_vm0 = vcmask (!%p11088_p0), 261120  }
  0x38   : > { %693 = sbr.rel (%p11088_p0) target bundleno = 214 (0xd6), region = 80  ;;  %698 = vxpose.xlu0.b32.start [1/4] (short) (narrow) (!%p11088_p0), %v694_v0, 64  ;;  %v697_v3 = vld [vmem:[%s640_s22 + $0x18] sm:$0xff] (!%p11088_p0) }
  0x3a   : > { %s15516_s13 = scalar_lea.vmem %s20173_s8, %s11106_s2 }
  0x3c   : > { %699 = vxpose.xlu0.b32.cont [2/4] (short) (narrow) (!%p11088_p0), %v695_v1, 64 }
  0x40   : > { %700 = vxpose.xlu0.b32.cont [3/4] (short) (narrow) %v696_v2, 64 }
  0x44   : > { %701 = vxpose.xlu0.b32.end [4/4] (short) (narrow) %v697_v3, 64 }
  0xb8   : > { %v714_v4 = vpop.trf.xlu0 }
  0xb9   : > { %731 = vst.msk [vmem:[#allocation2] sm:$0xff] %vm730_vm0, %v714_v4 }
  0xbc   : > { %v715_v5 = vpop.trf.xlu0 }
  0xbd   : > { %732 = vst.msk [vmem:[#allocation2 + $0x8] sm:$0xff] %vm730_vm0, %v715_v5 }
  0xc0   : > { %v716_v6 = vpop.trf.xlu0 }
  0xc1   : > { %733 = vst.msk [vmem:[#allocation2 + $0x10] sm:$0xff] %vm730_vm0, %v716_v6 }
  0xc4   : > { %v717_v7 = vpop.trf.xlu0 }
  0xc5   : > { %734 = vst.msk [vmem:[#allocation2 + $0x18] sm:$0xff] %vm730_vm0, %v717_v7 }
  0xc8   : > { %v718_v8 = vpop.trf.xlu0 }
  0xc9   : > { %735 = vst.msk [vmem:[#allocation2 + $0x20] sm:$0xff] %vm730_vm0, %v718_v8 }
  0xcc   : > { %v719_v9 = vpop.trf.xlu0 }
  0xcd   : > { %736 = vst.msk [vmem:[#allocation2 + $0x28] sm:$0xff] %vm730_vm0, %v719_v9 }
  0xd0   : > { %v720_v10 = vpop.trf.xlu0 }
  0xd1   : > { %737 = vst.msk [vmem:[#allocation2 + $0x30] sm:$0xff] %vm730_vm0, %v720_v10 }
  0xd4   : > { %v721_v11 = vpop.trf.xlu0 }
  0xd5   : > { %738 = vst.msk [vmem:[#allocation2 + $0x38] sm:$0xff] %vm730_vm0, %v721_v11 }
  0xd6 PF: > { %v739_v12 = vld [vmem:[#allocation2] sm:$0xff]  ;;  %vm748_vm1 = vcmask 261120   ;;  %v741_v13 = vld [vmem:[#allocation2 + $0x10] sm:$0xff]  ;;  %v740_v14 = vld [vmem:[#allocation2 + $0x8] sm:$0xff]  ;;  %s20175_s8 = scalar_lea.vmem %s19720_s1, %s15451_s26  ;;  %s15294_s29 = smov 96   ;;  %vm1755_vm2 = vcmask 253952  }
  0xd7   : > { %v749_v15 = vsel %vm748_vm1, %v739_v12, 0.0  ;;  %v755_v16 = vsel %vm748_vm1, %v741_v13, 0.0  ;;  %v742_v17 = vld [vmem:[#allocation2 + $0x18] sm:$0xff]  ;;  %v752_v18 = vsel %vm748_vm1, %v740_v14, 0.0  ;;  %v743_v20 = vld [vmem:[#allocation2 + $0x20] sm:$0xff]  ;;  %v744_v21 = vld [vmem:[#allocation2 + $0x28] sm:$0xff]  ;;  %s20185_s19 = scalar_lea.vmem %s19725_s6, %s15451_s26  ;;  %s20190_s20 = scalar_lea.vmem %s19723_s4, %s15451_s26 }
  0xd8   : > { %750 = vadd.xlane.f32.xlu0 %v749_v15  ;;  %756 = vadd.xlane.f32.xlu1 %v755_v16  ;;  %v758_v19 = vsel %vm748_vm1, %v742_v17, 0.0  ;;  %v761_v22 = vsel %vm748_vm1, %v743_v20, 0.0  ;;  %v764_v23 = vsel %vm748_vm1, %v744_v21, 0.0  ;;  %v745_v24 = vld [vmem:[#allocation2 + $0x30] sm:$0xff]  ;;  %v868_v4 = vld [vmem:[%s15473_s24] sm:$0xff]  ;;  %v869_v5 = vld [vmem:[%s15473_s24 + $0x8] sm:$0xff] }
  0xd9   : > { %v767_v26 = vsel %vm748_vm1, %v745_v24, 0.0  ;;  %v897_v6 = vand.u32 4294901760, %v868_v4  ;;  %v900_v7 = vand.u32 4294901760, %v869_v5  ;;  %v870_v10 = vld [vmem:[%s15473_s24 + $0x10] sm:$0xff]  ;;  %v871_v11 = vld [vmem:[%s15473_s24 + $0x18] sm:$0xff]  ;;  %s15296_s23 = smov 32  }
  0xda   : > { %v906_v15 = vand.u32 4294901760, %v871_v11  ;;  %vm5027_vm3 = vcmask 523264   ;;  %s20665_s17 = sld [smem:[#allocation139_spill]]  ;;  %vm7714_vm4 = vcmask 785408  }
  0xdb   : > { %v1047_v8 = vsub.f32 %v868_v4, %v897_v6  ;;  %v1054_v9 = vsub.f32 %v869_v5, %v900_v7 }
  0xdc   : > { %753 = vadd.xlane.f32.xlu0 %v752_v18  ;;  %759 = vadd.xlane.f32.xlu1 %v758_v19  ;;  %v746_v25 = vld [vmem:[#allocation2 + $0x38] sm:$0xff]  ;;  %v1068_v19 = vsub.f32 %v871_v11, %v906_v15 }
  0xdd   : > { %v770_v27 = vsel %vm748_vm1, %v746_v25, 0.0 }
  0xe0   : > { %762 = vadd.xlane.f32.xlu0 %v761_v22  ;;  %765 = vadd.xlane.f32.xlu1 %v764_v23  ;;  %v1069_v23 = vand.u32 4294901760, %v1068_v19  ;;  %s20666_s18 = scalar_lea.vmem %s20665_s17, %s15451_s26 }
  0xe4   : > { %768 = vadd.xlane.f32.xlu0 %v767_v26  ;;  %771 = vadd.xlane.f32.xlu1 %v770_v27  ;;  %v1070_v26 = vsub.f32 %v1068_v19, %v1069_v23 }
 0x165   : > { %v751_v28 = vpop.xlane.xlu0 %750  ;;  %v757_v29 = vpop.xlane.xlu1 %756 }
 0x166   : > { %v774_v30 = vmul.f32 0.03125, %v751_v28  ;;  %v776_v31 = vmul.f32 0.03125, %v757_v29  ;;  %v1071_v28 = vand.u32 4294901760, %v1070_v26 }
 0x168   : > { %v15537_v32 = vsub.f32 %v739_v12, %v774_v30  ;;  %v15539_v33 = vsub.f32 %v741_v13, %v776_v31  ;;  %v1048_v12 = vand.u32 4294901760, %v1047_v8  ;;  %v1055_v13 = vand.u32 4294901760, %v1054_v9 }
 0x169   : > { %v754_v34 = vpop.xlane.xlu0 %753  ;;  %v760_v35 = vpop.xlane.xlu1 %759  ;;  %v15581_v30 = vpack.c.bf16 %v900_v7, %v897_v6 }
 0x16a   : > { %v775_v36 = vmul.f32 0.03125, %v754_v34  ;;  %v777_v37 = vmul.f32 0.03125, %v760_v35  ;;  %v790_v38 = vmul.f32 %v15537_v32, %v15537_v32  ;;  %v792_v39 = vmul.f32 %v15539_v33, %v15539_v33  ;;  %v1764_v35 = vld [vmem:[%s15468_s16] sm:$0xff] }
 0x16b   : > { %v1049_v16 = vsub.f32 %v1047_v8, %v1048_v12  ;;  %13605 = vmatprep.subr.bf16.mxu1 %v15581_v30  ;;  %v15589_v34 = vpack.c.bf16 %v1054_v9, %v1047_v8 }
 0x16c   : > { %v15545_v40 = vsub.f32 %v740_v14, %v775_v36  ;;  %v15547_v41 = vsub.f32 %v742_v17, %v777_v37  ;;  %v798_v42 = vsel %vm748_vm1, %v790_v38, 0.0  ;;  %v804_v45 = vsel %vm748_vm1, %v792_v39, 0.0  ;;  %13607 = vmatpush3.bf16.msra.mxu1 %v15581_v30  ;;  %v1765_v36 = vld [vmem:[%s15468_s16 + $0x8] sm:$0xff] }
 0x16d   : > { %799 = vadd.xlane.f32.xlu0 %v798_v42  ;;  %v763_v43 = vpop.xlane.xlu0 %762  ;;  %v766_v44 = vpop.xlane.xlu1 %765  ;;  %v903_v14 = vand.u32 4294901760, %v870_v10  ;;  %v1056_v17 = vsub.f32 %v1054_v9, %v1055_v13  ;;  %v1769_v38 = vand.u32 4294901760, %v1764_v35  ;;  %v1772_v39 = vand.u32 4294901760, %v1765_v36 }
 0x16e   : > { %v778_v46 = vmul.f32 0.03125, %v763_v43  ;;  %v779_v47 = vmul.f32 0.03125, %v766_v44  ;;  %v791_v48 = vmul.f32 %v15545_v40, %v15545_v40  ;;  %v793_v49 = vmul.f32 %v15547_v41, %v15547_v41 }
 0x16f   : > { %v1061_v18 = vsub.f32 %v870_v10, %v903_v14  ;;  %v15585_v31 = vpack.c.bf16 %v906_v15, %v903_v14  ;;  %v15596_v42 = vpack.c.bf16 %v1772_v39, %v1769_v38  ;;  %v1919_v43 = vsub.f32 %v1764_v35, %v1769_v38 }
 0x170   : > { %v15555_v50 = vsub.f32 %v743_v20, %v778_v46  ;;  %v15557_v51 = vsub.f32 %v744_v21, %v779_v47  ;;  %v801_v52 = vsel %vm748_vm1, %v791_v48, 0.0  ;;  %v807_v55 = vsel %vm748_vm1, %v793_v49, 0.0 }
 0x171   : > { %805 = vadd.xlane.f32.xlu0 %v804_v45  ;;  %802 = vadd.xlane.f32.xlu1 %v801_v52  ;;  %v769_v53 = vpop.xlane.xlu0 %768  ;;  %v772_v54 = vpop.xlane.xlu1 %771  ;;  %v1050_v20 = vand.u32 4294901760, %v1049_v16  ;;  %v1057_v21 = vand.u32 4294901760, %v1056_v17  ;;  %v1062_v22 = vand.u32 4294901760, %v1061_v18  ;;  %v15594_v37 = vpack.c.bf16 %v1068_v19, %v1061_v18  ;;  %v15614_v16 = vld [vmem:[%s20175_s8] ss:$0 sm:$0xff] }
 0x172   : > { %v780_v56 = vmul.f32 0.03125, %v769_v53  ;;  %v781_v57 = vmul.f32 0.03125, %v772_v54  ;;  %v794_v58 = vmul.f32 %v15555_v50, %v15555_v50  ;;  %v795_v59 = vmul.f32 %v15557_v51, %v15557_v51  ;;  %13609 = vmatprep.subr.bf16.mxu1 %v15585_v31 }
 0x173   : > { %13611 = vmatpush3.bf16.msra.mxu1 %v15585_v31  ;;  %v1926_v44 = vsub.f32 %v1765_v36, %v1772_v39  ;;  %v1920_v45 = vand.u32 4294901760, %v1919_v43  ;;  %v15601_v54 = vpack.c.bf16 %v1055_v13, %v1048_v12 }
 0x174   : > { %v15565_v60 = vsub.f32 %v745_v24, %v780_v56  ;;  %v15567_v61 = vsub.f32 %v746_v25, %v781_v57  ;;  %v810_v62 = vsel %vm748_vm1, %v794_v58, 0.0  ;;  %v813_v63 = vsel %vm748_vm1, %v795_v59, 0.0  ;;  %13653 = vmatprep.subr.bf16.mxu1 %v15596_v42 }
 0x175   : > { %808 = vadd.xlane.f32.xlu1 %v807_v55  ;;  %811 = vadd.xlane.f32.xlu0 %v810_v62  ;;  %v13612_v24 = vpack.c.bf16 %v1057_v21, %v1050_v20  ;;  %v1063_v25 = vsub.f32 %v1061_v18, %v1062_v22  ;;  %v1927_v46 = vand.u32 4294901760, %v1926_v44  ;;  %v1921_v47 = vsub.f32 %v1919_v43, %v1920_v45 }
 0x176   : > { %v796_v0 = vmul.f32 %v15565_v60, %v15565_v60  ;;  %v797_v1 = vmul.f32 %v15567_v61, %v15567_v61  ;;  %v15603_v55 = vpack.c.bf16 %v1926_v44, %v1919_v43  ;;  %v15605_v56 = vpack.c.bf16 %v1069_v23, %v1062_v22 }
 0x177   : > { %13613 = vmatprep.subr.bf16.mxu0 %v13612_v24  ;;  %v1064_v27 = vand.u32 4294901760, %v1063_v25  ;;  %v1928_v48 = vsub.f32 %v1926_v44, %v1927_v46  ;;  %v1922_v49 = vand.u32 4294901760, %v1921_v47  ;;  %v15607_v57 = vpack.c.bf16 %v1927_v46, %v1920_v45 }
 0x178   : > { %v816_v2 = vsel %vm748_vm1, %v796_v0, 0.0  ;;  %v819_v3 = vsel %vm748_vm1, %v797_v1, 0.0  ;;  %13615 = vmatpush3.bf16.msra.mxu0 %v13612_v24 }
 0x179   : > { %814 = vadd.xlane.f32.xlu1 %v813_v63  ;;  %817 = vadd.xlane.f32.xlu0 %v816_v2  ;;  %v13616_v29 = vpack.c.bf16 %v1071_v28, %v1064_v27  ;;  %v1929_v52 = vand.u32 4294901760, %v1928_v48  ;;  %v1766_v28 = vld [vmem:[%s15468_s16 + $0x10] sm:$0xff] }
 0x17a   : > { %v1775_v44 = vand.u32 4294901760, %v1766_v28 }
 0x17b   : > { %13617 = vmatprep.subr.bf16.mxu0 %v13616_v29  ;;  %v15599_v53 = vpack.c.bf16 %v1929_v52, %v1922_v49 }
 0x17c   : > { %13619 = vmatpush3.bf16.msra.mxu0 %v13616_v29  ;;  %v1767_v29 = vld [vmem:[%s15468_s16 + $0x18] sm:$0xff]  ;;  %s15295_s16 = smov 64  }
 0x17d   : > { %820 = vadd.xlane.f32.xlu1 %v819_v3  ;;  %13621 = vmatprep.subr.bf16.mxu0 %v15589_v34  ;;  %v1778_v45 = vand.u32 4294901760, %v1767_v29 }
 0x1fa   : > { %v800_v58 = vpop.xlane.xlu0 %799 }
 0x1fb   : > { %v822_v59 = vmul.f32 0.03125, %v800_v58 }
 0x1fd   : > { %v830_v62 = vadd.f32 1e-05, %v822_v59 }
 0x1fe   : > { %v803_v63 = vpop.xlane.xlu1 %802  ;;  %v806_v0 = vpop.xlane.xlu0 %805 }
 0x1ff   : > { %14834 = vrsqrt.f32 %v830_v62  ;;  %v823_v1 = vmul.f32 0.03125, %v803_v63  ;;  %v824_v2 = vmul.f32 0.03125, %v806_v0 }
 0x201   : > { %v831_v3 = vadd.f32 1e-05, %v823_v1  ;;  %v832_v4 = vadd.f32 1e-05, %v824_v2  ;;  %v15650_v1 = vpack.c.bf16 %v1778_v45, %v1775_v44 }
 0x202   : > { %v809_v5 = vpop.xlane.xlu1 %808  ;;  %v812_v6 = vpop.xlane.xlu0 %811 }
 0x203   : > { %14836 = vrsqrt.f32 %v831_v3  ;;  %v825_v7 = vmul.f32 0.03125, %v809_v5  ;;  %v826_v8 = vmul.f32 0.03125, %v812_v6  ;;  %v15659_v5 = vsub.f32 %v1766_v28, %v1775_v44 }
 0x204   : > { %14838 = vrsqrt.f32 %v832_v4 }
 0x205   : > { %v833_v9 = vadd.f32 1e-05, %v825_v7  ;;  %v834_v10 = vadd.f32 1e-05, %v826_v8 }
 0x206   : > { %v815_v11 = vpop.xlane.xlu1 %814  ;;  %v818_v12 = vpop.xlane.xlu0 %817 }
 0x207   : > { %14840 = vrsqrt.f32 %v833_v9  ;;  %v827_v13 = vmul.f32 0.03125, %v815_v11  ;;  %v828_v14 = vmul.f32 0.03125, %v818_v12 }
 0x208   : > { %14842 = vrsqrt.f32 %v834_v10 }
 0x209   : > { %v14835_v15 = vpop.eup %14834  ;;  %v835_v17 = vadd.f32 1e-05, %v827_v13  ;;  %v836_v18 = vadd.f32 1e-05, %v828_v14  ;;  %v15683_v14 = vsub.f32 %v1767_v29, %v1778_v45  ;;  %v1934_v45 = vand.u32 4294901760, %v15659_v5 }
 0x20a   : > { %v846_v19 = vmul.f32 %v14835_v15, %v15537_v32  ;;  %v821_v20 = vpop.xlane.xlu1 %820 }
 0x20b   : > { %14844 = vrsqrt.f32 %v835_v17  ;;  %v829_v21 = vmul.f32 0.03125, %v821_v20 }
 0x20c   : > { %v860_v22 = vmul.f32 %v15614_v16, %v846_v19  ;;  %14846 = vrsqrt.f32 %v836_v18 }
 0x20d   : > { %v14837_v23 = vpop.eup %14836  ;;  %v837_v24 = vadd.f32 1e-05, %v829_v21 }
 0x20e   : > { %v14839_v25 = vpop.eup %14838  ;;  %v873_v26 = vsel %vm748_vm1, %v860_v22, 0  ;;  %v847_v27 = vmul.f32 %v14837_v23, %v15545_v40 }
 0x20f   : > { %v15622_v35 = vand.u32 4294901760, %v873_v26  ;;  %v848_v36 = vmul.f32 %v14839_v25, %v15539_v33  ;;  %14848 = vrsqrt.f32 %v837_v24 }
 0x210   : > { %v861_v32 = vmul.f32 %v15614_v16, %v847_v27 }
 0x211   : > { %v14841_v38 = vpop.eup %14840  ;;  %v862_v39 = vmul.f32 %v15614_v16, %v848_v36  ;;  %12072 = vmatprep.mubr.f32.mxu0 %v15622_v35  ;;  %v15629_v43 = vsub.f32 %v873_v26, %v15622_v35 }
 0x212   : > { %v14843_v40 = vpop.eup %14842  ;;  %v876_v46 = vsel %vm748_vm1, %v861_v32, 0  ;;  %v849_v47 = vmul.f32 %v14841_v38, %v15547_v41 }
 0x213   : > { %v15633_v48 = vand.u32 4294901760, %v876_v46  ;;  %v879_v33 = vsel %vm748_vm1, %v862_v39, 0  ;;  %v850_v49 = vmul.f32 %v14843_v40, %v15555_v50  ;;  %v15638_v52 = vand.u32 4294901760, %v15629_v43 }
 0x214   : > { %v15640_v58 = vand.u32 4294901760, %v879_v33  ;;  %v863_v59 = vmul.f32 %v15614_v16, %v849_v47  ;;  %v1941_v40 = vand.u32 4294901760, %v15683_v14 }
 0x215   : > { %v14845_v62 = vpop.eup %14844  ;;  %v864_v63 = vmul.f32 %v15614_v16, %v850_v49  ;;  %12073 = vmatmul.mubr.f32.vlgmr.msra.gmra.mrb[0].mxu0 %v15633_v48  ;;  %v968_v41 = vsub.f32 %v15629_v43, %v15638_v52  ;;  %v15648_v0 = vsub.f32 %v876_v46, %v15633_v48 }
 0x216   : > { %v14847_v50 = vpop.eup %14846  ;;  %v882_v2 = vsel %vm748_vm1, %v863_v59, 0  ;;  %v851_v3 = vmul.f32 %v14845_v62, %v15557_v51  ;;  %12075 = vmatprep.mubr.f32.mxu0 %v15640_v58  ;;  %13623 = vmatpush3.bf16.msra.mxu0 %v15589_v34  ;;  %v15657_v4 = vsub.f32 %v879_v33, %v15640_v58 }
 0x217   : > { %v15661_v6 = vand.u32 4294901760, %v882_v2  ;;  %v885_v7 = vsel %vm748_vm1, %v864_v63, 0  ;;  %v852_v8 = vmul.f32 %v14847_v50, %v15565_v60  ;;  %v15665_v9 = vand.u32 4294901760, %v968_v41  ;;  %13625 = vmatprep.subr.bf16.mxu0 %v15594_v37 }
 0x218   : > { %v15668_v51 = vand.u32 4294901760, %v885_v7  ;;  %v865_v10 = vmul.f32 %v15614_v16, %v851_v3  ;;  %v15672_v34 = vand.u32 4294901760, %v15648_v0  ;;  %v15675_v11 = vand.u32 4294901760, %v15657_v4 }
 0x219   : > { %v14849_v12 = vpop.eup %14848  ;;  %v866_v13 = vmul.f32 %v15614_v16, %v852_v8  ;;  %12052 = vmatprep.mubr.f32.mxu1 %v15665_v9  ;;  %12076 = vmatmul.mubr.f32.gmra.mrb[2].mxu0 %v15661_v6  ;;  %v15681_v60 = vsub.f32 %v882_v2, %v15661_v6  ;;  %v1935_v41 = vsub.f32 %v15659_v5, %v1934_v45 }
 0x21a   : > { %v888_v15 = vsel %vm748_vm1, %v865_v10, 0  ;;  %v853_v17 = vmul.f32 %v14849_v12, %v15567_v61  ;;  %12078 = vmatprep.mubr.f32.mxu0 %v15668_v51  ;;  %v978_v18 = vsub.f32 %v15648_v0, %v15672_v34  ;;  %v988_v19 = vsub.f32 %v15657_v4, %v15675_v11  ;;  %13627 = vmatpush3.bf16.msra.mxu0 %v15594_v37 }
 0x21b   : > { %v15693_v20 = vand.u32 4294901760, %v888_v15  ;;  %v891_v21 = vsel %vm748_vm1, %v866_v13, 0  ;;  %v15697_v22 = vand.u32 4294901760, %v15681_v60  ;;  %v15700_v23 = vsub.f32 %v885_v7, %v15668_v51  ;;  %13629 = vmatprep.subr.bf16.mxu0 %v15581_v30 }
 0x21c   : > { %v15703_v61 = vand.u32 4294901760, %v891_v21  ;;  %v867_v24 = vmul.f32 %v15614_v16, %v853_v17  ;;  %v979_v25 = vand.u32 4294901760, %v978_v18  ;;  %v989_v26 = vand.u32 4294901760, %v988_v19 }
 0x21d   : > { %12079 = vmatmul.mubr.f32.gmra.mrb[4].mxu0 %v15693_v20  ;;  %v998_v37 = vsub.f32 %v15681_v60, %v15697_v22  ;;  %v15710_v27 = vand.u32 4294901760, %v15700_v23  ;;  %v15713_v28 = vsub.f32 %v888_v15, %v15693_v20  ;;  %v1942_v50 = vsub.f32 %v15683_v14, %v1941_v40 }
 0x21e   : > { %v894_v29 = vsel %vm748_vm1, %v867_v24, 0  ;;  %12053 = vmatmul.mubr.f32.vlgmr.msra.gmra.mrb[0].mxu1 %v979_v25  ;;  %12081 = vmatprep.mubr.f32.mxu0 %v15703_v61  ;;  %v15718_v16 = vsub.f32 %v891_v21, %v15703_v61  ;;  %v1936_v7 = vand.u32 4294901760, %v1935_v41 }
 0x21f   : > { %v15720_v36 = vand.u32 4294901760, %v894_v29  ;;  %13655 = vmatpush3.bf16.msra.mxu1 %v15596_v42  ;;  %12055 = vmatprep.mubr.f32.mxu1 %v989_v26  ;;  %v999_v32 = vand.u32 4294901760, %v998_v37  ;;  %v1008_v38 = vsub.f32 %v15700_v23, %v15710_v27  ;;  %v15726_v39 = vand.u32 4294901760, %v15713_v28 }
 0x220   : > { %13657 = vmatprep.subr.bf16.mxu1 %v15650_v1  ;;  %v15730_v44 = vand.u32 4294901760, %v15718_v16  ;;  %v1943_v8 = vand.u32 4294901760, %v1942_v50 }
 0x221   : > { %12082 = vmatmul.mubr.f32.gmra.mrb[6].mxu0 %v15720_v36  ;;  %v1009_v46 = vand.u32 4294901760, %v1008_v38  ;;  %v1018_v47 = vsub.f32 %v15713_v28, %v15726_v39  ;;  %v15738_v33 = vsub.f32 %v894_v29, %v15720_v36 }
 0x222   : > { %12056 = vmatmul.mubr.f32.gmra.mrb[2].mxu1 %v999_v32  ;;  %12092 = vmatprep.mubr.f32.mxu0 %v15629_v43  ;;  %v1028_v49 = vsub.f32 %v15718_v16, %v15730_v44  ;;  %v13664_v10 = vpack.c.bf16 %v1943_v8, %v1936_v7 }
 0x223   : > { %12058 = vmatprep.mubr.f32.mxu1 %v1009_v46  ;;  %v1019_v59 = vand.u32 4294901760, %v1018_v47  ;;  %13659 = vmatpush3.bf16.msra.mxu1 %v15650_v1  ;;  %v15745_v62 = vand.u32 4294901760, %v15738_v33 }
 0x224   : > { %v1029_v63 = vand.u32 4294901760, %v1028_v49  ;;  %13661 = vmatprep.subr.bf16.mxu1 %v15599_v53 }
 0x225   : > { %12093 = vmatmul.mubr.f32.vlgmr.msra.gmra.mrb[0].mxu0 %v15648_v0  ;;  %v1038_v2 = vsub.f32 %v15738_v33, %v15745_v62 }
 0x226   : > { %12059 = vmatmul.mubr.f32.gmra.mrb[4].mxu1 %v1019_v59  ;;  %12095 = vmatprep.mubr.f32.mxu0 %v15657_v4 }
 0x227   : > { %12061 = vmatprep.mubr.f32.mxu1 %v1029_v63  ;;  %13631 = vmatpush3.bf16.msra.mxu0 %v15581_v30  ;;  %v1039_v3 = vand.u32 4294901760, %v1038_v2 }
 0x228   : > { %13633 = vmatprep.subr.bf16.mxu0 %v15585_v31 }
 0x229   : > { %12096 = vmatmul.mubr.f32.gmra.mrb[2].mxu0 %v15681_v60 }
 0x22a   : > { %12062 = vmatmul.mubr.f32.gmra.mrb[6].mxu1 %v1039_v3  ;;  %12098 = vmatprep.mubr.f32.mxu0 %v15700_v23 }
 0x22b   : > { %12172 = vmatprep.mubr.f32.mxu1 %v15665_v9  ;;  %13635 = vmatpush3.bf16.msra.mxu0 %v15585_v31 }
 0x22c   : > { %13637 = vmatprep.subr.bf16.mxu0 %v15601_v54 }
 0x22d   : > { %12099 = vmatmul.mubr.f32.gmra.mrb[4].mxu0 %v15713_v28 }
 0x22e   : > { %12173 = vmatmul.mubr.f32.vlgmr.msra.gmra.mrb[8].mxu1 %v979_v25  ;;  %12101 = vmatprep.mubr.f32.mxu0 %v15718_v16 }
 0x22f   : > { %13663 = vmatpush3.bf16.msra.mxu1 %v15599_v53  ;;  %12175 = vmatprep.mubr.f32.mxu1 %v989_v26  ;;  %v13672_v53 = vpack.c.bf16 %v15683_v14, %v15659_v5 }
 0x230   : > { %13665 = vmatprep.subr.bf16.mxu1 %v13664_v10 }
 0x231   : > { %12102 = vmatmul.mubr.f32.gmra.mrb[6].mxu0 %v15738_v33 }
 0x232   : > { %12176 = vmatmul.mubr.f32.gmra.mrb[10].mxu1 %v999_v32  ;;  %12112 = vmatprep.mubr.f32.mxu0 %v15638_v52 }
 0x233   : > { %12178 = vmatprep.mubr.f32.mxu1 %v1009_v46  ;;  %13667 = vmatpush3.bf16.msra.mxu1 %v13664_v10 }
 0x234   : > { %13669 = vmatprep.subr.bf16.mxu1 %v15603_v55 }
 0x235   : > { %12113 = vmatmul.mubr.f32.vlgmr.msra.gmra.mrb[0].mxu0 %v15672_v34 }
 0x236   : > { %12179 = vmatmul.mubr.f32.gmra.mrb[12].mxu1 %v1019_v59  ;;  %12115 = vmatprep.mubr.f32.mxu0 %v15675_v11 }
 0x237   : > { %13639 = vmatpush3.bf16.msra.mxu0 %v15601_v54  ;;  %12181 = vmatprep.mubr.f32.mxu1 %v1029_v63 }
 0x238   : > { %13641 = vmatprep.subr.bf16.mxu0 %v15605_v56 }
 0x239   : > { %12116 = vmatmul.mubr.f32.gmra.mrb[2].mxu0 %v15697_v22 }
 0x23a   : > { %12182 = vmatmul.mubr.f32.gmra.mrb[14].mxu1 %v1039_v3  ;;  %12118 = vmatprep.mubr.f32.mxu0 %v15710_v27 }
 0x23b   : > { %12192 = vmatprep.mubr.f32.mxu1 %v15622_v35  ;;  %13643 = vmatpush3.bf16.msra.mxu0 %v15605_v56 }
 0x23c   : > { %13645 = vmatprep.subr.bf16.mxu0 %v15581_v30 }
 0x23d   : > { %12119 = vmatmul.mubr.f32.gmra.mrb[4].mxu0 %v15726_v39 }
 0x23e   : > { %12193 = vmatmul.mubr.f32.vlgmr.msra.gmra.mrb[8].mxu1 %v15633_v48  ;;  %12121 = vmatprep.mubr.f32.mxu0 %v15730_v44 }
 0x23f   : > { %13671 = vmatpush3.bf16.msra.mxu1 %v15603_v55  ;;  %12195 = vmatprep.mubr.f32.mxu1 %v15640_v58 }
 0x240   : > { %13673 = vmatprep.subr.bf16.mxu1 %v13672_v53 }
 0x241   : > { %12122 = vmatmul.mubr.f32.gmra.mrb[6].mxu0 %v15745_v62 }
 0x242   : > { %12196 = vmatmul.mubr.f32.gmra.mrb[10].mxu1 %v15661_v6  ;;  %12132 = vmatprep.mubr.f32.mxu0 %v15622_v35 }
 0x243   : > { %12198 = vmatprep.mubr.f32.mxu1 %v15668_v51  ;;  %13675 = vmatpush3.bf16.msra.mxu1 %v13672_v53 }
 0x244   : > { %13677 = vmatprep.subr.bf16.mxu1 %v15596_v42 }
 0x245   : > { %12133 = vmatmul.mubr.f32.vlgmr.msra.gmra.mrb[0].mxu0 %v15633_v48 }
 0x246   : > { %12199 = vmatmul.mubr.f32.gmra.mrb[12].mxu1 %v15693_v20  ;;  %12135 = vmatprep.mubr.f32.mxu0 %v15640_v58 }
 0x247   : > { %13647 = vmatpush3.bf16.msra.mxu0 %v15581_v30  ;;  %12201 = vmatprep.mubr.f32.mxu1 %v15703_v61  ;;  %v13688_v30 = vpack.c.bf16 %v1941_v40, %v1934_v45 }
 0x248   : > { %13649 = vmatprep.subr.bf16.mxu0 %v15585_v31 }
 0x249   : > { %12136 = vmatmul.mubr.f32.gmra.mrb[2].mxu0 %v15661_v6 }
 0x24a   : > { %12202 = vmatmul.mubr.f32.gmra.mrb[14].mxu1 %v15720_v36  ;;  %12138 = vmatprep.mubr.f32.mxu0 %v15668_v51 }
 0x24b   : > { %12212 = vmatprep.mubr.f32.mxu1 %v15629_v43  ;;  %13651 = vmatpush3.bf16.msra.mxu0 %v15585_v31 }
 0x24d   : > { %12139 = vmatmul.mubr.f32.gmra.mrb[4].mxu0 %v15693_v20 }
 0x24e   : > { %12213 = vmatmul.mubr.f32.vlgmr.msra.gmra.mrb[8].mxu1 %v15648_v0  ;;  %12141 = vmatprep.mubr.f32.mxu0 %v15703_v61 }
 0x24f   : > { %13679 = vmatpush3.bf16.msra.mxu1 %v15596_v42  ;;  %12215 = vmatprep.mubr.f32.mxu1 %v15657_v4 }
 0x250   : > { %13681 = vmatprep.subr.bf16.mxu1 %v15650_v1 }
 0x251   : > { %12142 = vmatmul.mubr.f32.gmra.mrb[6].mxu0 %v15720_v36 }
 0x252   : > { %12216 = vmatmul.mubr.f32.gmra.mrb[10].mxu1 %v15681_v60  ;;  %12152 = vmatprep.mubr.f32.mxu0 %v15622_v35 }
 0x253   : > { %12218 = vmatprep.mubr.f32.mxu1 %v15700_v23  ;;  %13683 = vmatpush3.bf16.msra.mxu1 %v15650_v1 }
 0x254   : > { %13685 = vmatprep.subr.bf16.mxu1 %v15607_v57 }
 0x255   : > { %12153 = vmatmul.mubr.f32.vlgmr.msra.gmra.mrb[0].mxu0 %v15633_v48 }
 0x256   : > { %12219 = vmatmul.mubr.f32.gmra.mrb[12].mxu1 %v15713_v28  ;;  %12155 = vmatprep.mubr.f32.mxu0 %v15640_v58 }
 0x257   : > { %12221 = vmatprep.mubr.f32.mxu1 %v15718_v16 }
 0x259   : > { %12156 = vmatmul.mubr.f32.gmra.mrb[2].mxu0 %v15661_v6 }
 0x25a   : > { %12222 = vmatmul.mubr.f32.gmra.mrb[14].mxu1 %v15738_v33  ;;  %12158 = vmatprep.mubr.f32.mxu0 %v15668_v51 }
 0x25b   : > { %12232 = vmatprep.mubr.f32.mxu1 %v15638_v52 }
 0x25d   : > { %12159 = vmatmul.mubr.f32.gmra.mrb[4].mxu0 %v15693_v20 }
 0x25e   : > { %12233 = vmatmul.mubr.f32.vlgmr.msra.gmra.mrb[8].mxu1 %v15672_v34  ;;  %12161 = vmatprep.mubr.f32.mxu0 %v15703_v61 }
 0x25f   : > { %13687 = vmatpush3.bf16.msra.mxu1 %v15607_v57  ;;  %12235 = vmatprep.mubr.f32.mxu1 %v15675_v11 }
 0x260   : > { %13689 = vmatprep.subr.bf16.mxu1 %v13688_v30 }
 0x261   : > { %12162 = vmatmul.mubr.f32.gmra.mrb[6].mxu0 %v15720_v36 }
 0x262   : > { %12236 = vmatmul.mubr.f32.gmra.mrb[10].mxu1 %v15697_v22 }
 0x263   : > { %12238 = vmatprep.mubr.f32.mxu1 %v15710_v27  ;;  %13691 = vmatpush3.bf16.msra.mxu1 %v13688_v30 }
 0x264   : > { %13693 = vmatprep.subr.bf16.mxu1 %v15596_v42 }
 0x266   : > { %12239 = vmatmul.mubr.f32.gmra.mrb[12].mxu1 %v15726_v39 }
 0x267   : > { %12241 = vmatprep.mubr.f32.mxu1 %v15730_v44 }
 0x26a   : > { %12242 = vmatmul.mubr.f32.gmra.mrb[14].mxu1 %v15745_v62  ;;  %v1740_v62 = vlaneseq }
 0x26b   : > { %12252 = vmatprep.mubr.f32.mxu1 %v15622_v35 }
 0x26c   : > { %v15967_v8 = vshrl.u32 %v1740_v62, 7 }
 0x26e   : > { %12253 = vmatmul.mubr.f32.vlgmr.msra.gmra.mrb[8].mxu1 %v15633_v48 }
 0x26f   : > { %13695 = vmatpush3.bf16.msra.mxu1 %v15596_v42  ;;  %12255 = vmatprep.mubr.f32.mxu1 %v15640_v58 }
 0x270   : > { %13697 = vmatprep.subr.bf16.mxu1 %v15650_v1 }
 0x272   : > { %12256 = vmatmul.mubr.f32.gmra.mrb[10].mxu1 %v15661_v6 }
 0x273   : > { %12258 = vmatprep.mubr.f32.mxu1 %v15668_v51  ;;  %13699 = vmatpush3.bf16.msra.mxu1 %v15650_v1 }
 0x276   : > { %12259 = vmatmul.mubr.f32.gmra.mrb[12].mxu1 %v15693_v20 }
 0x277   : > { %12261 = vmatprep.mubr.f32.mxu1 %v15703_v61 }
 0x27a   : > { %12262 = vmatmul.mubr.f32.gmra.mrb[14].mxu1 %v15720_v36 }
 0x27b   : > { %12272 = vmatprep.mubr.f32.mxu1 %v15622_v35 }
 0x27e   : > { %12273 = vmatmul.mubr.f32.vlgmr.msra.gmra.mrb[8].mxu1 %v15633_v48 }
 0x27f   : > { %12275 = vmatprep.mubr.f32.mxu1 %v15640_v58 }
 0x282   : > { %12276 = vmatmul.mubr.f32.gmra.mrb[10].mxu1 %v15661_v6 }
 0x283   : > { %12278 = vmatprep.mubr.f32.mxu1 %v15668_v51 }
 0x286   : > { %12279 = vmatmul.mubr.f32.gmra.mrb[12].mxu1 %v15693_v20 }
 0x287   : > { %12281 = vmatprep.mubr.f32.mxu1 %v15703_v61 }
 0x28a   : > { %12282 = vmatmul.mubr.f32.gmra.mrb[14].mxu1 %v15720_v36 }
 0x2f1   : > { %v12054_v31 = vpop.f32.mrb[0].mxu1 }
 0x2f2   : > { %v971_v42 = vpop.f32.mrb[1].mxu1 }
 0x2f5   : > { %v12057_v54 = vpop.f32.mrb[2].mxu1 }
 0x2f6   : > { %v991_v55 = vpop.f32.mrb[3].mxu1 }
 0x2f9   : > { %v12060_v56 = vpop.f32.mrb[4].mxu1 }
 0x2fa   : > { %v1011_v57 = vpop.f32.mrb[5].mxu1 }
 0x2fd   : > { %v12063_v35 = vpop.f32.mrb[6].mxu1 }
 0x2fe   : > { %v1031_v43 = vpop.f32.mrb[7].mxu1 }
 0x328   : > { %v12154_v48 = vpop.f32.mrb[0].mxu0 }
 0x329   : > { %v15858_v52 = vadd.f32 %v12154_v48, %v12054_v31  ;;  %v1636_v58 = vpop.f32.mrb[1].mxu0 }
 0x32a   : > { %v15860_v0 = vadd.f32 %v1636_v58, %v971_v42 }
 0x32b   : > { %v1683_v1 = vmul.f32 %v15858_v52, %v15858_v52 }
 0x32c   : > { %v12157_v4 = vpop.f32.mrb[2].mxu0  ;;  %v1682_v5 = vmul.f32 %v15860_v0, %v15860_v0 }
 0x32d   : > { %v15866_v6 = vadd.f32 %v12157_v4, %v12057_v54  ;;  %v1648_v9 = vpop.f32.mrb[3].mxu0  ;;  %v1693_v51 = vsel %vm748_vm1, %v1683_v1, 0.0 }
 0x32e   : > { %v15869_v34 = vadd.f32 %v1648_v9, %v991_v55  ;;  %1694 = vadd.xlane.f32.xlu1 %v1693_v51  ;;  %v1690_v11 = vsel %vm748_vm1, %v1682_v5, 0.0 }
 0x32f   : > { %1691 = vadd.xlane.f32.xlu0 %v1690_v11  ;;  %v1685_v12 = vmul.f32 %v15866_v6, %v15866_v6 }
 0x330   : > { %v12160_v13 = vpop.f32.mrb[4].mxu0  ;;  %v1684_v60 = vmul.f32 %v15869_v34, %v15869_v34 }
 0x331   : > { %v15876_v14 = vadd.f32 %v12160_v13, %v12060_v56  ;;  %v1660_v15 = vpop.f32.mrb[5].mxu0  ;;  %v1699_v17 = vsel %vm748_vm1, %v1685_v12, 0.0  ;;  %v15197_v56 = vld [vmem:[%s15487_s25] ss:$0 sm:$0xff] }
 0x332   : > { %v15879_v18 = vadd.f32 %v1660_v15, %v1011_v57  ;;  %1700 = vadd.xlane.f32.xlu1 %v1699_v17  ;;  %v1696_v19 = vsel %vm748_vm1, %v1684_v60, 0.0 }
 0x333   : > { %1697 = vadd.xlane.f32.xlu0 %v1696_v19  ;;  %v1687_v20 = vmul.f32 %v15876_v14, %v15876_v14 }
 0x334   : > { %v12163_v21 = vpop.f32.mrb[6].mxu0  ;;  %v1686_v22 = vmul.f32 %v15879_v18, %v15879_v18 }
 0x335   : > { %v15886_v23 = vadd.f32 %v12163_v21, %v12063_v35  ;;  %v1672_v61 = vpop.f32.mrb[7].mxu0  ;;  %v1705_v24 = vsel %vm748_vm1, %v1687_v20, 0.0 }
 0x336   : > { %v15889_v25 = vadd.f32 %v1672_v61, %v1031_v43  ;;  %1706 = vadd.xlane.f32.xlu1 %v1705_v24  ;;  %v1702_v26 = vsel %vm748_vm1, %v1686_v22, 0.0 }
 0x337   : > { %1703 = vadd.xlane.f32.xlu0 %v1702_v26  ;;  %v1689_v37 = vmul.f32 %v15886_v23, %v15886_v23 }
 0x338   : > { %v1688_v27 = vmul.f32 %v15889_v25, %v15889_v25 }
 0x339   : > { %v1711_v28 = vsel %vm748_vm1, %v1689_v37, 0.0 }
 0x33a   : > { %1712 = vadd.xlane.f32.xlu1 %v1711_v28  ;;  %v1708_v29 = vsel %vm748_vm1, %v1688_v27, 0.0 }
 0x33b   : > { %1709 = vadd.xlane.f32.xlu0 %v1708_v29 }
 0x351   : > { %v15898_v16 = vpop.f32.mrb[8].mxu1 }
 0x352   : > { %2564 = vrot.lane.b32.xlu1 %v15898_v16, %s15294_s29  ;;  %v15902_v36 = vpop.f32.mrb[9].mxu1  ;;  %v2635_v33 = vmul.f32 %v15898_v16, %v15898_v16 }
 0x353   : > { %2562 = vrot.lane.b32.xlu0 %v15902_v36, %s15294_s29  ;;  %v2634_v46 = vmul.f32 %v15902_v36, %v15902_v36 }
 0x354   : > { %v2669_v49 = vsel %vm748_vm1, %v2635_v33, 0.0 }
 0x355   : > { %v15906_v32 = vpop.f32.mrb[10].mxu1  ;;  %v2666_v47 = vsel %vm748_vm1, %v2634_v46, 0.0 }
 0x356   : > { %2588 = vrot.lane.b32.xlu1 %v15898_v16, %s15295_s16  ;;  %v15910_v38 = vpop.f32.mrb[11].mxu1  ;;  %v2637_v7 = vmul.f32 %v15906_v32, %v15906_v32 }
 0x357   : > { %2586 = vrot.lane.b32.xlu0 %v15902_v36, %s15295_s16  ;;  %v2636_v59 = vmul.f32 %v15910_v38, %v15910_v38 }
 0x358   : > { %v2675_v42 = vsel %vm748_vm1, %v2637_v7, 0.0 }
 0x359   : > { %v15914_v39 = vpop.f32.mrb[12].mxu1  ;;  %v2672_v3 = vsel %vm748_vm1, %v2636_v59, 0.0 }
 0x35a   : > { %2612 = vrot.lane.b32.xlu1 %v15898_v16, %s15296_s23  ;;  %v15918_v44 = vpop.f32.mrb[13].mxu1 }
 0x35b   : > { %2610 = vrot.lane.b32.xlu0 %v15902_v36, %s15296_s23 }
 0x35d   : > { %v15922_v45 = vpop.f32.mrb[14].mxu1 }
 0x35e   : > { %2568 = vrot.lane.b32.xlu1 %v15906_v32, %s15294_s29  ;;  %v15926_v40 = vpop.f32.mrb[15].mxu1 }
 0x362   : > { %2592 = vrot.lane.b32.xlu1 %v15906_v32, %s15295_s16 }
 0x366   : > { %2616 = vrot.lane.b32.xlu1 %v15906_v32, %s15296_s23 }
 0x36a   : > { %2566 = vrot.lane.b32.xlu1 %v15910_v38, %s15294_s29 }
 0x36e   : > { %2572 = vrot.lane.b32.xlu1 %v15914_v39, %s15294_s29 }
 0x372   : > { %2596 = vrot.lane.b32.xlu1 %v15914_v39, %s15295_s16 }
 0x376   : > { %2620 = vrot.lane.b32.xlu1 %v15914_v39, %s15296_s23 }
 0x37a   : > { %2576 = vrot.lane.b32.xlu1 %v15922_v45, %s15294_s29  ;;  %2667 = vadd.xlane.f32.xlu0 %v2666_v47 }
 0x37e   : > { %2600 = vrot.lane.b32.xlu1 %v15922_v45, %s15295_s16 }
 0x390   : > { %2590 = vrot.lane.b32.xlu0 %v15910_v38, %s15295_s16 }
 0x394   : > { %2614 = vrot.lane.b32.xlu0 %v15910_v38, %s15296_s23 }
 0x398   : > { %2570 = vrot.lane.b32.xlu0 %v15918_v44, %s15294_s29 }
 0x39c   : > { %2594 = vrot.lane.b32.xlu0 %v15918_v44, %s15295_s16 }
 0x3a0   : > { %2618 = vrot.lane.b32.xlu0 %v15918_v44, %s15296_s23 }
 0x3a2   : > { %2670 = vadd.xlane.f32.xlu1 %v2669_v49 }
 0x3b3   : > { %2624 = vrot.lane.b32.xlu1 %v15922_v45, %s15296_s23 }
 0x3bb   : > { %v1695_v63 = vpop.xlane.xlu1 %1694 }
 0x3bc   : > { %v1715_v41 = vmax.f32 %v1695_v63, 1e-24  ;;  %v1692_v50 = vpop.xlane.xlu0 %1691  ;;  %v2639_v63 = vmul.f32 %v15914_v39, %v15914_v39 }
 0x3bd   : > { %v1714_v2 = vmax.f32 %v1692_v50, 1e-24 }
 0x3be   : > { %14850 = vrsqrt.f32 %v1715_v41 }
 0x3bf   : > { %14852 = vrsqrt.f32 %v1714_v2  ;;  %2673 = vadd.xlane.f32.xlu0 %v2672_v3  ;;  %v1701_v10 = vpop.xlane.xlu1 %1700 }
 0x3c0   : > { %v1717_v53 = vmax.f32 %v1701_v10, 1e-24  ;;  %v1698_v30 = vpop.xlane.xlu0 %1697 }
 0x3c1   : > { %v1716_v31 = vmax.f32 %v1698_v30, 1e-24 }
 0x3c2   : > { %14854 = vrsqrt.f32 %v1717_v53 }
 0x3c3   : > { %14856 = vrsqrt.f32 %v1716_v31  ;;  %2676 = vadd.xlane.f32.xlu0 %v2675_v42  ;;  %v1707_v55 = vpop.xlane.xlu1 %1706 }
 0x3c4   : > { %v1719_v57 = vmax.f32 %v1707_v55, 1e-24  ;;  %v1704_v35 = vpop.xlane.xlu0 %1703  ;;  %v2641_v55 = vmul.f32 %v15922_v45, %v15922_v45 }
 0x3c5   : > { %v1718_v43 = vmax.f32 %v1704_v35, 1e-24 }
 0x3c6   : > { %14858 = vrsqrt.f32 %v1719_v57 }
 0x3c7   : > { %14860 = vrsqrt.f32 %v1718_v43  ;;  %v1713_v48 = vpop.xlane.xlu1 %1712 }
 0x3c8   : > { %v14851_v58 = vpop.eup %14850  ;;  %v1721_v1 = vmax.f32 %v1713_v48, 1e-24  ;;  %v1710_v4 = vpop.xlane.xlu0 %1709  ;;  %v2681_v48 = vsel %vm748_vm1, %v2639_v63, 0.0 }
 0x3c9   : > { %v14853_v5 = vpop.eup %14852  ;;  %v1731_v9 = vmul.f32 %v14851_v58, %v15858_v52  ;;  %v1720_v51 = vmax.f32 %v1710_v4, 1e-24 }
 0x3ca   : > { %v1730_v11 = vmul.f32 %v14853_v5, %v15860_v0  ;;  %14862 = vrsqrt.f32 %v1721_v1 }
 0x3cb   : > { %v1746_v12 = vmul.f32 %v15197_v56, %v1731_v9  ;;  %14864 = vrsqrt.f32 %v1720_v51  ;;  %v15974_v13 = vpop.permute.xlu1 %2564 }
 0x3cc   : > { %v14855_v60 = vpop.eup %14854  ;;  %v1745_v15 = vmul.f32 %v15197_v56, %v1730_v11 }
 0x3cd   : > { %v14857_v17 = vpop.eup %14856  ;;  %v3137_v19 = vsel %vm748_vm1, %v1746_v12, 0  ;;  %v1733_v20 = vmul.f32 %v14855_v60, %v15866_v6 }
 0x3ce   : > { %v3161_v21 = vand.u32 4294901760, %v3137_v19  ;;  %v3134_v22 = vsel %vm748_vm1, %v1745_v15, 0  ;;  %v1732_v61 = vmul.f32 %v14857_v17, %v15869_v34  ;;  %v2687_v15 = vsel %vm748_vm1, %v2641_v55, 0.0 }
 0x3cf   : > { %v3158_v24 = vand.u32 4294901760, %v3134_v22  ;;  %v1748_v26 = vmul.f32 %v15197_v56, %v1733_v20  ;;  %v15980_v37 = vpop.permute.xlu1 %2588  ;;  %v2643_v17 = vmul.f32 %v15974_v13, %v15974_v13 }
 0x3d0   : > { %v14859_v27 = vpop.eup %14858  ;;  %v1747_v28 = vmul.f32 %v15197_v56, %v1732_v61  ;;  %v3559_v5 = vsub.f32 %v3137_v19, %v3161_v21 }
 0x3d1   : > { %v14861_v29 = vpop.eup %14860  ;;  %v3143_v46 = vsel %vm748_vm1, %v1748_v26, 0  ;;  %v1735_v47 = vmul.f32 %v14859_v27, %v15876_v14  ;;  %v15984_v33 = vpack.c.bf16 %v3161_v21, %v3158_v24  ;;  %v3552_v51 = vsub.f32 %v3134_v22, %v3158_v24 }
 0x3d2   : > { %v3167_v49 = vand.u32 4294901760, %v3143_v46  ;;  %v3140_v59 = vsel %vm748_vm1, %v1747_v28, 0  ;;  %v1734_v62 = vmul.f32 %v14861_v29, %v15879_v18 }
 0x3d3   : > { %20176 = vst [vmem:[#allocation20_spill] sm:$0xff] %v15984_v33  ;;  %v3164_v41 = vand.u32 4294901760, %v3140_v59  ;;  %v1750_v50 = vmul.f32 %v15197_v56, %v1735_v47  ;;  %13701 = vmatprep.subr.bf16.mxu0 %v15984_v33  ;;  %v15991_v2 = vpop.permute.xlu1 %2612  ;;  %v3553_v29 = vand.u32 4294901760, %v3552_v51 }
 0x3d4   : > { %v14863_v3 = vpop.eup %14862  ;;  %v1749_v7 = vmul.f32 %v15197_v56, %v1734_v62  ;;  %13703 = vmatpush3.bf16.xpose.msra.mxu0 %v15984_v33  ;;  %v15994_v10 = vsub.f32 %v3143_v46, %v3167_v49  ;;  %v3560_v46 = vand.u32 4294901760, %v3559_v5 }
 0x3d5   : > { %v14865_v53 = vpop.eup %14864  ;;  %v3149_v30 = vsel %vm748_vm1, %v1750_v50, 0  ;;  %v1737_v31 = vmul.f32 %v14863_v3, %v15886_v23  ;;  %v15998_v42 = vpack.c.bf16 %v3167_v49, %v3164_v41  ;;  %v3566_v11 = vsub.f32 %v3140_v59, %v3164_v41 }
 0x3d6   : > { %v3173_v57 = vand.u32 4294901760, %v3149_v30  ;;  %v3146_v35 = vsel %vm748_vm1, %v1749_v7, 0  ;;  %v1736_v43 = vmul.f32 %v14865_v53, %v15889_v25  ;;  %v3574_v12 = vand.u32 4294901760, %v15994_v10 }
 0x3d7   : > { %20177 = vst [vmem:[#allocation21_spill] sm:$0xff] %v15998_v42  ;;  %v3170_v58 = vand.u32 4294901760, %v3146_v35  ;;  %v1752_v1 = vmul.f32 %v15197_v56, %v1737_v31  ;;  %2682 = vadd.xlane.f32.xlu1 %v2681_v48  ;;  %13705 = vmatprep.subr.bf16.mxu0 %v15998_v42  ;;  %v16006_v4 = vpop.permute.xlu1 %2568  ;;  %v2693_v41 = vsel %vm748_vm1, %v2643_v17, 0.0 }
 0x3d8   : > { %v1751_v9 = vmul.f32 %v15197_v56, %v1736_v43  ;;  %v3567_v56 = vand.u32 4294901760, %v3566_v11  ;;  %v3575_v24 = vsub.f32 %v15994_v10, %v3574_v12  ;;  %v3587_v28 = vsub.f32 %v3149_v30, %v3173_v57 }
 0x3d9   : > { %v3155_v60 = vsel %vm748_vm1, %v1752_v1, 0  ;;  %2574 = vrot.lane.b32.xlu0 %v15926_v40, %s15294_s29  ;;  %v3580_v20 = vsub.f32 %v3146_v35, %v3170_v58  ;;  %v16016_v19 = vpack.c.bf16 %v3173_v57, %v3170_v58  ;;  %v2645_v50 = vmul.f32 %v16006_v4, %v16006_v4 }
 0x3da   : > { %v3179_v61 = vand.u32 4294901760, %v3155_v60  ;;  %v3152_v26 = vsel %vm748_vm1, %v1751_v9, 0  ;;  %v3568_v47 = vsub.f32 %v3566_v11, %v3567_v56  ;;  %v3576_v59 = vand.u32 4294901760, %v3575_v24 }
 0x3db   : > { %20178 = vst [vmem:[#allocation22_spill] sm:$0xff] %v16016_v19  ;;  %v3176_v21 = vand.u32 4294901760, %v3152_v26  ;;  %2688 = vadd.xlane.f32.xlu1 %v2687_v15  ;;  %v16018_v22 = vpop.permute.xlu1 %2592  ;;  %v3581_v27 = vand.u32 4294901760, %v3580_v20  ;;  %v3588_v63 = vand.u32 4294901760, %v3587_v28  ;;  %v16030_v57 = vpack.c.bf16 %v3559_v5, %v3552_v51 }
 0x3dc   : > { %13707 = vmatpush3.bf16.xpose.msra.mxu0 %v15998_v42  ;;  %v3601_v49 = vsub.f32 %v3155_v60, %v3179_v61  ;;  %v3569_v3 = vand.u32 4294901760, %v3568_v47  ;;  %v3554_v35 = vsub.f32 %v3552_v51, %v3553_v29  ;;  %v3561_v43 = vsub.f32 %v3559_v5, %v3560_v46 }
 0x3dd   : > { %2598 = vrot.lane.b32.xlu0 %v15926_v40, %s15295_s16  ;;  %13709 = vmatprep.subr.bf16.mxu0 %v16016_v19  ;;  %v3582_v62 = vsub.f32 %v3580_v20, %v3581_v27  ;;  %v3594_v7 = vsub.f32 %v3152_v26, %v3176_v21  ;;  %v3589_v31 = vsub.f32 %v3587_v28, %v3588_v63  ;;  %v2699_v17 = vsel %vm748_vm1, %v2645_v50, 0.0 }
 0x3de   : > { %v3602_v55 = vand.u32 4294901760, %v3601_v49  ;;  %v16032_v48 = vpack.c.bf16 %v3576_v59, %v3569_v3  ;;  %v16035_v60 = vpack.c.bf16 %v15994_v10, %v3566_v11  ;;  %v16037_v15 = vpack.c.bf16 %v3587_v28, %v3580_v20 }
 0x3df   : > { %2694 = vadd.xlane.f32.xlu1 %v2693_v41  ;;  %v16028_v53 = vpop.permute.xlu1 %2616  ;;  %v3583_v30 = vand.u32 4294901760, %v3582_v62  ;;  %v3595_v58 = vand.u32 4294901760, %v3594_v7  ;;  %v3590_v1 = vand.u32 4294901760, %v3589_v31  ;;  %v16040_v26 = vpack.c.bf16 %v3179_v61, %v3176_v21 }
 0x3e0   : > { %v3603_v9 = vsub.f32 %v3601_v49, %v3602_v55  ;;  %v16042_v47 = vpack.c.bf16 %v3601_v49, %v3594_v7  ;;  %v16048_v62 = vpack.c.bf16 %v3560_v46, %v3553_v29  ;;  %v16050_v41 = vpack.c.bf16 %v3574_v12, %v3567_v56 }
 0x3e1   : > { %20179 = vst [vmem:[#allocation23_spill] sm:$0xff] %v16040_v26  ;;  %v3596_v24 = vsub.f32 %v3594_v7, %v3595_v58  ;;  %v16046_v5 = vpack.c.bf16 %v3590_v1, %v3583_v30  ;;  %v16053_v11 = vpack.c.bf16 %v3588_v63, %v3581_v27  ;;  %v16055_v20 = vpack.c.bf16 %v3602_v55, %v3595_v58  ;;  %v16080_v30 = vpop.permute.xlu0 %2562 }
 0x3e2   : > { %20180 = vst [vmem:[#allocation24_spill] sm:$0xff] %v16042_v47  ;;  %v3604_v59 = vand.u32 4294901760, %v3603_v9  ;;  %20181 = vst [vmem:[#allocation25_spill] sm:$0xff] %v16048_v62  ;;  %v3555_v28 = vand.u32 4294901760, %v3554_v35  ;;  %v3562_v49 = vand.u32 4294901760, %v3561_v43  ;;  %v2651_v7 = vmul.f32 %v15980_v37, %v15980_v37 }
 0x3e3   : > { %2700 = vadd.xlane.f32.xlu1 %v2699_v17  ;;  %v16044_v51 = vpop.permute.xlu1 %2566  ;;  %20182 = vst [vmem:[#allocation26_spill] sm:$0xff] %v16050_v41  ;;  %v3597_v10 = vand.u32 4294901760, %v3596_v24  ;;  %20183 = vst [vmem:[#allocation27_spill] sm:$0xff] %v16053_v11  ;;  %v2638_v31 = vmul.f32 %v15918_v44, %v15918_v44  ;;  %v2653_v35 = vmul.f32 %v16018_v22, %v16018_v22 }
 0x3e4   : > { %13711 = vmatpush3.bf16.xpose.msra.mxu0 %v16016_v19  ;;  %20184 = vst [vmem:[#allocation28_spill] sm:$0xff] %v16055_v20  ;;  %v16067_v27 = vpack.c.bf16 %v3562_v49, %v3555_v28  ;;  %v2717_v55 = vsel %vm748_vm1, %v2651_v7, 0.0  ;;  %v2659_v49 = vmul.f32 %v15991_v2, %v15991_v2 }
 0x3e5   : > { %13713 = vmatprep.subr.bf16.mxu0 %v16040_v26  ;;  %v16058_v61 = vpack.c.bf16 %v3604_v59, %v3597_v10  ;;  %v2678_v43 = vsel %vm748_vm1, %v2638_v31, 0.0  ;;  %v16088_v58 = vpop.permute.xlu0 %2586  ;;  %v2723_v1 = vsel %vm748_vm1, %v2653_v35, 0.0 }
 0x3e7   : > { %v16060_v21 = vpop.permute.xlu1 %2572 }
 0x3e8   : > { %v2647_v29 = vmul.f32 %v16060_v21, %v16060_v21 }
 0x3e9   : > { %v16098_v10 = vpop.permute.xlu0 %2610 }
 0x3ea   : > { %v2705_v12 = vsel %vm748_vm1, %v2647_v29, 0.0 }
 0x3eb   : > { %v16065_v56 = vpop.permute.xlu1 %2596  ;;  %2706 = vadd.xlane.f32.xlu1 %v2705_v12 }
 0x3ec   : > { %13715 = vmatpush3.bf16.xpose.msra.mxu0 %v16040_v26  ;;  %v2655_v9 = vmul.f32 %v16065_v56, %v16065_v56 }
 0x3ed   : > { %13717 = vmatprep.subr.bf16.mxu0 %v16067_v27 }
 0x3ee   : > { %v2729_v24 = vsel %vm748_vm1, %v2655_v9, 0.0 }
 0x3ef   : > { %v16071_v46 = vpop.permute.xlu1 %2620 }
 0x3f0   : > { %v2663_v31 = vmul.f32 %v16071_v46, %v16071_v46 }
 0x3f3   : > { %v16073_v63 = vpop.permute.xlu1 %2576 }
 0x3f4   : > { %v2649_v50 = vmul.f32 %v16073_v63, %v16073_v63 }
 0x3f6   : > { %v2711_v3 = vsel %vm748_vm1, %v2649_v50, 0.0  ;;  %v2741_v50 = vsel %vm748_vm1, %v2659_v49, 0.0 }
 0x3f7   : > { %2712 = vadd.xlane.f32.xlu1 %v2711_v3  ;;  %v16093_v17 = vpop.permute.xlu1 %2600  ;;  %v2661_v3 = vmul.f32 %v16028_v53, %v16028_v53 }
 0x3f8   : > { %v2657_v59 = vmul.f32 %v16093_v17, %v16093_v17 }
 0x3f9   : > { %v2747_v7 = vsel %vm748_vm1, %v2661_v3, 0.0 }
 0x3fa   : > { %v2735_v28 = vsel %vm748_vm1, %v2657_v59, 0.0 }
 0x3fb   : > { %2718 = vadd.xlane.f32.xlu1 %v2717_v55  ;;  %v2753_v55 = vsel %vm748_vm1, %v2663_v31, 0.0 }
 0x3fc   : > { %2679 = vadd.xlane.f32.xlu0 %v2678_v43  ;;  %v16117_v43 = vld [vmem:[%s20185_s19] ss:$0 sm:$0xff] }
 0x3ff   : > { %2724 = vadd.xlane.f32.xlu1 %v2723_v1 }
 0x403   : > { %2730 = vadd.xlane.f32.xlu1 %v2729_v24 }
 0x407   : > { %v2668_v29 = vpop.xlane.xlu0 %2667  ;;  %2736 = vadd.xlane.f32.xlu1 %v2735_v28 }
 0x408   : > { %v2762_v12 = vmax.f32 %v2668_v29, 1e-24 }
 0x40a   : > { %14866 = vrsqrt.f32 %v2762_v12 }
 0x40b   : > { %2742 = vadd.xlane.f32.xlu1 %v2741_v50  ;;  %v2640_v50 = vmul.f32 %v15926_v40, %v15926_v40 }
 0x40f   : > { %2748 = vadd.xlane.f32.xlu1 %v2747_v7 }
 0x412   : > { %2622 = vrot.lane.b32.xlu0 %v15926_v40, %s15296_s23 }
 0x413   : > { %2754 = vadd.xlane.f32.xlu1 %v2753_v55  ;;  %v2684_v55 = vsel %vm748_vm1, %v2640_v50, 0.0 }
 0x414   : > { %v14867_v35 = vpop.eup %14866 }
 0x415   : > { %v2826_v1 = vmul.f32 %v14867_v35, %v15902_v36  ;;  %v16134_v36 = vpop.permute.xlu0 %2590  ;;  %v2642_v35 = vmul.f32 %v16080_v30, %v16080_v30 }
 0x417   : > { %v16121_v9 = vmul.f32 %v16117_v43, %v2826_v1 }
 0x419   : > { %v3038_v24 = vsel %vm748_vm1, %v16121_v9, 0  ;;  %v16138_v3 = vpop.permute.xlu0 %2614 }
 0x41a   : > { %v16125_v59 = vand.u32 4294901760, %v3038_v24 }
 0x41c   : > { %v16128_v28 = vsub.f32 %v3038_v24, %v16125_v59  ;;  %v2690_v24 = vsel %vm748_vm1, %v2642_v35, 0.0 }
 0x41e   : > { %20186 = vst [vmem:[#allocation29_spill] sm:$0xff] %v16128_v28  ;;  %v19750_v49 = vand.u32 4294901760, %v16128_v28 }
 0x420   : > { %v3233_v29 = vsub.f32 %v16128_v28, %v19750_v49  ;;  %v16150_v49 = vpop.permute.xlu0 %2570 }
 0x422   : > { %v3234_v12 = vand.u32 4294901760, %v3233_v29 }
 0x424   : > { %12300 = vmatprep.mubr.f32.mxu0 %v3234_v12  ;;  %v2644_v12 = vmul.f32 %v16044_v51, %v16044_v51 }
 0x42f   : > { %v2671_v7 = vpop.xlane.xlu1 %2670 }
 0x430   : > { %v2763_v31 = vmax.f32 %v2671_v7, 1e-24  ;;  %v2696_v7 = vsel %vm748_vm1, %v2644_v12, 0.0 }
 0x431   : > { %2685 = vadd.xlane.f32.xlu0 %v2684_v55 }
 0x432   : > { %14868 = vrsqrt.f32 %v2763_v31  ;;  %v2646_v31 = vmul.f32 %v16150_v49, %v16150_v49 }
 0x433   : > { %v16143_v1 = vpop.permute.xlu1 %2624 }
 0x434   : > { %v2665_v29 = vmul.f32 %v16143_v1, %v16143_v1  ;;  %v2702_v35 = vsel %vm748_vm1, %v2646_v31, 0.0 }
 0x435   : > { %2691 = vadd.xlane.f32.xlu0 %v2690_v24 }
 0x436   : > { %v2759_v50 = vsel %vm748_vm1, %v2665_v29, 0.0  ;;  %v16163_v29 = vpop.permute.xlu0 %2594 }
 0x437   : > { %2760 = vadd.xlane.f32.xlu1 %v2759_v50 }
 0x439   : > { %2697 = vadd.xlane.f32.xlu0 %v2696_v7 }
 0x43a   : > { %v16171_v11 = vpop.permute.xlu0 %2618 }
 0x43c   : > { %v14869_v55 = vpop.eup %14868 }
 0x43d   : > { %v2827_v54 = vmul.f32 %v14869_v55, %v15898_v16  ;;  %2703 = vadd.xlane.f32.xlu0 %v2702_v35 }
 0x43f   : > { %v16159_v20 = vmul.f32 %v16117_v43, %v2827_v54 }
 0x441   : > { %v3041_v24 = vsel %vm748_vm1, %v16159_v20, 0 }
 0x442   : > { %v16165_v50 = vand.u32 4294901760, %v3041_v24 }
 0x444   : > { %v16168_v12 = vsub.f32 %v3041_v24, %v16165_v50 }
 0x446   : > { %20187 = vst [vmem:[#allocation30_spill] sm:$0xff] %v16168_v12  ;;  %v19753_v7 = vand.u32 4294901760, %v16168_v12 }
 0x448   : > { %5516 = vrot.lane.b32.xlu1 %v15860_v0, %s15294_s29  ;;  %v3243_v16 = vsub.f32 %v16168_v12, %v19753_v7  ;;  %v2658_v7 = vmul.f32 %v16098_v10, %v16098_v10 }
 0x44a   : > { %v3244_v54 = vand.u32 4294901760, %v3243_v16 }
 0x44c   : > { %5520 = vrot.lane.b32.xlu1 %v15869_v34, %s15294_s29  ;;  %12301 = vmatmul.mubr.f32.vlgmr.msra.gmra.mrb[8].mxu0 %v3244_v54  ;;  %v2674_v31 = vpop.xlane.xlu0 %2673 }
 0x44d   : > { %13719 = vmatpush3.bf16.xpose.msra.mxu0 %v16067_v27  ;;  %v2764_v55 = vmax.f32 %v2674_v31, 1e-24  ;;  %v2652_v31 = vmul.f32 %v16134_v36, %v16134_v36 }
 0x44e   : > { %13721 = vmatprep.subr.bf16.mxu0 %v16032_v48 }
 0x44f   : > { %14870 = vrsqrt.f32 %v2764_v55 }
 0x450   : > { %5524 = vrot.lane.b32.xlu1 %v15879_v18, %s15294_s29  ;;  %v2677_v0 = vpop.xlane.xlu0 %2676  ;;  %v2650_v18 = vmul.f32 %v16088_v58, %v16088_v58 }
 0x451   : > { %v2765_v35 = vmax.f32 %v2677_v0, 1e-24 }
 0x453   : > { %14872 = vrsqrt.f32 %v2765_v35 }
 0x454   : > { %5528 = vrot.lane.b32.xlu1 %v15889_v25, %s15294_s29  ;;  %v16186_v24 = vpop.permute.xlu0 %2574  ;;  %v2714_v25 = vsel %vm748_vm1, %v2650_v18, 0.0 }
 0x455   : > { %13723 = vmatpush3.bf16.xpose.msra.mxu0 %v16032_v48  ;;  %v2648_v34 = vmul.f32 %v16186_v24, %v16186_v24 }
 0x456   : > { %13725 = vmatprep.subr.bf16.mxu0 %v16046_v5 }
 0x457   : > { %v2708_v27 = vsel %vm748_vm1, %v2648_v34, 0.0  ;;  %v2654_v34 = vmul.f32 %v16163_v29, %v16163_v29 }
 0x458   : > { %2709 = vadd.xlane.f32.xlu0 %v2708_v27  ;;  %v16212_v18 = vpop.permute.xlu0 %2598 }
 0x459   : > { %v14871_v16 = vpop.eup %14870 }
 0x45a   : > { %v2828_v54 = vmul.f32 %v14871_v16, %v15910_v38  ;;  %v2720_v38 = vsel %vm748_vm1, %v2652_v31, 0.0 }
 0x45c   : > { %2715 = vadd.xlane.f32.xlu0 %v2714_v25  ;;  %v16200_v48 = vmul.f32 %v16117_v43, %v2828_v54  ;;  %v2726_v54 = vsel %vm748_vm1, %v2654_v34, 0.0  ;;  %v2656_v25 = vmul.f32 %v16212_v18, %v16212_v18 }
 0x45d   : > { %v14873_v55 = vpop.eup %14872  ;;  %13727 = vmatpush3.bf16.xpose.msra.mxu0 %v16046_v5 }
 0x45e   : > { %v2829_v0 = vmul.f32 %v14873_v55, %v15906_v32  ;;  %13729 = vmatprep.subr.bf16.mxu0 %v16058_v61  ;;  %v3044_v35 = vsel %vm748_vm1, %v16200_v48, 0 }
 0x45f   : > { %v16210_v27 = vand.u32 4294901760, %v3044_v35 }
 0x460   : > { %2721 = vadd.xlane.f32.xlu0 %v2720_v38  ;;  %v16215_v16 = vmul.f32 %v16117_v43, %v2829_v0  ;;  %v2732_v38 = vsel %vm748_vm1, %v2656_v25, 0.0 }
 0x461   : > { %v16218_v32 = vsub.f32 %v3044_v35, %v16210_v27 }
 0x462   : > { %v3047_v5 = vsel %vm748_vm1, %v16215_v16, 0 }
 0x463   : > { %20188 = vst [vmem:[#allocation31_spill] sm:$0xff] %v16218_v32  ;;  %v19755_v31 = vand.u32 4294901760, %v16218_v32  ;;  %v16226_v55 = vand.u32 4294901760, %v3047_v5 }
 0x464   : > { %2727 = vadd.xlane.f32.xlu0 %v2726_v54  ;;  %v2738_v54 = vsel %vm748_vm1, %v2658_v7, 0.0 }
 0x465   : > { %13731 = vmatpush3.bf16.xpose.msra.mxu0 %v16058_v61  ;;  %v3253_v0 = vsub.f32 %v16218_v32, %v19755_v31  ;;  %v16233_v35 = vsub.f32 %v3047_v5, %v16226_v55  ;;  %v2660_v31 = vmul.f32 %v16138_v3, %v16138_v3 }
 0x466   : > { %13733 = vmatprep.subr.bf16.mxu0 %v16030_v57 }
 0x467   : > { %20189 = vst [vmem:[#allocation32_spill] sm:$0xff] %v16233_v35  ;;  %v3254_v34 = vand.u32 4294901760, %v3253_v0  ;;  %v19756_v41 = vand.u32 4294901760, %v16233_v35  ;;  %v2744_v25 = vsel %vm748_vm1, %v2660_v31, 0.0  ;;  %v2662_v0 = vmul.f32 %v16171_v11, %v16171_v11  ;;  %v16256_v31 = vld [vmem:[%s20190_s20] sm:$0x1] }
 0x468   : > { %2733 = vadd.xlane.f32.xlu0 %v2732_v38 }
 0x469   : > { %12303 = vmatprep.mubr.f32.mxu0 %v3254_v34  ;;  %v3263_v61 = vsub.f32 %v16233_v35, %v19756_v41  ;;  %v2750_v38 = vsel %vm748_vm1, %v2662_v0, 0.0  ;;  %v2683_v34 = vpop.xlane.xlu1 %2682 }
 0x46a   : > { %v2767_v41 = vmax.f32 %v2683_v34, 1e-24 }
 0x46b   : > { %v3264_v5 = vand.u32 4294901760, %v3263_v61 }
 0x46c   : > { %2739 = vadd.xlane.f32.xlu0 %v2738_v54  ;;  %14874 = vrsqrt.f32 %v2767_v41  ;;  %v1754_v41 = vmul.f32 %v16256_v31, %v16256_v31 }
 0x46d   : > { %12304 = vmatmul.mubr.f32.gmra.mrb[10].mxu0 %v3264_v5  ;;  %v2689_v35 = vpop.xlane.xlu1 %2688 }
 0x46e   : > { %v1756_v0 = vsel %vm1755_vm2, %v1754_v41, 0.0 }
 0x470   : > { %2745 = vadd.xlane.f32.xlu0 %v2744_v25 }
 0x471   : > { %v2695_v42 = vpop.xlane.xlu1 %2694 }
 0x472   : > { %v2771_v32 = vmax.f32 %v2695_v42, 1e-24 }
 0x474   : > { %2751 = vadd.xlane.f32.xlu0 %v2750_v38 }
 0x476   : > { %v14875_v7 = vpop.eup %14874 }
 0x477   : > { %v2831_v62 = vmul.f32 %v14875_v7, %v15914_v39 }
 0x479   : > { %v16265_v25 = vmul.f32 %v16117_v43, %v2831_v62 }
 0x47b   : > { %v3053_v38 = vsel %vm748_vm1, %v16265_v25, 0 }
 0x489   : > { %v2680_v61 = vpop.xlane.xlu0 %2679 }
 0x48a   : > { %v2766_v26 = vmax.f32 %v2680_v61, 1e-24 }
 0x48c   : > { %14876 = vrsqrt.f32 %v2766_v26  ;;  %v16270_v26 = vand.u32 4294901760, %v3053_v38 }
 0x48d   : > { %v16258_v54 = vpop.permute.xlu0 %2622 }
 0x48e   : > { %v2664_v5 = vmul.f32 %v16258_v54, %v16258_v54  ;;  %v16277_v62 = vsub.f32 %v3053_v38, %v16270_v26 }
 0x490   : > { %v2756_v39 = vsel %vm748_vm1, %v2664_v5, 0.0  ;;  %20191 = vst [vmem:[#allocation33_spill] sm:$0xff] %v16277_v62  ;;  %v19768_v41 = vand.u32 4294901760, %v16277_v62 }
 0x491   : > { %2757 = vadd.xlane.f32.xlu0 %v2756_v39 }
 0x495   : > { %1757 = vadd.xlane.f32.xlu0 %v1756_v0 }
 0x496   : > { %v14877_v34 = vpop.eup %14876 }
 0x497   : > { %v2830_v7 = vmul.f32 %v14877_v34, %v15918_v44  ;;  %v3283_v44 = vsub.f32 %v16277_v62, %v19768_v41  ;;  %v2701_v41 = vpop.xlane.xlu1 %2700 }
 0x499   : > { %v16274_v61 = vmul.f32 %v16117_v43, %v2830_v7  ;;  %v3284_v7 = vand.u32 4294901760, %v3283_v44 }
 0x49b   : > { %v3050_v5 = vsel %vm748_vm1, %v16274_v61, 0  ;;  %v2707_v44 = vpop.xlane.xlu1 %2706 }
 0x49c   : > { %v16281_v39 = vand.u32 4294901760, %v3050_v5 }
 0x49e   : > { %v16285_v0 = vsub.f32 %v3050_v5, %v16281_v39  ;;  %v2769_v5 = vmax.f32 %v2689_v35, 1e-24 }
 0x49f   : > { %v2713_v62 = vpop.xlane.xlu1 %2712 }
 0x4a0   : > { %20192 = vst [vmem:[#allocation34_spill] sm:$0xff] %v16285_v0  ;;  %v19769_v19 = vand.u32 4294901760, %v16285_v0  ;;  %14878 = vrsqrt.f32 %v2769_v5  ;;  %v2777_v12 = vmax.f32 %v2713_v62, 1e-24 }
 0x4a1   : > { %14880 = vrsqrt.f32 %v2771_v32 }
 0x4a2   : > { %v3273_v38 = vsub.f32 %v16285_v0, %v19769_v19 }
 0x4a4   : > { %v3274_v34 = vand.u32 4294901760, %v3273_v38  ;;  %v2773_v38 = vmax.f32 %v2701_v41, 1e-24 }
 0x4a6   : > { %12306 = vmatprep.mubr.f32.mxu0 %v3274_v34  ;;  %14882 = vrsqrt.f32 %v2773_v38 }
 0x4a7   : > { %12307 = vmatmul.mubr.f32.gmra.mrb[12].mxu0 %v3284_v7 }
 0x4aa   : > { %v14879_v34 = vpop.eup %14878 }
 0x4ab   : > { %5518 = vrot.lane.b32.xlu0 %v15858_v52, %s15294_s29  ;;  %v2775_v52 = vmax.f32 %v2707_v44, 1e-24  ;;  %v2833_v35 = vmul.f32 %v14879_v34, %v15922_v45 }
 0x4ad   : > { %14884 = vrsqrt.f32 %v2775_v52  ;;  %v16304_v42 = vmul.f32 %v16117_v43, %v2833_v35 }
 0x4af   : > { %5522 = vrot.lane.b32.xlu0 %v15866_v6, %s15294_s29  ;;  %v14881_v6 = vpop.eup %14880 }
 0x4b0   : > { %v14883_v19 = vpop.eup %14882 }
 0x4b1   : > { %v2837_v44 = vmul.f32 %v14883_v19, %v16006_v4 }
 0x4b3   : > { %5526 = vrot.lane.b32.xlu0 %v15876_v14, %s15294_s29  ;;  %v2835_v14 = vmul.f32 %v14881_v6, %v15974_v13  ;;  %v2719_v13 = vpop.xlane.xlu1 %2718  ;;  %v16319_v0 = vmul.f32 %v16117_v43, %v2837_v44 }
 0x4b5   : > { %v16310_v45 = vmul.f32 %v16117_v43, %v2835_v14  ;;  %20194 = vst [vmem:[#allocation36_spill] sm:$0xff] %v16319_v0 }
 0x4b7   : > { %5530 = vrot.lane.b32.xlu0 %v15886_v23, %s15294_s29  ;;  %v3059_v23 = vsel %vm748_vm1, %v16304_v42, 0  ;;  %20193 = vst [vmem:[#allocation35_spill] sm:$0xff] %v16310_v45  ;;  %v14885_v52 = vpop.eup %14884  ;;  %v3065_v6 = vsel %vm748_vm1, %v16310_v45, 0  ;;  %v2725_v44 = vpop.xlane.xlu1 %2724 }
 0x4b8   : > { %v16313_v35 = vand.u32 4294901760, %v3059_v23  ;;  %v16325_v19 = vand.u32 4294901760, %v3065_v6 }
 0x4ba   : > { %v16323_v4 = vsub.f32 %v3059_v23, %v16313_v35  ;;  %20196 = vst [vmem:[#allocation38_spill] sm:$0xff] %v16325_v19 }
 0x4bb   : > { %v2731_v45 = vpop.xlane.xlu1 %2730 }
 0x4bc   : > { %20195 = vst [vmem:[#allocation37_spill] sm:$0xff] %v16323_v4 }
 0x4be   : > { %v2686_v7 = vpop.xlane.xlu0 %2685 }
 0x4bf   : > { %v2768_v5 = vmax.f32 %v2686_v7, 1e-24 }
 0x4c1   : > { %14886 = vrsqrt.f32 %v2768_v5 }
 0x4c2   : > { %v2692_v32 = vpop.xlane.xlu0 %2691 }
 0x4c3   : > { %v2770_v41 = vmax.f32 %v2692_v32, 1e-24  ;;  %v2839_v32 = vmul.f32 %v14885_v52, %v16060_v21  ;;  %v3071_v21 = vsel %vm748_vm1, %v16319_v0, 0 }
 0x4c5   : > { %14888 = vrsqrt.f32 %v2770_v41  ;;  %v16333_v52 = vmul.f32 %v16117_v43, %v2839_v32 }
 0x4c6   : > { %v2698_v38 = vpop.xlane.xlu0 %2697 }
 0x4c7   : > { %v2772_v34 = vmax.f32 %v2698_v38, 1e-24  ;;  %20198 = vst [vmem:[#allocation40_spill] sm:$0xff] %v16333_v52 }
 0x4c9   : > { %14890 = vrsqrt.f32 %v2772_v34 }
 0x4ca   : > { %v2704_v7 = vpop.xlane.xlu0 %2703 }
 0x4cb   : > { %v14887_v5 = vpop.eup %14886  ;;  %v2774_v41 = vmax.f32 %v2704_v7, 1e-24  ;;  %v19783_v7 = vand.u32 4294901760, %v16323_v4 }
 0x4cc   : > { %v2832_v14 = vmul.f32 %v14887_v5, %v15926_v40 }
 0x4cd   : > { %14892 = vrsqrt.f32 %v2774_v41  ;;  %v16342_v41 = vsub.f32 %v3065_v6, %v16325_v19  ;;  %v3303_v6 = vsub.f32 %v16323_v4, %v19783_v7 }
 0x4ce   : > { %v16328_v38 = vmul.f32 %v16117_v43, %v2832_v14  ;;  %v16347_v14 = vand.u32 4294901760, %v3071_v21  ;;  %14894 = vrsqrt.f32 %v2777_v12 }
 0x4cf   : > { %v14889_v34 = vpop.eup %14888  ;;  %20199 = vst [vmem:[#allocation41_spill] sm:$0xff] %v16342_v41 }
 0x4d0   : > { %20197 = vst [vmem:[#allocation39_spill] sm:$0xff] %v16328_v38  ;;  %v2834_v40 = vmul.f32 %v14889_v34, %v16080_v30  ;;  %v3056_v23 = vsel %vm748_vm1, %v16328_v38, 0  ;;  %20201 = vst [vmem:[#allocation43_spill] sm:$0xff] %v16347_v14  ;;  %v3077_v30 = vsel %vm748_vm1, %v16333_v52, 0 }
 0x4d1   : > { %v16339_v5 = vand.u32 4294901760, %v3056_v23 }
 0x4d2   : > { %v16345_v62 = vmul.f32 %v16117_v43, %v2834_v40 }
 0x4d3   : > { %v14891_v32 = vpop.eup %14890  ;;  %v16350_v28 = vsub.f32 %v3056_v23, %v16339_v5  ;;  %v2779_v23 = vmax.f32 %v2719_v13, 1e-24  ;;  %v3304_v13 = vand.u32 4294901760, %v3303_v6 }
 0x4d4   : > { %20200 = vst [vmem:[#allocation42_spill] sm:$0xff] %v16345_v62  ;;  %v2836_v34 = vmul.f32 %v14891_v32, %v16044_v51  ;;  %v3062_v40 = vsel %vm748_vm1, %v16345_v62, 0  ;;  %v16368_v51 = vsub.f32 %v3071_v21, %v16347_v14  ;;  %v16370_v32 = vand.u32 4294901760, %v3077_v30 }
 0x4d5   : > { %20202 = vst [vmem:[#allocation44_spill] sm:$0xff] %v16350_v28  ;;  %v19793_v0 = vand.u32 4294901760, %v16350_v28  ;;  %v16361_v33 = vand.u32 4294901760, %v3062_v40  ;;  %v20206_v14 = vand.u32 4294901760, %v16342_v41  ;;  %14896 = vrsqrt.f32 %v2779_v23 }
 0x4d6   : > { %v16365_v47 = vmul.f32 %v16117_v43, %v2836_v34  ;;  %20204 = vst [vmem:[#allocation46_spill] sm:$0xff] %v16368_v51 }
 0x4d7   : > { %v14893_v7 = vpop.eup %14892  ;;  %v3293_v4 = vsub.f32 %v16350_v28, %v19793_v0  ;;  %v16376_v52 = vsub.f32 %v3062_v40, %v16361_v33  ;;  %v3323_v38 = vsub.f32 %v16342_v41, %v20206_v14  ;;  %v2737_v14 = vpop.xlane.xlu1 %2736  ;;  %v2781_v0 = vmax.f32 %v2725_v44, 1e-24 }
 0x4d8   : > { %20203 = vst [vmem:[#allocation45_spill] sm:$0xff] %v16365_v47  ;;  %v2838_v12 = vmul.f32 %v14893_v7, %v16150_v49  ;;  %v3068_v34 = vsel %vm748_vm1, %v16365_v47, 0  ;;  %v16392_v49 = vsub.f32 %v3077_v30, %v16370_v32  ;;  %v14895_v23 = vpop.eup %14894  ;;  %v20210_v28 = vand.u32 4294901760, %v16368_v51 }
 0x4d9   : > { %20205 = vst [vmem:[#allocation47_spill] sm:$0xff] %v16376_v52  ;;  %v3294_v62 = vand.u32 4294901760, %v3293_v4  ;;  %v19798_v21 = vand.u32 4294901760, %v16376_v52  ;;  %v16385_v19 = vand.u32 4294901760, %v3068_v34  ;;  %14898 = vrsqrt.f32 %v2781_v0 }
 0x4da   : > { %v16389_v40 = vmul.f32 %v16117_v43, %v2838_v12  ;;  %20208 = vst [vmem:[#allocation49_spill] sm:$0xff] %v16392_v49 }
 0x4db   : > { %12309 = vmatprep.mubr.f32.mxu0 %v3294_v62  ;;  %v3313_v4 = vsub.f32 %v16376_v52, %v19798_v21  ;;  %v16398_v7 = vsub.f32 %v3068_v34, %v16385_v19  ;;  %v3324_v62 = vand.u32 4294901760, %v3323_v38  ;;  %v3343_v21 = vsub.f32 %v16368_v51, %v20210_v28  ;;  %v2743_v47 = vpop.xlane.xlu1 %2742 }
 0x4dc   : > { %20207 = vst [vmem:[#allocation48_spill] sm:$0xff] %v16389_v40  ;;  %12310 = vmatmul.mubr.f32.gmra.mrb[14].mxu0 %v3304_v13  ;;  %v3074_v6 = vsel %vm748_vm1, %v16389_v40, 0  ;;  %v19804_v34 = vand.u32 4294901760, %v16392_v49  ;;  %v2783_v52 = vmax.f32 %v2731_v45, 1e-24 }
 0x4dd   : > { %20209 = vst [vmem:[#allocation50_spill] sm:$0xff] %v16398_v7  ;;  %v3314_v12 = vand.u32 4294901760, %v3313_v4  ;;  %v19803_v41 = vand.u32 4294901760, %v16398_v7  ;;  %v16403_v30 = vand.u32 4294901760, %v3074_v6  ;;  %v2841_v4 = vmul.f32 %v14895_v23, %v16073_v63 }
 0x4de   : > { %v3344_v28 = vand.u32 4294901760, %v3343_v21  ;;  %v3363_v45 = vsub.f32 %v16392_v49, %v19804_v34  ;;  %14900 = vrsqrt.f32 %v2783_v52  ;;  %v2787_v34 = vmax.f32 %v2743_v47, 1e-24 }
 0x4df   : > { %12312 = vmatprep.mubr.f32.mxu0 %v3314_v12  ;;  %v3333_v13 = vsub.f32 %v16398_v7, %v19803_v41  ;;  %v16413_v44 = vsub.f32 %v3074_v6, %v16403_v30  ;;  %v2785_v12 = vmax.f32 %v2737_v14, 1e-24  ;;  %v14897_v41 = vpop.eup %14896  ;;  %v16424_v63 = vmul.f32 %v16117_v43, %v2841_v4  ;;  %v2749_v52 = vpop.xlane.xlu1 %2748 }
 0x4e0   : > { %12313 = vmatmul.mubr.f32.gmra.mrb[16].mxu0 %v3324_v62  ;;  %v3364_v21 = vand.u32 4294901760, %v3363_v45  ;;  %v2789_v4 = vmax.f32 %v2749_v52, 1e-24 }
 0x4e1   : > { %20211 = vst [vmem:[#allocation51_spill] sm:$0xff] %v16413_v44  ;;  %v3334_v38 = vand.u32 4294901760, %v3333_v13  ;;  %v19805_v40 = vand.u32 4294901760, %v16413_v44  ;;  %20212 = vst [vmem:[#allocation52_spill] sm:$0xff] %v16424_v63  ;;  %v2843_v13 = vmul.f32 %v14897_v41, %v15980_v37  ;;  %14902 = vrsqrt.f32 %v2785_v12 }
 0x4e2   : > { %v3083_v14 = vsel %vm748_vm1, %v16424_v63, 0 }
 0x4e3   : > { %12315 = vmatprep.mubr.f32.mxu0 %v3334_v38  ;;  %v3353_v6 = vsub.f32 %v16413_v44, %v19805_v40  ;;  %v14899_v40 = vpop.eup %14898  ;;  %v16429_v49 = vand.u32 4294901760, %v3083_v14  ;;  %v16432_v45 = vmul.f32 %v16117_v43, %v2843_v13  ;;  %v2755_v12 = vpop.xlane.xlu1 %2754 }
 0x4e4   : > { %12316 = vmatmul.mubr.f32.gmra.mrb[18].mxu0 %v3344_v28  ;;  %v2845_v41 = vmul.f32 %v14899_v40, %v16018_v22 }
 0x4e5   : > { %v2710_v0 = vpop.xlane.xlu0 %2709  ;;  %v3354_v23 = vand.u32 4294901760, %v3353_v6 }
 0x4e6   : > { %v2776_v62 = vmax.f32 %v2710_v0, 1e-24  ;;  %v16436_v0 = vsub.f32 %v3083_v14, %v16429_v49  ;;  %v16444_v22 = vmul.f32 %v16117_v43, %v2845_v41 }
 0x4e7   : > { %12318 = vmatprep.mubr.f32.mxu0 %v3354_v23 }
 0x4e8   : > { %14904 = vrsqrt.f32 %v2776_v62  ;;  %12319 = vmatmul.mubr.f32.gmra.mrb[20].mxu0 %v3364_v21  ;;  %v14901_v37 = vpop.eup %14900  ;;  %20213 = vst [vmem:[#allocation53_spill] sm:$0xff] %v16436_v0  ;;  %v2791_v21 = vmax.f32 %v2755_v12, 1e-24  ;;  %20214 = vst [vmem:[#allocation54_spill] sm:$0xff] %v16444_v22  ;;  %v19810_v14 = vand.u32 4294901760, %v16436_v0 }
 0x4e9   : > { %v2716_v38 = vpop.xlane.xlu0 %2715  ;;  %14906 = vrsqrt.f32 %v2787_v34  ;;  %v3089_v34 = vsel %vm748_vm1, %v16432_v45, 0  ;;  %v2847_v23 = vmul.f32 %v14901_v37, %v16065_v56 }
 0x4ea   : > { %v2778_v28 = vmax.f32 %v2716_v38, 1e-24 }
 0x4eb   : > { %v14903_v62 = vpop.eup %14902  ;;  %v16450_v56 = vmul.f32 %v16117_v43, %v2847_v23 }
 0x4ec   : > { %14908 = vrsqrt.f32 %v2778_v28  ;;  %v16441_v28 = vand.u32 4294901760, %v3089_v34 }
 0x4ed   : > { %v2722_v47 = vpop.xlane.xlu0 %2721  ;;  %14910 = vrsqrt.f32 %v2789_v4  ;;  %v2849_v4 = vmul.f32 %v14903_v62, %v16093_v17  ;;  %20215 = vst [vmem:[#allocation55_spill] sm:$0xff] %v16450_v56  ;;  %v3383_v62 = vsub.f32 %v16436_v0, %v19810_v14 }
 0x4ee   : > { %v2780_v6 = vmax.f32 %v2722_v47, 1e-24  ;;  %v16456_v41 = vsub.f32 %v3089_v34, %v16441_v28 }
 0x4ef   : > { %v16471_v34 = vmul.f32 %v16117_v43, %v2849_v4  ;;  %v3384_v4 = vand.u32 4294901760, %v3383_v62 }
 0x4f0   : > { %14912 = vrsqrt.f32 %v2780_v6  ;;  %20217 = vst [vmem:[#allocation57_spill] sm:$0xff] %v16456_v41 }
 0x4f1   : > { %v2728_v13 = vpop.xlane.xlu0 %2727  ;;  %20218 = vst [vmem:[#allocation58_spill] sm:$0xff] %v16471_v34 }
 0x4f2   : > { %v14905_v52 = vpop.eup %14904  ;;  %v2782_v38 = vmax.f32 %v2728_v13, 1e-24 }
 0x4f3   : > { %v2840_v40 = vmul.f32 %v14905_v52, %v16186_v24  ;;  %v14907_v37 = vpop.eup %14906  ;;  %v3095_v24 = vsel %vm748_vm1, %v16444_v22, 0  ;;  %v3101_v52 = vsel %vm748_vm1, %v16450_v56, 0 }
 0x4f4   : > { %14914 = vrsqrt.f32 %v2782_v38 }
 0x4f5   : > { %14916 = vrsqrt.f32 %v2791_v21  ;;  %v2734_v47 = vpop.xlane.xlu0 %2733  ;;  %v16453_v12 = vmul.f32 %v16117_v43, %v2840_v40  ;;  %v2851_v40 = vmul.f32 %v14907_v37, %v15991_v2  ;;  %v16486_v2 = vand.u32 4294901760, %v3101_v52 }
 0x4f6   : > { %v14909_v6 = vpop.eup %14908  ;;  %v2784_v13 = vmax.f32 %v2734_v47, 1e-24 }
 0x4f7   : > { %20216 = vst [vmem:[#allocation56_spill] sm:$0xff] %v16453_v12  ;;  %v2842_v17 = vmul.f32 %v14909_v6, %v16088_v58  ;;  %v3080_v23 = vsel %vm748_vm1, %v16453_v12, 0  ;;  %v14911_v38 = vpop.eup %14910  ;;  %v16477_v6 = vand.u32 4294901760, %v3095_v24  ;;  %20220 = vst [vmem:[#allocation60_spill] sm:$0xff] %v16486_v2  ;;  %v16516_v56 = vsub.f32 %v3101_v52, %v16486_v2 }
 0x4f8   : > { %14918 = vrsqrt.f32 %v2784_v13  ;;  %v16466_v21 = vand.u32 4294901760, %v3080_v23 }
 0x4f9   : > { %v2740_v58 = vpop.xlane.xlu0 %2739  ;;  %v16475_v47 = vmul.f32 %v16117_v43, %v2842_v17  ;;  %20226 = vst [vmem:[#allocation65_spill] sm:$0xff] %v16516_v56 }
 0x4fa   : > { %v14913_v44 = vpop.eup %14912  ;;  %v2786_v14 = vmax.f32 %v2740_v58, 1e-24  ;;  %v16480_v13 = vsub.f32 %v3080_v23, %v16466_v21  ;;  %v3107_v58 = vsel %vm748_vm1, %v16471_v34, 0  ;;  %v2853_v23 = vmul.f32 %v14911_v38, %v16028_v53 }
 0x4fb   : > { %v2844_v51 = vmul.f32 %v14913_v44, %v16134_v36  ;;  %v3086_v7 = vsel %vm748_vm1, %v16475_v47, 0  ;;  %v16498_v36 = vsub.f32 %v3095_v24, %v16477_v6  ;;  %v16501_v44 = vmul.f32 %v16117_v43, %v2851_v40 }
 0x4fc   : > { %20219 = vst [vmem:[#allocation59_spill] sm:$0xff] %v16480_v13  ;;  %14920 = vrsqrt.f32 %v2786_v14  ;;  %v19821_v37 = vand.u32 4294901760, %v16480_v13  ;;  %v16489_v17 = vand.u32 4294901760, %v3086_v7  ;;  %v20225_v53 = vand.u32 4294901760, %v16456_v41 }
 0x4fd   : > { %v2746_v12 = vpop.xlane.xlu0 %2745  ;;  %v16495_v0 = vmul.f32 %v16117_v43, %v2844_v51  ;;  %20222 = vst [vmem:[#allocation62_spill] sm:$0xff] %v16498_v36  ;;  %20223 = vst [vmem:[#allocation63_spill] sm:$0xff] %v16501_v44  ;;  %v16530_v52 = vmul.f32 %v16117_v43, %v2853_v23  ;;  %v19838_v23 = vand.u32 4294901760, %v16516_v56 }
 0x4fe   : > { %v14915_v14 = vpop.eup %14914  ;;  %v2788_v62 = vmax.f32 %v2746_v12, 1e-24  ;;  %v3373_v63 = vsub.f32 %v16480_v13, %v19821_v37  ;;  %v16507_v34 = vsub.f32 %v3086_v7, %v16489_v17  ;;  %v3403_v51 = vsub.f32 %v16456_v41, %v20225_v53 }
 0x4ff   : > { %20221 = vst [vmem:[#allocation61_spill] sm:$0xff] %v16495_v0  ;;  %v14917_v38 = vpop.eup %14916  ;;  %v2846_v24 = vmul.f32 %v14915_v14, %v16163_v29  ;;  %v3092_v40 = vsel %vm748_vm1, %v16495_v0, 0  ;;  %v16518_v12 = vand.u32 4294901760, %v3107_v58  ;;  %v3113_v29 = vsel %vm748_vm1, %v16501_v44, 0  ;;  %20228 = vst [vmem:[#allocation67_spill] sm:$0xff] %v16530_v52 }
 0x500   : > { %20224 = vst [vmem:[#allocation64_spill] sm:$0xff] %v16507_v34  ;;  %14922 = vrsqrt.f32 %v2788_v62  ;;  %v3374_v37 = vand.u32 4294901760, %v3373_v63  ;;  %v19831_v7 = vand.u32 4294901760, %v16507_v34  ;;  %v16521_v13 = vand.u32 4294901760, %v3092_v40 }
 0x501   : > { %20227 = vst [vmem:[#allocation66_spill] sm:$0xff] %v16518_v12  ;;  %v2752_v22 = vpop.xlane.xlu0 %2751  ;;  %v16525_v41 = vmul.f32 %v16117_v43, %v2846_v24  ;;  %v2855_v62 = vmul.f32 %v14917_v38, %v16071_v46  ;;  %v16544_v2 = vsub.f32 %v3107_v58, %v16518_v12  ;;  %v3404_v38 = vand.u32 4294901760, %v3403_v51 }
 0x502   : > { %v14919_v14 = vpop.eup %14918  ;;  %v2790_v63 = vmax.f32 %v2752_v22, 1e-24  ;;  %12321 = vmatprep.mubr.f32.mxu0 %v3374_v37  ;;  %v3393_v0 = vsub.f32 %v16507_v34, %v19831_v7  ;;  %v16537_v53 = vsub.f32 %v3092_v40, %v16521_v13  ;;  %v20232_v40 = vand.u32 4294901760, %v16498_v36 }
 0x503   : > { %v2848_v24 = vmul.f32 %v14919_v14, %v16212_v18  ;;  %12322 = vmatmul.mubr.f32.gmra.mrb[22].mxu0 %v3384_v4  ;;  %v3098_v44 = vsel %vm748_vm1, %v16525_v41, 0  ;;  %20230 = vst [vmem:[#allocation69_spill] sm:$0xff] %v16544_v2  ;;  %v16555_v14 = vand.u32 4294901760, %v3113_v29  ;;  %v3119_v51 = vsel %vm748_vm1, %v16530_v52, 0  ;;  %v2761_v52 = vpop.xlane.xlu1 %2760 }
 0x504   : > { %20229 = vst [vmem:[#allocation68_spill] sm:$0xff] %v16537_v53  ;;  %14924 = vrsqrt.f32 %v2790_v63  ;;  %v3394_v46 = vand.u32 4294901760, %v3393_v0  ;;  %v19832_v22 = vand.u32 4294901760, %v16537_v53  ;;  %v16547_v37 = vand.u32 4294901760, %v3098_v44 }
 0x505   : > { %v3423_v18 = vsub.f32 %v16498_v36, %v20232_v40  ;;  %v16553_v4 = vmul.f32 %v16117_v43, %v2848_v24  ;;  %20233 = vst [vmem:[#allocation71_spill] sm:$0xff] %v16555_v14  ;;  %v16566_v63 = vmul.f32 %v16117_v43, %v2855_v62 }
 0x506   : > { %20231 = vst [vmem:[#allocation70_spill] sm:$0xff] %v16547_v37  ;;  %v14921_v7 = vpop.eup %14920  ;;  %12324 = vmatprep.mubr.f32.mxu0 %v3394_v46  ;;  %v3413_v0 = vsub.f32 %v16537_v53, %v19832_v22  ;;  %v16561_v58 = vsub.f32 %v3098_v44, %v16547_v37  ;;  %v3443_v46 = vsub.f32 %v16516_v56, %v19838_v23 }
 0x507   : > { %20235 = vst [vmem:[#allocation73_spill] sm:$0xff] %v16566_v63  ;;  %v2850_v24 = vmul.f32 %v14921_v7, %v16098_v10  ;;  %12325 = vmatmul.mubr.f32.gmra.mrb[24].mxu0 %v3404_v38  ;;  %v3104_v40 = vsel %vm748_vm1, %v16553_v4, 0  ;;  %v3424_v53 = vand.u32 4294901760, %v3423_v18  ;;  %v16582_v10 = vsub.f32 %v3113_v29, %v16555_v14 }
 0x508   : > { %20234 = vst [vmem:[#allocation72_spill] sm:$0xff] %v16561_v58  ;;  %v3414_v22 = vand.u32 4294901760, %v3413_v0  ;;  %v19845_v44 = vand.u32 4294901760, %v16561_v58  ;;  %v16575_v36 = vand.u32 4294901760, %v3104_v40  ;;  %v16584_v7 = vand.u32 4294901760, %v3119_v51 }
 0x509   : > { %v16579_v62 = vmul.f32 %v16117_v43, %v2850_v24  ;;  %20237 = vst [vmem:[#allocation75_spill] sm:$0xff] %v16582_v10  ;;  %v3125_v18 = vsel %vm748_vm1, %v16566_v63, 0  ;;  %v3444_v29 = vand.u32 4294901760, %v3443_v46  ;;  %v20240_v14 = vand.u32 4294901760, %v16544_v2 }
 0x50a   : > { %20236 = vst [vmem:[#allocation74_spill] sm:$0xff] %v16575_v36  ;;  %20238 = vst [vmem:[#allocation76_spill] sm:$0xff] %v16584_v7  ;;  %v14923_v38 = vpop.eup %14922  ;;  %12327 = vmatprep.mubr.f32.mxu0 %v3414_v22  ;;  %v3433_v0 = vsub.f32 %v16561_v58, %v19845_v44  ;;  %v16590_v23 = vsub.f32 %v3104_v40, %v16575_v36 }
 0x50b   : > { %v2852_v24 = vmul.f32 %v14923_v38, %v16138_v3  ;;  %12328 = vmatmul.mubr.f32.gmra.mrb[26].mxu0 %v3424_v53  ;;  %v3110_v56 = vsel %vm748_vm1, %v16579_v62, 0  ;;  %v3463_v44 = vsub.f32 %v16544_v2, %v20240_v14  ;;  %v16608_v3 = vsub.f32 %v3119_v51, %v16584_v7 }
 0x50c   : > { %20239 = vst [vmem:[#allocation77_spill] sm:$0xff] %v16590_v23  ;;  %v3434_v34 = vand.u32 4294901760, %v3433_v0  ;;  %v19855_v22 = vand.u32 4294901760, %v16590_v23  ;;  %v16601_v40 = vand.u32 4294901760, %v3110_v56  ;;  %v16610_v53 = vand.u32 4294901760, %v3125_v18 }
 0x50d   : > { %v16605_v63 = vmul.f32 %v16117_v43, %v2852_v24  ;;  %20242 = vst [vmem:[#allocation79_spill] sm:$0xff] %v16608_v3  ;;  %v2793_v38 = vmax.f32 %v2761_v52, 1e-24  ;;  %v3464_v2 = vand.u32 4294901760, %v3463_v44 }
 0x50e   : > { %20241 = vst [vmem:[#allocation78_spill] sm:$0xff] %v16601_v40  ;;  %20243 = vst [vmem:[#allocation80_spill] sm:$0xff] %v16610_v53  ;;  %v14925_v46 = vpop.eup %14924  ;;  %12330 = vmatprep.mubr.f32.mxu0 %v3434_v34  ;;  %v3453_v0 = vsub.f32 %v16590_v23, %v19855_v22  ;;  %v16616_v14 = vsub.f32 %v3110_v56, %v16601_v40  ;;  %v20246_v34 = vand.u32 4294901760, %v16582_v10  ;;  %v19859_v22 = vand.u32 4294901760, %v16608_v3 }
 0x50f   : > { %v2854_v58 = vmul.f32 %v14925_v46, %v16171_v11  ;;  %12331 = vmatmul.mubr.f32.gmra.mrb[28].mxu0 %v3444_v29  ;;  %v3116_v24 = vsel %vm748_vm1, %v16605_v63, 0  ;;  %v16632_v11 = vsub.f32 %v3125_v18, %v16610_v53  ;;  %14926 = vrsqrt.f32 %v2793_v38 }
 0x510   : > { %20244 = vst [vmem:[#allocation81_spill] sm:$0xff] %v16616_v14  ;;  %v3454_v51 = vand.u32 4294901760, %v3453_v0  ;;  %v19856_v7 = vand.u32 4294901760, %v16616_v14  ;;  %v16622_v12 = vand.u32 4294901760, %v3116_v24  ;;  %v3483_v52 = vsub.f32 %v16582_v10, %v20246_v34 }
 0x511   : > { %v16629_v56 = vmul.f32 %v16117_v43, %v2854_v58  ;;  %20247 = vst [vmem:[#allocation83_spill] sm:$0xff] %v16632_v11  ;;  %v3503_v38 = vsub.f32 %v16608_v3, %v19859_v22 }
 0x512   : > { %20245 = vst [vmem:[#allocation82_spill] sm:$0xff] %v16622_v12  ;;  %12333 = vmatprep.mubr.f32.mxu0 %v3454_v51  ;;  %v3473_v44 = vsub.f32 %v16616_v14, %v19856_v7  ;;  %v16638_v29 = vsub.f32 %v3116_v24, %v16622_v12  ;;  %v3484_v18 = vand.u32 4294901760, %v3483_v52  ;;  %v19867_v51 = vand.u32 4294901760, %v16632_v11 }
 0x513   : > { %12334 = vmatmul.mubr.f32.gmra.mrb[30].mxu0 %v3464_v2  ;;  %v3122_v46 = vsel %vm748_vm1, %v16629_v56, 0  ;;  %v3504_v10 = vand.u32 4294901760, %v3503_v38 }
 0x514   : > { %20248 = vst [vmem:[#allocation84_spill] sm:$0xff] %v16638_v29  ;;  %v3474_v0 = vand.u32 4294901760, %v3473_v44  ;;  %v19860_v58 = vand.u32 4294901760, %v16638_v29  ;;  %v16643_v34 = vand.u32 4294901760, %v3122_v46  ;;  %v3523_v52 = vsub.f32 %v16632_v11, %v19867_v51 }
 0x516   : > { %20249 = vst [vmem:[#allocation85_spill] sm:$0xff] %v16643_v34  ;;  %12336 = vmatprep.mubr.f32.mxu0 %v3474_v0  ;;  %v3493_v2 = vsub.f32 %v16638_v29, %v19860_v58  ;;  %v16653_v24 = vsub.f32 %v3122_v46, %v16643_v34  ;;  %v3524_v3 = vand.u32 4294901760, %v3523_v52  ;;  %v5517_v46 = vpop.permute.xlu1 %5516 }
 0x517   : > { %12337 = vmatmul.mubr.f32.gmra.mrb[32].mxu0 %v3484_v18 }
 0x518   : > { %20250 = vst [vmem:[#allocation86_spill] sm:$0xff] %v16653_v24  ;;  %v3494_v44 = vand.u32 4294901760, %v3493_v2  ;;  %v19868_v7 = vand.u32 4294901760, %v16653_v24 }
 0x519   : > { %v14927_v22 = vpop.eup %14926 }
 0x51a   : > { %12339 = vmatprep.mubr.f32.mxu0 %v3494_v44  ;;  %v3513_v0 = vsub.f32 %v16653_v24, %v19868_v7  ;;  %v2857_v2 = vmul.f32 %v14927_v22, %v16143_v1  ;;  %v16666_v51 = vpop.permute.xlu1 %5520  ;;  %v5637_v7 = vand.u32 4294901760, %v5517_v46 }
 0x51b   : > { %12340 = vmatmul.mubr.f32.gmra.mrb[34].mxu0 %v3504_v10  ;;  %20252 = vst [vmem:[#allocation88_spill] sm:$0xff] %v16666_v51 }
 0x51c   : > { %v3514_v58 = vand.u32 4294901760, %v3513_v0  ;;  %v16664_v44 = vmul.f32 %v16117_v43, %v2857_v2  ;;  %v16670_v52 = vsub.f32 %v5517_v46, %v5637_v7 }
 0x51e   : > { %12342 = vmatprep.mubr.f32.mxu0 %v3514_v58  ;;  %v2758_v18 = vpop.xlane.xlu0 %2757  ;;  %20251 = vst [vmem:[#allocation87_spill] sm:$0xff] %v16664_v44  ;;  %v3131_v58 = vsel %vm748_vm1, %v16664_v44, 0  ;;  %20253 = vst [vmem:[#allocation89_spill] sm:$0xff] %v16670_v52 }
 0x51f   : > { %v2792_v29 = vmax.f32 %v2758_v18, 1e-24  ;;  %12343 = vmatmul.mubr.f32.gmra.mrb[36].mxu0 %v3524_v3  ;;  %v16676_v3 = vpop.permute.xlu1 %5524  ;;  %v16680_v18 = vand.u32 4294901760, %v3131_v58 }
 0x520   : > { %20256 = vst [vmem:[#allocation92_spill] sm:$0xff] %v16676_v3 }
 0x521   : > { %14928 = vrsqrt.f32 %v2792_v29  ;;  %20258 = vst [vmem:[#allocation94_spill] sm:$0xff] %v16680_v18  ;;  %v16699_v24 = vsub.f32 %v3131_v58, %v16680_v18 }
 0x522   : > { %v1758_v38 = vpop.xlane.xlu0 %1757 }
 0x523   : > { %v1759_v14 = vmax.f32 %v1758_v38, 1e-24 }
 0x525   : > { %14930 = vrsqrt.f32 %v1759_v14  ;;  %v19875_v14 = vand.u32 4294901760, %v16666_v51 }
 0x526   : > { %v5519_v10 = vpop.permute.xlu0 %5518 }
 0x527   : > { %v5640_v0 = vand.u32 4294901760, %v5519_v10 }
 0x529   : > { %v16672_v1 = vpack.c.bf16 %v5640_v0, %v5637_v7  ;;  %v16674_v22 = vsub.f32 %v5519_v10, %v5640_v0 }
 0x52a   : > { %v16678_v29 = vpop.permute.xlu0 %5522 }
 0x52b   : > { %20254 = vst [vmem:[#allocation90_spill] sm:$0xff] %v16672_v1  ;;  %20255 = vst [vmem:[#allocation91_spill] sm:$0xff] %v16674_v22  ;;  %v14929_v2 = vpop.eup %14928  ;;  %v19874_v11 = vand.u32 4294901760, %v16678_v29  ;;  %13797 = vmatprep.subr.bf16.mxu1 %v16672_v1  ;;  %v20261_v46 = vand.u32 4294901760, %v16674_v22 }
 0x52c   : > { %20257 = vst [vmem:[#allocation93_spill] sm:$0xff] %v16678_v29  ;;  %v2856_v7 = vmul.f32 %v14929_v2, %v16258_v54  ;;  %13799 = vmatpush3.bf16.msra.mxu1 %v16672_v1  ;;  %v19889_v54 = vand.u32 4294901760, %v16676_v3  ;;  %v20310_v3 = vld [vmem:[#allocation59_spill] sm:$0xff] }
 0x52d   : > { %v16693_v10 = vpack.c.bf16 %v19874_v11, %v19875_v14  ;;  %v6040_v11 = vsub.f32 %v16674_v22, %v20261_v46  ;;  %v16707_v14 = vpop.permute.xlu1 %5528  ;;  %v15188_v46 = vld [vmem:[%s15487_s25] sm:$0x1]  ;;  %s20629_s25 = sld [smem:[#allocation19_spill]] }
 0x52e   : > { %v16695_v0 = vpop.permute.xlu0 %5526  ;;  %v2895_v38 = vmul.f32 %v16117_v43, %v2856_v7  ;;  %20262 = vst [vmem:[#allocation97_spill] sm:$0xff] %v16707_v14  ;;  %v20264_v7 = vand.u32 4294901760, %v16670_v52 }
 0x52f   : > { %20259 = vst [vmem:[#allocation95_spill] sm:$0xff] %v16693_v10  ;;  %20260 = vst [vmem:[#allocation96_spill] sm:$0xff] %v16695_v0  ;;  %v14931_v44 = vpop.eup %14930  ;;  %v19888_v2 = vand.u32 4294901760, %v16695_v0  ;;  %13801 = vmatprep.subr.bf16.mxu1 %v16693_v10  ;;  %v20309_v0 = vld [vmem:[#allocation49_spill] sm:$0xff] }
 0x530   : > { %v1761_v1 = vmul.f32 %v14931_v44, %v16256_v31  ;;  %13803 = vmatpush3.bf16.msra.mxu1 %v16693_v10  ;;  %v3128_v43 = vsel %vm748_vm1, %v2895_v38, 0  ;;  %v6033_v29 = vsub.f32 %v16670_v52, %v20264_v7  ;;  %v19892_v44 = vand.u32 4294901760, %v16707_v14  ;;  %v20305_v14 = vld [vmem:[#allocation23_spill] sm:$0xff] }
 0x531   : > { %v16716_v58 = vpack.c.bf16 %v19888_v2, %v19889_v54  ;;  %v16721_v51 = vand.u32 4294901760, %v3128_v43  ;;  %v6041_v2 = vand.u32 4294901760, %v6040_v11  ;;  %v20267_v7 = vsub.s32 0, %v15967_v8 }
 0x532   : > { %v1762_v22 = vmul.f32 %v15188_v46, %v1761_v1  ;;  %v16724_v23 = vpop.permute.xlu0 %5530  ;;  %v6034_v46 = vand.u32 4294901760, %v6033_v29 }
 0x533   : > { %20263 = vst [vmem:[#allocation98_spill] sm:$0xff] %v16716_v58  ;;  %20265 = vst [vmem:[#allocation99_spill] sm:$0xff] %v16721_v51  ;;  %v19893_v10 = vand.u32 4294901760, %v16724_v23  ;;  %13805 = vmatprep.subr.bf16.mxu1 %v16716_v58  ;;  %v16731_v54 = vsub.f32 %v3128_v43, %v16721_v51  ;;  %v20269_v43 = vand.u32 4294901760, %v16699_v24 }
 0x534   : > { %20266 = vst [vmem:[#allocation100_spill] sm:$0xff] %v16724_v23  ;;  %v16735_v52 = vrot.slane %v1762_v22, %v20267_v7  ;;  %13807 = vmatpush3.bf16.msra.mxu1 %v16716_v58  ;;  %v16751_v22 = vpack.c.bf16 %v6041_v2, %v6034_v46  ;;  %v20307_v23 = vld [vmem:[#allocation51_spill] sm:$0xff] }
 0x535   : > { %v16742_v1 = vpack.c.bf16 %v19893_v10, %v19892_v44  ;;  %v19894_v31 = vand.u32 4294901760, %v16731_v54  ;;  %v3543_v8 = vsub.f32 %v16699_v24, %v20269_v43 }
 0x536   : > { %v2904_v11 = vmul.f32 %v16735_v52, %v16159_v20  ;;  %20270 = vst [vmem:[#allocation102_spill] sm:$0xff] %v16751_v22  ;;  %v2903_v44 = vmul.f32 %v16735_v52, %v16121_v9  ;;  %v2906_v46 = vmul.f32 %v16735_v52, %v16215_v16  ;;  %v16778_v16 = vmul.f32 %v16735_v52, %v16579_v62 }
 0x537   : > { %20268 = vst [vmem:[#allocation101_spill] sm:$0xff] %v16742_v1  ;;  %13809 = vmatprep.subr.bf16.mxu1 %v16742_v1  ;;  %v3533_v7 = vsub.f32 %v16731_v54, %v19894_v31  ;;  %v3544_v43 = vand.u32 4294901760, %v3543_v8  ;;  %v16790_v8 = vmul.f32 %v16735_v52, %v16629_v56  ;;  %v2908_v62 = vmul.f32 %v16735_v52, %v16265_v25  ;;  %v20299_v31 = vld [vmem:[#allocation22_spill] sm:$0xff] }
 0x538   : > { %13811 = vmatpush3.bf16.msra.mxu1 %v16742_v1  ;;  %v2938_v29 = vsel %vm748_vm1, %v2904_v11, 0.0  ;;  %v2935_v2 = vsel %vm748_vm1, %v2903_v44, 0.0  ;;  %v16767_v11 = vmul.f32 %v16735_v52, %v16525_v41  ;;  %v2944_v9 = vsel %vm748_vm1, %v2906_v46, 0.0  ;;  %v20300_v1 = vld [vmem:[#allocation37_spill] sm:$0xff] }
 0x539   : > { %2939 = vadd.xlane.f32.xlu1 %v2938_v29  ;;  %13813 = vmatprep.subr.bf16.mxu1 %v16751_v22  ;;  %v3534_v20 = vand.u32 4294901760, %v3533_v7  ;;  %v2905_v44 = vmul.f32 %v16735_v52, %v16200_v48  ;;  %v16782_v41 = vmul.f32 %v16735_v52, %v16605_v63  ;;  %v16798_v63 = vmul.f32 %v16735_v52, %v2895_v38  ;;  %v20272_v7 = vld [vmem:[#allocation39_spill] sm:$0xff]  ;;  %v20303_v22 = vld [vmem:[#allocation41_spill] sm:$0xff] }
 0x53a   : > { %v2907_v56 = vmul.f32 %v16735_v52, %v16274_v61  ;;  %v2910_v38 = vmul.f32 %v16735_v52, %v16304_v42  ;;  %v2909_v29 = vmul.f32 %v16735_v52, %v20272_v7  ;;  %v20279_v7 = vld [vmem:[#allocation60_spill] sm:$0xff] }
 0x53b   : > { %12345 = vmatprep.mubr.f32.mxu0 %v3534_v20  ;;  %v2941_v48 = vsel %vm748_vm1, %v2905_v44, 0.0  ;;  %v20273_v20 = vld [vmem:[#allocation24_spill] sm:$0xff] }
 0x53c   : > { %12346 = vmatmul.mubr.f32.gmra.mrb[38].mxu0 %v3544_v43  ;;  %v2947_v25 = vsel %vm748_vm1, %v2907_v56, 0.0  ;;  %v2956_v61 = vsel %vm748_vm1, %v2910_v38, 0.0  ;;  %v20274_v43 = vld [vmem:[#allocation43_spill] sm:$0xff]  ;;  %v2953_v42 = vsel %vm748_vm1, %v2909_v29, 0.0  ;;  %v20276_v44 = vld [vmem:[#allocation20_spill] sm:$0xff] }
 0x53d   : > { %12364 = vmatprep.mubr.f32.mxu0 %v16125_v59  ;;  %2936 = vadd.xlane.f32.xlu1 %v2935_v2  ;;  %v20275_v2 = vld [vmem:[#allocation35_spill] sm:$0xff]  ;;  %v20278_v38 = vld [vmem:[#allocation36_spill] sm:$0xff] }
 0x53e   : > { %v2912_v46 = vmul.f32 %v16735_v52, %v20275_v2 }
 0x540   : > { %12365 = vmatmul.mubr.f32.vlgmr.msra.gmra.mrb[8].mxu0 %v16165_v50 }
 0x541   : > { %13735 = vmatpush3.bf16.xpose.msra.mxu0 %v16030_v57  ;;  %12367 = vmatprep.mubr.f32.mxu0 %v16210_v27  ;;  %v16786_v57 = vmul.f32 %v16735_v52, %v16553_v4  ;;  %v2950_v4 = vsel %vm748_vm1, %v2908_v62, 0.0  ;;  %v20277_v62 = vld [vmem:[#allocation42_spill] sm:$0xff] }
 0x542   : > { %13737 = vmatprep.subr.bf16.mxu0 %v16035_v60  ;;  %2945 = vadd.xlane.f32.xlu1 %v2944_v9  ;;  %v2920_v9 = vmul.f32 %v16735_v52, %v16432_v45  ;;  %v2919_v45 = vmul.f32 %v16735_v52, %v16475_v47 }
 0x544   : > { %12368 = vmatmul.mubr.f32.gmra.mrb[10].mxu0 %v16226_v55 }
 0x545   : > { %12370 = vmatprep.mubr.f32.mxu0 %v16281_v39 }
 0x546   : > { %2942 = vadd.xlane.f32.xlu1 %v2941_v48  ;;  %v2986_v48 = vsel %vm748_vm1, %v2920_v9, 0.0  ;;  %v20283_v9 = vld [vmem:[#allocation71_spill] sm:$0xff] }
 0x548   : > { %12371 = vmatmul.mubr.f32.gmra.mrb[12].mxu0 %v16270_v26 }
 0x549   : > { %13739 = vmatpush3.bf16.xpose.msra.mxu0 %v16035_v60  ;;  %12373 = vmatprep.mubr.f32.mxu0 %v16339_v5  ;;  %v20271_v60 = vld [vmem:[#allocation38_spill] sm:$0xff] }
 0x54a   : > { %13741 = vmatprep.subr.bf16.mxu0 %v16037_v15  ;;  %2951 = vadd.xlane.f32.xlu1 %v2950_v4  ;;  %v2911_v4 = vmul.f32 %v16735_v52, %v20277_v62  ;;  %v20284_v62 = vld [vmem:[#allocation61_spill] sm:$0xff] }
 0x54c   : > { %12374 = vmatmul.mubr.f32.gmra.mrb[14].mxu0 %v16313_v35  ;;  %v2959_v56 = vsel %vm748_vm1, %v2911_v4, 0.0  ;;  %v2921_v4 = vmul.f32 %v16735_v52, %v20284_v62  ;;  %v20291_v62 = vld [vmem:[#allocation31_spill] sm:$0xff] }
 0x54d   : > { %12376 = vmatprep.mubr.f32.mxu0 %v16361_v33 }
 0x54e   : > { %2948 = vadd.xlane.f32.xlu1 %v2947_v25  ;;  %v2983_v25 = vsel %vm748_vm1, %v2919_v45, 0.0  ;;  %v2989_v45 = vsel %vm748_vm1, %v2921_v4, 0.0 }
 0x550   : > { %12377 = vmatmul.mubr.f32.gmra.mrb[16].mxu0 %v20271_v60 }
 0x551   : > { %13743 = vmatpush3.bf16.xpose.msra.mxu0 %v16037_v15  ;;  %12379 = vmatprep.mubr.f32.mxu0 %v16385_v19  ;;  %v2962_v15 = vsel %vm748_vm1, %v2912_v46, 0.0  ;;  %v20282_v46 = vld [vmem:[#allocation45_spill] sm:$0xff] }
 0x552   : > { %13745 = vmatprep.subr.bf16.mxu0 %v20273_v20  ;;  %2957 = vadd.xlane.f32.xlu1 %v2956_v61  ;;  %v2914_v61 = vmul.f32 %v16735_v52, %v20278_v38 }
 0x554   : > { %12380 = vmatmul.mubr.f32.gmra.mrb[18].mxu0 %v20274_v43  ;;  %v2968_v29 = vsel %vm748_vm1, %v2914_v61, 0.0 }
 0x555   : > { %12382 = vmatprep.mubr.f32.mxu0 %v16403_v30 }
 0x556   : > { %2954 = vadd.xlane.f32.xlu1 %v2953_v42  ;;  %v20281_v42 = vld [vmem:[#allocation66_spill] sm:$0xff] }
 0x558   : > { %12383 = vmatmul.mubr.f32.gmra.mrb[20].mxu0 %v16370_v32 }
 0x559   : > { %13747 = vmatpush3.bf16.xpose.msra.mxu0 %v20273_v20  ;;  %12385 = vmatprep.mubr.f32.mxu0 %v16466_v21  ;;  %v20280_v20 = vld [vmem:[#allocation54_spill] sm:$0xff] }
 0x55a   : > { %13749 = vmatprep.subr.bf16.mxu0 %v20276_v44  ;;  %2963 = vadd.xlane.f32.xlu1 %v2962_v15  ;;  %v2922_v47 = vmul.f32 %v16735_v52, %v20280_v20  ;;  %v2913_v15 = vmul.f32 %v16735_v52, %v20282_v46  ;;  %v20289_v46 = vld [vmem:[#allocation48_spill] sm:$0xff] }
 0x55c   : > { %12386 = vmatmul.mubr.f32.gmra.mrb[22].mxu0 %v16429_v49  ;;  %v2992_v2 = vsel %vm748_vm1, %v2922_v47, 0.0  ;;  %v20288_v47 = vld [vmem:[#allocation29_spill] sm:$0xff] }
 0x55d   : > { %12388 = vmatprep.mubr.f32.mxu0 %v16489_v17 }
 0x55e   : > { %2987 = vadd.xlane.f32.xlu1 %v2986_v48  ;;  %v2965_v48 = vsel %vm748_vm1, %v2913_v15, 0.0  ;;  %v2915_v15 = vmul.f32 %v16735_v52, %v20289_v46  ;;  %v20297_v46 = vld [vmem:[#allocation44_spill] sm:$0xff] }
 0x560   : > { %12389 = vmatmul.mubr.f32.gmra.mrb[24].mxu0 %v16441_v28  ;;  %v2971_v4 = vsel %vm748_vm1, %v2915_v15, 0.0 }
 0x561   : > { %12391 = vmatprep.mubr.f32.mxu0 %v16521_v13 }
 0x562   : > { %2960 = vadd.xlane.f32.xlu1 %v2959_v56  ;;  %v20285_v56 = vld [vmem:[#allocation76_spill] sm:$0xff] }
 0x564   : > { %12392 = vmatmul.mubr.f32.gmra.mrb[26].mxu0 %v16477_v6 }
 0x565   : > { %12394 = vmatprep.mubr.f32.mxu0 %v16547_v37 }
 0x566   : > { %2984 = vadd.xlane.f32.xlu1 %v2983_v25  ;;  %v20286_v25 = vld [vmem:[#allocation40_spill] sm:$0xff] }
 0x567   : > { %v2916_v38 = vmul.f32 %v16735_v52, %v20286_v25  ;;  %v20293_v25 = vld [vmem:[#allocation32_spill] sm:$0xff] }
 0x568   : > { %12395 = vmatmul.mubr.f32.gmra.mrb[28].mxu0 %v20279_v7  ;;  %v20326_v7 = vld [vmem:[#allocation87_spill] sm:$0xff] }
 0x569   : > { %12397 = vmatprep.mubr.f32.mxu0 %v16575_v36  ;;  %v2974_v61 = vsel %vm748_vm1, %v2916_v38, 0.0  ;;  %v20294_v38 = vld [vmem:[#allocation34_spill] sm:$0xff]  ;;  %v3025_v36 = vsel %vm748_vm1, %v16798_v63, 0.0 }
 0x56a   : > { %2969 = vadd.xlane.f32.xlu1 %v2968_v29  ;;  %v20287_v29 = vld [vmem:[#allocation55_spill] sm:$0xff] }
 0x56b   : > { %v2924_v20 = vmul.f32 %v16735_v52, %v20287_v29  ;;  %v20295_v29 = vld [vmem:[#allocation52_spill] sm:$0xff] }
 0x56c   : > { %12398 = vmatmul.mubr.f32.gmra.mrb[30].mxu0 %v20281_v42 }
 0x56d   : > { %12400 = vmatprep.mubr.f32.mxu0 %v16601_v40  ;;  %v20321_v40 = vld [vmem:[#allocation73_spill] sm:$0xff] }
 0x56e   : > { %2993 = vadd.xlane.f32.xlu1 %v2992_v2  ;;  %v2998_v2 = vsel %vm748_vm1, %v2924_v20, 0.0  ;;  %v2918_v20 = vmul.f32 %v16735_v52, %v20295_v29  ;;  %v20302_v29 = vld [vmem:[#allocation56_spill] sm:$0xff] }
 0x56f   : > { %v2917_v58 = vmul.f32 %v16735_v52, %v20302_v29  ;;  %v20308_v29 = vld [vmem:[#allocation63_spill] sm:$0xff] }
 0x570   : > { %12401 = vmatmul.mubr.f32.gmra.mrb[32].mxu0 %v20283_v9  ;;  %v2980_v15 = vsel %vm748_vm1, %v2918_v20, 0.0  ;;  %v20304_v20 = vld [vmem:[#allocation50_spill] sm:$0xff]  ;;  %v3019_v9 = vsel %vm748_vm1, %v16790_v8, 0.0  ;;  %v2934_v8 = vmul.f32 %v16735_v52, %v20326_v7  ;;  %v20335_v7 = vand.u32 4294901760, %v20294_v38 }
 0x571   : > { %12403 = vmatprep.mubr.f32.mxu0 %v16622_v12 }
 0x572   : > { %2966 = vadd.xlane.f32.xlu1 %v2965_v48  ;;  %v20290_v48 = vld [vmem:[#allocation30_spill] sm:$0xff]  ;;  %v3028_v37 = vsel %vm748_vm1, %v2934_v8, 0.0 }
 0x573   : > { %v20331_v63 = vand.u32 4294901760, %v20290_v48 }
 0x574   : > { %12404 = vmatmul.mubr.f32.gmra.mrb[34].mxu0 %v20285_v56  ;;  %v20318_v56 = vld [vmem:[#allocation72_spill] sm:$0xff] }
 0x575   : > { %12406 = vmatprep.mubr.f32.mxu0 %v16643_v34  ;;  %v20316_v34 = vld [vmem:[#allocation67_spill] sm:$0xff] }
 0x576   : > { %2990 = vadd.xlane.f32.xlu1 %v2989_v45  ;;  %v20292_v45 = vld [vmem:[#allocation21_spill] sm:$0xff] }
 0x578   : > { %12407 = vmatmul.mubr.f32.gmra.mrb[36].mxu0 %v16610_v53  ;;  %v3001_v53 = vsel %vm748_vm1, %v16786_v57, 0.0  ;;  %v2932_v57 = vmul.f32 %v16735_v52, %v20321_v40  ;;  %v20327_v40 = vld [vmem:[#allocation79_spill] sm:$0xff] }
 0x579   : > { %12409 = vmatprep.mubr.f32.mxu0 %v16721_v51  ;;  %v20313_v51 = vld [vmem:[#allocation64_spill] sm:$0xff] }
 0x57a   : > { %2975 = vadd.xlane.f32.xlu1 %v2974_v61  ;;  %v2995_v61 = vsel %vm748_vm1, %v16767_v11, 0.0  ;;  %v20301_v11 = vld [vmem:[#allocation47_spill] sm:$0xff]  ;;  %v3022_v42 = vsel %vm748_vm1, %v2932_v57, 0.0 }
 0x57b   : > { %v20329_v57 = vld [vmem:[#allocation83_spill] sm:$0xff] }
 0x57c   : > { %12410 = vmatmul.mubr.f32.gmra.mrb[38].mxu0 %v16680_v18  ;;  %v20312_v18 = vld [vmem:[#allocation53_spill] sm:$0xff] }
 0x57d   : > { %12428 = vmatprep.mubr.f32.mxu0 %v20288_v47 }
 0x57e   : > { %2999 = vadd.xlane.f32.xlu1 %v2998_v2  ;;  %v20296_v2 = vld [vmem:[#allocation33_spill] sm:$0xff] }
 0x57f   : > { %v20336_v8 = vand.u32 4294901760, %v20296_v2 }
 0x580   : > { %12429 = vmatmul.mubr.f32.vlgmr.msra.gmra.mrb[8].mxu0 %v20290_v48  ;;  %v20338_v48 = vld [vmem:[#allocation27_spill] sm:$0xff] }
 0x581   : > { %13751 = vmatpush3.bf16.xpose.msra.mxu0 %v20276_v44  ;;  %12431 = vmatprep.mubr.f32.mxu0 %v20291_v62 }
 0x582   : > { %13753 = vmatprep.subr.bf16.mxu0 %v20292_v45  ;;  %2972 = vadd.xlane.f32.xlu1 %v2971_v4  ;;  %v20298_v4 = vld [vmem:[#allocation58_spill] sm:$0xff] }
 0x583   : > { %v2926_v10 = vmul.f32 %v16735_v52, %v20298_v4  ;;  %v2977_v4 = vsel %vm748_vm1, %v2917_v58, 0.0 }
 0x584   : > { %12432 = vmatmul.mubr.f32.gmra.mrb[10].mxu0 %v20293_v25 }
 0x585   : > { %12434 = vmatprep.mubr.f32.mxu0 %v20294_v38  ;;  %v20342_v38 = vand.u32 4294901760, %v20304_v20 }
 0x586   : > { %2996 = vadd.xlane.f32.xlu1 %v2995_v61  ;;  %v3004_v61 = vsel %vm748_vm1, %v2926_v10, 0.0  ;;  %v3007_v10 = vsel %vm748_vm1, %v16778_v16, 0.0  ;;  %v3013_v16 = vsel %vm748_vm1, %v16782_v41, 0.0  ;;  %v20319_v41 = vld [vmem:[#allocation65_spill] sm:$0xff] }
 0x588   : > { %12435 = vmatmul.mubr.f32.gmra.mrb[12].mxu0 %v20296_v2  ;;  %v20343_v2 = vld [vmem:[#allocation28_spill] sm:$0xff] }
 0x589   : > { %13755 = vmatpush3.bf16.xpose.msra.mxu0 %v20292_v45  ;;  %12437 = vmatprep.mubr.f32.mxu0 %v20297_v46 }
 0x58a   : > { %13757 = vmatprep.subr.bf16.mxu0 %v20299_v31  ;;  %2981 = vadd.xlane.f32.xlu1 %v2980_v15  ;;  %v20306_v15 = vld [vmem:[#allocation46_spill] sm:$0xff] }
 0x58c   : > { %12438 = vmatmul.mubr.f32.gmra.mrb[14].mxu0 %v20300_v1 }
 0x58d   : > { %12440 = vmatprep.mubr.f32.mxu0 %v20301_v11 }
 0x58e   : > { %3005 = vadd.xlane.f32.xlu1 %v3004_v61  ;;  %v2928_v61 = vmul.f32 %v16735_v52, %v20308_v29  ;;  %v20315_v29 = vld [vmem:[#allocation68_spill] sm:$0xff] }
 0x590   : > { %12441 = vmatmul.mubr.f32.gmra.mrb[16].mxu0 %v20303_v22  ;;  %v3010_v58 = vsel %vm748_vm1, %v2928_v61, 0.0  ;;  %v2930_v61 = vmul.f32 %v16735_v52, %v20316_v34  ;;  %v20322_v34 = vld [vmem:[#allocation69_spill] sm:$0xff]  ;;  %v20333_v52 = vld [vmem:[#allocation26_spill] sm:$0xff] }
 0x591   : > { %13759 = vmatpush3.bf16.xpose.msra.mxu0 %v20299_v31  ;;  %12443 = vmatprep.mubr.f32.mxu0 %v20304_v20  ;;  %v20349_v20 = vand.u32 4294901760, %v20313_v51 }
 0x592   : > { %13761 = vmatprep.subr.bf16.mxu0 %v20305_v14  ;;  %2978 = vadd.xlane.f32.xlu1 %v2977_v4  ;;  %v20311_v4 = vld [vmem:[#allocation25_spill] sm:$0xff]  ;;  %v3016_v12 = vsel %vm748_vm1, %v2930_v61, 0.0  ;;  %v20324_v61 = vld [vmem:[#allocation75_spill] sm:$0xff] }
 0x594   : > { %12444 = vmatmul.mubr.f32.gmra.mrb[18].mxu0 %v20306_v15 }
 0x595   : > { %12446 = vmatprep.mubr.f32.mxu0 %v20307_v23 }
 0x596   : > { %3008 = vadd.xlane.f32.xlu1 %v3007_v10  ;;  %v20314_v10 = vld [vmem:[#allocation57_spill] sm:$0xff] }
 0x598   : > { %12447 = vmatmul.mubr.f32.gmra.mrb[20].mxu0 %v20309_v0 }
 0x599   : > { %13763 = vmatpush3.bf16.xpose.msra.mxu0 %v20305_v14  ;;  %12449 = vmatprep.mubr.f32.mxu0 %v20310_v3 }
 0x59a   : > { %13765 = vmatprep.subr.bf16.mxu0 %v20311_v4  ;;  %3011 = vadd.xlane.f32.xlu1 %v3010_v58  ;;  %v20317_v58 = vld [vmem:[#allocation62_spill] sm:$0xff] }
 0x59c   : > { %12450 = vmatmul.mubr.f32.gmra.mrb[22].mxu0 %v20312_v18 }
 0x59d   : > { %12452 = vmatprep.mubr.f32.mxu0 %v20313_v51  ;;  %v20356_v51 = vand.u32 4294901760, %v20322_v34 }
 0x59e   : > { %3014 = vadd.xlane.f32.xlu1 %v3013_v16  ;;  %v20320_v16 = vld [vmem:[#allocation77_spill] sm:$0xff] }
 0x5a0   : > { %12453 = vmatmul.mubr.f32.gmra.mrb[24].mxu0 %v20314_v10 }
 0x5a1   : > { %12455 = vmatprep.mubr.f32.mxu0 %v20315_v29 }
 0x5a2   : > { %3002 = vadd.xlane.f32.xlu1 %v3001_v53  ;;  %v20323_v53 = vld [vmem:[#allocation81_spill] sm:$0xff] }
 0x5a4   : > { %12456 = vmatmul.mubr.f32.gmra.mrb[26].mxu0 %v20317_v58 }
 0x5a5   : > { %12458 = vmatprep.mubr.f32.mxu0 %v20318_v56 }
 0x5a6   : > { %3017 = vadd.xlane.f32.xlu1 %v3016_v12  ;;  %v20325_v12 = vld [vmem:[#allocation84_spill] sm:$0xff] }
 0x5a8   : > { %12459 = vmatmul.mubr.f32.gmra.mrb[28].mxu0 %v20319_v41 }
 0x5a9   : > { %12461 = vmatprep.mubr.f32.mxu0 %v20320_v16 }
 0x5aa   : > { %3020 = vadd.xlane.f32.xlu1 %v3019_v9  ;;  %v20328_v9 = vld [vmem:[#allocation86_spill] sm:$0xff] }
 0x5ac   : > { %12462 = vmatmul.mubr.f32.gmra.mrb[30].mxu0 %v20322_v34  ;;  %v20363_v34 = vand.u32 4294901760, %v16731_v54 }
 0x5ad   : > { %12464 = vmatprep.mubr.f32.mxu0 %v20323_v53 }
 0x5ae   : > { %3023 = vadd.xlane.f32.xlu1 %v3022_v42  ;;  %v20330_v42 = vand.u32 4294901760, %v20288_v47  ;;  %v20337_v47 = vand.u32 4294901760, %v20297_v46  ;;  %v20344_v46 = vand.u32 4294901760, %v20306_v15  ;;  %v20350_v15 = vand.u32 4294901760, %v20314_v10 }
 0x5af   : > { %v20357_v10 = vand.u32 4294901760, %v20323_v53  ;;  %v20364_v53 = vand.u32 4294901760, %v16699_v24 }
 0x5b0   : > { %12465 = vmatmul.mubr.f32.gmra.mrb[32].mxu0 %v20324_v61 }
 0x5b1   : > { %12467 = vmatprep.mubr.f32.mxu0 %v20325_v12 }
 0x5b2   : > { %3026 = vadd.xlane.f32.xlu1 %v3025_v36  ;;  %v20332_v36 = vand.u32 4294901760, %v20291_v62  ;;  %v20339_v62 = vand.u32 4294901760, %v20300_v1  ;;  %v20346_v1 = vand.u32 4294901760, %v20309_v0  ;;  %v20352_v0 = vand.u32 4294901760, %v20317_v58 }
 0x5b3   : > { %v20359_v58 = vand.u32 4294901760, %v20325_v12  ;;  %v20372_v12 = vld [vmem:[#allocation76_spill] sm:$0xff] }
 0x5b4   : > { %12468 = vmatmul.mubr.f32.gmra.mrb[34].mxu0 %v20327_v40 }
 0x5b5   : > { %12470 = vmatprep.mubr.f32.mxu0 %v20328_v9 }
 0x5b6   : > { %3029 = vadd.xlane.f32.xlu1 %v3028_v37  ;;  %v20334_v37 = vand.u32 4294901760, %v20293_v25  ;;  %v20341_v25 = vand.u32 4294901760, %v20303_v22  ;;  %v20347_v22 = vand.u32 4294901760, %v20310_v3  ;;  %v20353_v3 = vand.u32 4294901760, %v20318_v56 }
 0x5b7   : > { %v20360_v56 = vand.u32 4294901760, %v20327_v40  ;;  %v20373_v40 = vld [vmem:[#allocation85_spill] sm:$0xff] }
 0x5b8   : > { %12471 = vmatmul.mubr.f32.gmra.mrb[36].mxu0 %v20329_v57 }
 0x5b9   : > { %12473 = vmatprep.mubr.f32.mxu0 %v16731_v54  ;;  %v20366_v54 = vld [vmem:[#allocation60_spill] sm:$0xff] }
 0x5bc   : > { %12474 = vmatmul.mubr.f32.gmra.mrb[38].mxu0 %v16699_v24  ;;  %v20365_v24 = vld [vmem:[#allocation70_spill] sm:$0xff] }
 0x5bd   : > { %12492 = vmatprep.mubr.f32.mxu0 %v20330_v42  ;;  %v20345_v42 = vand.u32 4294901760, %v20307_v23  ;;  %v20351_v23 = vand.u32 4294901760, %v20315_v29  ;;  %v20358_v29 = vand.u32 4294901760, %v20324_v61  ;;  %v20371_v61 = vld [vmem:[#allocation82_spill] sm:$0xff] }
 0x5c0   : > { %12493 = vmatmul.mubr.f32.vlgmr.msra.gmra.mrb[8].mxu0 %v20331_v63  ;;  %v20354_v63 = vand.u32 4294901760, %v20319_v41  ;;  %v20361_v41 = vand.u32 4294901760, %v20328_v9  ;;  %v20374_v9 = vld [vmem:[#allocation80_spill] sm:$0xff] }
 0x5c1   : > { %13767 = vmatpush3.bf16.xpose.msra.mxu0 %v20311_v4  ;;  %12495 = vmatprep.mubr.f32.mxu0 %v20332_v36  ;;  %v20340_v4 = vand.u32 4294901760, %v20301_v11  ;;  %v20348_v11 = vand.u32 4294901760, %v20312_v18  ;;  %v20355_v18 = vand.u32 4294901760, %v20320_v16  ;;  %v20362_v16 = vand.u32 4294901760, %v20329_v57  ;;  %v20375_v57 = vld [vmem:[#allocation99_spill] sm:$0xff]  ;;  %v20376_v36 = vld [vmem:[#allocation94_spill] sm:$0xff] }
 0x5c2   : > { %13769 = vmatprep.subr.bf16.mxu0 %v20333_v52 }
 0x5c4   : > { %12496 = vmatmul.mubr.f32.gmra.mrb[10].mxu0 %v20334_v37 }
 0x5c5   : > { %12498 = vmatprep.mubr.f32.mxu0 %v20335_v7 }
 0x5c8   : > { %12499 = vmatmul.mubr.f32.gmra.mrb[12].mxu0 %v20336_v8 }
 0x5c9   : > { %13771 = vmatpush3.bf16.xpose.msra.mxu0 %v20333_v52  ;;  %12501 = vmatprep.mubr.f32.mxu0 %v20337_v47 }
 0x5ca   : > { %13773 = vmatprep.subr.bf16.mxu0 %v20338_v48 }
 0x5cc   : > { %12502 = vmatmul.mubr.f32.gmra.mrb[14].mxu0 %v20339_v62 }
 0x5cd   : > { %12504 = vmatprep.mubr.f32.mxu0 %v20340_v4 }
 0x5d0   : > { %12505 = vmatmul.mubr.f32.gmra.mrb[16].mxu0 %v20341_v25 }
 0x5d1   : > { %13775 = vmatpush3.bf16.xpose.msra.mxu0 %v20338_v48  ;;  %12507 = vmatprep.mubr.f32.mxu0 %v20342_v38 }
 0x5d2   : > { %13777 = vmatprep.subr.bf16.mxu0 %v20343_v2 }
 0x5d4   : > { %12508 = vmatmul.mubr.f32.gmra.mrb[18].mxu0 %v20344_v46 }
 0x5d5   : > { %12510 = vmatprep.mubr.f32.mxu0 %v20345_v42 }
 0x5d8   : > { %12511 = vmatmul.mubr.f32.gmra.mrb[20].mxu0 %v20346_v1 }
 0x5d9   : > { %13779 = vmatpush3.bf16.xpose.msra.mxu0 %v20343_v2  ;;  %12513 = vmatprep.mubr.f32.mxu0 %v20347_v22 }
 0x5da   : > { %13781 = vmatprep.subr.bf16.mxu0 %v20276_v44 }
 0x5dc   : > { %12514 = vmatmul.mubr.f32.gmra.mrb[22].mxu0 %v20348_v11 }
 0x5dd   : > { %12516 = vmatprep.mubr.f32.mxu0 %v20349_v20 }
 0x5e0   : > { %12517 = vmatmul.mubr.f32.gmra.mrb[24].mxu0 %v20350_v15 }
 0x5e1   : > { %12519 = vmatprep.mubr.f32.mxu0 %v20351_v23 }
 0x5e4   : > { %12520 = vmatmul.mubr.f32.gmra.mrb[26].mxu0 %v20352_v0 }
 0x5e5   : > { %12522 = vmatprep.mubr.f32.mxu0 %v20353_v3 }
 0x5e8   : > { %12523 = vmatmul.mubr.f32.gmra.mrb[28].mxu0 %v20354_v63 }
 0x5e9   : > { %12525 = vmatprep.mubr.f32.mxu0 %v20355_v18 }
 0x5ec   : > { %12526 = vmatmul.mubr.f32.gmra.mrb[30].mxu0 %v20356_v51 }
 0x5ed   : > { %12528 = vmatprep.mubr.f32.mxu0 %v20357_v10 }
 0x5f0   : > { %12529 = vmatmul.mubr.f32.gmra.mrb[32].mxu0 %v20358_v29 }
 0x5f1   : > { %12531 = vmatprep.mubr.f32.mxu0 %v20359_v58 }
 0x5f4   : > { %12532 = vmatmul.mubr.f32.gmra.mrb[34].mxu0 %v20360_v56 }
 0x5f5   : > { %12534 = vmatprep.mubr.f32.mxu0 %v20361_v41 }
 0x5f8   : > { %12535 = vmatmul.mubr.f32.gmra.mrb[36].mxu0 %v20362_v16 }
 0x5f9   : > { %12537 = vmatprep.mubr.f32.mxu0 %v20363_v34  ;;  %v17192_v34 = vpop.xlane.xlu1 %2939 }
 0x5fa   : > { %20377 = vst [vmem:[#allocation38_spill] sm:$0xff] %v17192_v34 }
 0x5fc   : > { %12538 = vmatmul.mubr.f32.gmra.mrb[38].mxu0 %v20364_v53 }
 0x5fd   : > { %12556 = vmatprep.mubr.f32.mxu0 %v16125_v59 }
 0x600   : > { %12557 = vmatmul.mubr.f32.vlgmr.msra.gmra.mrb[8].mxu0 %v16165_v50 }
 0x601   : > { %13783 = vmatpush3.bf16.xpose.msra.mxu0 %v20276_v44  ;;  %12559 = vmatprep.mubr.f32.mxu0 %v16210_v27  ;;  %v20368_v44 = vld [vmem:[#allocation66_spill] sm:$0xff] }
 0x602   : > { %13785 = vmatprep.subr.bf16.mxu0 %v20292_v45 }
 0x604   : > { %12560 = vmatmul.mubr.f32.gmra.mrb[10].mxu0 %v16226_v55 }
 0x605   : > { %12562 = vmatprep.mubr.f32.mxu0 %v16281_v39 }
 0x608   : > { %12563 = vmatmul.mubr.f32.gmra.mrb[12].mxu0 %v16270_v26 }
 0x609   : > { %13787 = vmatpush3.bf16.xpose.msra.mxu0 %v20292_v45  ;;  %12565 = vmatprep.mubr.f32.mxu0 %v16339_v5  ;;  %v20370_v45 = vld [vmem:[#allocation71_spill] sm:$0xff] }
 0x60a   : > { %13789 = vmatprep.subr.bf16.mxu0 %v20299_v31 }
 0x60c   : > { %12566 = vmatmul.mubr.f32.gmra.mrb[14].mxu0 %v16313_v35 }
 0x60d   : > { %12568 = vmatprep.mubr.f32.mxu0 %v16361_v33 }
 0x610   : > { %12569 = vmatmul.mubr.f32.gmra.mrb[16].mxu0 %v20271_v60 }
 0x611   : > { %13791 = vmatpush3.bf16.xpose.msra.mxu0 %v20299_v31  ;;  %12571 = vmatprep.mubr.f32.mxu0 %v16385_v19  ;;  %v20367_v31 = vld [vmem:[#allocation74_spill] sm:$0xff] }
 0x612   : > { %13793 = vmatprep.subr.bf16.mxu0 %v20305_v14 }
 0x614   : > { %12572 = vmatmul.mubr.f32.gmra.mrb[18].mxu0 %v20274_v43 }
 0x615   : > { %12574 = vmatprep.mubr.f32.mxu0 %v16403_v30 }
 0x618   : > { %12575 = vmatmul.mubr.f32.gmra.mrb[20].mxu0 %v16370_v32 }
 0x619   : > { %13795 = vmatpush3.bf16.xpose.msra.mxu0 %v20305_v14  ;;  %12577 = vmatprep.mubr.f32.mxu0 %v16466_v21  ;;  %v20369_v14 = vld [vmem:[#allocation78_spill] sm:$0xff] }
 0x61c   : > { %12578 = vmatmul.mubr.f32.gmra.mrb[22].mxu0 %v16429_v49 }
 0x61d   : > { %12580 = vmatprep.mubr.f32.mxu0 %v16489_v17 }
 0x620   : > { %12581 = vmatmul.mubr.f32.gmra.mrb[24].mxu0 %v16441_v28 }
 0x621   : > { %12583 = vmatprep.mubr.f32.mxu0 %v16521_v13 }
 0x624   : > { %12584 = vmatmul.mubr.f32.gmra.mrb[26].mxu0 %v16477_v6 }
 0x625   : > { %12586 = vmatprep.mubr.f32.mxu0 %v20365_v24 }
 0x628   : > { %12587 = vmatmul.mubr.f32.gmra.mrb[28].mxu0 %v20366_v54 }
 0x629   : > { %12589 = vmatprep.mubr.f32.mxu0 %v20367_v31 }
 0x62c   : > { %12590 = vmatmul.mubr.f32.gmra.mrb[30].mxu0 %v20368_v44 }
 0x62d   : > { %12592 = vmatprep.mubr.f32.mxu0 %v20369_v14 }
 0x630   : > { %12593 = vmatmul.mubr.f32.gmra.mrb[32].mxu0 %v20370_v45 }
 0x631   : > { %12595 = vmatprep.mubr.f32.mxu0 %v20371_v61 }
 0x634   : > { %12596 = vmatmul.mubr.f32.gmra.mrb[34].mxu0 %v20372_v12 }
 0x635   : > { %12598 = vmatprep.mubr.f32.mxu0 %v20373_v40 }
 0x638   : > { %12599 = vmatmul.mubr.f32.gmra.mrb[36].mxu0 %v20374_v9 }
 0x639   : > { %12601 = vmatprep.mubr.f32.mxu0 %v20375_v57 }
 0x63c   : > { %12602 = vmatmul.mubr.f32.gmra.mrb[38].mxu0 %v20376_v36 }
 0x63d   : > { %12620 = vmatprep.mubr.f32.mxu0 %v16125_v59 }
 0x640   : > { %12621 = vmatmul.mubr.f32.vlgmr.msra.gmra.mrb[8].mxu0 %v16165_v50 }
 0x641   : > { %12623 = vmatprep.mubr.f32.mxu0 %v16210_v27 }
 0x644   : > { %12624 = vmatmul.mubr.f32.gmra.mrb[10].mxu0 %v16226_v55 }
 0x645   : > { %12626 = vmatprep.mubr.f32.mxu0 %v16281_v39 }
 0x648   : > { %12627 = vmatmul.mubr.f32.gmra.mrb[12].mxu0 %v16270_v26 }
 0x649   : > { %12629 = vmatprep.mubr.f32.mxu0 %v16339_v5 }
 0x64c   : > { %12630 = vmatmul.mubr.f32.gmra.mrb[14].mxu0 %v16313_v35 }
 0x64d   : > { %12632 = vmatprep.mubr.f32.mxu0 %v16361_v33 }
 0x650   : > { %12633 = vmatmul.mubr.f32.gmra.mrb[16].mxu0 %v20271_v60 }
 0x651   : > { %12635 = vmatprep.mubr.f32.mxu0 %v16385_v19 }
 0x654   : > { %12636 = vmatmul.mubr.f32.gmra.mrb[18].mxu0 %v20274_v43 }
 0x655   : > { %12638 = vmatprep.mubr.f32.mxu0 %v16403_v30 }
 0x658   : > { %12639 = vmatmul.mubr.f32.gmra.mrb[20].mxu0 %v16370_v32 }
 0x659   : > { %12641 = vmatprep.mubr.f32.mxu0 %v16466_v21 }
 0x65c   : > { %12642 = vmatmul.mubr.f32.gmra.mrb[22].mxu0 %v16429_v49 }
 0x65d   : > { %12644 = vmatprep.mubr.f32.mxu0 %v16489_v17 }
 0x660   : > { %12645 = vmatmul.mubr.f32.gmra.mrb[24].mxu0 %v16441_v28 }
 0x661   : > { %12647 = vmatprep.mubr.f32.mxu0 %v16521_v13 }
 0x664   : > { %12648 = vmatmul.mubr.f32.gmra.mrb[26].mxu0 %v16477_v6 }
 0x665   : > { %12650 = vmatprep.mubr.f32.mxu0 %v20365_v24  ;;  %v17196_v24 = vpop.xlane.xlu1 %2936 }
 0x666   : > { %20378 = vst [vmem:[#allocation39_spill] sm:$0xff] %v17196_v24 }
 0x668   : > { %12651 = vmatmul.mubr.f32.gmra.mrb[28].mxu0 %v20366_v54 }
 0x669   : > { %12653 = vmatprep.mubr.f32.mxu0 %v20367_v31 }
 0x66c   : > { %12654 = vmatmul.mubr.f32.gmra.mrb[30].mxu0 %v20368_v44  ;;  %v17202_v44 = vpop.xlane.xlu1 %2945 }
 0x66d   : > { %12656 = vmatprep.mubr.f32.mxu0 %v20369_v14  ;;  %20379 = vst [vmem:[#allocation24_spill] sm:$0xff] %v17202_v44 }
 0x670   : > { %12657 = vmatmul.mubr.f32.gmra.mrb[32].mxu0 %v20370_v45  ;;  %v17206_v45 = vpop.xlane.xlu1 %2942 }
 0x671   : > { %12659 = vmatprep.mubr.f32.mxu0 %v20371_v61  ;;  %20380 = vst [vmem:[#allocation43_spill] sm:$0xff] %v17206_v45 }
 0x674   : > { %12660 = vmatmul.mubr.f32.gmra.mrb[34].mxu0 %v20372_v12 }
 0x675   : > { %12662 = vmatprep.mubr.f32.mxu0 %v20373_v40  ;;  %v17212_v40 = vpop.xlane.xlu1 %2951 }
 0x676   : > { %20381 = vst [vmem:[#allocation35_spill] sm:$0xff] %v17212_v40 }
 0x678   : > { %12663 = vmatmul.mubr.f32.gmra.mrb[36].mxu0 %v20374_v9 }
 0x679   : > { %12665 = vmatprep.mubr.f32.mxu0 %v20375_v57  ;;  %v17216_v57 = vpop.xlane.xlu1 %2948 }
 0x67a   : > { %20382 = vst [vmem:[#allocation20_spill] sm:$0xff] %v17216_v57 }
 0x67c   : > { %12666 = vmatmul.mubr.f32.gmra.mrb[38].mxu0 %v20376_v36 }
 0x713   : > { %v17092_v33 = vpop.f32.mrb[8].mxu0 }
 0x714   : > { %v17094_v59 = vpop.f32.mrb[9].mxu0  ;;  %v5031_v50 = vsel %vm5027_vm3, %v17092_v33, -inf }
 0x715   : > { %5032 = vmax.xlane.f32.xlu0 %v5031_v50  ;;  %v5028_v26 = vsel %vm5027_vm3, %v17094_v59, -inf }
 0x717   : > { %v17098_v27 = vpop.f32.mrb[10].mxu0 }
 0x718   : > { %v17100_v55 = vpop.f32.mrb[11].mxu0  ;;  %v5037_v19 = vsel %vm5027_vm3, %v17098_v27, -inf }
 0x719   : > { %5029 = vmax.xlane.f32.xlu0 %v5028_v26  ;;  %v5034_v49 = vsel %vm5027_vm3, %v17100_v55, -inf  ;;  %v17222_v26 = vpop.xlane.xlu1 %2957 }
 0x71a   : > { %20383 = vst [vmem:[#allocation42_spill] sm:$0xff] %v17222_v26 }
 0x71b   : > { %v17104_v39 = vpop.f32.mrb[12].mxu0 }
 0x71c   : > { %v17106_v35 = vpop.f32.mrb[13].mxu0  ;;  %v5043_v21 = vsel %vm5027_vm3, %v17104_v39, -inf }
 0x71d   : > { %5038 = vmax.xlane.f32.xlu0 %v5037_v19  ;;  %v5040_v17 = vsel %vm5027_vm3, %v17106_v35, -inf }
 0x71f   : > { %v17110_v5 = vpop.f32.mrb[14].mxu0 }
 0x720   : > { %v17112_v32 = vpop.f32.mrb[15].mxu0  ;;  %v5049_v52 = vsel %vm5027_vm3, %v17110_v5, -inf }
 0x721   : > { %5035 = vmax.xlane.f32.xlu0 %v5034_v49  ;;  %v5046_v8 = vsel %vm5027_vm3, %v17112_v32, -inf  ;;  %v17226_v49 = vpop.xlane.xlu1 %2954 }
 0x722   : > { %20384 = vst [vmem:[#allocation36_spill] sm:$0xff] %v17226_v49 }
 0x723   : > { %v17116_v30 = vpop.f32.mrb[16].mxu0 }
 0x724   : > { %v17118_v28 = vpop.f32.mrb[17].mxu0  ;;  %v5055_v62 = vsel %vm5027_vm3, %v17116_v30, -inf }
 0x725   : > { %5044 = vmax.xlane.f32.xlu0 %v5043_v21  ;;  %v5052_v38 = vsel %vm5027_vm3, %v17118_v28, -inf }
 0x727   : > { %v17122_v6 = vpop.f32.mrb[18].mxu0 }
 0x728   : > { %v17124_v13 = vpop.f32.mrb[19].mxu0  ;;  %v5061_v42 = vsel %vm5027_vm3, %v17122_v6, -inf }
 0x729   : > { %5041 = vmax.xlane.f32.xlu0 %v5040_v17  ;;  %v5058_v11 = vsel %vm5027_vm3, %v17124_v13, -inf }
 0x72b   : > { %v17128_v60 = vpop.f32.mrb[20].mxu0 }
 0x72c   : > { %v17130_v43 = vpop.f32.mrb[21].mxu0  ;;  %v5067_v23 = vsel %vm5027_vm3, %v17128_v60, -inf }
 0x72d   : > { %5050 = vmax.xlane.f32.xlu0 %v5049_v52  ;;  %v5064_v63 = vsel %vm5027_vm3, %v17130_v43, -inf  ;;  %v17232_v52 = vpop.xlane.xlu1 %2963 }
 0x72e   : > { %20385 = vst [vmem:[#allocation54_spill] sm:$0xff] %v17232_v52 }
 0x72f   : > { %v17134_v37 = vpop.f32.mrb[22].mxu0 }
 0x730   : > { %v17136_v7 = vpop.f32.mrb[23].mxu0  ;;  %v5073_v10 = vsel %vm5027_vm3, %v17134_v37, -inf }
 0x731   : > { %5047 = vmax.xlane.f32.xlu0 %v5046_v8  ;;  %v5070_v56 = vsel %vm5027_vm3, %v17136_v7, -inf }
 0x733   : > { %v17140_v47 = vpop.f32.mrb[24].mxu0 }
 0x734   : > { %v17142_v48 = vpop.f32.mrb[25].mxu0  ;;  %v5079_v41 = vsel %vm5027_vm3, %v17140_v47, -inf }
 0x735   : > { %5056 = vmax.xlane.f32.xlu0 %v5055_v62  ;;  %v5076_v16 = vsel %vm5027_vm3, %v17142_v48, -inf  ;;  %v17236_v62 = vpop.xlane.xlu1 %2987 }
 0x736   : > { %20386 = vst [vmem:[#allocation45_spill] sm:$0xff] %v17236_v62 }
 0x737   : > { %v17146_v4 = vpop.f32.mrb[26].mxu0 }
 0x738   : > { %v17148_v25 = vpop.f32.mrb[27].mxu0  ;;  %v5085_v53 = vsel %vm5027_vm3, %v17146_v4, -inf }
 0x739   : > { %5053 = vmax.xlane.f32.xlu0 %v5052_v38  ;;  %v5082_v54 = vsel %vm5027_vm3, %v17148_v25, -inf }
 0x73b   : > { %v17152_v2 = vpop.f32.mrb[28].mxu0 }
 0x73c   : > { %v17154_v46 = vpop.f32.mrb[29].mxu0  ;;  %v5091_v31 = vsel %vm5027_vm3, %v17152_v2, -inf }
 0x73d   : > { %5062 = vmax.xlane.f32.xlu0 %v5061_v42  ;;  %v5088_v14 = vsel %vm5027_vm3, %v17154_v46, -inf  ;;  %v17240_v42 = vpop.xlane.xlu1 %2960 }
 0x73e   : > { %20387 = vst [vmem:[#allocation61_spill] sm:$0xff] %v17240_v42 }
 0x73f   : > { %v17158_v1 = vpop.f32.mrb[30].mxu0 }
 0x740   : > { %v17160_v22 = vpop.f32.mrb[31].mxu0  ;;  %v5097_v61 = vsel %vm5027_vm3, %v17158_v1, -inf }
 0x741   : > { %5059 = vmax.xlane.f32.xlu0 %v5058_v11  ;;  %v5094_v12 = vsel %vm5027_vm3, %v17160_v22, -inf  ;;  %v17242_v11 = vpop.xlane.xlu1 %2984 }
 0x742   : > { %20388 = vst [vmem:[#allocation40_spill] sm:$0xff] %v17242_v11 }
 0x743   : > { %v17164_v20 = vpop.f32.mrb[32].mxu0 }
 0x744   : > { %v17166_v15 = vpop.f32.mrb[33].mxu0  ;;  %v5103_v9 = vsel %vm5027_vm3, %v17164_v20, -inf }
 0x745   : > { %5068 = vmax.xlane.f32.xlu0 %v5067_v23  ;;  %v5100_v36 = vsel %vm5027_vm3, %v17166_v15, -inf  ;;  %v17244_v23 = vpop.xlane.xlu1 %2969 }
 0x746   : > { %20389 = vst [vmem:[#allocation55_spill] sm:$0xff] %v17244_v23 }
 0x747   : > { %v17170_v0 = vpop.f32.mrb[34].mxu0 }
 0x748   : > { %v17172_v3 = vpop.f32.mrb[35].mxu0  ;;  %v5109_v50 = vsel %vm5027_vm3, %v17170_v0, -inf }
 0x749   : > { %5065 = vmax.xlane.f32.xlu0 %v5064_v63  ;;  %v5106_v19 = vsel %vm5027_vm3, %v17172_v3, -inf }
 0x74b   : > { %v17176_v18 = vpop.f32.mrb[36].mxu0 }
 0x74c   : > { %v17178_v51 = vpop.f32.mrb[37].mxu0  ;;  %v5115_v21 = vsel %vm5027_vm3, %v17176_v18, -inf }
 0x74d   : > { %5074 = vmax.xlane.f32.xlu0 %v5073_v10  ;;  %v5112_v17 = vsel %vm5027_vm3, %v17178_v51, -inf }
 0x74f   : > { %v17182_v29 = vpop.f32.mrb[38].mxu0 }
 0x750   : > { %v17184_v58 = vpop.f32.mrb[39].mxu0  ;;  %v5121_v38 = vsel %vm5027_vm3, %v17182_v29, -inf }
 0x751   : > { %5071 = vmax.xlane.f32.xlu0 %v5070_v56  ;;  %v5118_v8 = vsel %vm5027_vm3, %v17184_v58, -inf }
 0x755   : > { %5080 = vmax.xlane.f32.xlu0 %v5079_v41 }
 0x759   : > { %5077 = vmax.xlane.f32.xlu0 %v5076_v16 }
 0x75d   : > { %5086 = vmax.xlane.f32.xlu0 %v5085_v53 }
 0x761   : > { %5083 = vmax.xlane.f32.xlu0 %v5082_v54  ;;  %v17254_v54 = vpop.xlane.xlu1 %2993 }
 0x762   : > { %20392 = vst [vmem:[#allocation30_spill] sm:$0xff] %v17254_v54 }
 0x765   : > { %5092 = vmax.xlane.f32.xlu0 %v5091_v31 }
 0x769   : > { %5089 = vmax.xlane.f32.xlu0 %v5088_v14 }
 0x76d   : > { %5098 = vmax.xlane.f32.xlu0 %v5097_v61 }
 0x771   : > { %5095 = vmax.xlane.f32.xlu0 %v5094_v12 }
 0x775   : > { %5104 = vmax.xlane.f32.xlu0 %v5103_v9 }
 0x779   : > { %5101 = vmax.xlane.f32.xlu0 %v5100_v36 }
 0x77d   : > { %5110 = vmax.xlane.f32.xlu0 %v5109_v50 }
 0x781   : > { %5107 = vmax.xlane.f32.xlu0 %v5106_v19 }
 0x785   : > { %5116 = vmax.xlane.f32.xlu0 %v5115_v21 }
 0x789   : > { %5113 = vmax.xlane.f32.xlu0 %v5112_v17  ;;  %v20396_v17 = vld [vmem:[#allocation88_spill] sm:$0xff] }
 0x78d   : > { %5119 = vmax.xlane.f32.xlu0 %v5118_v8  ;;  %v20397_v8 = vand.u32 4294901760, %v20396_v17 }
 0x791   : > { %5122 = vmax.xlane.f32.xlu0 %v5121_v38  ;;  %v17273_v38 = vsub.f32 %v20396_v17, %v20397_v8  ;;  %v20405_v8 = vld [vmem:[#allocation92_spill] sm:$0xff] }
 0x793   : > { %20398 = vst [vmem:[#allocation34_spill] sm:$0xff] %v17273_v38 }
 0x7a2   : > { %v5033_v63 = vpop.xlane.xlu0 %5032 }
 0x7a3   : > { %v17247_v10 = vmax.f32 %v17192_v34, %v5033_v63 }
 0x7a5   : > { %20390 = vst [vmem:[#allocation29_spill] sm:$0xff] %v17247_v10  ;;  %v5253_v56 = vsub.f32 %v17092_v33, %v17247_v10  ;;  %v17263_v33 = vpop.xlane.xlu1 %2966 }
 0x7a6   : > { %v5030_v41 = vpop.xlane.xlu0 %5029  ;;  %20394 = vst [vmem:[#allocation21_spill] sm:$0xff] %v17263_v33 }
 0x7a7   : > { %v5286_v16 = vmul.f32 1.442695, %v5253_v56  ;;  %v17252_v53 = vmax.f32 %v17196_v24, %v5030_v41 }
 0x7a9   : > { %20391 = vst [vmem:[#allocation48_spill] sm:$0xff] %v17252_v53  ;;  %v5252_v31 = vsub.f32 %v17094_v59, %v17252_v53  ;;  %14932 = vpow2.f32 %v5286_v16  ;;  %v17280_v41 = vpop.xlane.xlu1 %2990  ;;  %v20401_v16 = vld [vmem:[#allocation93_spill] sm:$0xff] }
 0x7aa   : > { %v5039_v14 = vpop.xlane.xlu0 %5038  ;;  %20400 = vst [vmem:[#allocation33_spill] sm:$0xff] %v17280_v41 }
 0x7ab   : > { %v5284_v61 = vmul.f32 1.442695, %v5252_v31  ;;  %v17259_v12 = vmax.f32 %v17202_v44, %v5039_v14  ;;  %v20402_v31 = vand.u32 4294901760, %v20401_v16 }
 0x7ad   : > { %20393 = vst [vmem:[#allocation31_spill] sm:$0xff] %v17259_v12  ;;  %v5255_v9 = vsub.f32 %v17098_v27, %v17259_v12  ;;  %14934 = vpow2.f32 %v5284_v61  ;;  %v17285_v14 = vsub.f32 %v20401_v16, %v20402_v31  ;;  %v20406_v16 = vand.u32 4294901760, %v20405_v8 }
 0x7ae   : > { %v5036_v36 = vpop.xlane.xlu0 %5035 }
 0x7af   : > { %v5290_v50 = vmul.f32 1.442695, %v5255_v9  ;;  %v17266_v19 = vmax.f32 %v17206_v45, %v5036_v36  ;;  %20403 = vst [vmem:[#allocation44_spill] sm:$0xff] %v17285_v14  ;;  %v17302_v31 = vsub.f32 %v20405_v8, %v20406_v16 }
 0x7b1   : > { %20395 = vst [vmem:[#allocation32_spill] sm:$0xff] %v17266_v19  ;;  %v5254_v59 = vsub.f32 %v17100_v55, %v17266_v19  ;;  %14936 = vpow2.f32 %v5290_v50  ;;  %20407 = vst [vmem:[#allocation22_spill] sm:$0xff] %v17302_v31 }
 0x7b2   : > { %v5045_v21 = vpop.xlane.xlu0 %5044 }
 0x7b3   : > { %v5288_v63 = vmul.f32 1.442695, %v5254_v59  ;;  %v17276_v27 = vmax.f32 %v17212_v40, %v5045_v21  ;;  %v17278_v56 = vpop.eup %14932  ;;  %v20408_v40 = vld [vmem:[#allocation96_spill] sm:$0xff] }
 0x7b4   : > { %v5544_v55 = vsel %vm5027_vm3, %v17278_v56, 0  ;;  %v20409_v44 = vand.u32 4294901760, %v20408_v40 }
 0x7b5   : > { %20399 = vst [vmem:[#allocation52_spill] sm:$0xff] %v17276_v27  ;;  %v5257_v61 = vsub.f32 %v17104_v39, %v17276_v27  ;;  %v17291_v9 = vand.u32 4294901760, %v5544_v55  ;;  %14938 = vpow2.f32 %v5288_v63  ;;  %v17317_v27 = vpop.xlane.xlu1 %2975 }
 0x7b6   : > { %v5042_v36 = vpop.xlane.xlu0 %5041  ;;  %v17307_v39 = vsub.f32 %v20408_v40, %v20409_v44  ;;  %20412 = vst [vmem:[#allocation56_spill] sm:$0xff] %v17317_v27 }
 0x7b7   : > { %v5294_v59 = vmul.f32 1.442695, %v5257_v61  ;;  %v17295_v21 = vmax.f32 %v17216_v57, %v5042_v36  ;;  %v17297_v17 = vpop.eup %14934  ;;  %v17310_v63 = vsub.f32 %v5544_v55, %v17291_v9  ;;  %v20414_v55 = vand.u32 4294901760, %v17273_v38  ;;  %v20416_v57 = vld [vmem:[#allocation100_spill] sm:$0xff] }
 0x7b8   : > { %20410 = vst [vmem:[#allocation37_spill] sm:$0xff] %v17307_v39  ;;  %v5541_v50 = vsel %vm5027_vm3, %v17297_v17, 0 }
 0x7b9   : > { %20404 = vst [vmem:[#allocation58_spill] sm:$0xff] %v17295_v21  ;;  %20411 = vst [vmem:[#allocation47_spill] sm:$0xff] %v17310_v63  ;;  %v5256_v36 = vsub.f32 %v17106_v35, %v17295_v21  ;;  %14940 = vpow2.f32 %v5294_v59  ;;  %v17319_v16 = vand.u32 4294901760, %v5541_v50  ;;  %v6047_v61 = vsub.f32 %v17273_v38, %v20414_v55  ;;  %v20420_v21 = vld [vmem:[#allocation97_spill] sm:$0xff] }
 0x7ba   : > { %v5051_v8 = vpop.xlane.xlu0 %5050  ;;  %v20421_v10 = vand.u32 4294901760, %v20420_v21 }
 0x7bb   : > { %v5292_v12 = vmul.f32 1.442695, %v5256_v36  ;;  %v17322_v44 = vmax.f32 %v17222_v26, %v5051_v8  ;;  %v17328_v35 = vpop.eup %14936  ;;  %v17333_v59 = vsub.f32 %v5541_v50, %v17319_v16  ;;  %v20417_v36 = vand.u32 4294901760, %v20416_v57 }
 0x7bc   : > { %v20419_v26 = vand.u32 4294901760, %v17285_v14  ;;  %v5550_v34 = vsel %vm5027_vm3, %v17328_v35, 0  ;;  %v17350_v50 = vsub.f32 %v20420_v21, %v20421_v10  ;;  %v6048_v24 = vand.u32 4294901760, %v6047_v61 }
 0x7bd   : > { %20413 = vst [vmem:[#allocation41_spill] sm:$0xff] %v17322_v44  ;;  %20415 = vst [vmem:[#allocation50_spill] sm:$0xff] %v17333_v59  ;;  %v17338_v8 = vsub.f32 %v20416_v57, %v20417_v36  ;;  %v5259_v40 = vsub.f32 %v17110_v5, %v17322_v44  ;;  %14942 = vpow2.f32 %v5292_v12  ;;  %v19943_v57 = vand.u32 4294901760, %v17333_v59 }
 0x7be   : > { %v6054_v55 = vsub.f32 %v17285_v14, %v20419_v26  ;;  %20422 = vst [vmem:[#allocation46_spill] sm:$0xff] %v17350_v50  ;;  %v5048_v45 = vpop.xlane.xlu0 %5047  ;;  %v17353_v36 = vand.u32 4294901760, %v5550_v34  ;;  %v20425_v26 = vand.u32 4294901760, %v17310_v63  ;;  %v17363_v14 = vpop.xlane.xlu1 %2999  ;;  %v20427_v12 = vand.u32 4294901760, %v17302_v31 }
 0x7bf   : > { %20418 = vst [vmem:[#allocation23_spill] sm:$0xff] %v17338_v8  ;;  %v5298_v19 = vmul.f32 1.442695, %v5259_v40  ;;  %v17356_v5 = vmax.f32 %v17226_v49, %v5048_v45  ;;  %v17361_v53 = vpop.eup %14938  ;;  %20426 = vst [vmem:[#allocation49_spill] sm:$0xff] %v17363_v14  ;;  %v5712_v10 = vsub.f32 %v17333_v59, %v19943_v57  ;;  %v20428_v45 = vand.u32 4294901760, %v17307_v39 }
 0x7c0   : > { %20423 = vst [vmem:[#allocation51_spill] sm:$0xff] %v17353_v36  ;;  %v5722_v44 = vsub.f32 %v17310_v63, %v20425_v26  ;;  %v6061_v21 = vsub.f32 %v17302_v31, %v20427_v12  ;;  %v17375_v49 = vsub.f32 %v5550_v34, %v17353_v36  ;;  %v6055_v63 = vand.u32 4294901760, %v6054_v55 }
 0x7c1   : > { %20424 = vst [vmem:[#allocation63_spill] sm:$0xff] %v17356_v5  ;;  %v6068_v40 = vsub.f32 %v17307_v39, %v20428_v45  ;;  %v5258_v26 = vsub.f32 %v17112_v32, %v17356_v5  ;;  %v5547_v57 = vsel %vm5027_vm3, %v17361_v53, 0  ;;  %v19956_v59 = vand.u32 4294901760, %v17350_v50 }
 0x7c2   : > { %20429 = vst [vmem:[#allocation59_spill] sm:$0xff] %v17375_v49  ;;  %14944 = vpow2.f32 %v5298_v19  ;;  %v5057_v12 = vpop.xlane.xlu0 %5056  ;;  %v5713_v31 = vand.u32 4294901760, %v5712_v10  ;;  %v17383_v38 = vand.u32 4294901760, %v5547_v57  ;;  %v5723_v39 = vand.u32 4294901760, %v5722_v44  ;;  %v17401_v61 = vpop.xlane.xlu1 %2972 }
 0x7c3   : > { %v5296_v45 = vmul.f32 1.442695, %v5258_v26  ;;  %v17386_v34 = vmax.f32 %v17232_v52, %v5057_v12  ;;  %v17389_v36 = vpop.eup %14940  ;;  %v6069_v32 = vand.u32 4294901760, %v6068_v40  ;;  %v13816_v10 = vpack.c.bf16 %v6055_v63, %v6048_v24  ;;  %20432 = vst [vmem:[#allocation53_spill] sm:$0xff] %v17401_v61 }
 0x7c4   : > { %12684 = vmatprep.mubr.f32.mxu1 %v5713_v31  ;;  %v17392_v55 = vsub.f32 %v5547_v57, %v17383_v38  ;;  %v20431_v26 = vand.u32 4294901760, %v17338_v8  ;;  %v5556_v44 = vsel %vm5027_vm3, %v17389_v36, 0  ;;  %v20433_v31 = vld [vmem:[#allocation102_spill] sm:$0xff]  ;;  %v20435_v52 = vand.u32 4294901760, %v17375_v49 }
 0x7c5   : > { %20430 = vst [vmem:[#allocation25_spill] sm:$0xff] %v17386_v34  ;;  %v5261_v19 = vsub.f32 %v17116_v30, %v17386_v34  ;;  %12685 = vmatmul.mubr.f32.vlgmr.msra.gmra.mrb[16].mxu1 %v5723_v39  ;;  %14946 = vpow2.f32 %v5296_v45  ;;  %v6075_v30 = vsub.f32 %v17350_v50, %v19956_v59  ;;  %v17408_v24 = vand.u32 4294901760, %v5556_v44 }
 0x7c6   : > { %v6082_v12 = vsub.f32 %v17338_v8, %v20431_v26  ;;  %13815 = vmatpush3.bf16.msra.mxu1 %v20433_v31  ;;  %v5054_v40 = vpop.xlane.xlu0 %5053  ;;  %v19965_v57 = vand.u32 4294901760, %v17392_v55  ;;  %v6062_v26 = vand.u32 4294901760, %v6061_v21  ;;  %v5742_v45 = vsub.f32 %v17375_v49, %v20435_v52 }
 0x7c7   : > { %v5302_v39 = vmul.f32 1.442695, %v5261_v19  ;;  %13817 = vmatprep.subr.bf16.mxu1 %v13816_v10  ;;  %v17411_v63 = vmax.f32 %v17240_v42, %v5054_v40  ;;  %v17416_v31 = vpop.eup %14942  ;;  %v17422_v59 = vsub.f32 %v5556_v44, %v17408_v24  ;;  %v6076_v49 = vand.u32 4294901760, %v6075_v30 }
 0x7c8   : > { %v5732_v34 = vsub.f32 %v17392_v55, %v19965_v57  ;;  %v13820_v5 = vpack.c.bf16 %v6069_v32, %v6062_v26  ;;  %v6083_v40 = vand.u32 4294901760, %v6082_v12  ;;  %v5553_v21 = vsel %vm5027_vm3, %v17416_v31, 0  ;;  %v17436_v12 = vpop.xlane.xlu1 %2996 }
 0x7c9   : > { %20434 = vst [vmem:[#allocation64_spill] sm:$0xff] %v17411_v63  ;;  %v5260_v19 = vsub.f32 %v17118_v28, %v17411_v63  ;;  %14948 = vpow2.f32 %v5302_v39  ;;  %v17428_v8 = vand.u32 4294901760, %v5553_v21  ;;  %v5743_v57 = vand.u32 4294901760, %v5742_v45  ;;  %20437 = vst [vmem:[#allocation68_spill] sm:$0xff] %v17436_v12 }
 0x7ca   : > { %13819 = vmatpush3.bf16.msra.mxu1 %v13816_v10  ;;  %v5063_v52 = vpop.xlane.xlu0 %5062  ;;  %v5733_v42 = vand.u32 4294901760, %v5732_v34  ;;  %v19966_v28 = vand.u32 4294901760, %v17422_v59  ;;  %v13824_v30 = vpack.c.bf16 %v6083_v40, %v6076_v49  ;;  %v20440_v40 = vld [vmem:[#allocation89_spill] sm:$0xff] }
 0x7cb   : > { %v5300_v50 = vmul.f32 1.442695, %v5260_v19  ;;  %13821 = vmatprep.subr.bf16.mxu1 %v13820_v5  ;;  %v17431_v44 = vmax.f32 %v17244_v23, %v5063_v52  ;;  %v17439_v10 = vsub.f32 %v5553_v21, %v17428_v8  ;;  %v20441_v21 = vld [vmem:[#allocation91_spill] sm:$0xff] }
 0x7cc   : > { %v17434_v32 = vpop.eup %14944  ;;  %12687 = vmatprep.mubr.f32.mxu1 %v5733_v42 }
 0x7cd   : > { %20436 = vst [vmem:[#allocation57_spill] sm:$0xff] %v17431_v44  ;;  %v5263_v34 = vsub.f32 %v17122_v6, %v17431_v44  ;;  %12688 = vmatmul.mubr.f32.gmra.mrb[18].mxu1 %v5743_v57  ;;  %v5562_v39 = vsel %vm5027_vm3, %v17434_v32, 0  ;;  %14950 = vpow2.f32 %v5300_v50  ;;  %v19969_v45 = vand.u32 4294901760, %v17439_v10 }
 0x7ce   : > { %13823 = vmatpush3.bf16.msra.mxu1 %v13820_v5  ;;  %v5060_v26 = vpop.xlane.xlu0 %5059  ;;  %v17446_v19 = vand.u32 4294901760, %v5562_v39  ;;  %v5762_v6 = vsub.f32 %v17422_v59, %v19966_v28  ;;  %v17470_v28 = vpop.xlane.xlu1 %2981 }
 0x7cf   : > { %v5306_v52 = vmul.f32 1.442695, %v5263_v34  ;;  %13825 = vmatprep.subr.bf16.mxu1 %v13824_v30  ;;  %v17449_v42 = vmax.f32 %v17263_v33, %v5060_v26  ;;  %v17454_v49 = vpop.eup %14946  ;;  %v5752_v50 = vsub.f32 %v17439_v10, %v19969_v45  ;;  %v17466_v34 = vpack.c.bf16 %v20441_v21, %v20440_v40  ;;  %20442 = vst [vmem:[#allocation72_spill] sm:$0xff] %v17470_v28 }
 0x7d0   : > { %v17460_v5 = vsub.f32 %v5562_v39, %v17446_v19  ;;  %v5559_v26 = vsel %vm5027_vm3, %v17454_v49, 0 }
 0x7d1   : > { %20438 = vst [vmem:[#allocation67_spill] sm:$0xff] %v17449_v42  ;;  %v5262_v57 = vsub.f32 %v17124_v13, %v17449_v42  ;;  %14952 = vpow2.f32 %v5306_v52  ;;  %v5753_v23 = vand.u32 4294901760, %v5752_v50  ;;  %v17472_v45 = vand.u32 4294901760, %v5559_v26 }
 0x7d2   : > { %20439 = vst [vmem:[#allocation62_spill] sm:$0xff] %v17460_v5  ;;  %13827 = vmatpush3.bf16.msra.mxu1 %v13824_v30  ;;  %v5069_v33 = vpop.xlane.xlu0 %5068  ;;  %v5763_v42 = vand.u32 4294901760, %v5762_v6 }
 0x7d3   : > { %v5304_v39 = vmul.f32 1.442695, %v5262_v57  ;;  %13829 = vmatprep.subr.bf16.mxu1 %v17466_v34  ;;  %v17476_v13 = vmax.f32 %v17317_v27, %v5069_v33  ;;  %v14949_v63 = vpop.eup %14948  ;;  %12690 = vmatprep.mubr.f32.mxu1 %v5753_v23  ;;  %v17480_v21 = vsub.f32 %v5559_v26, %v17472_v45  ;;  %v20446_v23 = vand.u32 4294901760, %v17460_v5 }
 0x7d4   : > { %12691 = vmatmul.mubr.f32.gmra.mrb[20].mxu1 %v5763_v42  ;;  %v5375_v52 = vsel %vm5027_vm3, %v14949_v63, 0.0  ;;  %v5568_v6 = vsel %vm5027_vm3, %v14949_v63, 0  ;;  %v17495_v42 = vpop.xlane.xlu1 %3005 }
 0x7d5   : > { %20443 = vst [vmem:[#allocation65_spill] sm:$0xff] %v17476_v13  ;;  %20444 = vst [vmem:[#allocation77_spill] sm:$0xff] %v17480_v21  ;;  %v5265_v30 = vsub.f32 %v17128_v60, %v17476_v13  ;;  %14954 = vpow2.f32 %v5304_v39  ;;  %5376 = vadd.xlane.f32.xlu0 %v5375_v52  ;;  %v19978_v33 = vand.u32 4294901760, %v17480_v21  ;;  %v5782_v26 = vsub.f32 %v17460_v5, %v20446_v23 }
 0x7d6   : > { %v5066_v50 = vpop.xlane.xlu0 %5065  ;;  %v17493_v27 = vand.u32 4294901760, %v5568_v6  ;;  %20447 = vst [vmem:[#allocation69_spill] sm:$0xff] %v17495_v42 }
 0x7d7   : > { %v5310_v57 = vmul.f32 1.442695, %v5265_v30  ;;  %v17488_v44 = vmax.f32 %v17401_v61, %v5066_v50  ;;  %v14951_v60 = vpop.eup %14950  ;;  %v5772_v39 = vsub.f32 %v17480_v21, %v19978_v33  ;;  %v5783_v5 = vand.u32 4294901760, %v5782_v26 }
 0x7d8   : > { %v5372_v30 = vsel %vm5027_vm3, %v14951_v60, 0.0  ;;  %v5565_v23 = vsel %vm5027_vm3, %v14951_v60, 0  ;;  %v17505_v61 = vsub.f32 %v5568_v6, %v17493_v27 }
 0x7d9   : > { %20445 = vst [vmem:[#allocation73_spill] sm:$0xff] %v17488_v44  ;;  %v5264_v63 = vsub.f32 %v17130_v43, %v17488_v44  ;;  %14956 = vpow2.f32 %v5310_v57  ;;  %5373 = vadd.xlane.f32.xlu1 %v5372_v30  ;;  %v5773_v50 = vand.u32 4294901760, %v5772_v39  ;;  %v17510_v33 = vand.u32 4294901760, %v5565_v23  ;;  %v17516_v39 = vpop.xlane.xlu1 %2978 }
 0x7da   : > { %v5075_v52 = vpop.xlane.xlu0 %5074  ;;  %20448 = vst [vmem:[#allocation81_spill] sm:$0xff] %v17505_v61  ;;  %20450 = vst [vmem:[#allocation84_spill] sm:$0xff] %v17516_v39 }
 0x7db   : > { %v5308_v13 = vmul.f32 1.442695, %v5264_v63  ;;  %v17508_v40 = vmax.f32 %v17470_v28, %v5075_v52  ;;  %v14953_v21 = vpop.eup %14952  ;;  %12693 = vmatprep.mubr.f32.mxu1 %v5773_v50  ;;  %v17519_v63 = vsub.f32 %v5565_v23, %v17510_v33 }
 0x7dc   : > { %12694 = vmatmul.mubr.f32.gmra.mrb[22].mxu1 %v5783_v5  ;;  %v5381_v57 = vsel %vm5027_vm3, %v14953_v21, 0.0  ;;  %v5574_v26 = vsel %vm5027_vm3, %v14953_v21, 0 }
 0x7dd   : > { %20449 = vst [vmem:[#allocation75_spill] sm:$0xff] %v17508_v40  ;;  %v5267_v43 = vsub.f32 %v17134_v37, %v17508_v40  ;;  %14958 = vpow2.f32 %v5308_v13  ;;  %5382 = vadd.xlane.f32.xlu0 %v5381_v57  ;;  %v17525_v37 = vand.u32 4294901760, %v5574_v26  ;;  %v19985_v50 = vand.u32 4294901760, %v17519_v63 }
 0x7de   : > { %v5072_v6 = vpop.xlane.xlu0 %5071  ;;  %v20453_v57 = vand.u32 4294901760, %v17505_v61 }
 0x7df   : > { %v5314_v30 = vmul.f32 1.442695, %v5267_v43  ;;  %v17523_v52 = vmax.f32 %v17516_v39, %v5072_v6  ;;  %20452 = vst [vmem:[#allocation79_spill] sm:$0xff] %v17525_v37  ;;  %v14955_v5 = vpop.eup %14954  ;;  %v5792_v43 = vsub.f32 %v17519_v63, %v19985_v50  ;;  %v17539_v39 = vsub.f32 %v5574_v26, %v17525_v37 }
 0x7e0   : > { %v5378_v13 = vsel %vm5027_vm3, %v14955_v5, 0.0  ;;  %v5802_v23 = vsub.f32 %v17505_v61, %v20453_v57  ;;  %v5571_v6 = vsel %vm5027_vm3, %v14955_v5, 0 }
 0x7e1   : > { %20451 = vst [vmem:[#allocation87_spill] sm:$0xff] %v17523_v52  ;;  %v5266_v60 = vsub.f32 %v17136_v7, %v17523_v52  ;;  %14960 = vpow2.f32 %v5314_v30  ;;  %5379 = vadd.xlane.f32.xlu1 %v5378_v13  ;;  %20454 = vst [vmem:[#allocation86_spill] sm:$0xff] %v17539_v39  ;;  %v17544_v52 = vand.u32 4294901760, %v5571_v6  ;;  %v5793_v30 = vand.u32 4294901760, %v5792_v43 }
 0x7e2   : > { %v5081_v21 = vpop.xlane.xlu0 %5080  ;;  %v5803_v57 = vand.u32 4294901760, %v5802_v23  ;;  %v19991_v5 = vand.u32 4294901760, %v17539_v39 }
 0x7e3   : > { %v5312_v28 = vmul.f32 1.442695, %v5266_v60  ;;  %v17542_v7 = vmax.f32 %v17236_v62, %v5081_v21  ;;  %20456 = vst [vmem:[#allocation26_spill] sm:$0xff] %v17544_v52  ;;  %v17546_v40 = vpop.eup %14956  ;;  %v17551_v50 = vsub.f32 %v5571_v6, %v17544_v52  ;;  %12696 = vmatprep.mubr.f32.mxu1 %v5793_v30 }
 0x7e4   : > { %v5580_v26 = vsel %vm5027_vm3, %v17546_v40, 0  ;;  %12697 = vmatmul.mubr.f32.gmra.mrb[24].mxu1 %v5803_v57  ;;  %v5822_v30 = vsub.f32 %v17539_v39, %v19991_v5 }
 0x7e5   : > { %20455 = vst [vmem:[#allocation83_spill] sm:$0xff] %v17542_v7  ;;  %v5269_v13 = vsub.f32 %v17140_v47, %v17542_v7  ;;  %20457 = vst [vmem:[#allocation27_spill] sm:$0xff] %v17551_v50  ;;  %14962 = vpow2.f32 %v5312_v28  ;;  %v19992_v43 = vand.u32 4294901760, %v17551_v50  ;;  %v17560_v23 = vand.u32 4294901760, %v5580_v26 }
 0x7e6   : > { %v5078_v60 = vpop.xlane.xlu0 %5077 }
 0x7e7   : > { %v5318_v21 = vmul.f32 1.442695, %v5269_v13  ;;  %v17557_v62 = vmax.f32 %v17242_v11, %v5078_v60  ;;  %v14959_v47 = vpop.eup %14958  ;;  %20459 = vst [vmem:[#allocation70_spill] sm:$0xff] %v17560_v23  ;;  %v5812_v57 = vsub.f32 %v17551_v50, %v19992_v43  ;;  %v17573_v11 = vsub.f32 %v5580_v26, %v17560_v23 }
 0x7e8   : > { %v5384_v28 = vsel %vm5027_vm3, %v14959_v47, 0.0  ;;  %v5577_v60 = vsel %vm5027_vm3, %v14959_v47, 0  ;;  %v5823_v47 = vand.u32 4294901760, %v5822_v30 }
 0x7e9   : > { %20458 = vst [vmem:[#allocation28_spill] sm:$0xff] %v17557_v62  ;;  %v5268_v6 = vsub.f32 %v17142_v48, %v17557_v62  ;;  %14964 = vpow2.f32 %v5318_v21  ;;  %5385 = vadd.xlane.f32.xlu1 %v5384_v28  ;;  %20460 = vst [vmem:[#allocation60_spill] sm:$0xff] %v17573_v11  ;;  %v17578_v62 = vand.u32 4294901760, %v5577_v60  ;;  %v17582_v21 = vpop.xlane.xlu1 %3008  ;;  %v5813_v28 = vand.u32 4294901760, %v5812_v57 }
 0x7ea   : > { %v5087_v13 = vpop.xlane.xlu0 %5086  ;;  %20463 = vst [vmem:[#allocation78_spill] sm:$0xff] %v17582_v21 }
 0x7eb   : > { %v5316_v7 = vmul.f32 1.442695, %v5268_v6  ;;  %v17576_v48 = vmax.f32 %v17254_v54, %v5087_v13  ;;  %20462 = vst [vmem:[#allocation66_spill] sm:$0xff] %v17578_v62  ;;  %v17580_v44 = vpop.eup %14960  ;;  %v17588_v26 = vsub.f32 %v5577_v60, %v17578_v62  ;;  %12699 = vmatprep.mubr.f32.mxu1 %v5813_v28 }
 0x7ec   : > { %v5586_v13 = vsel %vm5027_vm3, %v17580_v44, 0  ;;  %12700 = vmatmul.mubr.f32.gmra.mrb[26].mxu1 %v5823_v47 }
 0x7ed   : > { %20461 = vst [vmem:[#allocation74_spill] sm:$0xff] %v17576_v48  ;;  %v5271_v43 = vsub.f32 %v17146_v4, %v17576_v48  ;;  %20464 = vst [vmem:[#allocation71_spill] sm:$0xff] %v17588_v26  ;;  %14966 = vpow2.f32 %v5316_v7  ;;  %v20003_v57 = vand.u32 4294901760, %v17588_v26  ;;  %v20466_v4 = vand.u32 4294901760, %v17573_v11  ;;  %v17608_v28 = vpop.xlane.xlu1 %3011 }
 0x7ee   : > { %v5084_v6 = vpop.xlane.xlu0 %5083  ;;  %v17601_v60 = vand.u32 4294901760, %v5586_v13  ;;  %20468 = vst [vmem:[#allocation85_spill] sm:$0xff] %v17608_v28 }
 0x7ef   : > { %v5322_v54 = vmul.f32 1.442695, %v5271_v43  ;;  %v17593_v39 = vmax.f32 %v17280_v41, %v5084_v6  ;;  %v17596_v5 = vpop.eup %14962  ;;  %v5842_v30 = vsub.f32 %v17573_v11, %v20466_v4  ;;  %v5832_v43 = vsub.f32 %v17588_v26, %v20003_v57 }
 0x7f0   : > { %20467 = vst [vmem:[#allocation76_spill] sm:$0xff] %v17601_v60  ;;  %v5583_v6 = vsel %vm5027_vm3, %v17596_v5, 0  ;;  %v17613_v41 = vsub.f32 %v5586_v13, %v17601_v60 }
 0x7f1   : > { %20465 = vst [vmem:[#allocation82_spill] sm:$0xff] %v17593_v39  ;;  %v5270_v7 = vsub.f32 %v17148_v25, %v17593_v39  ;;  %14968 = vpow2.f32 %v5322_v54  ;;  %v5833_v11 = vand.u32 4294901760, %v5832_v43  ;;  %v5843_v39 = vand.u32 4294901760, %v5842_v30 }
 0x7f2   : > { %v5093_v47 = vpop.xlane.xlu0 %5092  ;;  %20469 = vst [vmem:[#allocation80_spill] sm:$0xff] %v17613_v41  ;;  %v17618_v50 = vand.u32 4294901760, %v5583_v6 }
 0x7f3   : > { %v5320_v4 = vmul.f32 1.442695, %v5270_v7  ;;  %v17616_v48 = vmax.f32 %v17363_v14, %v5093_v47  ;;  %v14965_v25 = vpop.eup %14964  ;;  %12702 = vmatprep.mubr.f32.mxu1 %v5833_v11  ;;  %v17633_v11 = vpop.xlane.xlu1 %3014 }
 0x7f4   : > { %20471 = vst [vmem:[#allocation94_spill] sm:$0xff] %v17618_v50  ;;  %v5399_v54 = vsel %vm5027_vm3, %v14965_v25, 0.0  ;;  %12703 = vmatmul.mubr.f32.gmra.mrb[28].mxu1 %v5843_v39  ;;  %v17625_v7 = vsub.f32 %v5583_v6, %v17618_v50  ;;  %v5592_v43 = vsel %vm5027_vm3, %v14965_v25, 0  ;;  %20474 = vst [vmem:[#allocation92_spill] sm:$0xff] %v17633_v11  ;;  %v20475_v6 = vand.u32 4294901760, %v17613_v41 }
 0x7f5   : > { %20470 = vst [vmem:[#allocation99_spill] sm:$0xff] %v17616_v48  ;;  %v5273_v57 = vsub.f32 %v17152_v2, %v17616_v48  ;;  %14970 = vpow2.f32 %v5320_v4  ;;  %5400 = vadd.xlane.f32.xlu0 %v5399_v54  ;;  %v17631_v14 = vand.u32 4294901760, %v5592_v43 }
 0x7f6   : > { %v5090_v13 = vpop.xlane.xlu0 %5089  ;;  %v20014_v26 = vand.u32 4294901760, %v17625_v7  ;;  %v5862_v25 = vsub.f32 %v17613_v41, %v20475_v6 }
 0x7f7   : > { %v5326_v30 = vmul.f32 1.442695, %v5273_v57  ;;  %v17629_v47 = vmax.f32 %v17436_v12, %v5090_v13  ;;  %20473 = vst [vmem:[#allocation93_spill] sm:$0xff] %v17631_v14  ;;  %v14967_v2 = vpop.eup %14966  ;;  %v17647_v12 = vsub.f32 %v5592_v43, %v17631_v14 }
 0x7f8   : > { %v5396_v4 = vsel %vm5027_vm3, %v14967_v2, 0.0  ;;  %v5852_v54 = vsub.f32 %v17625_v7, %v20014_v26  ;;  %v5589_v13 = vsel %vm5027_vm3, %v14967_v2, 0  ;;  %v17658_v2 = vpop.xlane.xlu1 %3002 }
 0x7f9   : > { %20472 = vst [vmem:[#allocation88_spill] sm:$0xff] %v17629_v47  ;;  %v5272_v39 = vsub.f32 %v17154_v46, %v17629_v47  ;;  %14972 = vpow2.f32 %v5326_v30  ;;  %5397 = vadd.xlane.f32.xlu1 %v5396_v4  ;;  %20476 = vst [vmem:[#allocation96_spill] sm:$0xff] %v17647_v12  ;;  %v17652_v47 = vand.u32 4294901760, %v5589_v13  ;;  %v5863_v4 = vand.u32 4294901760, %v5862_v25 }
 0x7fa   : > { %v5099_v57 = vpop.xlane.xlu0 %5098  ;;  %v5853_v6 = vand.u32 4294901760, %v5852_v54  ;;  %20479 = vst [vmem:[#allocation102_spill] sm:$0xff] %v17658_v2 }
 0x7fb   : > { %v5324_v48 = vmul.f32 1.442695, %v5272_v39  ;;  %v17650_v46 = vmax.f32 %v17495_v42, %v5099_v57  ;;  %20478 = vst [vmem:[#allocation97_spill] sm:$0xff] %v17652_v47  ;;  %v14969_v61 = vpop.eup %14968  ;;  %v17661_v39 = vsub.f32 %v5589_v13, %v17652_v47  ;;  %v20483_v13 = vand.u32 4294901760, %v17647_v12 }
 0x7fc   : > { %v5405_v41 = vsel %vm5027_vm3, %v14969_v61, 0.0  ;;  %12705 = vmatprep.mubr.f32.mxu1 %v5853_v6  ;;  %v5598_v57 = vsel %vm5027_vm3, %v14969_v61, 0 }
 0x7fd   : > { %20477 = vst [vmem:[#allocation100_spill] sm:$0xff] %v17650_v46  ;;  %v5275_v30 = vsub.f32 %v17158_v1, %v17650_v46  ;;  %14974 = vpow2.f32 %v5324_v48  ;;  %5406 = vadd.xlane.f32.xlu0 %v5405_v41  ;;  %20480 = vst [vmem:[#allocation103_spill] sm:$0xff] %v17661_v39  ;;  %12706 = vmatmul.mubr.f32.gmra.mrb[30].mxu1 %v5863_v4  ;;  %v17667_v25 = vand.u32 4294901760, %v5598_v57  ;;  %v20019_v26 = vand.u32 4294901760, %v17661_v39 }
 0x7fe   : > { %v5096_v43 = vpop.xlane.xlu0 %5095  ;;  %v5882_v6 = vsub.f32 %v17647_v12, %v20483_v13 }
 0x7ff   : > { %v5330_v54 = vmul.f32 1.442695, %v5275_v30  ;;  %v17665_v1 = vmax.f32 %v17658_v2, %v5096_v43  ;;  %20482 = vst [vmem:[#allocation105_spill] sm:$0xff] %v17667_v25  ;;  %v14971_v42 = vpop.eup %14970  ;;  %v5872_v30 = vsub.f32 %v17661_v39, %v20019_v26  ;;  %v17681_v43 = vsub.f32 %v5598_v57, %v17667_v25  ;;  %v17696_v57 = vpop.xlane.xlu1 %3017 }
 0x800   : > { %v5402_v41 = vsel %vm5027_vm3, %v14971_v42, 0.0  ;;  %v5595_v4 = vsel %vm5027_vm3, %v14971_v42, 0  ;;  %v5883_v13 = vand.u32 4294901760, %v5882_v6  ;;  %20487 = vst [vmem:[#allocation109_spill] sm:$0xff] %v17696_v57 }
 0x801   : > { %20481 = vst [vmem:[#allocation104_spill] sm:$0xff] %v17665_v1  ;;  %v5274_v48 = vsub.f32 %v17160_v22, %v17665_v1  ;;  %14976 = vpow2.f32 %v5330_v54  ;;  %5403 = vadd.xlane.f32.xlu1 %v5402_v41  ;;  %20484 = vst [vmem:[#allocation106_spill] sm:$0xff] %v17681_v43  ;;  %v17686_v1 = vand.u32 4294901760, %v5595_v4  ;;  %v5873_v54 = vand.u32 4294901760, %v5872_v30 }
 0x802   : > { %v5105_v61 = vpop.xlane.xlu0 %5104 }
 0x803   : > { %v5328_v2 = vmul.f32 1.442695, %v5274_v48  ;;  %v17684_v22 = vmax.f32 %v17608_v28, %v5105_v61  ;;  %20486 = vst [vmem:[#allocation108_spill] sm:$0xff] %v17686_v1  ;;  %v17688_v46 = vpop.eup %14972  ;;  %v17693_v26 = vsub.f32 %v5595_v4, %v17686_v1  ;;  %12708 = vmatprep.mubr.f32.mxu1 %v5873_v54  ;;  %v20490_v54 = vand.u32 4294901760, %v17681_v43 }
 0x804   : > { %v5604_v61 = vsel %vm5027_vm3, %v17688_v46, 0  ;;  %12709 = vmatmul.mubr.f32.gmra.mrb[32].mxu1 %v5883_v13 }
 0x805   : > { %20485 = vst [vmem:[#allocation107_spill] sm:$0xff] %v17684_v22  ;;  %v5277_v41 = vsub.f32 %v17164_v20, %v17684_v22  ;;  %14978 = vpow2.f32 %v5328_v2  ;;  %v20028_v20 = vand.u32 4294901760, %v17693_v26  ;;  %v17704_v4 = vand.u32 4294901760, %v5604_v61 }
 0x806   : > { %v5102_v48 = vpop.xlane.xlu0 %5101  ;;  %v5902_v22 = vsub.f32 %v17681_v43, %v20490_v54 }
 0x807   : > { %v5334_v28 = vmul.f32 1.442695, %v5277_v41  ;;  %v17701_v30 = vmax.f32 %v17582_v21, %v5102_v48  ;;  %v14975_v6 = vpop.eup %14974  ;;  %20489 = vst [vmem:[#allocation111_spill] sm:$0xff] %v17704_v4  ;;  %v5892_v13 = vsub.f32 %v17693_v26, %v20028_v20  ;;  %v17717_v21 = vsub.f32 %v5604_v61, %v17704_v4 }
 0x808   : > { %v5408_v2 = vsel %vm5027_vm3, %v14975_v6, 0.0  ;;  %v5601_v48 = vsel %vm5027_vm3, %v14975_v6, 0  ;;  %v5903_v6 = vand.u32 4294901760, %v5902_v22  ;;  %v5390_v61 = vsel %vm5027_vm3, %v17596_v5, 0.0 }
 0x809   : > { %20488 = vst [vmem:[#allocation110_spill] sm:$0xff] %v17701_v30  ;;  %v5276_v42 = vsub.f32 %v17166_v15, %v17701_v30  ;;  %14980 = vpow2.f32 %v5334_v28  ;;  %5409 = vadd.xlane.f32.xlu1 %v5408_v2  ;;  %20491 = vst [vmem:[#allocation112_spill] sm:$0xff] %v17717_v21  ;;  %v17722_v30 = vand.u32 4294901760, %v5601_v48  ;;  %v17726_v28 = vpop.xlane.xlu1 %3020  ;;  %v5893_v2 = vand.u32 4294901760, %v5892_v13 }
 0x80a   : > { %v5111_v41 = vpop.xlane.xlu0 %5110  ;;  %20494 = vst [vmem:[#allocation115_spill] sm:$0xff] %v17726_v28  ;;  %v20497_v5 = vand.u32 4294901760, %v17717_v21 }
 0x80b   : > { %v5332_v12 = vmul.f32 1.442695, %v5276_v42  ;;  %v17720_v15 = vmax.f32 %v17696_v57, %v5111_v41  ;;  %20493 = vst [vmem:[#allocation114_spill] sm:$0xff] %v17722_v30  ;;  %v17724_v39 = vpop.eup %14976  ;;  %v17734_v42 = vsub.f32 %v5601_v48, %v17722_v30  ;;  %12711 = vmatprep.mubr.f32.mxu1 %v5893_v2 }
 0x80c   : > { %v5610_v57 = vsel %vm5027_vm3, %v17724_v39, 0  ;;  %12712 = vmatmul.mubr.f32.gmra.mrb[34].mxu1 %v5903_v6  ;;  %v5922_v48 = vsub.f32 %v17717_v21, %v20497_v5 }
 0x80d   : > { %20492 = vst [vmem:[#allocation113_spill] sm:$0xff] %v17720_v15  ;;  %v5279_v20 = vsub.f32 %v17170_v0, %v17720_v15  ;;  %20495 = vst [vmem:[#allocation116_spill] sm:$0xff] %v17734_v42  ;;  %14982 = vpow2.f32 %v5332_v12  ;;  %5391 = vadd.xlane.f32.xlu1 %v5390_v61  ;;  %v20037_v0 = vand.u32 4294901760, %v17734_v42  ;;  %v17745_v15 = vand.u32 4294901760, %v5610_v57  ;;  %v17752_v2 = vpop.xlane.xlu1 %3023 }
 0x80e   : > { %v5108_v41 = vpop.xlane.xlu0 %5107  ;;  %20499 = vst [vmem:[#allocation119_spill] sm:$0xff] %v17752_v2 }
 0x80f   : > { %v5338_v13 = vmul.f32 1.442695, %v5279_v20  ;;  %v17739_v54 = vmax.f32 %v17633_v11, %v5108_v41  ;;  %v14979_v22 = vpop.eup %14978  ;;  %20498 = vst [vmem:[#allocation118_spill] sm:$0xff] %v17745_v15  ;;  %v5912_v20 = vsub.f32 %v17734_v42, %v20037_v0  ;;  %v17756_v41 = vsub.f32 %v5610_v57, %v17745_v15 }
 0x810   : > { %v5607_v61 = vsel %vm5027_vm3, %v14979_v22, 0 }
 0x811   : > { %20496 = vst [vmem:[#allocation117_spill] sm:$0xff] %v17739_v54  ;;  %v5278_v12 = vsub.f32 %v17172_v3, %v17739_v54  ;;  %14984 = vpow2.f32 %v5338_v13  ;;  %20500 = vst [vmem:[#allocation120_spill] sm:$0xff] %v17756_v41  ;;  %v5913_v21 = vand.u32 4294901760, %v5912_v20  ;;  %v5923_v3 = vand.u32 4294901760, %v5922_v48 }
 0x812   : > { %v5117_v6 = vpop.xlane.xlu0 %5116  ;;  %v17761_v54 = vand.u32 4294901760, %v5607_v61 }
 0x813   : > { %v5336_v11 = vmul.f32 1.442695, %v5278_v12  ;;  %v17759_v5 = vmax.f32 %v17752_v2, %v5117_v6  ;;  %v14981_v43 = vpop.eup %14980  ;;  %12714 = vmatprep.mubr.f32.mxu1 %v5913_v21  ;;  %v17776_v21 = vpop.xlane.xlu1 %3026 }
 0x814   : > { %20502 = vst [vmem:[#allocation122_spill] sm:$0xff] %v17761_v54  ;;  %v5423_v13 = vsel %vm5027_vm3, %v14981_v43, 0.0  ;;  %12715 = vmatmul.mubr.f32.gmra.mrb[36].mxu1 %v5923_v3  ;;  %v17768_v12 = vsub.f32 %v5607_v61, %v17761_v54  ;;  %v5616_v20 = vsel %vm5027_vm3, %v14981_v43, 0  ;;  %20505 = vst [vmem:[#allocation125_spill] sm:$0xff] %v17776_v21  ;;  %v5387_v61 = vsel %vm5027_vm3, %v17546_v40, 0.0 }
 0x815   : > { %20501 = vst [vmem:[#allocation121_spill] sm:$0xff] %v17759_v5  ;;  %v5281_v0 = vsub.f32 %v17176_v18, %v17759_v5  ;;  %14986 = vpow2.f32 %v5336_v11  ;;  %5424 = vadd.xlane.f32.xlu0 %v5423_v13  ;;  %v17774_v2 = vand.u32 4294901760, %v5616_v20  ;;  %v20506_v43 = vand.u32 4294901760, %v17756_v41 }
 0x816   : > { %v5114_v57 = vpop.xlane.xlu0 %5113  ;;  %v20046_v42 = vand.u32 4294901760, %v17768_v12 }
 0x817   : > { %v5342_v48 = vmul.f32 1.442695, %v5281_v0  ;;  %v17772_v6 = vmax.f32 %v17726_v28, %v5114_v57  ;;  %20504 = vst [vmem:[#allocation124_spill] sm:$0xff] %v17774_v2  ;;  %v14983_v18 = vpop.eup %14982  ;;  %v5942_v0 = vsub.f32 %v17756_v41, %v20506_v43 }
 0x818   : > { %v5420_v3 = vsel %vm5027_vm3, %v14983_v18, 0.0  ;;  %v5932_v57 = vsub.f32 %v17768_v12, %v20046_v42  ;;  %v5613_v28 = vsel %vm5027_vm3, %v14983_v18, 0  ;;  %v5411_v18 = vsel %vm5027_vm3, %v17688_v46, 0.0 }
 0x819   : > { %20503 = vst [vmem:[#allocation123_spill] sm:$0xff] %v17772_v6  ;;  %v5280_v11 = vsub.f32 %v17178_v51, %v17772_v6  ;;  %14988 = vpow2.f32 %v5342_v48  ;;  %5388 = vadd.xlane.f32.xlu0 %v5387_v61  ;;  %5421 = vadd.xlane.f32.xlu1 %v5420_v3  ;;  %v17792_v51 = vsub.f32 %v5616_v20, %v17774_v2  ;;  %v17797_v5 = vand.u32 4294901760, %v5613_v28 }
 0x81a   : > { %v5120_v13 = vpop.xlane.xlu0 %5119  ;;  %v5933_v48 = vand.u32 4294901760, %v5932_v57  ;;  %v5943_v41 = vand.u32 4294901760, %v5942_v0 }
 0x81b   : > { %v5340_v40 = vmul.f32 1.442695, %v5280_v11  ;;  %v17795_v6 = vmax.f32 %v17776_v21, %v5120_v13  ;;  %20508 = vst [vmem:[#allocation127_spill] sm:$0xff] %v17797_v5  ;;  %v14985_v43 = vpop.eup %14984  ;;  %v17805_v20 = vsub.f32 %v5613_v28, %v17797_v5  ;;  %v17807_v11 = vpop.xlane.xlu1 %3029  ;;  %v5414_v13 = vsel %vm5027_vm3, %v14979_v22, 0.0 }
 0x81c   : > { %20509 = vst [vmem:[#allocation128_spill] sm:$0xff] %v17807_v11  ;;  %12717 = vmatprep.mubr.f32.mxu1 %v5933_v48  ;;  %v5622_v42 = vsel %vm5027_vm3, %v14985_v43, 0  ;;  %v20511_v0 = vand.u32 4294901760, %v17792_v51 }
 0x81d   : > { %20507 = vst [vmem:[#allocation126_spill] sm:$0xff] %v17795_v6  ;;  %v5282_v3 = vsub.f32 %v17184_v58, %v17795_v6  ;;  %14990 = vpow2.f32 %v5340_v40  ;;  %5412 = vadd.xlane.f32.xlu0 %v5411_v18  ;;  %12718 = vmatmul.mubr.f32.gmra.mrb[38].mxu1 %v5943_v41  ;;  %v20051_v46 = vand.u32 4294901760, %v17805_v20  ;;  %v17818_v48 = vand.u32 4294901760, %v5622_v42 }
 0x81e   : > { %v5123_v57 = vpop.xlane.xlu0 %5122  ;;  %5415 = vadd.xlane.f32.xlu1 %v5414_v13  ;;  %v5962_v40 = vsub.f32 %v17792_v51, %v20511_v0  ;;  %v5348_v18 = vsel %vm5027_vm3, %v17297_v17, 0.0 }
 0x81f   : > { %v5344_v61 = vmul.f32 1.442695, %v5282_v3  ;;  %v17812_v58 = vmax.f32 %v17807_v11, %v5123_v57  ;;  %v14987_v28 = vpop.eup %14986  ;;  %20512 = vst [vmem:[#allocation130_spill] sm:$0xff] %v17818_v48  ;;  %v5393_v3 = vsel %vm5027_vm3, %v17580_v44, 0.0  ;;  %v5952_v41 = vsub.f32 %v17805_v20, %v20051_v46 }
 0x820   : > { %v5619_v13 = vsel %vm5027_vm3, %v14987_v28, 0  ;;  %v17831_v57 = vsub.f32 %v5622_v42, %v17818_v48  ;;  %v5963_v6 = vand.u32 4294901760, %v5962_v40  ;;  %v5426_v42 = vsel %vm5027_vm3, %v14987_v28, 0.0 }
 0x821   : > { %20510 = vst [vmem:[#allocation129_spill] sm:$0xff] %v17812_v58  ;;  %v5283_v22 = vsub.f32 %v17182_v29, %v17812_v58  ;;  %14992 = vpow2.f32 %v5344_v61  ;;  %5394 = vadd.xlane.f32.xlu0 %v5393_v3  ;;  %v5953_v29 = vand.u32 4294901760, %v5952_v41  ;;  %v17833_v21 = vand.u32 4294901760, %v5619_v13 }
 0x822   : > { %5349 = vadd.xlane.f32.xlu1 %v5348_v18  ;;  %v20050_v11 = vand.u32 4294901760, %v17831_v57  ;;  %v5417_v61 = vsel %vm5027_vm3, %v17724_v39, 0.0 }
 0x823   : > { %v5346_v0 = vmul.f32 1.442695, %v5283_v22  ;;  %20513 = vst [vmem:[#allocation131_spill] sm:$0xff] %v17833_v21  ;;  %v14989_v44 = vpop.eup %14988  ;;  %12720 = vmatprep.mubr.f32.mxu1 %v5953_v29  ;;  %v17839_v17 = vsub.f32 %v5619_v13, %v17833_v21  ;;  %v5429_v13 = vsel %vm5027_vm3, %v14985_v43, 0.0 }
 0x824   : > { %v5628_v3 = vsel %vm5027_vm3, %v14989_v44, 0  ;;  %12721 = vmatmul.mubr.f32.gmra.mrb[40].mxu1 %v5963_v6  ;;  %v5982_v39 = vsub.f32 %v17831_v57, %v20050_v11  ;;  %v5435_v43 = vsel %vm5027_vm3, %v14989_v44, 0.0 }
 0x825   : > { %14994 = vpow2.f32 %v5346_v0  ;;  %5418 = vadd.xlane.f32.xlu0 %v5417_v61  ;;  %v17843_v22 = vand.u32 4294901760, %v5628_v3  ;;  %v20054_v40 = vand.u32 4294901760, %v17839_v17 }
 0x826   : > { %5427 = vadd.xlane.f32.xlu1 %v5426_v42 }
 0x827   : > { %20514 = vst [vmem:[#allocation132_spill] sm:$0xff] %v17843_v22  ;;  %v14991_v41 = vpop.eup %14990  ;;  %v17850_v18 = vsub.f32 %v5628_v3, %v17843_v22  ;;  %v5972_v28 = vsub.f32 %v17839_v17, %v20054_v40  ;;  %v5983_v3 = vand.u32 4294901760, %v5982_v39 }
 0x828   : > { %v5432_v6 = vsel %vm5027_vm3, %v14991_v41, 0.0  ;;  %v5625_v0 = vsel %vm5027_vm3, %v14991_v41, 0  ;;  %v5354_v41 = vsel %vm5027_vm3, %v17361_v53, 0.0 }
 0x829   : > { %5430 = vadd.xlane.f32.xlu0 %v5429_v13  ;;  %v17858_v29 = vand.u32 4294901760, %v5625_v0  ;;  %v5973_v61 = vand.u32 4294901760, %v5972_v28  ;;  %v20053_v42 = vand.u32 4294901760, %v17850_v18 }
 0x82a   : > { %5433 = vadd.xlane.f32.xlu1 %v5432_v6 }
 0x82b   : > { %20515 = vst [vmem:[#allocation133_spill] sm:$0xff] %v17858_v29  ;;  %v14993_v11 = vpop.eup %14992  ;;  %v17862_v46 = vsub.f32 %v5625_v0, %v17858_v29  ;;  %12723 = vmatprep.mubr.f32.mxu1 %v5973_v61  ;;  %v6002_v39 = vsub.f32 %v17850_v18, %v20053_v42 }
 0x82c   : > { %v5631_v58 = vsel %vm5027_vm3, %v14993_v11, 0  ;;  %12724 = vmatmul.mubr.f32.gmra.mrb[42].mxu1 %v5983_v3  ;;  %v5360_v3 = vsel %vm5027_vm3, %v17416_v31, 0.0  ;;  %v5351_v31 = vsel %vm5027_vm3, %v17278_v56, 0.0 }
 0x82d   : > { %5436 = vadd.xlane.f32.xlu0 %v5435_v43  ;;  %v20055_v13 = vand.u32 4294901760, %v17862_v46  ;;  %v17869_v6 = vand.u32 4294901760, %v5631_v58  ;;  %v6003_v40 = vand.u32 4294901760, %v6002_v39 }
 0x82e   : > { %5355 = vadd.xlane.f32.xlu1 %v5354_v41 }
 0x82f   : > { %20516 = vst [vmem:[#allocation134_spill] sm:$0xff] %v17869_v6  ;;  %v14995_v28 = vpop.eup %14994  ;;  %v5992_v44 = vsub.f32 %v17862_v46, %v20055_v13  ;;  %v17878_v0 = vsub.f32 %v5631_v58, %v17869_v6 }
 0x830   : > { %v5441_v61 = vsel %vm5027_vm3, %v14995_v28, 0.0  ;;  %v5634_v53 = vsel %vm5027_vm3, %v14995_v28, 0  ;;  %v5438_v28 = vsel %vm5027_vm3, %v14993_v11, 0.0  ;;  %v5363_v11 = vsel %vm5027_vm3, %v17389_v36, 0.0 }
 0x831   : > { %5442 = vadd.xlane.f32.xlu0 %v5441_v61  ;;  %v5993_v43 = vand.u32 4294901760, %v5992_v44  ;;  %v20057_v41 = vand.u32 4294901760, %v17878_v0  ;;  %v17885_v42 = vand.u32 4294901760, %v5634_v53 }
 0x832   : > { %5361 = vadd.xlane.f32.xlu1 %v5360_v3  ;;  %v20518_v3 = vld [vmem:[#allocation34_spill] sm:$0xff] }
 0x833   : > { %20517 = vst [vmem:[#allocation135_spill] sm:$0xff] %v17885_v42  ;;  %12726 = vmatprep.mubr.f32.mxu1 %v5993_v43  ;;  %v6012_v58 = vsub.f32 %v17878_v0, %v20057_v41  ;;  %v17891_v13 = vsub.f32 %v5634_v53, %v17885_v42  ;;  %v5357_v53 = vsel %vm5027_vm3, %v17328_v35, 0.0  ;;  %v20519_v43 = vld [vmem:[#allocation44_spill] sm:$0xff]  ;;  %v5369_v35 = vsel %vm5027_vm3, %v17434_v32, 0.0  ;;  %v20525_v32 = vld [vmem:[#allocation90_spill] sm:$0xff]  ;;  %v20535_v41 = vld [vmem:[#allocation89_spill] sm:$0xff] }
 0x834   : > { %12727 = vmatmul.mubr.f32.gmra.mrb[44].mxu1 %v6003_v40  ;;  %v5366_v40 = vsel %vm5027_vm3, %v17454_v49, 0.0  ;;  %v20520_v49 = vld [vmem:[#allocation51_spill] sm:$0xff] }
 0x835   : > { %5352 = vadd.xlane.f32.xlu0 %v5351_v31  ;;  %v6013_v44 = vand.u32 4294901760, %v6012_v58  ;;  %v20056_v61 = vand.u32 4294901760, %v17891_v13  ;;  %v13832_v58 = vpack.c.bf16 %v20519_v43, %v20518_v3  ;;  %v20521_v31 = vld [vmem:[#allocation22_spill] sm:$0xff] }
 0x836   : > { %5439 = vadd.xlane.f32.xlu1 %v5438_v28  ;;  %v20522_v28 = vld [vmem:[#allocation37_spill] sm:$0xff] }
 0x837   : > { %12729 = vmatprep.mubr.f32.mxu1 %v6013_v44  ;;  %v6022_v39 = vsub.f32 %v17891_v13, %v20056_v61  ;;  %v13836_v36 = vpack.c.bf16 %v20522_v28, %v20521_v31  ;;  %v20523_v44 = vld [vmem:[#allocation46_spill] sm:$0xff] }
 0x838   : > { %v20534_v61 = vld [vmem:[#allocation62_spill] sm:$0xff] }
 0x839   : > { %5358 = vadd.xlane.f32.xlu0 %v5357_v53  ;;  %v6023_v56 = vand.u32 4294901760, %v6022_v39  ;;  %v20526_v53 = vld [vmem:[#allocation50_spill] sm:$0xff] }
 0x83a   : > { %5367 = vadd.xlane.f32.xlu1 %v5366_v40  ;;  %v20527_v40 = vld [vmem:[#allocation47_spill] sm:$0xff] }
 0x83b   : > { %12730 = vmatmul.mubr.f32.gmra.mrb[46].mxu1 %v6023_v56  ;;  %v20528_v56 = vld [vmem:[#allocation95_spill] sm:$0xff] }
 0x83c   : > { %12748 = vmatprep.mubr.f32.mxu1 %v17319_v16 }
 0x83d   : > { %5364 = vadd.xlane.f32.xlu0 %v5363_v11  ;;  %v20529_v11 = vld [vmem:[#allocation59_spill] sm:$0xff] }
 0x83f   : > { %12749 = vmatmul.mubr.f32.vlgmr.msra.gmra.mrb[16].mxu1 %v17291_v9 }
 0x840   : > { %13831 = vmatpush3.bf16.msra.mxu1 %v17466_v34  ;;  %12751 = vmatprep.mubr.f32.mxu1 %v17383_v38  ;;  %v20524_v34 = vld [vmem:[#allocation23_spill] sm:$0xff] }
 0x841   : > { %13833 = vmatprep.subr.bf16.mxu1 %v13832_v58  ;;  %5370 = vadd.xlane.f32.xlu0 %v5369_v35  ;;  %v13840_v39 = vpack.c.bf16 %v20524_v34, %v20523_v44 }
 0x843   : > { %12752 = vmatmul.mubr.f32.gmra.mrb[18].mxu1 %v20520_v49 }
 0x844   : > { %13835 = vmatpush3.bf16.msra.mxu1 %v13832_v58  ;;  %12754 = vmatprep.mubr.f32.mxu1 %v17428_v8  ;;  %v20530_v58 = vld [vmem:[#allocation98_spill] sm:$0xff] }
 0x845   : > { %13837 = vmatprep.subr.bf16.mxu1 %v13836_v36 }
 0x847   : > { %12755 = vmatmul.mubr.f32.gmra.mrb[20].mxu1 %v17408_v24 }
 0x848   : > { %13839 = vmatpush3.bf16.msra.mxu1 %v13836_v36  ;;  %12757 = vmatprep.mubr.f32.mxu1 %v17472_v45  ;;  %v20532_v36 = vld [vmem:[#allocation77_spill] sm:$0xff] }
 0x849   : > { %13841 = vmatprep.subr.bf16.mxu1 %v13840_v39 }
 0x84b   : > { %12758 = vmatmul.mubr.f32.gmra.mrb[22].mxu1 %v17446_v19 }
 0x84c   : > { %13843 = vmatpush3.bf16.msra.mxu1 %v13840_v39  ;;  %12760 = vmatprep.mubr.f32.mxu1 %v17510_v33  ;;  %v20533_v39 = vld [vmem:[#allocation101_spill] sm:$0xff] }
 0x84d   : > { %13845 = vmatprep.subr.bf16.mxu1 %v20525_v32 }
 0x84f   : > { %12761 = vmatmul.mubr.f32.gmra.mrb[24].mxu1 %v17493_v27 }
 0x850   : > { %12763 = vmatprep.mubr.f32.mxu1 %v17544_v52 }
 0x853   : > { %12764 = vmatmul.mubr.f32.gmra.mrb[26].mxu1 %v17525_v37 }
 0x854   : > { %12766 = vmatprep.mubr.f32.mxu1 %v17578_v62  ;;  %v20564_v62 = vld [vmem:[#allocation20_spill] sm:$0xff] }
 0x857   : > { %12767 = vmatmul.mubr.f32.gmra.mrb[28].mxu1 %v17560_v23  ;;  %v20562_v23 = vld [vmem:[#allocation120_spill] sm:$0xff] }
 0x858   : > { %12769 = vmatprep.mubr.f32.mxu1 %v17618_v50 }
 0x85b   : > { %12770 = vmatmul.mubr.f32.gmra.mrb[30].mxu1 %v17601_v60  ;;  %v20559_v60 = vld [vmem:[#allocation32_spill] sm:$0xff] }
 0x85c   : > { %12772 = vmatprep.mubr.f32.mxu1 %v17652_v47 }
 0x85f   : > { %12773 = vmatmul.mubr.f32.gmra.mrb[32].mxu1 %v17631_v14  ;;  %v20555_v14 = vld [vmem:[#allocation106_spill] sm:$0xff] }
 0x860   : > { %12775 = vmatprep.mubr.f32.mxu1 %v17686_v1 }
 0x863   : > { %12776 = vmatmul.mubr.f32.gmra.mrb[34].mxu1 %v17667_v25  ;;  %v20553_v25 = vld [vmem:[#allocation96_spill] sm:$0xff] }
 0x864   : > { %12778 = vmatprep.mubr.f32.mxu1 %v17722_v30 }
 0x866   : > { %v17958_v35 = vpop.xlane.xlu1 %5373 }
 0x867   : > { %12779 = vmatmul.mubr.f32.gmra.mrb[36].mxu1 %v17704_v4  ;;  %20531 = vst [vmem:[#allocation34_spill] sm:$0xff] %v17958_v35  ;;  %v20540_v35 = vld [vmem:[#allocation81_spill] sm:$0xff]  ;;  %v20552_v4 = vld [vmem:[#allocation39_spill] sm:$0xff] }
 0x868   : > { %12781 = vmatprep.mubr.f32.mxu1 %v17761_v54  ;;  %v20550_v54 = vld [vmem:[#allocation103_spill] sm:$0xff] }
 0x86b   : > { %12782 = vmatmul.mubr.f32.gmra.mrb[38].mxu1 %v17745_v15 }
 0x86c   : > { %12784 = vmatprep.mubr.f32.mxu1 %v17797_v5  ;;  %v20543_v5 = vld [vmem:[#allocation86_spill] sm:$0xff] }
 0x86f   : > { %12785 = vmatmul.mubr.f32.gmra.mrb[40].mxu1 %v17774_v2  ;;  %v20542_v2 = vld [vmem:[#allocation27_spill] sm:$0xff] }
 0x870   : > { %12787 = vmatprep.mubr.f32.mxu1 %v17833_v21 }
 0x873   : > { %12788 = vmatmul.mubr.f32.gmra.mrb[42].mxu1 %v17818_v48  ;;  %v17968_v48 = vpop.xlane.xlu1 %5379 }
 0x874   : > { %12790 = vmatprep.mubr.f32.mxu1 %v17858_v29  ;;  %20539 = vst [vmem:[#allocation44_spill] sm:$0xff] %v17968_v48 }
 0x877   : > { %12791 = vmatmul.mubr.f32.gmra.mrb[44].mxu1 %v17843_v22  ;;  %v17973_v21 = vpop.xlane.xlu1 %5385 }
 0x878   : > { %12793 = vmatprep.mubr.f32.mxu1 %v17869_v6  ;;  %v20537_v6 = vld [vmem:[#allocation91_spill] sm:$0xff]  ;;  %20541 = vst [vmem:[#allocation51_spill] sm:$0xff] %v17973_v21  ;;  %v20551_v21 = vld [vmem:[#allocation48_spill] sm:$0xff] }
 0x879   : > { %v20538_v22 = vand.u32 4294901760, %v20537_v6  ;;  %v20548_v6 = vld [vmem:[#allocation80_spill] sm:$0xff]  ;;  %v5156_v30 = vsub.f32 %v20552_v4, %v20551_v21  ;;  %v20560_v4 = vld [vmem:[#allocation43_spill] sm:$0xff] }
 0x87a   : > { %v5158_v21 = vsub.f32 %v20560_v4, %v20559_v60 }
 0x87b   : > { %12794 = vmatmul.mubr.f32.gmra.mrb[46].mxu1 %v17885_v42  ;;  %v20536_v42 = vand.u32 4294901760, %v20535_v41  ;;  %v20545_v41 = vld [vmem:[#allocation71_spill] sm:$0xff] }
 0x87c   : > { %12812 = vmatprep.mubr.f32.mxu1 %v20526_v53 }
 0x87d   : > { %v13860_v29 = vpack.c.bf16 %v20538_v22, %v20536_v42  ;;  %v20546_v22 = vld [vmem:[#allocation60_spill] sm:$0xff] }
 0x87f   : > { %12813 = vmatmul.mubr.f32.vlgmr.msra.gmra.mrb[16].mxu1 %v20527_v40 }
 0x880   : > { %13847 = vmatpush3.bf16.msra.mxu1 %v20525_v32  ;;  %12815 = vmatprep.mubr.f32.mxu1 %v17392_v55 }
 0x881   : > { %13849 = vmatprep.subr.bf16.mxu1 %v20528_v56 }
 0x883   : > { %12816 = vmatmul.mubr.f32.gmra.mrb[18].mxu1 %v20529_v11 }
 0x884   : > { %13851 = vmatpush3.bf16.msra.mxu1 %v20528_v56  ;;  %12818 = vmatprep.mubr.f32.mxu1 %v17439_v10 }
 0x885   : > { %13853 = vmatprep.subr.bf16.mxu1 %v20530_v58 }
 0x886   : > { %v17977_v15 = vpop.xlane.xlu1 %5397 }
 0x887   : > { %12819 = vmatmul.mubr.f32.gmra.mrb[20].mxu1 %v17422_v59  ;;  %20544 = vst [vmem:[#allocation22_spill] sm:$0xff] %v17977_v15  ;;  %v5188_v15 = vmul.f32 1.442695, %v5156_v30  ;;  %v5192_v30 = vmul.f32 1.442695, %v5158_v21  ;;  %v20569_v21 = vand.u32 4294901760, %v20526_v53 }
 0x888   : > { %13855 = vmatpush3.bf16.msra.mxu1 %v20530_v58  ;;  %12821 = vmatprep.mubr.f32.mxu1 %v20532_v36  ;;  %v20574_v53 = vand.u32 4294901760, %v20529_v11  ;;  %v20581_v11 = vand.u32 4294901760, %v20532_v36  ;;  %v20590_v36 = vand.u32 4294901760, %v20548_v6 }
 0x889   : > { %13857 = vmatprep.subr.bf16.mxu1 %v20533_v39  ;;  %14996 = vpow2.f32 %v5188_v15 }
 0x88a   : > { %14998 = vpow2.f32 %v5192_v30 }
 0x88b   : > { %12822 = vmatmul.mubr.f32.gmra.mrb[22].mxu1 %v20534_v61 }
 0x88c   : > { %13859 = vmatpush3.bf16.msra.mxu1 %v20533_v39  ;;  %12824 = vmatprep.mubr.f32.mxu1 %v17519_v63 }
 0x88d   : > { %13861 = vmatprep.subr.bf16.mxu1 %v13860_v29 }
 0x88e   : > { %v17981_v42 = vpop.xlane.xlu1 %5403 }
 0x88f   : > { %12825 = vmatmul.mubr.f32.gmra.mrb[24].mxu1 %v20540_v35  ;;  %20547 = vst [vmem:[#allocation37_spill] sm:$0xff] %v17981_v42  ;;  %v20556_v42 = vld [vmem:[#allocation116_spill] sm:$0xff] }
 0x890   : > { %12827 = vmatprep.mubr.f32.mxu1 %v20542_v2 }
 0x893   : > { %12828 = vmatmul.mubr.f32.gmra.mrb[26].mxu1 %v20543_v5  ;;  %v18008_v15 = vpop.eup %14996 }
 0x894   : > { %12830 = vmatprep.mubr.f32.mxu1 %v20545_v41  ;;  %20565 = vst [vmem:[#allocation47_spill] sm:$0xff] %v18008_v15 }
 0x896   : > { %v17985_v48 = vpop.xlane.xlu1 %5409 }
 0x897   : > { %12831 = vmatmul.mubr.f32.gmra.mrb[28].mxu1 %v20546_v22  ;;  %20549 = vst [vmem:[#allocation46_spill] sm:$0xff] %v17985_v48  ;;  %v20558_v48 = vld [vmem:[#allocation112_spill] sm:$0xff] }
 0x898   : > { %12833 = vmatprep.mubr.f32.mxu1 %v17625_v7 }
 0x89a   : > { %v17992_v1 = vpop.xlane.xlu1 %5391 }
 0x89b   : > { %12834 = vmatmul.mubr.f32.gmra.mrb[30].mxu1 %v20548_v6  ;;  %20554 = vst [vmem:[#allocation23_spill] sm:$0xff] %v17992_v1  ;;  %v20563_v1 = vld [vmem:[#allocation58_spill] sm:$0xff]  ;;  %v20597_v6 = vand.u32 4294901760, %v17768_v12 }
 0x89c   : > { %12836 = vmatprep.mubr.f32.mxu1 %v20550_v54  ;;  %v5160_v37 = vsub.f32 %v20564_v62, %v20563_v1  ;;  %v18023_v1 = vpop.eup %14998 }
 0x89e   : > { %v5196_v60 = vmul.f32 1.442695, %v5160_v37 }
 0x89f   : > { %12837 = vmatmul.mubr.f32.gmra.mrb[32].mxu1 %v20553_v25 }
 0x8a0   : > { %12839 = vmatprep.mubr.f32.mxu1 %v17693_v26  ;;  %15000 = vpow2.f32 %v5196_v60 }
 0x8a3   : > { %12840 = vmatmul.mubr.f32.gmra.mrb[34].mxu1 %v20555_v14 }
 0x8a4   : > { %12842 = vmatprep.mubr.f32.mxu1 %v20556_v42 }
 0x8a6   : > { %v17996_v47 = vpop.xlane.xlu1 %5421 }
 0x8a7   : > { %20557 = vst [vmem:[#allocation90_spill] sm:$0xff] %v17996_v47  ;;  %12843 = vmatmul.mubr.f32.gmra.mrb[36].mxu1 %v20558_v48 }
 0x8a8   : > { %12845 = vmatprep.mubr.f32.mxu1 %v17768_v12  ;;  %v20604_v12 = vand.u32 4294901760, %v17850_v18 }
 0x8aa   : > { %v18031_v30 = vpop.eup %15000 }
 0x8ab   : > { %v18002_v50 = vpop.xlane.xlu1 %5415  ;;  %12846 = vmatmul.mubr.f32.gmra.mrb[38].mxu1 %v20562_v23 }
 0x8ac   : > { %20561 = vst [vmem:[#allocation50_spill] sm:$0xff] %v18002_v50  ;;  %12848 = vmatprep.mubr.f32.mxu1 %v17805_v20  ;;  %v20572_v50 = vand.u32 4294901760, %v20519_v43 }
 0x8af   : > { %v5350_v47 = vpop.xlane.xlu1 %5349  ;;  %12849 = vmatmul.mubr.f32.gmra.mrb[40].mxu1 %v17792_v51 }
 0x8b0   : > { %v18012_v52 = vadd.f32 %v18008_v15, %v5350_v47  ;;  %12851 = vmatprep.mubr.f32.mxu1 %v17839_v17 }
 0x8b2   : > { %20566 = vst [vmem:[#allocation95_spill] sm:$0xff] %v18012_v52 }
 0x8b3   : > { %v18015_v4 = vpop.xlane.xlu1 %5427  ;;  %12852 = vmatmul.mubr.f32.gmra.mrb[42].mxu1 %v17831_v57 }
 0x8b4   : > { %20567 = vst [vmem:[#allocation59_spill] sm:$0xff] %v18015_v4  ;;  %12854 = vmatprep.mubr.f32.mxu1 %v17862_v46  ;;  %v20571_v4 = vand.u32 4294901760, %v20518_v3  ;;  %v20577_v3 = vand.u32 4294901760, %v17439_v10  ;;  %v20583_v10 = vand.u32 4294901760, %v17519_v63  ;;  %v20589_v63 = vand.u32 4294901760, %v17625_v7 }
 0x8b5   : > { %v20596_v7 = vand.u32 4294901760, %v20558_v48  ;;  %v20603_v48 = vand.u32 4294901760, %v17862_v46  ;;  %v20608_v46 = vld [vmem:[#allocation79_spill] sm:$0xff] }
 0x8b6   : > { %v13864_v15 = vpack.c.bf16 %v20572_v50, %v20571_v4  ;;  %v20578_v50 = vand.u32 4294901760, %v17422_v59  ;;  %v20584_v59 = vand.u32 4294901760, %v20540_v35  ;;  %v20591_v35 = vand.u32 4294901760, %v20550_v54  ;;  %v20619_v4 = vld [vmem:[#allocation122_spill] sm:$0xff] }
 0x8b7   : > { %v18019_v62 = vpop.xlane.xlu1 %5433  ;;  %12855 = vmatmul.mubr.f32.gmra.mrb[44].mxu1 %v17850_v18  ;;  %v20598_v54 = vand.u32 4294901760, %v20562_v23  ;;  %v20605_v23 = vand.u32 4294901760, %v17878_v0  ;;  %v20611_v18 = vld [vmem:[#allocation94_spill] sm:$0xff] }
 0x8b8   : > { %20568 = vst [vmem:[#allocation98_spill] sm:$0xff] %v18019_v62  ;;  %12857 = vmatprep.mubr.f32.mxu1 %v17878_v0  ;;  %v20570_v62 = vand.u32 4294901760, %v20527_v40  ;;  %v20576_v40 = vand.u32 4294901760, %v20522_v28  ;;  %v20585_v28 = vand.u32 4294901760, %v20542_v2  ;;  %v20592_v2 = vand.u32 4294901760, %v20553_v25  ;;  %v20613_v0 = vld [vmem:[#allocation97_spill] sm:$0xff] }
 0x8b9   : > { %v20599_v25 = vand.u32 4294901760, %v17805_v20  ;;  %v20606_v20 = vand.u32 4294901760, %v17891_v13 }
 0x8bb   : > { %v5356_v47 = vpop.xlane.xlu1 %5355  ;;  %12858 = vmatmul.mubr.f32.gmra.mrb[46].mxu1 %v17891_v13  ;;  %v20612_v13 = vld [vmem:[#allocation76_spill] sm:$0xff] }
 0x8bc   : > { %v18027_v37 = vadd.f32 %v18023_v1, %v5356_v47  ;;  %12876 = vmatprep.mubr.f32.mxu1 %v20569_v21  ;;  %v20573_v47 = vand.u32 4294901760, %v17392_v55  ;;  %v20575_v21 = vand.u32 4294901760, %v20521_v31  ;;  %v20579_v55 = vand.u32 4294901760, %v20523_v44 }
 0x8bd   : > { %v20582_v31 = vand.u32 4294901760, %v20534_v61  ;;  %v20586_v44 = vand.u32 4294901760, %v20543_v5  ;;  %v20588_v61 = vand.u32 4294901760, %v20546_v22  ;;  %v20593_v5 = vand.u32 4294901760, %v17693_v26 }
 0x8be   : > { %v20595_v22 = vand.u32 4294901760, %v20556_v42  ;;  %v20600_v26 = vand.u32 4294901760, %v17792_v51  ;;  %v20602_v42 = vand.u32 4294901760, %v17831_v57  ;;  %v20607_v51 = vld [vmem:[#allocation26_spill] sm:$0xff] }
 0x8bf   : > { %v5362_v60 = vpop.xlane.xlu1 %5361  ;;  %12877 = vmatmul.mubr.f32.vlgmr.msra.gmra.mrb[16].mxu1 %v20570_v62  ;;  %v13868_v62 = vpack.c.bf16 %v20576_v40, %v20575_v21  ;;  %v20609_v57 = vld [vmem:[#allocation66_spill] sm:$0xff]  ;;  %v20623_v21 = vld [vmem:[#allocation131_spill] sm:$0xff] }
 0x8c0   : > { %v18040_v52 = vadd.f32 %v18031_v30, %v5362_v60  ;;  %13863 = vmatpush3.bf16.msra.mxu1 %v13860_v29  ;;  %12879 = vmatprep.mubr.f32.mxu1 %v20573_v47  ;;  %v20580_v29 = vand.u32 4294901760, %v20524_v34  ;;  %v20587_v34 = vand.u32 4294901760, %v20545_v41  ;;  %v20594_v41 = vand.u32 4294901760, %v20555_v14  ;;  %v20620_v60 = vld [vmem:[#allocation118_spill] sm:$0xff]  ;;  %v20621_v47 = vld [vmem:[#allocation127_spill] sm:$0xff] }
 0x8c1   : > { %13865 = vmatprep.subr.bf16.mxu1 %v13864_v15  ;;  %v20601_v14 = vand.u32 4294901760, %v17839_v17  ;;  %v20610_v17 = vld [vmem:[#allocation70_spill] sm:$0xff] }
 0x8c2   : > { %v13872_v43 = vpack.c.bf16 %v20580_v29, %v20579_v55  ;;  %v20624_v40 = vld [vmem:[#allocation130_spill] sm:$0xff]  ;;  %v20628_v55 = vld [vmem:[#allocation135_spill] sm:$0xff] }
 0x8c3   : > { %12880 = vmatmul.mubr.f32.gmra.mrb[18].mxu1 %v20574_v53  ;;  %v20622_v53 = vld [vmem:[#allocation124_spill] sm:$0xff]  ;;  %v18205_v29 = vld [vmem:[%s20629_s25 + $0x10] sm:$0xff] }
 0x8c4   : > { %13867 = vmatpush3.bf16.msra.mxu1 %v13864_v15  ;;  %12882 = vmatprep.mubr.f32.mxu1 %v20577_v3  ;;  %v20618_v15 = vld [vmem:[#allocation111_spill] sm:$0xff]  ;;  %v20626_v3 = vld [vmem:[#allocation132_spill] sm:$0xff] }
 0x8c5   : > { %13869 = vmatprep.subr.bf16.mxu1 %v13868_v62 }
 0x8c7   : > { %12883 = vmatmul.mubr.f32.gmra.mrb[20].mxu1 %v20578_v50  ;;  %v20627_v50 = vld [vmem:[#allocation134_spill] sm:$0xff] }
 0x8c8   : > { %13871 = vmatpush3.bf16.msra.mxu1 %v13868_v62  ;;  %12885 = vmatprep.mubr.f32.mxu1 %v20581_v11  ;;  %v20625_v62 = vld [vmem:[#allocation133_spill] sm:$0xff] }
 0x8c9   : > { %13873 = vmatprep.subr.bf16.mxu1 %v13872_v43 }
 0x8cb   : > { %12886 = vmatmul.mubr.f32.gmra.mrb[22].mxu1 %v20582_v31 }
 0x8cc   : > { %13875 = vmatpush3.bf16.msra.mxu1 %v13872_v43  ;;  %12888 = vmatprep.mubr.f32.mxu1 %v20583_v10  ;;  %v18212_v10 = vld [vmem:[%s20629_s25 + $0x18] sm:$0xff] }
 0x8cd   : > { %13877 = vmatprep.subr.bf16.mxu1 %v20525_v32 }
 0x8cf   : > { %12889 = vmatmul.mubr.f32.gmra.mrb[24].mxu1 %v20584_v59  ;;  %v20106_v59 = vand.u32 4294901760, %v18205_v29 }
 0x8d0   : > { %12891 = vmatprep.mubr.f32.mxu1 %v20585_v28  ;;  %v18216_v28 = vld [vmem:[%s20629_s25 + $0x20] sm:$0xff] }
 0x8d3   : > { %12892 = vmatmul.mubr.f32.gmra.mrb[26].mxu1 %v20586_v44  ;;  %v18219_v44 = vld [vmem:[%s20629_s25 + $0x28] sm:$0xff] }
 0x8d4   : > { %12894 = vmatprep.mubr.f32.mxu1 %v20587_v34  ;;  %v20105_v34 = vand.u32 4294901760, %v18212_v10 }
 0x8d7   : > { %12895 = vmatmul.mubr.f32.gmra.mrb[28].mxu1 %v20588_v61 }
 0x8d8   : > { %12897 = vmatprep.mubr.f32.mxu1 %v20589_v63  ;;  %v20104_v63 = vand.u32 4294901760, %v18216_v28 }
 0x8db   : > { %12898 = vmatmul.mubr.f32.gmra.mrb[30].mxu1 %v20590_v36  ;;  %v20103_v36 = vand.u32 4294901760, %v18219_v44 }
 0x8dc   : > { %12900 = vmatprep.mubr.f32.mxu1 %v20591_v35  ;;  %v18234_v35 = vpack.c.bf16 %v20105_v34, %v20106_v59  ;;  %v20684_v34 = vld [vmem:[#allocation78_spill] sm:$0xff] }
 0x8de   : > { %20630 = vst [vmem:[#allocation77_spill] sm:$0xff] %v18234_v35 }
 0x8df   : > { %12901 = vmatmul.mubr.f32.gmra.mrb[32].mxu1 %v20592_v2 }
 0x8e0   : > { %12903 = vmatprep.mubr.f32.mxu1 %v20593_v5  ;;  %v18245_v5 = vpack.c.bf16 %v20103_v36, %v20104_v63 }
 0x8e2   : > { %20631 = vst [vmem:[#allocation101_spill] sm:$0xff] %v18245_v5 }
 0x8e3   : > { %12904 = vmatmul.mubr.f32.gmra.mrb[34].mxu1 %v20594_v41 }
 0x8e4   : > { %12906 = vmatprep.mubr.f32.mxu1 %v20595_v22  ;;  %v20632_v22 = vld [vmem:[#allocation29_spill] sm:$0xff] }
 0x8e7   : > { %12907 = vmatmul.mubr.f32.gmra.mrb[36].mxu1 %v20596_v7  ;;  %v20633_v7 = vld [vmem:[#allocation38_spill] sm:$0xff] }
 0x8e8   : > { %12909 = vmatprep.mubr.f32.mxu1 %v20597_v6  ;;  %v5157_v6 = vsub.f32 %v20633_v7, %v20632_v22  ;;  %v20650_v7 = vld [vmem:[#allocation65_spill] sm:$0xff] }
 0x8eb   : > { %12910 = vmatmul.mubr.f32.gmra.mrb[38].mxu1 %v20598_v54  ;;  %v5190_v54 = vmul.f32 1.442695, %v5157_v6  ;;  %v20651_v6 = vld [vmem:[#allocation56_spill] sm:$0xff] }
 0x8ec   : > { %12912 = vmatprep.mubr.f32.mxu1 %v20599_v25  ;;  %v20634_v25 = vld [vmem:[#allocation31_spill] sm:$0xff] }
 0x8ed   : > { %15002 = vpow2.f32 %v5190_v54  ;;  %v5169_v54 = vsub.f32 %v20651_v6, %v20650_v7 }
 0x8ef   : > { %12913 = vmatmul.mubr.f32.gmra.mrb[40].mxu1 %v20600_v26  ;;  %v20635_v26 = vld [vmem:[#allocation24_spill] sm:$0xff] }
 0x8f0   : > { %12915 = vmatprep.mubr.f32.mxu1 %v20601_v14  ;;  %v5159_v14 = vsub.f32 %v20635_v26, %v20634_v25 }
 0x8f3   : > { %12916 = vmatmul.mubr.f32.gmra.mrb[42].mxu1 %v20602_v42 }
 0x8f4   : > { %12918 = vmatprep.mubr.f32.mxu1 %v20603_v48  ;;  %v20636_v48 = vld [vmem:[#allocation52_spill] sm:$0xff] }
 0x8f7   : > { %12919 = vmatmul.mubr.f32.gmra.mrb[44].mxu1 %v20604_v12  ;;  %v20637_v12 = vld [vmem:[#allocation35_spill] sm:$0xff] }
 0x8f8   : > { %12921 = vmatprep.mubr.f32.mxu1 %v20605_v23  ;;  %v5161_v23 = vsub.f32 %v20637_v12, %v20636_v48  ;;  %v20652_v12 = vld [vmem:[#allocation73_spill] sm:$0xff] }
 0x8fb   : > { %12922 = vmatmul.mubr.f32.gmra.mrb[46].mxu1 %v20606_v20  ;;  %v5194_v20 = vmul.f32 1.442695, %v5159_v14 }
 0x8fc   : > { %12940 = vmatprep.mubr.f32.mxu1 %v17319_v16 }
 0x8fd   : > { %15004 = vpow2.f32 %v5194_v20 }
 0x8ff   : > { %12941 = vmatmul.mubr.f32.vlgmr.msra.gmra.mrb[16].mxu1 %v17291_v9 }
 0x900   : > { %13879 = vmatpush3.bf16.msra.mxu1 %v20525_v32  ;;  %12943 = vmatprep.mubr.f32.mxu1 %v17383_v38  ;;  %v20614_v32 = vld [vmem:[#allocation93_spill] sm:$0xff] }
 0x901   : > { %13881 = vmatprep.subr.bf16.mxu1 %v20528_v56 }
 0x903   : > { %12944 = vmatmul.mubr.f32.gmra.mrb[18].mxu1 %v20520_v49 }
 0x904   : > { %13883 = vmatpush3.bf16.msra.mxu1 %v20528_v56  ;;  %12946 = vmatprep.mubr.f32.mxu1 %v17428_v8  ;;  %v20615_v56 = vld [vmem:[#allocation108_spill] sm:$0xff] }
 0x905   : > { %13885 = vmatprep.subr.bf16.mxu1 %v20530_v58 }
 0x907   : > { %12947 = vmatmul.mubr.f32.gmra.mrb[20].mxu1 %v17408_v24 }
 0x908   : > { %13887 = vmatpush3.bf16.msra.mxu1 %v20530_v58  ;;  %12949 = vmatprep.mubr.f32.mxu1 %v17472_v45  ;;  %v20616_v58 = vld [vmem:[#allocation105_spill] sm:$0xff] }
 0x909   : > { %13889 = vmatprep.subr.bf16.mxu1 %v20533_v39 }
 0x90b   : > { %12950 = vmatmul.mubr.f32.gmra.mrb[22].mxu1 %v17446_v19 }
 0x90c   : > { %13891 = vmatpush3.bf16.msra.mxu1 %v20533_v39  ;;  %12952 = vmatprep.mubr.f32.mxu1 %v17510_v33  ;;  %v20617_v39 = vld [vmem:[#allocation114_spill] sm:$0xff] }
 0x90f   : > { %12953 = vmatmul.mubr.f32.gmra.mrb[24].mxu1 %v17493_v27 }
 0x910   : > { %12955 = vmatprep.mubr.f32.mxu1 %v20607_v51 }
 0x913   : > { %12956 = vmatmul.mubr.f32.gmra.mrb[26].mxu1 %v20608_v46 }
 0x914   : > { %12958 = vmatprep.mubr.f32.mxu1 %v20609_v57 }
 0x917   : > { %12959 = vmatmul.mubr.f32.gmra.mrb[28].mxu1 %v20610_v17 }
 0x918   : > { %12961 = vmatprep.mubr.f32.mxu1 %v20611_v18 }
 0x91b   : > { %12962 = vmatmul.mubr.f32.gmra.mrb[30].mxu1 %v20612_v13 }
 0x91c   : > { %12964 = vmatprep.mubr.f32.mxu1 %v20613_v0 }
 0x91f   : > { %12965 = vmatmul.mubr.f32.gmra.mrb[32].mxu1 %v20614_v32 }
 0x920   : > { %12967 = vmatprep.mubr.f32.mxu1 %v20615_v56 }
 0x923   : > { %12968 = vmatmul.mubr.f32.gmra.mrb[34].mxu1 %v20616_v58 }
 0x924   : > { %12970 = vmatprep.mubr.f32.mxu1 %v20617_v39 }
 0x927   : > { %12971 = vmatmul.mubr.f32.gmra.mrb[36].mxu1 %v20618_v15 }
 0x928   : > { %12973 = vmatprep.mubr.f32.mxu1 %v20619_v4 }
 0x92b   : > { %12974 = vmatmul.mubr.f32.gmra.mrb[38].mxu1 %v20620_v60 }
 0x92c   : > { %12976 = vmatprep.mubr.f32.mxu1 %v20621_v47 }
 0x92f   : > { %12977 = vmatmul.mubr.f32.gmra.mrb[40].mxu1 %v20622_v53 }
 0x930   : > { %12979 = vmatprep.mubr.f32.mxu1 %v20623_v21 }
 0x933   : > { %12980 = vmatmul.mubr.f32.gmra.mrb[42].mxu1 %v20624_v40 }
 0x934   : > { %12982 = vmatprep.mubr.f32.mxu1 %v20625_v62 }
 0x937   : > { %12983 = vmatmul.mubr.f32.gmra.mrb[44].mxu1 %v20626_v3 }
 0x938   : > { %12985 = vmatprep.mubr.f32.mxu1 %v20627_v50 }
 0x93b   : > { %12986 = vmatmul.mubr.f32.gmra.mrb[46].mxu1 %v20628_v55 }
 0x93c   : > { %13004 = vmatprep.mubr.f32.mxu1 %v17319_v16 }
 0x93f   : > { %13005 = vmatmul.mubr.f32.vlgmr.msra.gmra.mrb[16].mxu1 %v17291_v9 }
 0x940   : > { %13007 = vmatprep.mubr.f32.mxu1 %v17383_v38  ;;  %v18182_v38 = vpop.xlane.xlu0 %5376 }
 0x943   : > { %13008 = vmatmul.mubr.f32.gmra.mrb[18].mxu1 %v20520_v49  ;;  %v18202_v49 = vld [vmem:[%s20629_s25 + $0x8] sm:$0xff] }
 0x944   : > { %13010 = vmatprep.mubr.f32.mxu1 %v17428_v8  ;;  %v20107_v31 = vand.u32 4294901760, %v18202_v49 }
 0x947   : > { %13011 = vmatmul.mubr.f32.gmra.mrb[20].mxu1 %v17408_v24 }
 0x948   : > { %13013 = vmatprep.mubr.f32.mxu1 %v17472_v45 }
 0x94b   : > { %13014 = vmatmul.mubr.f32.gmra.mrb[22].mxu1 %v17446_v19 }
 0x94c   : > { %13016 = vmatprep.mubr.f32.mxu1 %v17510_v33  ;;  %v18199_v33 = vld [vmem:[%s20629_s25] sm:$0xff] }
 0x94d   : > { %v20108_v11 = vand.u32 4294901760, %v18199_v33 }
 0x94f   : > { %13017 = vmatmul.mubr.f32.gmra.mrb[24].mxu1 %v17493_v27  ;;  %v18184_v27 = vpop.xlane.xlu0 %5382  ;;  %v18226_v61 = vpack.c.bf16 %v20107_v31, %v20108_v11 }
 0x950   : > { %13019 = vmatprep.mubr.f32.mxu1 %v20607_v51  ;;  %v20638_v51 = vld [vmem:[#allocation41_spill] sm:$0xff] }
 0x951   : > { %13893 = vmatprep.subr.bf16.mxu1 %v18226_v61 }
 0x952   : > { %13895 = vmatpush3.bf16.msra.mxu1 %v18226_v61 }
 0x953   : > { %13020 = vmatmul.mubr.f32.gmra.mrb[26].mxu1 %v20608_v46  ;;  %v18186_v9 = vpop.xlane.xlu0 %5400  ;;  %13897 = vmatprep.subr.bf16.mxu1 %v18234_v35  ;;  %v20639_v46 = vld [vmem:[#allocation42_spill] sm:$0xff] }
 0x954   : > { %13022 = vmatprep.mubr.f32.mxu1 %v20609_v57  ;;  %v5163_v57 = vsub.f32 %v20639_v46, %v20638_v51  ;;  %v15003_v51 = vpop.eup %15002  ;;  %v5214_v46 = vmul.f32 1.442695, %v5169_v54 }
 0x956   : > { %13899 = vmatpush3.bf16.msra.mxu1 %v18234_v35 }
 0x957   : > { %13023 = vmatmul.mubr.f32.gmra.mrb[28].mxu1 %v20610_v17  ;;  %v18188_v16 = vpop.xlane.xlu0 %5406  ;;  %13901 = vmatprep.subr.bf16.mxu1 %v18245_v5  ;;  %v20640_v17 = vld [vmem:[#allocation63_spill] sm:$0xff] }
 0x958   : > { %13025 = vmatprep.mubr.f32.mxu1 %v20611_v18  ;;  %v20641_v18 = vld [vmem:[#allocation36_spill] sm:$0xff] }
 0x95a   : > { %13903 = vmatpush3.bf16.msra.mxu1 %v18245_v5 }
 0x95b   : > { %13026 = vmatmul.mubr.f32.gmra.mrb[30].mxu1 %v20612_v13  ;;  %v18190_v8 = vpop.xlane.xlu0 %5424  ;;  %v5162_v13 = vsub.f32 %v20641_v18, %v20640_v17  ;;  %v20655_v17 = vld [vmem:[#allocation72_spill] sm:$0xff] }
 0x95c   : > { %13028 = vmatprep.mubr.f32.mxu1 %v20613_v0  ;;  %v20642_v0 = vld [vmem:[#allocation25_spill] sm:$0xff] }
 0x95f   : > { %13029 = vmatmul.mubr.f32.gmra.mrb[32].mxu1 %v20614_v32  ;;  %v18192_v24 = vpop.xlane.xlu0 %5388  ;;  %v20643_v32 = vld [vmem:[#allocation54_spill] sm:$0xff] }
 0x960   : > { %13031 = vmatprep.mubr.f32.mxu1 %v20615_v56  ;;  %v5165_v56 = vsub.f32 %v20643_v32, %v20642_v0  ;;  %v20656_v32 = vld [vmem:[#allocation87_spill] sm:$0xff] }
 0x962   : > { %v5206_v22 = vmul.f32 1.442695, %v5165_v56  ;;  %v20657_v56 = vld [vmem:[#allocation84_spill] sm:$0xff] }
 0x963   : > { %13032 = vmatmul.mubr.f32.gmra.mrb[34].mxu1 %v20616_v58  ;;  %v18194_v45 = vpop.xlane.xlu0 %5412 }
 0x964   : > { %13034 = vmatprep.mubr.f32.mxu1 %v20617_v39  ;;  %v5198_v39 = vmul.f32 1.442695, %v5161_v23  ;;  %v20653_v23 = vld [vmem:[#allocation53_spill] sm:$0xff] }
 0x965   : > { %v5168_v20 = vsub.f32 %v20653_v23, %v20652_v12 }
 0x966   : > { %15006 = vpow2.f32 %v5198_v39  ;;  %v5170_v39 = vsub.f32 %v20657_v56, %v20656_v32 }
 0x967   : > { %13035 = vmatmul.mubr.f32.gmra.mrb[36].mxu1 %v20618_v15  ;;  %v18196_v19 = vpop.xlane.xlu0 %5394  ;;  %v20644_v15 = vld [vmem:[#allocation64_spill] sm:$0xff]  ;;  %v5212_v0 = vmul.f32 1.442695, %v5168_v20 }
 0x968   : > { %13037 = vmatprep.mubr.f32.mxu1 %v20619_v4  ;;  %v20645_v4 = vld [vmem:[#allocation61_spill] sm:$0xff] }
 0x96b   : > { %13038 = vmatmul.mubr.f32.gmra.mrb[38].mxu1 %v20620_v60  ;;  %v18207_v43 = vpop.xlane.xlu0 %5418  ;;  %v5164_v60 = vsub.f32 %v20645_v4, %v20644_v15  ;;  %v15005_v15 = vpop.eup %15004 }
 0x96c   : > { %13040 = vmatprep.mubr.f32.mxu1 %v20621_v47  ;;  %v5202_v47 = vmul.f32 1.442695, %v5163_v57  ;;  %v20654_v57 = vld [vmem:[#allocation75_spill] sm:$0xff] }
 0x96d   : > { %v5204_v25 = vmul.f32 1.442695, %v5164_v60  ;;  %v5171_v18 = vsub.f32 %v20655_v17, %v20654_v57  ;;  %v20658_v60 = vld [vmem:[#allocation83_spill] sm:$0xff] }
 0x96e   : > { %15008 = vpow2.f32 %v5202_v47  ;;  %v20659_v47 = vld [vmem:[#allocation45_spill] sm:$0xff] }
 0x96f   : > { %13041 = vmatmul.mubr.f32.gmra.mrb[40].mxu1 %v20622_v53  ;;  %v18238_v2 = vpop.xlane.xlu0 %5430  ;;  %v20646_v53 = vld [vmem:[#allocation57_spill] sm:$0xff]  ;;  %v5218_v4 = vmul.f32 1.442695, %v5171_v18  ;;  %v20667_v18 = vld [vmem:[#allocation82_spill] sm:$0xff] }
 0x970   : > { %13043 = vmatprep.mubr.f32.mxu1 %v20623_v21  ;;  %v20647_v21 = vld [vmem:[#allocation55_spill] sm:$0xff] }
 0x973   : > { %13044 = vmatmul.mubr.f32.gmra.mrb[42].mxu1 %v20624_v40  ;;  %v18249_v41 = vpop.xlane.xlu0 %5436  ;;  %v5167_v40 = vsub.f32 %v20647_v21, %v20646_v53  ;;  %v5173_v53 = vsub.f32 %v20659_v47, %v20658_v60  ;;  %v20670_v60 = vld [vmem:[#allocation49_spill] sm:$0xff] }
 0x974   : > { %13046 = vmatprep.mubr.f32.mxu1 %v20625_v62  ;;  %v5200_v62 = vmul.f32 1.442695, %v5162_v13 }
 0x975   : > { %v5210_v26 = vmul.f32 1.442695, %v5167_v40  ;;  %v18282_v40 = vpop.xlane.xlu1 %5439  ;;  %v5222_v54 = vmul.f32 1.442695, %v5173_v53 }
 0x976   : > { %15010 = vpow2.f32 %v5200_v62 }
 0x977   : > { %13047 = vmatmul.mubr.f32.gmra.mrb[44].mxu1 %v20626_v3  ;;  %v18256_v42 = vpop.xlane.xlu0 %5442  ;;  %v20648_v3 = vld [vmem:[#allocation67_spill] sm:$0xff]  ;;  %15012 = vpow2.f32 %v5206_v22  ;;  %v20662_v22 = vld [vmem:[#allocation40_spill] sm:$0xff] }
 0x978   : > { %13049 = vmatprep.mubr.f32.mxu1 %v20627_v50  ;;  %v20649_v50 = vld [vmem:[#allocation21_spill] sm:$0xff]  ;;  %15014 = vpow2.f32 %v5204_v25  ;;  %v20663_v25 = vld [vmem:[#allocation74_spill] sm:$0xff] }
 0x979   : > { %15016 = vpow2.f32 %v5210_v26  ;;  %v20664_v26 = vld [vmem:[#allocation30_spill] sm:$0xff]  ;;  %v5368_v32 = vpop.xlane.xlu1 %5367 }
 0x97b   : > { %13050 = vmatmul.mubr.f32.gmra.mrb[46].mxu1 %v20628_v55  ;;  %v5353_v58 = vpop.xlane.xlu0 %5352  ;;  %v5166_v55 = vsub.f32 %v20649_v50, %v20648_v3  ;;  %v20660_v3 = vld [vmem:[#allocation95_spill] sm:$0xff]  ;;  %v5216_v50 = vmul.f32 1.442695, %v5170_v39 }
 0x97c   : > { %v5445_v13 = vadd.f32 %v15003_v51, %v5353_v58  ;;  %v15007_v58 = vpop.eup %15006 }
 0x97d   : > { %v5208_v48 = vmul.f32 1.442695, %v5166_v55  ;;  %v20661_v55 = vld [vmem:[#allocation28_spill] sm:$0xff]  ;;  %v18287_v6 = vpop.eup %15008 }
 0x97e   : > { %v5172_v7 = vsub.f32 %v20662_v22, %v20661_v55 }
 0x97f   : > { %v5359_v14 = vpop.xlane.xlu0 %5358  ;;  %15018 = vpow2.f32 %v5208_v48  ;;  %v5175_v48 = vsub.f32 %v20664_v26, %v20663_v25  ;;  %v20672_v26 = vld [vmem:[#allocation88_spill] sm:$0xff] }
 0x980   : > { %15020 = vpow2.f32 %v5214_v46  ;;  %v5447_v62 = vadd.f32 %v15005_v15, %v5359_v14  ;;  %v18291_v12 = vpop.eup %15010  ;;  %v18298_v14 = vld [vmem:[%s20666_s18] ss:$0 sm:$0xff]  ;;  %v5220_v17 = vmul.f32 1.442695, %v5172_v7 }
 0x981   : > { %15022 = vrcp.f32 %v5445_v13  ;;  %v18300_v20 = vpop.eup %15012  ;;  %v20668_v13 = vld [vmem:[#allocation33_spill] sm:$0xff]  ;;  %v5226_v39 = vmul.f32 1.442695, %v5175_v48  ;;  %v5477_v53 = vmul.f32 %v15003_v51, %v18298_v14  ;;  %v5450_v22 = vadd.f32 %v18291_v12, %v5368_v32  ;;  %v20673_v48 = vld [vmem:[#allocation68_spill] sm:$0xff] }
 0x982   : > { %15024 = vrcp.f32 %v20660_v3  ;;  %v18303_v57 = vpop.eup %15014  ;;  %v20671_v3 = vld [vmem:[#allocation47_spill] sm:$0xff] }
 0x983   : > { %v5365_v21 = vpop.xlane.xlu0 %5364  ;;  %15026 = vpow2.f32 %v5212_v0  ;;  %v5174_v0 = vsub.f32 %v20668_v13, %v20667_v18  ;;  %v18307_v56 = vpop.eup %15016 }
 0x984   : > { %15028 = vpow2.f32 %v5218_v4  ;;  %v5449_v23 = vadd.f32 %v15007_v58, %v5365_v21  ;;  %v20669_v4 = vld [vmem:[#allocation99_spill] sm:$0xff] }
 0x985   : > { %15030 = vrcp.f32 %v5447_v62  ;;  %v5177_v47 = vsub.f32 %v20670_v60, %v20669_v4  ;;  %v5224_v51 = vmul.f32 1.442695, %v5174_v0  ;;  %v5479_v60 = vmul.f32 %v15005_v15, %v18298_v14 }
 0x986   : > { %15032 = vrcp.f32 %v18027_v37  ;;  %v5478_v0 = vmul.f32 %v18023_v1, %v18298_v14 }
 0x987   : > { %v5371_v46 = vpop.xlane.xlu0 %5370  ;;  %15034 = vpow2.f32 %v5216_v50  ;;  %v5476_v50 = vmul.f32 %v20671_v3, %v18298_v14  ;;  %v5230_v13 = vmul.f32 1.442695, %v5177_v47 }
 0x988   : > { %15036 = vpow2.f32 %v5222_v54  ;;  %v5451_v37 = vadd.f32 %v18287_v6, %v5371_v46 }
 0x989   : > { %v18312_v21 = vpop.eup %15018  ;;  %15038 = vrcp.f32 %v5449_v23  ;;  %v5176_v23 = vsub.f32 %v20673_v48, %v20672_v26  ;;  %v5480_v26 = vmul.f32 %v18031_v30, %v18298_v14  ;;  %v5483_v30 = vmul.f32 %v18287_v6, %v18298_v14 }
 0x98a   : > { %v18317_v55 = vpop.eup %15020  ;;  %15040 = vrcp.f32 %v18040_v52  ;;  %v5453_v52 = vadd.f32 %v18300_v20, %v18182_v38  ;;  %v5481_v38 = vmul.f32 %v15007_v58, %v18298_v14  ;;  %v5484_v6 = vmul.f32 %v18303_v57, %v18298_v14 }
 0x98b   : > { %v15023_v25 = vpop.eup %15022  ;;  %15042 = vpow2.f32 %v5220_v17 }
 0x98c   : > { %v15025_v46 = vpop.eup %15024  ;;  %15044 = vpow2.f32 %v5226_v39  ;;  %v20674_v39 = vld [vmem:[#allocation34_spill] sm:$0xff] }
 0x98d   : > { %v18326_v3 = vpop.eup %15026  ;;  %15046 = vrcp.f32 %v5451_v37  ;;  %v5452_v47 = vadd.f32 %v18303_v57, %v20674_v39 }
 0x98e   : > { %15048 = vrcp.f32 %v5450_v22  ;;  %v20675_v22 = vld [vmem:[#allocation100_spill] sm:$0xff] }
 0x98f   : > { %15050 = vpow2.f32 %v5224_v51  ;;  %v20677_v51 = vld [vmem:[#allocation44_spill] sm:$0xff] }
 0x990   : > { %15052 = vpow2.f32 %v5230_v13 }
 0x991   : > { %15054 = vrcp.f32 %v5453_v52  ;;  %v5482_v52 = vmul.f32 %v18291_v12, %v18298_v14  ;;  %v5457_v12 = vadd.f32 %v18317_v55, %v18192_v24  ;;  %v18389_v24 = vld [vmem:[%s20629_s25 + $0x48] sm:$0xff] }
 0x992   : > { %15056 = vrcp.f32 %v5452_v47  ;;  %v20112_v63 = vand.u32 4294901760, %v18389_v24 }
 0xa12   : > { %v13006_v62 = vpop.f32.mrb[16].mxu1 }
 0xa13   : > { %v7507_v7 = vadd.f32 %v13006_v62, %v5477_v53  ;;  %v7316_v54 = vpop.f32.mrb[17].mxu1  ;;  %v18334_v53 = vpop.eup %15028 }
 0xa14   : > { %v7506_v18 = vadd.f32 %v7316_v54, %v5476_v50  ;;  %v15031_v50 = vpop.eup %15030 }
 0xa15   : > { %v18323_v4 = vmul.f32 %v15023_v25, %v7507_v7  ;;  %v5228_v7 = vmul.f32 1.442695, %v5176_v23  ;;  %v15033_v37 = vpop.eup %15032  ;;  %v5455_v25 = vadd.f32 %v18307_v56, %v18184_v27  ;;  %v5454_v23 = vadd.f32 %v18312_v21, %v20677_v51  ;;  %v20680_v51 = vld [vmem:[#allocation51_spill] sm:$0xff] }
 0xa16   : > { %v18330_v32 = vmul.f32 %v15025_v46, %v7506_v18  ;;  %v13009_v17 = vpop.f32.mrb[18].mxu1  ;;  %v18345_v48 = vpop.eup %15034  ;;  %v20676_v18 = vld [vmem:[#allocation69_spill] sm:$0xff]  ;;  %v5456_v57 = vadd.f32 %v18326_v3, %v20680_v51 }
 0xa17   : > { %v7509_v62 = vadd.f32 %v13009_v17, %v5479_v60  ;;  %v7328_v15 = vpop.f32.mrb[19].mxu1  ;;  %v5179_v46 = vsub.f32 %v20676_v18, %v20675_v22  ;;  %v18353_v60 = vpop.eup %15036  ;;  %15058 = vpow2.f32 %v5228_v7  ;;  %v18374_v22 = vld [vmem:[%s20629_s25 + $0x30] sm:$0xff] }
 0xa18   : > { %v7508_v54 = vadd.f32 %v7328_v15, %v5478_v0  ;;  %v15039_v0 = vpop.eup %15038  ;;  %15060 = vrcp.f32 %v5455_v25  ;;  %v18377_v25 = vld [vmem:[%s20629_s25 + $0x38] sm:$0xff] }
 0xa19   : > { %v18341_v1 = vmul.f32 %v15031_v50, %v7509_v62  ;;  %v5485_v62 = vmul.f32 %v18300_v20, %v18298_v14  ;;  %v15041_v15 = vpop.eup %15040  ;;  %v20678_v50 = vld [vmem:[#allocation104_spill] sm:$0xff]  ;;  %15062 = vrcp.f32 %v5454_v23  ;;  %v20111_v23 = vand.u32 4294901760, %v18377_v25 }
 0xa1a   : > { %v18351_v58 = vmul.f32 %v15033_v37, %v7508_v54  ;;  %v13012_v13 = vpop.f32.mrb[20].mxu1  ;;  %v20679_v54 = vld [vmem:[#allocation102_spill] sm:$0xff]  ;;  %v18367_v7 = vpop.eup %15042  ;;  %v5234_v37 = vmul.f32 1.442695, %v5179_v46  ;;  %v20114_v46 = vand.u32 4294901760, %v18374_v22  ;;  %15064 = vrcp.f32 %v5457_v12 }
 0xa1b   : > { %v7511_v27 = vadd.f32 %v13012_v13, %v5481_v38  ;;  %v7340_v17 = vpop.f32.mrb[21].mxu1  ;;  %v5178_v47 = vsub.f32 %v20679_v54, %v20678_v50  ;;  %v18379_v18 = vpop.eup %15044  ;;  %15066 = vrcp.f32 %v5456_v57 }
 0xa1c   : > { %v7510_v39 = vadd.f32 %v7340_v17, %v5480_v26  ;;  %v18386_v17 = vld [vmem:[%s20629_s25 + $0x40] sm:$0xff]  ;;  %v18403_v11 = vpack.c.bf16 %v20111_v23, %v20114_v46  ;;  %15068 = vpow2.f32 %v5234_v37  ;;  %v20687_v23 = vld [vmem:[#allocation109_spill] sm:$0xff]  ;;  %v5461_v37 = vadd.f32 %v18353_v60, %v18186_v9 }
 0xa1d   : > { %v18363_v38 = vmul.f32 %v15039_v0, %v7511_v27  ;;  %v15047_v0 = vpop.eup %15046  ;;  %v20113_v36 = vand.u32 4294901760, %v18386_v17 }
 0xa1e   : > { %v18371_v20 = vmul.f32 %v15041_v15, %v7510_v39  ;;  %v13015_v26 = vpop.f32.mrb[22].mxu1  ;;  %v20681_v39 = vld [vmem:[#allocation107_spill] sm:$0xff]  ;;  %v20682_v15 = vld [vmem:[#allocation85_spill] sm:$0xff]  ;;  %v15049_v51 = vpop.eup %15048  ;;  %13905 = vmatprep.subr.bf16.mxu1 %v18403_v11 }
 0xa1f   : > { %v7513_v13 = vadd.f32 %v13015_v26, %v5483_v30  ;;  %v7352_v27 = vpop.f32.mrb[23].mxu1  ;;  %v5181_v50 = vsub.f32 %v20682_v15, %v20681_v39  ;;  %v5232_v30 = vmul.f32 1.442695, %v5178_v47  ;;  %v20683_v26 = vld [vmem:[#allocation110_spill] sm:$0xff]  ;;  %v18405_v5 = vpop.eup %15050  ;;  %13907 = vmatpush3.bf16.msra.mxu1 %v18403_v11 }
 0xa20   : > { %v7512_v54 = vadd.f32 %v7352_v27, %v5482_v52  ;;  %v5180_v59 = vsub.f32 %v20684_v34, %v20683_v26  ;;  %v5459_v52 = vadd.f32 %v18334_v53, %v18196_v19  ;;  %v18415_v34 = vpack.c.bf16 %v20112_v63, %v20113_v36  ;;  %v20686_v26 = vld [vmem:[#allocation113_spill] sm:$0xff] }
 0xa21   : > { %v18397_v31 = vmul.f32 %v15047_v0, %v7513_v13  ;;  %v18417_v13 = vpop.eup %15052  ;;  %v20685_v0 = vld [vmem:[#allocation23_spill] sm:$0xff]  ;;  %v5487_v19 = vmul.f32 %v18307_v56, %v18298_v14  ;;  %v5183_v63 = vsub.f32 %v20687_v23, %v20686_v26  ;;  %15070 = vpow2.f32 %v5232_v30  ;;  %v20690_v30 = vld [vmem:[#allocation22_spill] sm:$0xff] }
 0xa22   : > { %v18409_v27 = vmul.f32 %v15049_v51, %v7512_v54  ;;  %v13018_v47 = vpop.f32.mrb[24].mxu1  ;;  %v5458_v39 = vadd.f32 %v18345_v48, %v20685_v0  ;;  %v15055_v54 = vpop.eup %15054  ;;  %v5238_v51 = vmul.f32 1.442695, %v5181_v50  ;;  %v5236_v46 = vmul.f32 1.442695, %v5180_v59  ;;  %v20688_v0 = vld [vmem:[#allocation117_spill] sm:$0xff]  ;;  %13909 = vmatprep.subr.bf16.mxu1 %v18415_v34 }
 0xa23   : > { %v7515_v15 = vadd.f32 %v13018_v47, %v5485_v62  ;;  %v7364_v12 = vpop.f32.mrb[25].mxu1  ;;  %v15057_v57 = vpop.eup %15056  ;;  %v20689_v62 = vld [vmem:[#allocation92_spill] sm:$0xff]  ;;  %15072 = vrcp.f32 %v5459_v52  ;;  %v5460_v59 = vadd.f32 %v18367_v7, %v20690_v30  ;;  %v5242_v9 = vmul.f32 1.442695, %v5183_v63  ;;  %v20692_v52 = vld [vmem:[#allocation119_spill] sm:$0xff]  ;;  %13911 = vmatpush3.bf16.msra.mxu1 %v18415_v34 }
 0xa24   : > { %v7514_v36 = vadd.f32 %v7364_v12, %v5484_v6  ;;  %v5182_v47 = vsub.f32 %v20689_v62, %v20688_v0  ;;  %v18430_v56 = vpop.eup %15058  ;;  %v5486_v6 = vmul.f32 %v18312_v21, %v18298_v14  ;;  %15074 = vrcp.f32 %v5458_v39 }
 0xa25   : > { %v7579_v35 = vmul.f32 %v15055_v54, %v7515_v15  ;;  %v15061_v12 = vpop.eup %15060  ;;  %v5489_v54 = vmul.f32 %v18317_v55, %v18298_v14  ;;  %15076 = vpow2.f32 %v5238_v51  ;;  %v5463_v55 = vadd.f32 %v18379_v18, %v18188_v16 }
 0xa26   : > { %v7578_v50 = vmul.f32 %v15057_v57, %v7514_v36  ;;  %v13021_v23 = vpop.f32.mrb[26].mxu1  ;;  %v15063_v0 = vpop.eup %15062  ;;  %v20691_v36 = vld [vmem:[#allocation121_spill] sm:$0xff]  ;;  %15078 = vpow2.f32 %v5236_v46  ;;  %v5240_v21 = vmul.f32 1.442695, %v5182_v47  ;;  %v5491_v51 = vmul.f32 %v18334_v53, %v18298_v14 }
 0xa27   : > { %v7517_v26 = vadd.f32 %v13021_v23, %v5487_v19  ;;  %v7376_v15 = vpop.f32.mrb[27].mxu1  ;;  %7612 = vrot.lane.b32.xlu0 %v7579_v35, %s15296_s23  ;;  %v5185_v57 = vsub.f32 %v20692_v52, %v20691_v36  ;;  %v5488_v35 = vmul.f32 %v18326_v3, %v18298_v14  ;;  %15080 = vrcp.f32 %v5461_v37  ;;  %v20693_v23 = vld [vmem:[#allocation37_spill] sm:$0xff]  ;;  %v15065_v47 = vpop.eup %15064  ;;  %v20694_v37 = vld [vmem:[#allocation123_spill] sm:$0xff] }
 0xa28   : > { %v7516_v62 = vadd.f32 %v7376_v15, %v5486_v6  ;;  %7610 = vrot.lane.b32.xlu1 %v7578_v50, %s15296_s23  ;;  %15082 = vrcp.f32 %v5460_v59  ;;  %v5462_v50 = vadd.f32 %v18405_v5, %v20693_v23  ;;  %v5490_v3 = vmul.f32 %v18345_v48, %v18298_v14  ;;  %v15067_v59 = vpop.eup %15066  ;;  %v20697_v15 = vld [vmem:[#allocation128_spill] sm:$0xff] }
 0xa29   : > { %v7581_v39 = vmul.f32 %v15061_v12, %v7517_v26  ;;  %15084 = vpow2.f32 %v5242_v9  ;;  %v5246_v16 = vmul.f32 1.442695, %v5185_v57  ;;  %v20695_v12 = vld [vmem:[#allocation115_spill] sm:$0xff]  ;;  %v20696_v26 = vld [vmem:[#allocation129_spill] sm:$0xff]  ;;  %v18465_v9 = vpop.eup %15068  ;;  %v5465_v52 = vadd.f32 %v18417_v13, %v18194_v45 }
 0xa2a   : > { %v7580_v19 = vmul.f32 %v15063_v0, %v7516_v62  ;;  %v13024_v63 = vpop.f32.mrb[28].mxu1  ;;  %v5184_v30 = vsub.f32 %v20695_v12, %v20694_v37  ;;  %15086 = vpow2.f32 %v5240_v21  ;;  %v20698_v0 = vld [vmem:[#allocation46_spill] sm:$0xff]  ;;  %v5493_v21 = vmul.f32 %v18353_v60, %v18298_v14  ;;  %v20700_v60 = vld [vmem:[#allocation125_spill] sm:$0xff] }
 0xa2b   : > { %v7519_v6 = vadd.f32 %v13024_v63, %v5489_v54  ;;  %v7388_v46 = vpop.f32.mrb[29].mxu1  ;;  %7616 = vrot.lane.b32.xlu0 %v7581_v39, %s15296_s23  ;;  %v5187_v54 = vsub.f32 %v20697_v15, %v20696_v26  ;;  %v5464_v36 = vadd.f32 %v18430_v56, %v20698_v0  ;;  %15088 = vrcp.f32 %v5463_v55  ;;  %v18474_v39 = vld [vmem:[%s20629_s25 + $0x50] sm:$0xff]  ;;  %v18505_v0 = vld [vmem:[%s20629_s25 + $0x68] sm:$0xff] }
 0xa2c   : > { %v7518_v53 = vadd.f32 %v7388_v46, %v5488_v35  ;;  %7614 = vrot.lane.b32.xlu1 %v7580_v19, %s15296_s23  ;;  %v18477_v35 = vld [vmem:[%s20629_s25 + $0x58] sm:$0xff]  ;;  %v18479_v19 = vpop.eup %15070  ;;  %15090 = vrcp.f32 %v5462_v50  ;;  %v7770_v55 = vand.u32 4294901760, %v18474_v39  ;;  %v5244_v46 = vmul.f32 1.442695, %v5184_v30 }
 0xa2d   : > { %v18463_v48 = vmul.f32 %v15065_v47, %v7519_v6  ;;  %v7773_v6 = vand.u32 4294901760, %v18477_v35  ;;  %v15073_v45 = vpop.eup %15072  ;;  %15092 = vpow2.f32 %v5246_v16  ;;  %v20699_v47 = vld [vmem:[#allocation126_spill] sm:$0xff]  ;;  %v5467_v16 = vadd.f32 %v18465_v9, %v18207_v43 }
 0xa2e   : > { %v18469_v57 = vmul.f32 %v15067_v59, %v7518_v53  ;;  %v13027_v62 = vpop.f32.mrb[30].mxu1  ;;  %v5186_v37 = vsub.f32 %v20700_v60, %v20699_v47  ;;  %v15075_v53 = vpop.eup %15074  ;;  %v5250_v59 = vmul.f32 1.442695, %v5187_v54  ;;  %15094 = vrcp.f32 %v5464_v36  ;;  %v18502_v54 = vld [vmem:[%s20629_s25 + $0x60] sm:$0xff] }
 0xa2f   : > { %v7521_v63 = vadd.f32 %v13027_v62, %v5491_v51  ;;  %v7400_v23 = vpop.f32.mrb[31].mxu1  ;;  %v18491_v51 = vpack.c.bf16 %v7773_v6, %v7770_v55  ;;  %v18493_v50 = vpop.eup %15076  ;;  %15096 = vrcp.f32 %v5465_v52  ;;  %v5492_v15 = vmul.f32 %v18367_v7, %v18298_v14  ;;  %v20701_v62 = vld [vmem:[#allocation50_spill] sm:$0xff] }
 0xa30   : > { %v7520_v12 = vadd.f32 %v7400_v23, %v5490_v3  ;;  %v18507_v36 = vpop.eup %15078  ;;  %v20118_v43 = vand.u32 4294901760, %v18502_v54  ;;  %15098 = vpow2.f32 %v5244_v46  ;;  %v5248_v7 = vmul.f32 1.442695, %v5186_v37 }
 0xa31   : > { %v18485_v26 = vmul.f32 %v15073_v45, %v7521_v63  ;;  %v5466_v63 = vadd.f32 %v18479_v19, %v20701_v62  ;;  %13913 = vmatprep.subr.bf16.mxu1 %v18491_v51  ;;  %v20117_v45 = vand.u32 4294901760, %v18505_v0  ;;  %v15081_v47 = vpop.eup %15080  ;;  %15100 = vpow2.f32 %v5250_v59 }
 0xa32   : > { %v18497_v30 = vmul.f32 %v15075_v53, %v7520_v12  ;;  %v13030_v3 = vpop.f32.mrb[32].mxu1  ;;  %13915 = vmatpush3.bf16.msra.mxu1 %v18491_v51  ;;  %v15083_v12 = vpop.eup %15082  ;;  %v5495_v62 = vmul.f32 %v18379_v18, %v18298_v14  ;;  %v5469_v46 = vadd.f32 %v18493_v50, %v18190_v8  ;;  %15102 = vrcp.f32 %v5467_v16  ;;  %v20702_v18 = vld [vmem:[#allocation90_spill] sm:$0xff] }
 0xa33   : > { %v7523_v23 = vadd.f32 %v13030_v3, %v5493_v21  ;;  %v7412_v52 = vpop.f32.mrb[33].mxu1  ;;  %v18521_v21 = vpack.c.bf16 %v20117_v45, %v20118_v43  ;;  %v18523_v3 = vpop.eup %15084  ;;  %v5494_v59 = vmul.f32 %v18405_v5, %v18298_v14  ;;  %15104 = vrcp.f32 %v5466_v63 }
 0xa34   : > { %v7522_v60 = vadd.f32 %v7412_v52, %v5492_v15  ;;  %v5468_v52 = vadd.f32 %v18507_v36, %v20702_v18  ;;  %15106 = vpow2.f32 %v5248_v7  ;;  %v5497_v5 = vmul.f32 %v18417_v13, %v18298_v14 }
 0xa35   : > { %v7587_v53 = vmul.f32 %v15081_v47, %v7523_v23  ;;  %v18529_v23 = vpop.eup %15086  ;;  %13917 = vmatprep.subr.bf16.mxu1 %v18521_v21  ;;  %15108 = vrcp.f32 %v5469_v46  ;;  %v5471_v63 = vadd.f32 %v18523_v3, %v18238_v2  ;;  %v5499_v2 = vmul.f32 %v18465_v9, %v18298_v14 }
 0xa36   : > { %v7586_v37 = vmul.f32 %v15083_v12, %v7522_v60  ;;  %v13033_v15 = vpop.f32.mrb[34].mxu1  ;;  %v15089_v43 = vpop.eup %15088  ;;  %13919 = vmatpush3.bf16.msra.mxu1 %v18521_v21  ;;  %15110 = vrcp.f32 %v5468_v52 }
 0xa37   : > { %v7525_v47 = vadd.f32 %v13033_v15, %v5495_v62  ;;  %v7424_v45 = vpop.f32.mrb[35].mxu1  ;;  %7644 = vrot.lane.b32.xlu1 %v7587_v53, %s15295_s16  ;;  %v15091_v16 = vpop.eup %15090  ;;  %v5496_v15 = vmul.f32 %v18430_v56, %v18298_v14  ;;  %15112 = vrcp.f32 %v5471_v63 }
 0xa38   : > { %v7524_v8 = vadd.f32 %v7424_v45, %v5494_v59  ;;  %v18538_v12 = vpop.eup %15092  ;;  %v20703_v45 = vld [vmem:[#allocation59_spill] sm:$0xff] }
 0xa39   : > { %v7589_v60 = vmul.f32 %v15089_v43, %v7525_v47  ;;  %v15095_v7 = vpop.eup %15094  ;;  %v5470_v59 = vadd.f32 %v18529_v23, %v20703_v45  ;;  %v5473_v56 = vadd.f32 %v18538_v12, %v18249_v41 }
 0xa3a   : > { %v7588_v62 = vmul.f32 %v15091_v16, %v7524_v8  ;;  %v13036_v53 = vpop.f32.mrb[36].mxu1  ;;  %v15097_v13 = vpop.eup %15096 }
 0xa3b   : > { %v7527_v43 = vadd.f32 %v13036_v53, %v5497_v5  ;;  %v7436_v18 = vpop.f32.mrb[37].mxu1  ;;  %7642 = vrot.lane.b32.xlu1 %v7586_v37, %s15295_s16  ;;  %7648 = vrot.lane.b32.xlu0 %v7589_v60, %s15295_s16  ;;  %v15099_v8 = vpop.eup %15098  ;;  %v5498_v37 = vmul.f32 %v18479_v19, %v18298_v14  ;;  %15114 = vrcp.f32 %v5470_v59  ;;  %v20704_v60 = vld [vmem:[#allocation98_spill] sm:$0xff]  ;;  %v5501_v19 = vmul.f32 %v18493_v50, %v18298_v14 }
 0xa3c   : > { %v7526_v46 = vadd.f32 %v7436_v18, %v5496_v15  ;;  %v18558_v5 = vpop.eup %15100  ;;  %v5472_v53 = vadd.f32 %v15099_v8, %v20704_v60  ;;  %15116 = vrcp.f32 %v5473_v56 }
 0xa3d   : > { %v18548_v47 = vmul.f32 %v15097_v13, %v7527_v43  ;;  %v15103_v9 = vpop.eup %15102 }
 0xa3e   : > { %v18554_v52 = vmul.f32 %v15095_v7, %v7526_v46  ;;  %v13039_v16 = vpop.f32.mrb[38].mxu1  ;;  %v15105_v41 = vpop.eup %15104  ;;  %v5475_v7 = vadd.f32 %v18558_v5, %v18256_v42  ;;  %15118 = vrcp.f32 %v5472_v53  ;;  %v18577_v42 = vld [vmem:[%s20629_s25 + $0x78] sm:$0xff] }
 0xa3f   : > { %v7529_v15 = vadd.f32 %v13039_v16, %v5499_v2  ;;  %v7448_v45 = vpop.f32.mrb[39].mxu1  ;;  %7646 = vrot.lane.b32.xlu1 %v7588_v62, %s15295_s16  ;;  %v15107_v59 = vpop.eup %15106  ;;  %v5500_v62 = vmul.f32 %v18507_v36, %v18298_v14  ;;  %v20121_v56 = vand.u32 4294901760, %v18577_v42  ;;  %v5503_v36 = vmul.f32 %v18523_v3, %v18298_v14 }
 0xa40   : > { %v7528_v63 = vadd.f32 %v7448_v45, %v5498_v37  ;;  %v5474_v46 = vadd.f32 %v15107_v59, %v18282_v40  ;;  %v18574_v37 = vld [vmem:[%s20629_s25 + $0x70] sm:$0xff]  ;;  %v15109_v60 = vpop.eup %15108  ;;  %15120 = vrcp.f32 %v5475_v7  ;;  %v5502_v40 = vmul.f32 %v18529_v23, %v18298_v14 }
 0xa41   : > { %v18564_v43 = vmul.f32 %v15103_v9, %v7529_v15  ;;  %v7782_v50 = vand.u32 4294901760, %v18574_v37  ;;  %v15111_v45 = vpop.eup %15110  ;;  %v20706_v7 = vand.u32 4294901760, %v18202_v49 }
 0xa42   : > { %v18568_v18 = vmul.f32 %v15105_v41, %v7528_v63  ;;  %v13042_v13 = vpop.f32.mrb[40].mxu1  ;;  %15122 = vrcp.f32 %v5474_v46 }
 0xa43   : > { %v7531_v2 = vadd.f32 %v13042_v13, %v5501_v19  ;;  %v7460_v16 = vpop.f32.mrb[41].mxu1  ;;  %v18589_v41 = vpack.c.bf16 %v20121_v56, %v7782_v50  ;;  %v20705_v19 = vand.u32 4294901760, %v18199_v33  ;;  %v18599_v3 = vsub.f32 %v18202_v49, %v20706_v7 }
 0xa44   : > { %v7530_v15 = vadd.f32 %v7460_v16, %v5500_v62  ;;  %v5505_v49 = vmul.f32 %v18538_v12, %v18298_v14 }
 0xa45   : > { %v7595_v9 = vmul.f32 %v15109_v60, %v7531_v2  ;;  %v18594_v13 = vsub.f32 %v18199_v33, %v20705_v19  ;;  %v15113_v2 = vpop.eup %15112  ;;  %13921 = vmatprep.subr.bf16.mxu1 %v18589_v41  ;;  %v20120_v33 = vand.u32 4294901760, %v18599_v3 }
 0xa46   : > { %v7594_v53 = vmul.f32 %v15111_v45, %v7530_v15  ;;  %v13045_v63 = vpop.f32.mrb[42].mxu1  ;;  %v15115_v15 = vpop.eup %15114  ;;  %13923 = vmatpush3.bf16.msra.mxu1 %v18589_v41 }
 0xa47   : > { %v7533_v23 = vadd.f32 %v13045_v63, %v5503_v36  ;;  %v7472_v62 = vpop.f32.mrb[43].mxu1  ;;  %7676 = vrot.lane.b32.xlu0 %v7595_v9, %s15294_s29  ;;  %v20119_v60 = vand.u32 4294901760, %v18594_v13  ;;  %v5504_v9 = vmul.f32 %v15099_v8, %v18298_v14  ;;  %v15117_v12 = vpop.eup %15116 }
 0xa48   : > { %v7532_v16 = vadd.f32 %v7472_v62, %v5502_v40  ;;  %7674 = vrot.lane.b32.xlu1 %v7594_v53, %s15294_s29  ;;  %v7911_v53 = vsub.f32 %v18599_v3, %v20120_v33  ;;  %v15119_v62 = vpop.eup %15118 }
 0xa49   : > { %v7597_v45 = vmul.f32 %v15113_v2, %v7533_v23  ;;  %v7904_v40 = vsub.f32 %v18594_v13, %v20119_v60 }
 0xa4a   : > { %v7596_v46 = vmul.f32 %v15115_v15, %v7532_v16  ;;  %v13048_v36 = vpop.f32.mrb[44].mxu1  ;;  %v7912_v8 = vand.u32 4294901760, %v7911_v53  ;;  %v5507_v16 = vmul.f32 %v18558_v5, %v18298_v14  ;;  %v15121_v33 = vpop.eup %15120  ;;  %v18675_v53 = vsub.f32 %v18477_v35, %v7773_v6 }
 0xa4b   : > { %v7535_v63 = vadd.f32 %v13048_v36, %v5505_v49  ;;  %v7484_v19 = vpop.f32.mrb[45].mxu1  ;;  %7620 = vrot.lane.b32.xlu0 %v18463_v48, %s15296_s23  ;;  %v7905_v23 = vand.u32 4294901760, %v7904_v40  ;;  %v5506_v49 = vmul.f32 %v15107_v59, %v18298_v14  ;;  %v20707_v14 = vand.u32 4294901760, %v18374_v22 }
 0xa4c   : > { %v7534_v7 = vadd.f32 %v7484_v19, %v5504_v9  ;;  %7618 = vrot.lane.b32.xlu1 %v18469_v57, %s15296_s23  ;;  %v15123_v9 = vpop.eup %15122  ;;  %20712 = vst [vmem:[#allocation89_spill] sm:$0xff] %v18675_v53  ;;  %v20713_v35 = vand.u32 4294901760, %v18502_v54  ;;  %v20715_v6 = vand.u32 4294901760, %v18505_v0 }
 0xa4d   : > { %v7599_v2 = vmul.f32 %v15117_v12, %v7535_v63  ;;  %v18623_v36 = vpack.c.bf16 %v7912_v8, %v7905_v23  ;;  %v18637_v59 = vsub.f32 %v18374_v22, %v20707_v14  ;;  %v20126_v12 = vand.u32 4294901760, %v18675_v53 }
 0xa4e   : > { %v7598_v15 = vmul.f32 %v15119_v62, %v7534_v7  ;;  %v13051_v60 = vpop.f32.mrb[46].mxu1  ;;  %v20718_v14 = vand.u32 4294901760, %v18577_v42 }
 0xa4f   : > { %v7537_v48 = vadd.f32 %v13051_v60, %v5507_v16  ;;  %v7496_v56 = vpop.f32.mrb[47].mxu1  ;;  %7652 = vrot.lane.b32.xlu0 %v18548_v47, %s15295_s16  ;;  %13925 = vmatprep.subr.bf16.mxu1 %v18623_v36  ;;  %v20708_v47 = vand.u32 4294901760, %v18377_v25 }
 0xa50   : > { %v7536_v57 = vadd.f32 %v7496_v56, %v5506_v49  ;;  %7650 = vrot.lane.b32.xlu1 %v18554_v52, %s15295_s16 }
 0xa51   : > { %v7601_v5 = vmul.f32 %v15121_v33, %v7537_v48  ;;  %v18642_v52 = vsub.f32 %v18377_v25, %v20708_v47  ;;  %v20709_v25 = vand.u32 4294901760, %v18386_v17  ;;  %v18670_v33 = vsub.f32 %v18474_v39, %v7770_v55 }
 0xa52   : > { %v7600_v40 = vmul.f32 %v15123_v9, %v7536_v57  ;;  %v18690_v55 = vsub.f32 %v18502_v54, %v20713_v35  ;;  %v7981_v54 = vsub.f32 %v18675_v53, %v20126_v12  ;;  %v18724_v47 = vsub.f32 %v18577_v42, %v20718_v14 }
 0xa53   : > { %7624 = vrot.lane.b32.xlu0 %v18485_v26, %s15296_s23  ;;  %v20131_v26 = vand.u32 4294901760, %v18637_v59  ;;  %v18659_v60 = vsub.f32 %v18386_v17, %v20709_v25  ;;  %20711 = vst [vmem:[#allocation62_spill] sm:$0xff] %v18670_v33  ;;  %v20722_v12 = vand.u32 4294901760, %v18216_v28 }
 0xa54   : > { %7622 = vrot.lane.b32.xlu1 %v18497_v30, %s15296_s23  ;;  %v20130_v30 = vand.u32 4294901760, %v18642_v52  ;;  %20714 = vst [vmem:[#allocation91_spill] sm:$0xff] %v18690_v55  ;;  %v7982_v48 = vand.u32 4294901760, %v7981_v54  ;;  %20719 = vst [vmem:[#allocation86_spill] sm:$0xff] %v18724_v47 }
 0xa55   : > { %v7946_v22 = vsub.f32 %v18637_v59, %v20131_v26 }
 0xa56   : > { %v7953_v56 = vsub.f32 %v18642_v52, %v20130_v30 }
 0xa57   : > { %7656 = vrot.lane.b32.xlu0 %v18564_v43, %s15295_s16  ;;  %v20710_v43 = vand.u32 4294901760, %v18389_v24  ;;  %v7947_v17 = vand.u32 4294901760, %v7946_v22 }
 0xa58   : > { %7654 = vrot.lane.b32.xlu1 %v18568_v18, %s15295_s16  ;;  %v7954_v63 = vand.u32 4294901760, %v7953_v56 }
 0xa59   : > { %v18665_v18 = vsub.f32 %v18389_v24, %v20710_v43  ;;  %v20127_v24 = vand.u32 4294901760, %v18670_v33 }
 0xa5a   : > { %v18682_v7 = vpack.c.bf16 %v7954_v63, %v7947_v17 }
 0xa5b   : > { %7680 = vrot.lane.b32.xlu0 %v7597_v45, %s15294_s29  ;;  %v20129_v45 = vand.u32 4294901760, %v18659_v60  ;;  %v20128_v19 = vand.u32 4294901760, %v18665_v18  ;;  %v7974_v8 = vsub.f32 %v18670_v33, %v20127_v24 }
 0xa5c   : > { %7678 = vrot.lane.b32.xlu1 %v7596_v46, %s15294_s29  ;;  %v18695_v46 = vsub.f32 %v18505_v0, %v20715_v6  ;;  %v20125_v0 = vand.u32 4294901760, %v18690_v55  ;;  %v18750_v6 = vpack.c.bf16 %v18642_v52, %v18637_v59 }
 0xa5d   : > { %v7960_v39 = vsub.f32 %v18659_v60, %v20129_v45  ;;  %v7967_v23 = vsub.f32 %v18665_v18, %v20128_v19  ;;  %v7975_v49 = vand.u32 4294901760, %v7974_v8  ;;  %v18758_v8 = vpack.c.bf16 %v18675_v53, %v18670_v33 }
 0xa5e   : > { %20716 = vst [vmem:[#allocation81_spill] sm:$0xff] %v18695_v46  ;;  %v20124_v16 = vand.u32 4294901760, %v18695_v46  ;;  %v7988_v57 = vsub.f32 %v18690_v55, %v20125_v0  ;;  %v18762_v54 = vpack.c.bf16 %v18695_v46, %v18690_v55 }
 0xa5f   : > { %7684 = vrot.lane.b32.xlu0 %v7599_v2, %s15294_s29  ;;  %v7961_v62 = vand.u32 4294901760, %v7960_v39  ;;  %v7968_v2 = vand.u32 4294901760, %v7967_v23  ;;  %v18729_v56 = vpack.c.bf16 %v7982_v48, %v7975_v49  ;;  %v18754_v23 = vpack.c.bf16 %v18665_v18, %v18659_v60 }
 0xa60   : > { %7682 = vrot.lane.b32.xlu1 %v7598_v15, %s15294_s29  ;;  %v7995_v9 = vsub.f32 %v18695_v46, %v20124_v16  ;;  %v18719_v15 = vsub.f32 %v18574_v37, %v7782_v50  ;;  %v7989_v25 = vand.u32 4294901760, %v7988_v57  ;;  %v20122_v37 = vand.u32 4294901760, %v18724_v47 }
 0xa61   : > { %v18727_v22 = vpack.c.bf16 %v7968_v2, %v7961_v62  ;;  %v18736_v50 = vpack.c.bf16 %v18599_v3, %v18594_v13 }
 0xa62   : > { %20717 = vst [vmem:[#allocation27_spill] sm:$0xff] %v18719_v15  ;;  %v7996_v43 = vand.u32 4294901760, %v7995_v9  ;;  %v20123_v17 = vand.u32 4294901760, %v18719_v15  ;;  %v18766_v62 = vpack.c.bf16 %v18724_v47, %v18719_v15 }
 0xa63   : > { %7688 = vrot.lane.b32.xlu0 %v7601_v5, %s15294_s29 }
 0xa64   : > { %7686 = vrot.lane.b32.xlu1 %v7600_v40, %s15294_s29  ;;  %v18738_v42 = vpack.c.bf16 %v7996_v43, %v7989_v25  ;;  %v8002_v5 = vsub.f32 %v18719_v15, %v20123_v17  ;;  %v8009_v40 = vsub.f32 %v18724_v47, %v20122_v37  ;;  %v20720_v25 = vand.u32 4294901760, %v18205_v29 }
 0xa66   : > { %v8003_v63 = vand.u32 4294901760, %v8002_v5  ;;  %v8010_v39 = vand.u32 4294901760, %v8009_v40  ;;  %v18771_v43 = vsub.f32 %v18205_v29, %v20720_v25  ;;  %v20721_v5 = vand.u32 4294901760, %v18212_v10 }
 0xa68   : > { %v18746_v35 = vpack.c.bf16 %v8010_v39, %v8003_v63  ;;  %v18776_v40 = vsub.f32 %v18212_v10, %v20721_v5  ;;  %v20133_v17 = vand.u32 4294901760, %v18771_v43  ;;  %v18788_v10 = vsub.f32 %v18216_v28, %v20722_v12 }
 0xa69   : > { %v20723_v5 = vand.u32 4294901760, %v18219_v44 }
 0xa6a   : > { %v20132_v16 = vand.u32 4294901760, %v18776_v40  ;;  %v7918_v28 = vsub.f32 %v18771_v43, %v20133_v17 }
 0xa6b   : > { %v18793_v24 = vsub.f32 %v18219_v44, %v20723_v5 }
 0xa6c   : > { %v7919_v5 = vand.u32 4294901760, %v7918_v28 }
 0xa99   : > { %v7613_v57 = vpop.permute.xlu0 %7612 }
 0xa9a   : > { %v7611_v2 = vpop.permute.xlu1 %7610  ;;  %v7699_v37 = vsel %vm748_vm1, %v18323_v4, %v7613_v57 }
 0xa9b   : > { %v7698_v0 = vsel %vm748_vm1, %v18330_v32, %v7611_v2  ;;  %v20139_v2 = vand.u32 4294901760, %v18788_v10 }
 0xa9d   : > { %v7617_v14 = vpop.permute.xlu0 %7616  ;;  %v7932_v26 = vsub.f32 %v18788_v10, %v20139_v2 }
 0xa9e   : > { %v7615_v49 = vpop.permute.xlu1 %7614  ;;  %v7701_v33 = vsel %vm748_vm1, %v18341_v1, %v7617_v14 }
 0xaa9   : > { %v7645_v48 = vpop.permute.xlu1 %7644 }
 0xaaa   : > { %v7707_v29 = vsel %vm5027_vm3, %v7699_v37, %v7645_v48  ;;  %v20141_v48 = vand.u32 4294901760, %v18793_v24 }
 0xaad   : > { %v7643_v9 = vpop.permute.xlu1 %7642  ;;  %v7649_v63 = vpop.permute.xlu0 %7648 }
 0xaae   : > { %v7706_v4 = vsel %vm5027_vm3, %v7698_v0, %v7643_v9  ;;  %v7925_v0 = vsub.f32 %v18776_v40, %v20132_v16 }
 0xab0   : > { %v7926_v30 = vand.u32 4294901760, %v7925_v0 }
 0xab1   : > { %v7647_v39 = vpop.permute.xlu1 %7646 }
 0xab2   : > { %v13928_v46 = vpack.c.bf16 %v7926_v30, %v7919_v5  ;;  %v7709_v30 = vsel %vm5027_vm3, %v7701_v33, %v7649_v63 }
 0xab9   : > { %v7677_v25 = vpop.permute.xlu0 %7676 }
 0xaba   : > { %v7716_v57 = vsel %vm7714_vm4, %v7707_v29, %v7677_v25  ;;  %v7675_v19 = vpop.permute.xlu1 %7674 }
 0xabb   : > { %v18797_v45 = vand.u32 4294901760, %v7716_v57  ;;  %v7715_v32 = vsel %vm7714_vm4, %v7706_v4, %v7675_v19 }
 0xabc   : > { %v18800_v37 = vand.u32 4294901760, %v7715_v32 }
 0xabd   : > { %v18806_v12 = vsub.f32 %v7716_v57, %v18797_v45  ;;  %v7621_v44 = vpop.permute.xlu0 %7620 }
 0xabe   : > { %v18814_v19 = vsub.f32 %v7715_v32, %v18800_v37  ;;  %v7619_v9 = vpop.permute.xlu1 %7618  ;;  %v7939_v32 = vsub.f32 %v18793_v24, %v20141_v48  ;;  %v7703_v1 = vsel %vm748_vm1, %v18363_v38, %v7621_v44 }
 0xabf   : > { %v20137_v29 = vand.u32 4294901760, %v18806_v12 }
 0xac0   : > { %v7822_v25 = vand.u32 4294901760, %v18814_v19  ;;  %v7940_v55 = vand.u32 4294901760, %v7939_v32 }
 0xac1   : > { %v7833_v4 = vsub.f32 %v18806_v12, %v20137_v29  ;;  %v7653_v57 = vpop.permute.xlu0 %7652  ;;  %v7933_v29 = vand.u32 4294901760, %v7932_v26 }
 0xac2   : > { %v7651_v16 = vpop.permute.xlu1 %7650  ;;  %v7823_v17 = vsub.f32 %v18814_v19, %v7822_v25  ;;  %v7711_v33 = vsel %vm5027_vm3, %v7703_v1, %v7653_v57 }
 0xac3   : > { %v7834_v47 = vand.u32 4294901760, %v7833_v4  ;;  %v13932_v53 = vpack.c.bf16 %v7940_v55, %v7933_v29 }
 0xac4   : > { %v7824_v28 = vand.u32 4294901760, %v7823_v17  ;;  %v7700_v17 = vsel %vm748_vm1, %v18351_v58, %v7615_v49  ;;  %v7702_v58 = vsel %vm748_vm1, %v18371_v20, %v7619_v9 }
 0xac5   : > { %v7625_v15 = vpop.permute.xlu0 %7624  ;;  %v7708_v5 = vsel %vm5027_vm3, %v7700_v17, %v7647_v39  ;;  %v7710_v63 = vsel %vm5027_vm3, %v7702_v58, %v7651_v16 }
 0xac6   : > { %13084 = vmatprep.mubr.f32.mxu1 %v7824_v28  ;;  %v7623_v0 = vpop.permute.xlu1 %7622  ;;  %v7705_v29 = vsel %vm748_vm1, %v18397_v31, %v7625_v15 }
 0xac7   : > { %13085 = vmatmul.mubr.f32.vlgmr.msra.gmra.mrb[48].mxu1 %v7834_v47  ;;  %v7704_v32 = vsel %vm748_vm1, %v18409_v27, %v7623_v0 }
 0xac8   : > { %13927 = vmatpush3.bf16.msra.mxu1 %v18623_v36 }
 0xac9   : > { %v7657_v2 = vpop.permute.xlu0 %7656  ;;  %13929 = vmatprep.subr.bf16.mxu1 %v13928_v46 }
 0xaca   : > { %v7655_v48 = vpop.permute.xlu1 %7654  ;;  %v7713_v28 = vsel %vm5027_vm3, %v7705_v29, %v7657_v2 }
 0xacb   : > { %v7712_v15 = vsel %vm5027_vm3, %v7704_v32, %v7655_v48 }
 0xacc   : > { %13931 = vmatpush3.bf16.msra.mxu1 %v13928_v46 }
 0xacd   : > { %v7681_v26 = vpop.permute.xlu0 %7680  ;;  %13933 = vmatprep.subr.bf16.mxu1 %v13932_v53 }
 0xace   : > { %v7718_v47 = vsel %vm7714_vm4, %v7709_v30, %v7681_v26  ;;  %v7679_v36 = vpop.permute.xlu1 %7678 }
 0xacf   : > { %v18838_v4 = vand.u32 4294901760, %v7718_v47  ;;  %v7717_v55 = vsel %vm7714_vm4, %v7708_v5, %v7679_v36 }
 0xad0   : > { %v18843_v46 = vand.u32 4294901760, %v7717_v55  ;;  %13935 = vmatpush3.bf16.msra.mxu1 %v13932_v53 }
 0xad1   : > { %v18849_v49 = vsub.f32 %v7718_v47, %v18838_v4  ;;  %v7685_v14 = vpop.permute.xlu0 %7684  ;;  %13937 = vmatprep.subr.bf16.mxu1 %v18682_v7 }
 0xad2   : > { %v18854_v39 = vsub.f32 %v7717_v55, %v18843_v46  ;;  %v7720_v38 = vsel %vm7714_vm4, %v7711_v33, %v7685_v14  ;;  %v7683_v44 = vpop.permute.xlu1 %7682 }
 0xad3   : > { %v18857_v53 = vand.u32 4294901760, %v7720_v38  ;;  %v7719_v20 = vsel %vm7714_vm4, %v7710_v63, %v7683_v44  ;;  %v7852_v9 = vand.u32 4294901760, %v18849_v49 }
 0xad4   : > { %v18863_v57 = vand.u32 4294901760, %v7719_v20  ;;  %13939 = vmatpush3.bf16.msra.mxu1 %v18682_v7  ;;  %v7842_v16 = vand.u32 4294901760, %v18854_v39 }
 0xad5   : > { %v18871_v17 = vsub.f32 %v7720_v38, %v18857_v53  ;;  %v7689_v30 = vpop.permute.xlu0 %7688  ;;  %13941 = vmatprep.subr.bf16.mxu1 %v18727_v22  ;;  %v7853_v31 = vsub.f32 %v18849_v49, %v7852_v9 }
 0xad6   : > { %v18879_v7 = vsub.f32 %v7719_v20, %v18863_v57  ;;  %v7722_v26 = vsel %vm7714_vm4, %v7713_v28, %v7689_v30  ;;  %v7687_v27 = vpop.permute.xlu1 %7686  ;;  %v7843_v2 = vsub.f32 %v18854_v39, %v7842_v16  ;;  %v13960_v30 = vpack.c.bf16 %v18776_v40, %v18771_v43 }
 0xad7   : > { %v18885_v0 = vand.u32 4294901760, %v7722_v26  ;;  %v7721_v5 = vsel %vm7714_vm4, %v7712_v15, %v7687_v27  ;;  %v7872_v47 = vand.u32 4294901760, %v18871_v17  ;;  %v7854_v58 = vand.u32 4294901760, %v7853_v31 }
 0xad8   : > { %v18889_v36 = vand.u32 4294901760, %v7721_v5  ;;  %13943 = vmatpush3.bf16.msra.mxu1 %v18727_v22  ;;  %v7844_v48 = vand.u32 4294901760, %v7843_v2  ;;  %v7862_v55 = vand.u32 4294901760, %v18879_v7  ;;  %v20747_v2 = vld [vmem:[#allocation86_spill] sm:$0xff] }
 0xad9   : > { %v18894_v1 = vsub.f32 %v7722_v26, %v18885_v0  ;;  %13945 = vmatprep.subr.bf16.mxu1 %v18729_v56  ;;  %v7873_v33 = vsub.f32 %v18871_v17, %v7872_v47  ;;  %v20745_v26 = vld [vmem:[#allocation27_spill] sm:$0xff] }
 0xada   : > { %v18901_v14 = vsub.f32 %v7721_v5, %v18889_v36  ;;  %13087 = vmatprep.mubr.f32.mxu1 %v7844_v48  ;;  %v7863_v22 = vsub.f32 %v18879_v7, %v7862_v55  ;;  %v20746_v27 = vand.u32 4294901760, %v20745_v26  ;;  %v20748_v5 = vand.u32 4294901760, %v20747_v2 }
 0xadb   : > { %13088 = vmatmul.mubr.f32.gmra.mrb[50].mxu1 %v7854_v58  ;;  %v7892_v63 = vand.u32 4294901760, %v18894_v1  ;;  %v7874_v20 = vand.u32 4294901760, %v7873_v33 }
 0xadc   : > { %13947 = vmatpush3.bf16.msra.mxu1 %v18729_v56  ;;  %v7864_v38 = vand.u32 4294901760, %v7863_v22  ;;  %v7882_v44 = vand.u32 4294901760, %v18901_v14 }
 0xadd   : > { %13949 = vmatprep.subr.bf16.mxu1 %v18738_v42  ;;  %v7893_v29 = vsub.f32 %v18894_v1, %v7892_v63 }
 0xade   : > { %13090 = vmatprep.mubr.f32.mxu1 %v7864_v38  ;;  %v7883_v32 = vsub.f32 %v18901_v14, %v7882_v44 }
 0xadf   : > { %13091 = vmatmul.mubr.f32.gmra.mrb[52].mxu1 %v7874_v20  ;;  %v7894_v56 = vand.u32 4294901760, %v7893_v29 }
 0xae0   : > { %13951 = vmatpush3.bf16.msra.mxu1 %v18738_v42  ;;  %v7884_v28 = vand.u32 4294901760, %v7883_v32  ;;  %v13964_v42 = vpack.c.bf16 %v18793_v24, %v18788_v10 }
 0xae1   : > { %13953 = vmatprep.subr.bf16.mxu1 %v18746_v35 }
 0xae2   : > { %13093 = vmatprep.mubr.f32.mxu1 %v7884_v28 }
 0xae3   : > { %13094 = vmatmul.mubr.f32.gmra.mrb[54].mxu1 %v7894_v56 }
 0xae4   : > { %13955 = vmatpush3.bf16.msra.mxu1 %v18746_v35  ;;  %13128 = vmatprep.mubr.f32.mxu1 %v18800_v37  ;;  %v20725_v35 = vld [vmem:[#allocation101_spill] sm:$0xff] }
 0xae5   : > { %13957 = vmatprep.subr.bf16.mxu1 %v18736_v50 }
 0xae7   : > { %13129 = vmatmul.mubr.f32.vlgmr.msra.gmra.mrb[48].mxu1 %v18797_v45 }
 0xae8   : > { %13959 = vmatpush3.bf16.msra.mxu1 %v18736_v50  ;;  %13131 = vmatprep.mubr.f32.mxu1 %v18843_v46  ;;  %v20724_v50 = vld [vmem:[#allocation77_spill] sm:$0xff] }
 0xae9   : > { %13961 = vmatprep.subr.bf16.mxu1 %v13960_v30 }
 0xaeb   : > { %13132 = vmatmul.mubr.f32.gmra.mrb[50].mxu1 %v18838_v4 }
 0xaec   : > { %13963 = vmatpush3.bf16.msra.mxu1 %v13960_v30  ;;  %13134 = vmatprep.mubr.f32.mxu1 %v18863_v57 }
 0xaed   : > { %13965 = vmatprep.subr.bf16.mxu1 %v13964_v42 }
 0xaef   : > { %13135 = vmatmul.mubr.f32.gmra.mrb[52].mxu1 %v18857_v53 }
 0xaf0   : > { %13967 = vmatpush3.bf16.msra.mxu1 %v13964_v42  ;;  %13137 = vmatprep.mubr.f32.mxu1 %v18889_v36 }
 0xaf1   : > { %13969 = vmatprep.subr.bf16.mxu1 %v18750_v6 }
 0xaf3   : > { %13138 = vmatmul.mubr.f32.gmra.mrb[54].mxu1 %v18885_v0 }
 0xaf4   : > { %13971 = vmatpush3.bf16.msra.mxu1 %v18750_v6  ;;  %13172 = vmatprep.mubr.f32.mxu1 %v18814_v19  ;;  %v20726_v6 = vand.u32 4294901760, %v18594_v13  ;;  %v20731_v13 = vand.u32 4294901760, %v18788_v10  ;;  %v20736_v10 = vand.u32 4294901760, %v18665_v18 }
 0xaf5   : > { %13973 = vmatprep.subr.bf16.mxu1 %v18754_v23 }
 0xaf8   : > { %13975 = vmatpush3.bf16.msra.mxu1 %v18754_v23  ;;  %v20727_v23 = vand.u32 4294901760, %v18599_v3  ;;  %v20732_v3 = vand.u32 4294901760, %v18793_v24  ;;  %v20735_v24 = vand.u32 4294901760, %v18659_v60  ;;  %v20743_v60 = vld [vmem:[#allocation81_spill] sm:$0xff] }
 0xaf9   : > { %13977 = vmatprep.subr.bf16.mxu1 %v18758_v8 }
 0xafa   : > { %v14028_v31 = vpack.c.bf16 %v20732_v3, %v20731_v13 }
 0xafc   : > { %13979 = vmatpush3.bf16.msra.mxu1 %v18758_v8  ;;  %v14020_v8 = vpack.c.bf16 %v20727_v23, %v20726_v6 }
 0xafd   : > { %13981 = vmatprep.subr.bf16.mxu1 %v18762_v54 }
 0xb00   : > { %13983 = vmatpush3.bf16.msra.mxu1 %v18762_v54  ;;  %v20728_v54 = vand.u32 4294901760, %v18771_v43  ;;  %v20733_v43 = vand.u32 4294901760, %v18637_v59  ;;  %v20737_v59 = vld [vmem:[#allocation62_spill] sm:$0xff] }
 0xb01   : > { %13985 = vmatprep.subr.bf16.mxu1 %v18766_v62 }
 0xb04   : > { %13987 = vmatpush3.bf16.msra.mxu1 %v18766_v62  ;;  %v20729_v62 = vand.u32 4294901760, %v18776_v40  ;;  %v20734_v40 = vand.u32 4294901760, %v18642_v52  ;;  %v20738_v52 = vand.u32 4294901760, %v20737_v59 }
 0xb05   : > { %13989 = vmatprep.subr.bf16.mxu1 %v18226_v61 }
 0xb06   : > { %v14024_v19 = vpack.c.bf16 %v20729_v62, %v20728_v54 }
 0xb07   : > { %13173 = vmatmul.mubr.f32.vlgmr.msra.gmra.mrb[48].mxu1 %v18806_v12 }
 0xb08   : > { %13175 = vmatprep.mubr.f32.mxu1 %v18854_v39  ;;  %13991 = vmatpush3.bf16.msra.mxu1 %v18226_v61  ;;  %v20739_v39 = vld [vmem:[#allocation89_spill] sm:$0xff] }
 0xb09   : > { %13993 = vmatprep.subr.bf16.mxu1 %v20724_v50 }
 0xb0b   : > { %13176 = vmatmul.mubr.f32.gmra.mrb[50].mxu1 %v18849_v49  ;;  %v14036_v49 = vpack.c.bf16 %v20736_v10, %v20735_v24 }
 0xb0c   : > { %13178 = vmatprep.mubr.f32.mxu1 %v18879_v7  ;;  %13995 = vmatpush3.bf16.msra.mxu1 %v20724_v50  ;;  %v20744_v7 = vand.u32 4294901760, %v20743_v60 }
 0xb0d   : > { %13997 = vmatprep.subr.bf16.mxu1 %v20725_v35 }
 0xb0f   : > { %13179 = vmatmul.mubr.f32.gmra.mrb[52].mxu1 %v18871_v17  ;;  %v20741_v17 = vld [vmem:[#allocation91_spill] sm:$0xff] }
 0xb10   : > { %13181 = vmatprep.mubr.f32.mxu1 %v18901_v14  ;;  %13999 = vmatpush3.bf16.msra.mxu1 %v20725_v35  ;;  %v20742_v15 = vand.u32 4294901760, %v20741_v17 }
 0xb11   : > { %14001 = vmatprep.subr.bf16.mxu1 %v18403_v11 }
 0xb12   : > { %v14044_v18 = vpack.c.bf16 %v20744_v7, %v20742_v15 }
 0xb13   : > { %13182 = vmatmul.mubr.f32.gmra.mrb[54].mxu1 %v18894_v1 }
 0xb14   : > { %14003 = vmatpush3.bf16.msra.mxu1 %v18403_v11  ;;  %13216 = vmatprep.mubr.f32.mxu1 %v7822_v25  ;;  %v20730_v25 = vand.u32 4294901760, %v18806_v12  ;;  %v14032_v12 = vpack.c.bf16 %v20734_v40, %v20733_v43 }
 0xb15   : > { %14005 = vmatprep.subr.bf16.mxu1 %v18415_v34 }
 0xb18   : > { %14007 = vmatpush3.bf16.msra.mxu1 %v18415_v34 }
 0xb19   : > { %14009 = vmatprep.subr.bf16.mxu1 %v18491_v51 }
 0xb1c   : > { %14011 = vmatpush3.bf16.msra.mxu1 %v18491_v51 }
 0xb1d   : > { %14013 = vmatprep.subr.bf16.mxu1 %v18521_v21 }
 0xb20   : > { %14015 = vmatpush3.bf16.msra.mxu1 %v18521_v21 }
 0xb21   : > { %14017 = vmatprep.subr.bf16.mxu1 %v18589_v41 }
 0xb24   : > { %14019 = vmatpush3.bf16.msra.mxu1 %v18589_v41 }
 0xb25   : > { %14021 = vmatprep.subr.bf16.mxu1 %v14020_v8 }
 0xb27   : > { %13217 = vmatmul.mubr.f32.vlgmr.msra.gmra.mrb[48].mxu1 %v20730_v25 }
 0xb28   : > { %13219 = vmatprep.mubr.f32.mxu1 %v7842_v16  ;;  %14023 = vmatpush3.bf16.msra.mxu1 %v14020_v8 }
 0xb29   : > { %14025 = vmatprep.subr.bf16.mxu1 %v14024_v19 }
 0xb2b   : > { %13220 = vmatmul.mubr.f32.gmra.mrb[50].mxu1 %v7852_v9  ;;  %v20740_v9 = vand.u32 4294901760, %v20739_v39 }
 0xb2c   : > { %13222 = vmatprep.mubr.f32.mxu1 %v7862_v55  ;;  %14027 = vmatpush3.bf16.msra.mxu1 %v14024_v19 }
 0xb2d   : > { %14029 = vmatprep.subr.bf16.mxu1 %v14028_v31  ;;  %v14040_v16 = vpack.c.bf16 %v20740_v9, %v20738_v52 }
 0xb2f   : > { %13223 = vmatmul.mubr.f32.gmra.mrb[52].mxu1 %v7872_v47  ;;  %v14048_v47 = vpack.c.bf16 %v20748_v5, %v20746_v27 }
 0xb30   : > { %13225 = vmatprep.mubr.f32.mxu1 %v7882_v44  ;;  %14031 = vmatpush3.bf16.msra.mxu1 %v14028_v31 }
 0xb31   : > { %14033 = vmatprep.subr.bf16.mxu1 %v14032_v12 }
 0xb33   : > { %13226 = vmatmul.mubr.f32.gmra.mrb[54].mxu1 %v7892_v63 }
 0xb34   : > { %14035 = vmatpush3.bf16.msra.mxu1 %v14032_v12  ;;  %13260 = vmatprep.mubr.f32.mxu1 %v18800_v37 }
 0xb35   : > { %14037 = vmatprep.subr.bf16.mxu1 %v14036_v49 }
 0xb38   : > { %14039 = vmatpush3.bf16.msra.mxu1 %v14036_v49 }
 0xb39   : > { %14041 = vmatprep.subr.bf16.mxu1 %v14040_v16 }
 0xb3c   : > { %14043 = vmatpush3.bf16.msra.mxu1 %v14040_v16 }
 0xb3d   : > { %14045 = vmatprep.subr.bf16.mxu1 %v14044_v18 }
 0xb40   : > { %14047 = vmatpush3.bf16.msra.mxu1 %v14044_v18 }
 0xb41   : > { %14049 = vmatprep.subr.bf16.mxu1 %v14048_v47 }
 0xb44   : > { %14051 = vmatpush3.bf16.msra.mxu1 %v14048_v47 }
 0xb45   : > { %14053 = vmatprep.subr.bf16.mxu1 %v18226_v61 }
 0xb47   : > { %13261 = vmatmul.mubr.f32.vlgmr.msra.gmra.mrb[48].mxu1 %v18797_v45 }
 0xb48   : > { %13263 = vmatprep.mubr.f32.mxu1 %v18843_v46  ;;  %14055 = vmatpush3.bf16.msra.mxu1 %v18226_v61 }
 0xb49   : > { %14057 = vmatprep.subr.bf16.mxu1 %v20724_v50 }
 0xb4b   : > { %13264 = vmatmul.mubr.f32.gmra.mrb[50].mxu1 %v18838_v4 }
 0xb4c   : > { %13266 = vmatprep.mubr.f32.mxu1 %v18863_v57  ;;  %14059 = vmatpush3.bf16.msra.mxu1 %v20724_v50 }
 0xb4d   : > { %14061 = vmatprep.subr.bf16.mxu1 %v20725_v35 }
 0xb4f   : > { %13267 = vmatmul.mubr.f32.gmra.mrb[52].mxu1 %v18857_v53 }
 0xb50   : > { %13269 = vmatprep.mubr.f32.mxu1 %v18889_v36  ;;  %14063 = vmatpush3.bf16.msra.mxu1 %v20725_v35 }
 0xb51   : > { %14065 = vmatprep.subr.bf16.mxu1 %v18403_v11 }
 0xb53   : > { %13270 = vmatmul.mubr.f32.gmra.mrb[54].mxu1 %v18885_v0 }
 0xb54   : > { %14067 = vmatpush3.bf16.msra.mxu1 %v18403_v11  ;;  %13304 = vmatprep.mubr.f32.mxu1 %v18800_v37 }
 0xb55   : > { %14069 = vmatprep.subr.bf16.mxu1 %v18415_v34 }
 0xb58   : > { %14071 = vmatpush3.bf16.msra.mxu1 %v18415_v34 }
 0xb59   : > { %14073 = vmatprep.subr.bf16.mxu1 %v18491_v51 }
 0xb5c   : > { %14075 = vmatpush3.bf16.msra.mxu1 %v18491_v51 }
 0xb5d   : > { %14077 = vmatprep.subr.bf16.mxu1 %v18521_v21 }
 0xb60   : > { %14079 = vmatpush3.bf16.msra.mxu1 %v18521_v21 }
 0xb61   : > { %14081 = vmatprep.subr.bf16.mxu1 %v18589_v41 }
 0xb64   : > { %14083 = vmatpush3.bf16.msra.mxu1 %v18589_v41 }
 0xb67   : > { %13305 = vmatmul.mubr.f32.vlgmr.msra.gmra.mrb[48].mxu1 %v18797_v45 }
 0xb68   : > { %13307 = vmatprep.mubr.f32.mxu1 %v18843_v46 }
 0xb6b   : > { %13308 = vmatmul.mubr.f32.gmra.mrb[50].mxu1 %v18838_v4 }
 0xb6c   : > { %13310 = vmatprep.mubr.f32.mxu1 %v18863_v57 }
 0xb6f   : > { %13311 = vmatmul.mubr.f32.gmra.mrb[52].mxu1 %v18857_v53 }
 0xb70   : > { %13313 = vmatprep.mubr.f32.mxu1 %v18889_v36 }
 0xb73   : > { %13314 = vmatmul.mubr.f32.gmra.mrb[54].mxu1 %v18885_v0 }
 0xc3a   : > { %v13306_v11 = vpop.f32.mrb[48].mxu1 }
 0xc3b   : > { %v8635_v61 = vpop.f32.mrb[49].mxu1  ;;  %v8685_v34 = vsel %vm748_vm1, %v13306_v11, 0.0 }
 0xc3c   : > { %8686 = vadd.xlane.f32.xlu0 %v8685_v34  ;;  %v8682_v51 = vsel %vm748_vm1, %v8635_v61, 0.0 }
 0xc3d   : > { %8683 = vadd.xlane.f32.xlu1 %v8682_v51 }
 0xc3e   : > { %v13309_v21 = vpop.f32.mrb[50].mxu1 }
 0xc3f   : > { %v8647_v41 = vpop.f32.mrb[51].mxu1  ;;  %v8691_v46 = vsel %vm748_vm1, %v13309_v21, 0.0 }
 0xc40   : > { %v8688_v45 = vsel %vm748_vm1, %v8647_v41, 0.0 }
 0xc41   : > { %8689 = vadd.xlane.f32.xlu0 %v8688_v45 }
 0xc42   : > { %v13312_v37 = vpop.f32.mrb[52].mxu1 }
 0xc43   : > { %v8659_v4 = vpop.f32.mrb[53].mxu1  ;;  %v8697_v48 = vsel %vm748_vm1, %v13312_v37, 0.0 }
 0xc44   : > { %v8694_v53 = vsel %vm748_vm1, %v8659_v4, 0.0 }
 0xc45   : > { %8692 = vadd.xlane.f32.xlu0 %v8691_v46  ;;  %8695 = vadd.xlane.f32.xlu1 %v8694_v53 }
 0xc46   : > { %v13315_v57 = vpop.f32.mrb[54].mxu1 }
 0xc47   : > { %v8671_v0 = vpop.f32.mrb[55].mxu1  ;;  %v8703_v55 = vsel %vm748_vm1, %v13315_v57, 0.0 }
 0xc48   : > { %v8700_v36 = vsel %vm748_vm1, %v8671_v0, 0.0 }
 0xc49   : > { %8698 = vadd.xlane.f32.xlu0 %v8697_v48  ;;  %8701 = vadd.xlane.f32.xlu1 %v8700_v36 }
 0xc4d   : > { %8704 = vadd.xlane.f32.xlu0 %v8703_v55 }
 0xcc9   : > { %v8687_v1 = vpop.xlane.xlu0 %8686 }
 0xcca   : > { %v8707_v58 = vmul.f32 0.03125, %v8687_v1  ;;  %v8684_v33 = vpop.xlane.xlu1 %8683 }
 0xccb   : > { %v8706_v14 = vmul.f32 0.03125, %v8684_v33 }
 0xccc   : > { %v19055_v22 = vsub.f32 %v13306_v11, %v8707_v58 }
 0xccd   : > { %v19057_v63 = vsub.f32 %v8635_v61, %v8706_v14 }
 0xcce   : > { %v8690_v38 = vpop.xlane.xlu0 %8689  ;;  %v8723_v44 = vmul.f32 %v19055_v22, %v19055_v22 }
 0xccf   : > { %v8708_v20 = vmul.f32 0.03125, %v8690_v38  ;;  %v8722_v29 = vmul.f32 %v19057_v63, %v19057_v63 }
 0xcd0   : > { %v8733_v32 = vsel %vm748_vm1, %v8723_v44, 0.0 }
 0xcd1   : > { %v19064_v28 = vsub.f32 %v8647_v41, %v8708_v20  ;;  %8734 = vadd.xlane.f32.xlu0 %v8733_v32  ;;  %v8730_v56 = vsel %vm748_vm1, %v8722_v29, 0.0  ;;  %v15189_v32 = vld [vmem:[#allocation2 + $0x8] sm:$0xff] }
 0xcd2   : > { %v8693_v30 = vpop.xlane.xlu0 %8692  ;;  %v8696_v42 = vpop.xlane.xlu1 %8695  ;;  %8731 = vadd.xlane.f32.xlu1 %v8730_v56 }
 0xcd3   : > { %v8709_v50 = vmul.f32 0.03125, %v8693_v30  ;;  %v8710_v35 = vmul.f32 0.03125, %v8696_v42  ;;  %v8724_v6 = vmul.f32 %v19064_v28, %v19064_v28  ;;  %v15190_v30 = vld [vmem:[#allocation2] sm:$0xff] }
 0xcd5   : > { %v19069_v23 = vsub.f32 %v13309_v21, %v8709_v50  ;;  %v19071_v8 = vsub.f32 %v8659_v4, %v8710_v35  ;;  %v8736_v54 = vsel %vm748_vm1, %v8724_v6, 0.0 }
 0xcd6   : > { %v8699_v62 = vpop.xlane.xlu0 %8698  ;;  %8737 = vadd.xlane.f32.xlu1 %v8736_v54  ;;  %v8702_v19 = vpop.xlane.xlu1 %8701 }
 0xcd7   : > { %v8711_v25 = vmul.f32 0.03125, %v8699_v62  ;;  %v8712_v13 = vmul.f32 0.03125, %v8702_v19  ;;  %v8725_v3 = vmul.f32 %v19069_v23, %v19069_v23  ;;  %v8726_v31 = vmul.f32 %v19071_v8, %v19071_v8  ;;  %v15191_v62 = vld [vmem:[#allocation2 + $0x10] sm:$0xff] }
 0xcd9   : > { %v19078_v43 = vsub.f32 %v13312_v37, %v8711_v25  ;;  %v19080_v40 = vsub.f32 %v8671_v0, %v8712_v13  ;;  %v8739_v12 = vsel %vm748_vm1, %v8725_v3, 0.0  ;;  %v8742_v24 = vsel %vm748_vm1, %v8726_v31, 0.0  ;;  %v11092_v0 = vld [vmem:[%s673_s27] ss:$0 sm:$0xff] }
 0xcda   : > { %8740 = vadd.xlane.f32.xlu0 %v8739_v12  ;;  %v8705_v10 = vpop.xlane.xlu0 %8704  ;;  %8743 = vadd.xlane.f32.xlu1 %v8742_v24 }
 0xcdb   : > { %v8713_v49 = vmul.f32 0.03125, %v8705_v10  ;;  %v8727_v59 = vmul.f32 %v19078_v43, %v19078_v43  ;;  %v8728_v52 = vmul.f32 %v19080_v40, %v19080_v40  ;;  %v15192_v10 = vld [vmem:[#allocation2 + $0x18] sm:$0xff] }
 0xcdd   : > { %v19088_v39 = vsub.f32 %v13315_v57, %v8713_v49  ;;  %v8745_v9 = vsel %vm748_vm1, %v8727_v59, 0.0  ;;  %v8748_v16 = vsel %vm748_vm1, %v8728_v52, 0.0  ;;  %v15193_v52 = vld [vmem:[#allocation2 + $0x20] sm:$0xff] }
 0xcde   : > { %8746 = vadd.xlane.f32.xlu0 %v8745_v9  ;;  %8749 = vadd.xlane.f32.xlu1 %v8748_v16 }
 0xcdf   : > { %v8729_v17 = vmul.f32 %v19088_v39, %v19088_v39 }
 0xce1   : > { %v8751_v15 = vsel %vm748_vm1, %v8729_v17, 0.0 }
 0xce2   : > { %8752 = vadd.xlane.f32.xlu0 %v8751_v15 }
 0xd5e   : > { %v8735_v60 = vpop.xlane.xlu0 %8734 }
 0xd5f   : > { %v8755_v7 = vmul.f32 0.03125, %v8735_v60  ;;  %v8732_v18 = vpop.xlane.xlu1 %8731 }
 0xd60   : > { %v8754_v26 = vmul.f32 0.03125, %v8732_v18 }
 0xd61   : > { %v8763_v27 = vadd.f32 1e-05, %v8755_v7  ;;  %v15194_v7 = vld [vmem:[#allocation2 + $0x28] sm:$0xff] }
 0xd62   : > { %v8762_v2 = vadd.f32 1e-05, %v8754_v26  ;;  %v15195_v26 = vld [vmem:[#allocation2 + $0x30] sm:$0xff] }
 0xd63   : > { %15124 = vrsqrt.f32 %v8763_v27  ;;  %v8738_v5 = vpop.xlane.xlu1 %8737 }
 0xd64   : > { %15126 = vrsqrt.f32 %v8762_v2  ;;  %v8756_v47 = vmul.f32 0.03125, %v8738_v5 }
 0xd66   : > { %v8764_v11 = vadd.f32 1e-05, %v8756_v47  ;;  %v15196_v47 = vld [vmem:[#allocation2 + $0x38] sm:$0xff] }
 0xd67   : > { %v8741_v61 = vpop.xlane.xlu0 %8740  ;;  %v8744_v34 = vpop.xlane.xlu1 %8743 }
 0xd68   : > { %15128 = vrsqrt.f32 %v8764_v11  ;;  %v8757_v51 = vmul.f32 0.03125, %v8741_v61  ;;  %v8758_v21 = vmul.f32 0.03125, %v8744_v34  ;;  %v8928_v34 = vld [vmem:[%s15506_s14 + $0x8] sm:$0xff] }
 0xd6a   : > { %v8765_v41 = vadd.f32 1e-05, %v8757_v51  ;;  %v8766_v45 = vadd.f32 1e-05, %v8758_v21  ;;  %v8959_v21 = vand.u32 4294901760, %v8928_v34 }
 0xd6b   : > { %v8747_v37 = vpop.xlane.xlu0 %8746  ;;  %v8750_v4 = vpop.xlane.xlu1 %8749 }
 0xd6c   : > { %15130 = vrsqrt.f32 %v8765_v41  ;;  %v8759_v46 = vmul.f32 0.03125, %v8747_v37  ;;  %v8760_v53 = vmul.f32 0.03125, %v8750_v4 }
 0xd6d   : > { %v15125_v57 = vpop.eup %15124  ;;  %15132 = vrsqrt.f32 %v8766_v45 }
 0xd6e   : > { %v15127_v36 = vpop.eup %15126  ;;  %v8767_v48 = vadd.f32 1e-05, %v8759_v46  ;;  %v8768_v55 = vadd.f32 1e-05, %v8760_v53  ;;  %v8779_v1 = vmul.f32 %v15125_v57, %v19055_v22 }
 0xd6f   : > { %v8753_v58 = vpop.xlane.xlu0 %8752  ;;  %v8778_v33 = vmul.f32 %v15127_v36, %v19057_v63 }
 0xd70   : > { %15134 = vrsqrt.f32 %v8767_v48  ;;  %v8761_v14 = vmul.f32 0.03125, %v8753_v58  ;;  %v8793_v38 = vmul.f32 %v11092_v0, %v8779_v1 }
 0xd71   : > { %15136 = vrsqrt.f32 %v8768_v55  ;;  %v8792_v44 = vmul.f32 %v11092_v0, %v8778_v33 }
 0xd72   : > { %v15129_v20 = vpop.eup %15128  ;;  %v8769_v29 = vadd.f32 1e-05, %v8761_v14  ;;  %v19102_v56 = vadd.f32 %v15189_v32, %v8793_v38 }
 0xd73   : > { %v19104_v42 = vadd.f32 %v15190_v30, %v8792_v44  ;;  %v8780_v50 = vmul.f32 %v15129_v20, %v19064_v28 }
 0xd74   : > { %15138 = vrsqrt.f32 %v8769_v29  ;;  %v8812_v22 = vsel %vm748_vm1, %v19102_v56, 0.0 }
 0xd75   : > { %8813 = vadd.xlane.f32.xlu0 %v8812_v22  ;;  %v8809_v63 = vsel %vm748_vm1, %v19104_v42, 0.0  ;;  %v8794_v35 = vmul.f32 %v11092_v0, %v8780_v50 }
 0xd76   : > { %v15131_v6 = vpop.eup %15130  ;;  %8810 = vadd.xlane.f32.xlu1 %v8809_v63 }
 0xd77   : > { %v15133_v54 = vpop.eup %15132  ;;  %v19111_v19 = vadd.f32 %v15191_v62, %v8794_v35  ;;  %v8781_v25 = vmul.f32 %v15131_v6, %v19069_v23 }
 0xd78   : > { %v8782_v13 = vmul.f32 %v15133_v54, %v19071_v8 }
 0xd79   : > { %v8815_v28 = vsel %vm748_vm1, %v19111_v19, 0.0  ;;  %v8795_v3 = vmul.f32 %v11092_v0, %v8781_v25 }
 0xd7a   : > { %v15135_v31 = vpop.eup %15134  ;;  %8816 = vadd.xlane.f32.xlu1 %v8815_v28  ;;  %v8796_v12 = vmul.f32 %v11092_v0, %v8782_v13 }
 0xd7b   : > { %v15137_v24 = vpop.eup %15136  ;;  %v19117_v49 = vadd.f32 %v15192_v10, %v8795_v3  ;;  %v8783_v59 = vmul.f32 %v15135_v31, %v19078_v43 }
 0xd7c   : > { %v19120_v9 = vadd.f32 %v15193_v52, %v8796_v12  ;;  %v8784_v23 = vmul.f32 %v15137_v24, %v19080_v40 }
 0xd7d   : > { %v8818_v8 = vsel %vm748_vm1, %v19117_v49, 0.0  ;;  %v8797_v16 = vmul.f32 %v11092_v0, %v8783_v59 }
 0xd7e   : > { %v15139_v17 = vpop.eup %15138  ;;  %8819 = vadd.xlane.f32.xlu0 %v8818_v8  ;;  %v8821_v15 = vsel %vm748_vm1, %v19120_v9, 0.0  ;;  %v8798_v60 = vmul.f32 %v11092_v0, %v8784_v23 }
 0xd7f   : > { %8822 = vadd.xlane.f32.xlu1 %v8821_v15  ;;  %v19127_v43 = vadd.f32 %v15194_v7, %v8797_v16  ;;  %v8785_v18 = vmul.f32 %v15139_v17, %v19088_v39  ;;  %v8927_v39 = vld [vmem:[%s15506_s14] sm:$0xff]  ;;  %v8929_v17 = vld [vmem:[%s15506_s14 + $0x10] sm:$0xff]  ;;  %v8930_v15 = vld [vmem:[%s15506_s14 + $0x18] sm:$0xff] }
 0xd80   : > { %v19130_v40 = vadd.f32 %v15195_v26, %v8798_v60  ;;  %v8956_v51 = vand.u32 4294901760, %v8927_v39  ;;  %v8962_v60 = vand.u32 4294901760, %v8929_v17  ;;  %v8965_v7 = vand.u32 4294901760, %v8930_v15 }
 0xd81   : > { %v8824_v27 = vsel %vm748_vm1, %v19127_v43, 0.0  ;;  %v8799_v2 = vmul.f32 %v11092_v0, %v8785_v18 }
 0xd82   : > { %8825 = vadd.xlane.f32.xlu0 %v8824_v27  ;;  %v8827_v5 = vsel %vm748_vm1, %v19130_v40, 0.0  ;;  %v19142_v41 = vpack.c.bf16 %v8959_v21, %v8956_v51  ;;  %v19196_v18 = vpack.c.bf16 %v8965_v7, %v8962_v60  ;;  %v9106_v26 = vsub.f32 %v8927_v39, %v8956_v51 }
 0xd83   : > { %8828 = vadd.xlane.f32.xlu1 %v8827_v5  ;;  %v19136_v11 = vadd.f32 %v15196_v47, %v8799_v2  ;;  %v9113_v27 = vsub.f32 %v8928_v34, %v8959_v21 }
 0xd84   : > { %14085 = vmatprep.subr.bf16.mxu0 %v19142_v41  ;;  %v9107_v2 = vand.u32 4294901760, %v9106_v26 }
 0xd85   : > { %v8830_v61 = vsel %vm748_vm1, %v19136_v11, 0.0  ;;  %14087 = vmatpush3.bf16.msra.mxu0 %v19142_v41  ;;  %v9114_v5 = vand.u32 4294901760, %v9113_v27  ;;  %v19205_v34 = vpack.c.bf16 %v9113_v27, %v9106_v26 }
 0xd86   : > { %8831 = vadd.xlane.f32.xlu0 %v8830_v61  ;;  %14089 = vmatprep.subr.bf16.mxu0 %v19196_v18  ;;  %v9108_v47 = vsub.f32 %v9106_v26, %v9107_v2 }
 0xd87   : > { %v9115_v61 = vsub.f32 %v9113_v27, %v9114_v5  ;;  %v19209_v21 = vpack.c.bf16 %v9114_v5, %v9107_v2 }
 0xd89   : > { %14091 = vmatpush3.bf16.msra.mxu0 %v19196_v18 }
 0xe02   : > { %v8814_v45 = vpop.xlane.xlu0 %8813 }
 0xe03   : > { %v8834_v37 = vmul.f32 0.03125, %v8814_v45  ;;  %v8811_v4 = vpop.xlane.xlu1 %8810  ;;  %v9109_v45 = vand.u32 4294901760, %v9108_v47 }
 0xe04   : > { %v8833_v46 = vmul.f32 0.03125, %v8811_v4 }
 0xe05   : > { %v19147_v53 = vsub.f32 %v19102_v56, %v8834_v37  ;;  %v9116_v37 = vand.u32 4294901760, %v9115_v61 }
 0xe06   : > { %v19150_v57 = vsub.f32 %v19104_v42, %v8833_v46  ;;  %v9120_v46 = vsub.f32 %v8929_v17, %v8962_v60 }
 0xe07   : > { %v8817_v0 = vpop.xlane.xlu1 %8816  ;;  %v8850_v36 = vmul.f32 %v19147_v53, %v19147_v53  ;;  %v19200_v4 = vpack.c.bf16 %v9116_v37, %v9109_v45 }
 0xe08   : > { %v8835_v48 = vmul.f32 0.03125, %v8817_v0  ;;  %v8849_v55 = vmul.f32 %v19150_v57, %v19150_v57  ;;  %v9127_v0 = vsub.f32 %v8930_v15, %v8965_v7 }
 0xe09   : > { %v8860_v1 = vsel %vm748_vm1, %v8850_v36, 0.0  ;;  %14093 = vmatprep.subr.bf16.mxu0 %v19200_v4  ;;  %v9121_v36 = vand.u32 4294901760, %v9120_v46 }
 0xe0a   : > { %v19158_v58 = vsub.f32 %v19111_v19, %v8835_v48  ;;  %8861 = vadd.xlane.f32.xlu0 %v8860_v1  ;;  %v8857_v33 = vsel %vm748_vm1, %v8849_v55, 0.0  ;;  %v9128_v48 = vand.u32 4294901760, %v9127_v0  ;;  %v19207_v51 = vpack.c.bf16 %v9127_v0, %v9120_v46 }
 0xe0b   : > { %v8820_v14 = vpop.xlane.xlu0 %8819  ;;  %8858 = vadd.xlane.f32.xlu1 %v8857_v33  ;;  %v9122_v55 = vsub.f32 %v9120_v46, %v9121_v36 }
 0xe0c   : > { %v8836_v38 = vmul.f32 0.03125, %v8820_v14  ;;  %v8823_v44 = vpop.xlane.xlu1 %8822  ;;  %v8851_v20 = vmul.f32 %v19158_v58, %v19158_v58  ;;  %v9129_v1 = vsub.f32 %v9127_v0, %v9128_v48 }
 0xe0d   : > { %v8837_v29 = vmul.f32 0.03125, %v8823_v44  ;;  %v9123_v33 = vand.u32 4294901760, %v9122_v55 }
 0xe0e   : > { %v19164_v32 = vsub.f32 %v19117_v49, %v8836_v38  ;;  %v8863_v30 = vsel %vm748_vm1, %v8851_v20, 0.0  ;;  %v9130_v14 = vand.u32 4294901760, %v9129_v1  ;;  %v19211_v38 = vpack.c.bf16 %v9128_v48, %v9121_v36 }
 0xe0f   : > { %v19168_v50 = vsub.f32 %v19120_v9, %v8837_v29  ;;  %v8826_v22 = vpop.xlane.xlu0 %8825  ;;  %8864 = vadd.xlane.f32.xlu1 %v8863_v30 }
 0xe10   : > { %v8838_v63 = vmul.f32 0.03125, %v8826_v22  ;;  %v8829_v35 = vpop.xlane.xlu1 %8828  ;;  %v8852_v6 = vmul.f32 %v19164_v32, %v19164_v32  ;;  %v19203_v39 = vpack.c.bf16 %v9130_v14, %v9123_v33 }
 0xe11   : > { %v8839_v54 = vmul.f32 0.03125, %v8829_v35  ;;  %v8853_v62 = vmul.f32 %v19168_v50, %v19168_v50 }
 0xe12   : > { %v19175_v25 = vsub.f32 %v19127_v43, %v8838_v63  ;;  %v8866_v13 = vsel %vm748_vm1, %v8852_v6, 0.0 }
 0xe13   : > { %v19179_v28 = vsub.f32 %v19130_v40, %v8839_v54  ;;  %8867 = vadd.xlane.f32.xlu0 %v8866_v13  ;;  %v8832_v3 = vpop.xlane.xlu0 %8831  ;;  %v8869_v31 = vsel %vm748_vm1, %v8853_v62, 0.0 }
 0xe14   : > { %v8840_v12 = vmul.f32 0.03125, %v8832_v3  ;;  %8870 = vadd.xlane.f32.xlu1 %v8869_v31  ;;  %v8854_v24 = vmul.f32 %v19175_v25, %v19175_v25 }
 0xe15   : > { %v8855_v10 = vmul.f32 %v19179_v28, %v19179_v28 }
 0xe16   : > { %v19187_v59 = vsub.f32 %v19136_v11, %v8840_v12  ;;  %v8872_v52 = vsel %vm748_vm1, %v8854_v24, 0.0 }
 0xe17   : > { %8873 = vadd.xlane.f32.xlu0 %v8872_v52  ;;  %v8875_v23 = vsel %vm748_vm1, %v8855_v10, 0.0 }
 0xe18   : > { %8876 = vadd.xlane.f32.xlu1 %v8875_v23  ;;  %v8856_v8 = vmul.f32 %v19187_v59, %v19187_v59 }
 0xe1a   : > { %v8878_v16 = vsel %vm748_vm1, %v8856_v8, 0.0 }
 0xe1b   : > { %8879 = vadd.xlane.f32.xlu0 %v8878_v16  ;;  %v19218_v16 = vld [vmem:[%s676_s15] ss:$0 sm:$0xff] }
 0xe97   : > { %v8862_v44 = vpop.xlane.xlu0 %8861 }
 0xe98   : > { %v8882_v20 = vmul.f32 0.03125, %v8862_v44  ;;  %v8859_v29 = vpop.xlane.xlu1 %8858 }
 0xe99   : > { %v8881_v30 = vmul.f32 0.03125, %v8859_v29 }
 0xe9a   : > { %v8890_v22 = vadd.f32 1e-05, %v8882_v20 }
 0xe9b   : > { %v8889_v63 = vadd.f32 1e-05, %v8881_v30 }
 0xe9c   : > { %15140 = vrsqrt.f32 %v8890_v22  ;;  %v8865_v35 = vpop.xlane.xlu1 %8864 }
 0xe9d   : > { %15142 = vrsqrt.f32 %v8889_v63  ;;  %v8883_v6 = vmul.f32 0.03125, %v8865_v35 }
 0xe9f   : > { %v8891_v54 = vadd.f32 1e-05, %v8883_v6 }
 0xea0   : > { %v8868_v62 = vpop.xlane.xlu0 %8867 }
 0xea1   : > { %15144 = vrsqrt.f32 %v8891_v54  ;;  %v8884_v13 = vmul.f32 0.03125, %v8868_v62  ;;  %v8871_v3 = vpop.xlane.xlu1 %8870 }
 0xea2   : > { %v8885_v31 = vmul.f32 0.03125, %v8871_v3 }
 0xea3   : > { %v8892_v12 = vadd.f32 1e-05, %v8884_v13 }
 0xea4   : > { %v8893_v24 = vadd.f32 1e-05, %v8885_v31  ;;  %v8874_v10 = vpop.xlane.xlu0 %8873 }
 0xea5   : > { %15146 = vrsqrt.f32 %v8892_v12  ;;  %v8886_v52 = vmul.f32 0.03125, %v8874_v10  ;;  %v8877_v23 = vpop.xlane.xlu1 %8876 }
 0xea6   : > { %v15141_v8 = vpop.eup %15140  ;;  %15148 = vrsqrt.f32 %v8893_v24  ;;  %v8887_v17 = vmul.f32 0.03125, %v8877_v23 }
 0xea7   : > { %v15143_v15 = vpop.eup %15142  ;;  %v8906_v60 = vmul.f32 %v15141_v8, %v19147_v53  ;;  %v8894_v7 = vadd.f32 1e-05, %v8886_v52 }
 0xea8   : > { %v8905_v26 = vmul.f32 %v15143_v15, %v19150_v57  ;;  %v8895_v27 = vadd.f32 1e-05, %v8887_v17  ;;  %v8880_v2 = vpop.xlane.xlu0 %8879 }
 0xea9   : > { %v8920_v5 = vmul.f32 %v19218_v16, %v8906_v60  ;;  %15150 = vrsqrt.f32 %v8894_v7  ;;  %v8888_v47 = vmul.f32 0.03125, %v8880_v2 }
 0xeaa   : > { %15152 = vrsqrt.f32 %v8895_v27  ;;  %v8919_v61 = vmul.f32 %v19218_v16, %v8905_v26 }
 0xeab   : > { %v15145_v45 = vpop.eup %15144  ;;  %v8935_v37 = vsel %vm748_vm1, %v8920_v5, 0  ;;  %v8896_v46 = vadd.f32 1e-05, %v8888_v47 }
 0xeac   : > { %v19225_v0 = vand.u32 4294901760, %v8935_v37  ;;  %v8907_v53 = vmul.f32 %v15145_v45, %v19158_v58  ;;  %v8932_v36 = vsel %vm748_vm1, %v8919_v61, 0 }
 0xead   : > { %15154 = vrsqrt.f32 %v8896_v46  ;;  %v19229_v57 = vand.u32 4294901760, %v8932_v36 }
 0xeae   : > { %v19232_v48 = vsub.f32 %v8935_v37, %v19225_v0  ;;  %v8921_v55 = vmul.f32 %v19218_v16, %v8907_v53 }
 0xeaf   : > { %v15147_v1 = vpop.eup %15146  ;;  %v19236_v33 = vsub.f32 %v8932_v36, %v19229_v57 }
 0xeb0   : > { %v15149_v14 = vpop.eup %15148  ;;  %v8908_v44 = vmul.f32 %v15147_v1, %v19164_v32  ;;  %v9036_v20 = vand.u32 4294901760, %v19232_v48  ;;  %v8938_v58 = vsel %vm748_vm1, %v8921_v55, 0 }
 0xeb1   : > { %v8909_v29 = vmul.f32 %v15149_v14, %v19168_v50  ;;  %v9026_v30 = vand.u32 4294901760, %v19236_v33  ;;  %v19243_v22 = vand.u32 4294901760, %v8938_v58 }
 0xeb2   : > { %v9037_v63 = vsub.f32 %v19232_v48, %v9036_v20  ;;  %v8922_v35 = vmul.f32 %v19218_v16, %v8908_v44 }
 0xeb3   : > { %v15151_v6 = vpop.eup %15150  ;;  %v9027_v32 = vsub.f32 %v19236_v33, %v9026_v30  ;;  %v19253_v54 = vsub.f32 %v8938_v58, %v19243_v22  ;;  %v8923_v50 = vmul.f32 %v19218_v16, %v8909_v29 }
 0xeb4   : > { %v15153_v62 = vpop.eup %15152  ;;  %v8910_v13 = vmul.f32 %v15151_v6, %v19175_v25  ;;  %v8941_v3 = vsel %vm748_vm1, %v8922_v35, 0  ;;  %v9038_v52 = vand.u32 4294901760, %v9037_v63 }
 0xeb5   : > { %v8911_v31 = vmul.f32 %v15153_v62, %v19179_v28  ;;  %v9028_v12 = vand.u32 4294901760, %v9027_v32  ;;  %v9046_v24 = vand.u32 4294901760, %v19253_v54  ;;  %v19260_v10 = vand.u32 4294901760, %v8941_v3 }
 0xeb6   : > { %v8944_v23 = vsel %vm748_vm1, %v8923_v50, 0  ;;  %v8924_v8 = vmul.f32 %v19218_v16, %v8910_v13 }
 0xeb7   : > { %v15155_v17 = vpop.eup %15154  ;;  %13324 = vmatprep.mubr.f32.mxu0 %v9028_v12  ;;  %v9047_v25 = vsub.f32 %v19253_v54, %v9046_v24  ;;  %v19268_v15 = vsub.f32 %v8941_v3, %v19260_v10  ;;  %v19270_v28 = vand.u32 4294901760, %v8944_v23  ;;  %v8925_v60 = vmul.f32 %v19218_v16, %v8911_v31 }
 0xeb8   : > { %v8912_v7 = vmul.f32 %v15155_v17, %v19187_v59  ;;  %13325 = vmatmul.mubr.f32.vlgmr.msra.gmra.mrb[40].mxu0 %v9038_v52  ;;  %v8947_v26 = vsel %vm748_vm1, %v8924_v8, 0 }
 0xeb9   : > { %v9048_v27 = vand.u32 4294901760, %v9047_v25  ;;  %14095 = vmatpush3.bf16.msra.mxu0 %v19200_v4  ;;  %v9056_v2 = vand.u32 4294901760, %v19268_v15  ;;  %v19278_v5 = vsub.f32 %v8944_v23, %v19270_v28  ;;  %v19280_v47 = vand.u32 4294901760, %v8947_v26 }
 0xeba   : > { %14097 = vmatprep.subr.bf16.mxu0 %v19203_v39  ;;  %v8950_v61 = vsel %vm748_vm1, %v8925_v60, 0  ;;  %v8926_v45 = vmul.f32 %v19218_v16, %v8912_v7 }
 0xebb   : > { %13327 = vmatprep.mubr.f32.mxu0 %v9048_v27  ;;  %v9057_v59 = vsub.f32 %v19268_v15, %v9056_v2  ;;  %v9066_v37 = vand.u32 4294901760, %v19278_v5  ;;  %v9075_v4 = vsub.f32 %v8947_v26, %v19280_v47  ;;  %v19288_v46 = vand.u32 4294901760, %v8950_v61 }
 0xebc   : > { %v8953_v53 = vsel %vm748_vm1, %v8926_v45, 0 }
 0xebd   : > { %v9058_v36 = vand.u32 4294901760, %v9057_v59  ;;  %v9067_v55 = vsub.f32 %v19278_v5, %v9066_v37  ;;  %v9076_v1 = vand.u32 4294901760, %v9075_v4  ;;  %14099 = vmatpush3.bf16.msra.mxu0 %v19203_v39  ;;  %v9085_v14 = vsub.f32 %v8950_v61, %v19288_v46 }
 0xebe   : > { %v19294_v16 = vand.u32 4294901760, %v8953_v53  ;;  %14101 = vmatprep.subr.bf16.mxu0 %v19205_v34 }
 0xebf   : > { %13328 = vmatmul.mubr.f32.gmra.mrb[42].mxu0 %v9058_v36  ;;  %v9068_v44 = vand.u32 4294901760, %v9067_v55  ;;  %v9077_v58 = vsub.f32 %v9075_v4, %v9076_v1  ;;  %v9086_v29 = vand.u32 4294901760, %v9085_v14 }
 0xec0   : > { %v9095_v63 = vsub.f32 %v8953_v53, %v19294_v16 }
 0xec1   : > { %13330 = vmatprep.mubr.f32.mxu0 %v9068_v44  ;;  %v9078_v35 = vand.u32 4294901760, %v9077_v58  ;;  %v9087_v6 = vsub.f32 %v9085_v14, %v9086_v29 }
 0xec2   : > { %v9096_v32 = vand.u32 4294901760, %v9095_v63 }
 0xec3   : > { %13331 = vmatmul.mubr.f32.gmra.mrb[44].mxu0 %v9078_v35  ;;  %v9088_v50 = vand.u32 4294901760, %v9087_v6 }
 0xec4   : > { %v9097_v62 = vsub.f32 %v9095_v63, %v9096_v32 }
 0xec5   : > { %13333 = vmatprep.mubr.f32.mxu0 %v9088_v50 }
 0xec6   : > { %v9098_v39 = vand.u32 4294901760, %v9097_v62 }
 0xec8   : > { %13334 = vmatmul.mubr.f32.gmra.mrb[46].mxu0 %v9098_v39 }
 0xec9   : > { %13344 = vmatprep.mubr.f32.mxu0 %v19229_v57 }
 0xecc   : > { %13345 = vmatmul.mubr.f32.vlgmr.msra.gmra.mrb[40].mxu0 %v19225_v0 }
 0xecd   : > { %14103 = vmatpush3.bf16.msra.mxu0 %v19205_v34  ;;  %13347 = vmatprep.mubr.f32.mxu0 %v19243_v22 }
 0xece   : > { %14105 = vmatprep.subr.bf16.mxu0 %v19207_v51 }
 0xed0   : > { %13348 = vmatmul.mubr.f32.gmra.mrb[42].mxu0 %v19260_v10 }
 0xed1   : > { %13350 = vmatprep.mubr.f32.mxu0 %v19270_v28  ;;  %14107 = vmatpush3.bf16.msra.mxu0 %v19207_v51 }
 0xed2   : > { %14109 = vmatprep.subr.bf16.mxu0 %v19142_v41 }
 0xed4   : > { %13351 = vmatmul.mubr.f32.gmra.mrb[44].mxu0 %v19280_v47 }
 0xed5   : > { %13353 = vmatprep.mubr.f32.mxu0 %v19288_v46 }
 0xed8   : > { %13354 = vmatmul.mubr.f32.gmra.mrb[46].mxu0 %v19294_v16 }
 0xed9   : > { %13364 = vmatprep.mubr.f32.mxu0 %v19236_v33 }
 0xedc   : > { %13365 = vmatmul.mubr.f32.vlgmr.msra.gmra.mrb[40].mxu0 %v19232_v48 }
 0xedd   : > { %14111 = vmatpush3.bf16.msra.mxu0 %v19142_v41  ;;  %13367 = vmatprep.mubr.f32.mxu0 %v19253_v54 }
 0xede   : > { %14113 = vmatprep.subr.bf16.mxu0 %v19196_v18 }
 0xee0   : > { %13368 = vmatmul.mubr.f32.gmra.mrb[42].mxu0 %v19268_v15 }
 0xee1   : > { %13370 = vmatprep.mubr.f32.mxu0 %v19278_v5  ;;  %14115 = vmatpush3.bf16.msra.mxu0 %v19196_v18 }
 0xee2   : > { %14117 = vmatprep.subr.bf16.mxu0 %v19209_v21 }
 0xee4   : > { %13371 = vmatmul.mubr.f32.gmra.mrb[44].mxu0 %v9075_v4 }
 0xee5   : > { %13373 = vmatprep.mubr.f32.mxu0 %v9085_v14 }
 0xee8   : > { %13374 = vmatmul.mubr.f32.gmra.mrb[46].mxu0 %v9095_v63 }
 0xee9   : > { %13384 = vmatprep.mubr.f32.mxu0 %v9026_v30 }
 0xeec   : > { %13385 = vmatmul.mubr.f32.vlgmr.msra.gmra.mrb[40].mxu0 %v9036_v20 }
 0xeed   : > { %14119 = vmatpush3.bf16.msra.mxu0 %v19209_v21  ;;  %13387 = vmatprep.mubr.f32.mxu0 %v9046_v24 }
 0xeee   : > { %14121 = vmatprep.subr.bf16.mxu0 %v19211_v38 }
 0xef0   : > { %13388 = vmatmul.mubr.f32.gmra.mrb[42].mxu0 %v9056_v2 }
 0xef1   : > { %13390 = vmatprep.mubr.f32.mxu0 %v9066_v37  ;;  %14123 = vmatpush3.bf16.msra.mxu0 %v19211_v38 }
 0xef2   : > { %14125 = vmatprep.subr.bf16.mxu0 %v19142_v41 }
 0xef4   : > { %13391 = vmatmul.mubr.f32.gmra.mrb[44].mxu0 %v9076_v1 }
 0xef5   : > { %13393 = vmatprep.mubr.f32.mxu0 %v9086_v29 }
 0xef8   : > { %13394 = vmatmul.mubr.f32.gmra.mrb[46].mxu0 %v9096_v32 }
 0xef9   : > { %13404 = vmatprep.mubr.f32.mxu0 %v19229_v57 }
 0xefc   : > { %13405 = vmatmul.mubr.f32.vlgmr.msra.gmra.mrb[40].mxu0 %v19225_v0 }
 0xefd   : > { %14127 = vmatpush3.bf16.msra.mxu0 %v19142_v41  ;;  %13407 = vmatprep.mubr.f32.mxu0 %v19243_v22 }
 0xefe   : > { %14129 = vmatprep.subr.bf16.mxu0 %v19196_v18 }
 0xf00   : > { %13408 = vmatmul.mubr.f32.gmra.mrb[42].mxu0 %v19260_v10 }
 0xf01   : > { %13410 = vmatprep.mubr.f32.mxu0 %v19270_v28  ;;  %14131 = vmatpush3.bf16.msra.mxu0 %v19196_v18 }
 0xf04   : > { %13411 = vmatmul.mubr.f32.gmra.mrb[44].mxu0 %v19280_v47 }
 0xf05   : > { %13413 = vmatprep.mubr.f32.mxu0 %v19288_v46 }
 0xf08   : > { %13414 = vmatmul.mubr.f32.gmra.mrb[46].mxu0 %v19294_v16 }
 0xf09   : > { %13424 = vmatprep.mubr.f32.mxu0 %v19229_v57 }
 0xf0c   : > { %13425 = vmatmul.mubr.f32.vlgmr.msra.gmra.mrb[40].mxu0 %v19225_v0 }
 0xf0d   : > { %13427 = vmatprep.mubr.f32.mxu0 %v19243_v22 }
 0xf10   : > { %13428 = vmatmul.mubr.f32.gmra.mrb[42].mxu0 %v19260_v10 }
 0xf11   : > { %13430 = vmatprep.mubr.f32.mxu0 %v19270_v28 }
 0xf14   : > { %13431 = vmatmul.mubr.f32.gmra.mrb[44].mxu0 %v19280_v47 }
 0xf15   : > { %13433 = vmatprep.mubr.f32.mxu0 %v19288_v46 }
 0xf18   : > { %13434 = vmatmul.mubr.f32.gmra.mrb[46].mxu0 %v19294_v16 }
 0xfdf   : > { %v13426_v41 = vpop.f32.mrb[40].mxu0 }
 0xfe0   : > { %v9750_v18 = vmul.f32 0.044715, %v13426_v41  ;;  %v9695_v34 = vpop.f32.mrb[41].mxu0  ;;  %v9742_v63 = vmul.f32 0.5, %v13426_v41 }
 0xfe1   : > { %v9749_v51 = vmul.f32 0.044715, %v9695_v34  ;;  %v9741_v32 = vmul.f32 0.5, %v9695_v34 }
 0xfe2   : > { %v9758_v21 = vmul.f32 %v13426_v41, %v9750_v18 }
 0xfe3   : > { %v9757_v38 = vmul.f32 %v9749_v51, %v9695_v34  ;;  %v13429_v57 = vpop.f32.mrb[42].mxu0 }
 0xfe4   : > { %v9766_v0 = vmul.f32 %v13426_v41, %v9758_v21  ;;  %v9752_v48 = vmul.f32 0.044715, %v13429_v57  ;;  %v9707_v33 = vpop.f32.mrb[43].mxu0 }
 0xfe5   : > { %v9765_v20 = vmul.f32 %v9757_v38, %v9695_v34  ;;  %v9751_v30 = vmul.f32 0.044715, %v9707_v33  ;;  %v9744_v38 = vmul.f32 0.5, %v13429_v57 }
 0xfe6   : > { %v9774_v22 = vadd.f32 %v13426_v41, %v9766_v0  ;;  %v9760_v54 = vmul.f32 %v13429_v57, %v9752_v48 }
 0xfe7   : > { %v9773_v13 = vadd.f32 %v9765_v20, %v9695_v34  ;;  %v9759_v3 = vmul.f32 %v9751_v30, %v9707_v33  ;;  %v19348_v31 = vpop.f32.mrb[44].mxu0  ;;  %v9743_v20 = vmul.f32 0.5, %v9707_v33 }
 0xfe8   : > { %v9768_v12 = vmul.f32 %v13429_v57, %v9760_v54  ;;  %v9754_v24 = vmul.f32 0.044715, %v19348_v31  ;;  %v19351_v10 = vpop.f32.mrb[45].mxu0  ;;  %v9782_v52 = vmul.f32 0.7978846, %v9774_v22 }
 0xfe9   : > { %v9767_v23 = vmul.f32 %v9759_v3, %v9707_v33  ;;  %v9753_v8 = vmul.f32 0.044715, %v19351_v10  ;;  %v9781_v17 = vmul.f32 0.7978846, %v9773_v13  ;;  %v9746_v3 = vmul.f32 0.5, %v19348_v31 }
 0xfea   : > { %v9776_v25 = vadd.f32 %v13429_v57, %v9768_v12  ;;  %v9762_v15 = vmul.f32 %v19348_v31, %v9754_v24  ;;  %15156 = vtanh.f32 %v9782_v52  ;;  %v9745_v57 = vmul.f32 0.5, %v19351_v10 }
 0xfeb   : > { %v9775_v28 = vadd.f32 %v9767_v23, %v9707_v33  ;;  %v9761_v60 = vmul.f32 %v9753_v8, %v19351_v10  ;;  %v13435_v7 = vpop.f32.mrb[46].mxu0  ;;  %15158 = vtanh.f32 %v9781_v17 }
 0xfec   : > { %v9770_v26 = vmul.f32 %v19348_v31, %v9762_v15  ;;  %v9756_v27 = vmul.f32 0.044715, %v13435_v7  ;;  %v9731_v2 = vpop.f32.mrb[47].mxu0  ;;  %v9784_v5 = vmul.f32 0.7978846, %v9776_v25  ;;  %v9748_v15 = vmul.f32 0.5, %v13435_v7 }
 0xfed   : > { %v9769_v47 = vmul.f32 %v9761_v60, %v19351_v10  ;;  %v9755_v61 = vmul.f32 0.044715, %v9731_v2  ;;  %v9783_v45 = vmul.f32 0.7978846, %v9775_v28 }
 0xfee   : > { %v9778_v59 = vadd.f32 %v19348_v31, %v9770_v26  ;;  %v9764_v37 = vmul.f32 %v13435_v7, %v9756_v27  ;;  %15160 = vtanh.f32 %v9784_v5  ;;  %v9747_v31 = vmul.f32 0.5, %v9731_v2 }
 0xfef   : > { %v9777_v4 = vadd.f32 %v9769_v47, %v19351_v10  ;;  %v9763_v46 = vmul.f32 %v9755_v61, %v9731_v2  ;;  %15162 = vtanh.f32 %v9783_v45 }
 0xff0   : > { %v9772_v53 = vmul.f32 %v13435_v7, %v9764_v37  ;;  %v9786_v36 = vmul.f32 0.7978846, %v9778_v59 }
 0xff1   : > { %v9771_v55 = vmul.f32 %v9763_v46, %v9731_v2  ;;  %v9785_v1 = vmul.f32 0.7978846, %v9777_v4 }
 0xff2   : > { %v9780_v14 = vadd.f32 %v13435_v7, %v9772_v53  ;;  %15164 = vtanh.f32 %v9786_v36 }
 0xff3   : > { %v9779_v16 = vadd.f32 %v9771_v55, %v9731_v2  ;;  %15166 = vtanh.f32 %v9785_v1 }
 0xff4   : > { %v15157_v44 = vpop.eup %15156  ;;  %v9788_v58 = vmul.f32 0.7978846, %v9780_v14 }
 0xff5   : > { %v15159_v29 = vpop.eup %15158  ;;  %v9798_v35 = vadd.f32 1.0, %v15157_v44  ;;  %v9787_v6 = vmul.f32 0.7978846, %v9779_v16 }
 0xff6   : > { %v9797_v50 = vadd.f32 1.0, %v15159_v29  ;;  %15168 = vtanh.f32 %v9788_v58 }
 0xff7   : > { %v9806_v62 = vmul.f32 %v9798_v35, %v9742_v63  ;;  %15170 = vtanh.f32 %v9787_v6 }
 0xff8   : > { %v15161_v39 = vpop.eup %15160  ;;  %v9805_v18 = vmul.f32 %v9797_v50, %v9741_v32 }
 0xff9   : > { %v15163_v51 = vpop.eup %15162  ;;  %v9817_v21 = vsel %vm5027_vm3, %v9806_v62, 0.0  ;;  %v9800_v0 = vadd.f32 1.0, %v15161_v39 }
 0xffa   : > { %9818 = vadd.xlane.f32.xlu0 %v9817_v21  ;;  %v9814_v48 = vsel %vm5027_vm3, %v9805_v18, 0.0  ;;  %v9799_v30 = vadd.f32 1.0, %v15163_v51 }
 0xffb   : > { %9815 = vadd.xlane.f32.xlu1 %v9814_v48  ;;  %v9808_v41 = vmul.f32 %v9800_v0, %v9744_v38 }
 0xffc   : > { %v15165_v22 = vpop.eup %15164  ;;  %v9807_v34 = vmul.f32 %v9799_v30, %v9743_v20 }
 0xffd   : > { %v15167_v54 = vpop.eup %15166  ;;  %v9823_v13 = vsel %vm5027_vm3, %v9808_v41, 0.0  ;;  %v9802_v12 = vadd.f32 1.0, %v15165_v22 }
 0xffe   : > { %9824 = vadd.xlane.f32.xlu0 %v9823_v13  ;;  %v9820_v24 = vsel %vm5027_vm3, %v9807_v34, 0.0  ;;  %v9801_v52 = vadd.f32 1.0, %v15167_v54 }
 0xfff   : > { %9821 = vadd.xlane.f32.xlu1 %v9820_v24  ;;  %v9810_v23 = vmul.f32 %v9802_v12, %v9746_v3 }
0x1000   : > { %v15169_v33 = vpop.eup %15168  ;;  %v9809_v8 = vmul.f32 %v9801_v52, %v9745_v57  ;;  %v9933_v57 = vld [vmem:[%s15516_s13] sm:$0xff]  ;;  %v9934_v52 = vld [vmem:[%s15516_s13 + $0x8] sm:$0xff] }
0x1001   : > { %v15171_v17 = vpop.eup %15170  ;;  %v9829_v25 = vsel %vm5027_vm3, %v9810_v23, 0.0  ;;  %v9804_v28 = vadd.f32 1.0, %v15169_v33  ;;  %v9969_v33 = vand.u32 4294901760, %v9934_v52 }
0x1002   : > { %9830 = vadd.xlane.f32.xlu0 %v9829_v25  ;;  %v9826_v60 = vsel %vm5027_vm3, %v9809_v8, 0.0  ;;  %v9803_v26 = vadd.f32 1.0, %v15171_v17  ;;  %v9936_v17 = vld [vmem:[%s15516_s13 + $0x18] sm:$0xff]  ;;  %v9937_v25 = vld [vmem:[%s15516_s13 + $0x20] sm:$0xff] }
0x1003   : > { %9827 = vadd.xlane.f32.xlu1 %v9826_v60  ;;  %v9812_v27 = vmul.f32 %v9804_v28, %v9748_v15  ;;  %v9975_v60 = vand.u32 4294901760, %v9936_v17 }
0x1004   : > { %v9811_v5 = vmul.f32 %v9803_v26, %v9747_v31  ;;  %v9938_v31 = vld [vmem:[%s15516_s13 + $0x28] sm:$0xff]  ;;  %v9978_v26 = vand.u32 4294901760, %v9937_v25 }
0x1005   : > { %v9835_v10 = vsel %vm5027_vm3, %v9812_v27, 0.0 }
0x1006   : > { %9836 = vadd.xlane.f32.xlu0 %v9835_v10  ;;  %v9832_v47 = vsel %vm5027_vm3, %v9811_v5, 0.0  ;;  %v9981_v10 = vand.u32 4294901760, %v9938_v31 }
0x1007   : > { %9833 = vadd.xlane.f32.xlu1 %v9832_v47 }
0x1087   : > { %v9819_v61 = vpop.xlane.xlu0 %9818 }
0x1088   : > { %v9840_v45 = vmul.f32 0.015625, %v9819_v61  ;;  %v9816_v59 = vpop.xlane.xlu1 %9815 }
0x1089   : > { %v9839_v37 = vmul.f32 0.015625, %v9816_v59 }
0x108a   : > { %v19370_v7 = vsub.f32 %v9806_v62, %v9840_v45  ;;  %v10127_v45 = vsub.f32 %v9934_v52, %v9969_v33 }
0x108b   : > { %v19372_v4 = vsub.f32 %v9805_v18, %v9839_v37  ;;  %v9825_v46 = vpop.xlane.xlu0 %9824 }
0x108c   : > { %v9842_v2 = vmul.f32 0.015625, %v9825_v46  ;;  %v9822_v53 = vpop.xlane.xlu1 %9821  ;;  %v9856_v36 = vmul.f32 %v19370_v7, %v19370_v7  ;;  %v19425_v46 = vpack.c.bf16 %v9981_v10, %v9978_v26 }
0x108d   : > { %v9841_v55 = vmul.f32 0.015625, %v9822_v53  ;;  %v9855_v1 = vmul.f32 %v19372_v4, %v19372_v4  ;;  %v10128_v53 = vand.u32 4294901760, %v10127_v45 }
0x108e   : > { %v19378_v14 = vsub.f32 %v9808_v41, %v9842_v2  ;;  %v9866_v16 = vsel %vm5027_vm3, %v9856_v36, 0.0 }
0x108f   : > { %v19381_v44 = vsub.f32 %v9807_v34, %v9841_v55  ;;  %v9831_v58 = vpop.xlane.xlu0 %9830  ;;  %9867 = vadd.xlane.f32.xlu0 %v9866_v16  ;;  %v9863_v29 = vsel %vm5027_vm3, %v9855_v1, 0.0  ;;  %v10129_v55 = vsub.f32 %v10127_v45, %v10128_v53  ;;  %v10141_v16 = vsub.f32 %v9936_v17, %v9975_v60 }
0x1090   : > { %v9844_v63 = vmul.f32 0.015625, %v9831_v58  ;;  %v9828_v35 = vpop.xlane.xlu1 %9827  ;;  %9864 = vadd.xlane.f32.xlu1 %v9863_v29  ;;  %v9858_v6 = vmul.f32 %v19378_v14, %v19378_v14 }
0x1091   : > { %v9843_v32 = vmul.f32 0.015625, %v9828_v35  ;;  %v9857_v50 = vmul.f32 %v19381_v44, %v19381_v44 }
0x1092   : > { %v19388_v62 = vsub.f32 %v9810_v23, %v9844_v63  ;;  %v9872_v39 = vsel %vm5027_vm3, %v9858_v6, 0.0  ;;  %v9966_v23 = vand.u32 4294901760, %v9933_v57  ;;  %v10130_v63 = vand.u32 4294901760, %v10129_v55 }
0x1093   : > { %v19391_v18 = vsub.f32 %v9809_v8, %v9843_v32  ;;  %9873 = vadd.xlane.f32.xlu0 %v9872_v39  ;;  %v9837_v51 = vpop.xlane.xlu0 %9836  ;;  %v9869_v21 = vsel %vm5027_vm3, %v9857_v50, 0.0  ;;  %v9935_v8 = vld [vmem:[%s15516_s13 + $0x10] sm:$0xff]  ;;  %v10142_v6 = vand.u32 4294901760, %v10141_v16  ;;  %v10148_v39 = vsub.f32 %v9937_v25, %v9978_v26 }
0x1094   : > { %v9846_v38 = vmul.f32 0.015625, %v9837_v51  ;;  %9870 = vadd.xlane.f32.xlu1 %v9869_v21  ;;  %v9834_v0 = vpop.xlane.xlu1 %9833  ;;  %v9860_v48 = vmul.f32 %v19388_v62, %v19388_v62  ;;  %v19415_v15 = vpack.c.bf16 %v9969_v33, %v9966_v23  ;;  %v9972_v28 = vand.u32 4294901760, %v9935_v8 }
0x1095   : > { %v9845_v20 = vmul.f32 0.015625, %v9834_v0  ;;  %v9859_v30 = vmul.f32 %v19391_v18, %v19391_v18  ;;  %v10120_v61 = vsub.f32 %v9933_v57, %v9966_v23  ;;  %v10143_v50 = vsub.f32 %v10141_v16, %v10142_v6 }
0x1096   : > { %v19398_v41 = vsub.f32 %v9812_v27, %v9846_v38  ;;  %v9878_v22 = vsel %vm5027_vm3, %v9860_v48, 0.0  ;;  %v9939_v27 = vld [vmem:[%s15516_s13 + $0x30] sm:$0xff]  ;;  %14133 = vmatprep.subr.bf16.mxu0 %v19415_v15  ;;  %v19421_v47 = vpack.c.bf16 %v9975_v60, %v9972_v28  ;;  %v10134_v1 = vsub.f32 %v9935_v8, %v9972_v28 }
0x1097   : > { %v19401_v34 = vsub.f32 %v9811_v5, %v9845_v20  ;;  %9879 = vadd.xlane.f32.xlu0 %v9878_v22  ;;  %v9875_v54 = vsel %vm5027_vm3, %v9859_v30, 0.0  ;;  %v9940_v5 = vld [vmem:[%s15516_s13 + $0x38] sm:$0xff]  ;;  %14135 = vmatpush3.bf16.msra.mxu0 %v19415_v15  ;;  %v9984_v59 = vand.u32 4294901760, %v9939_v27  ;;  %v10121_v2 = vand.u32 4294901760, %v10120_v61 }
0x1098   : > { %9876 = vadd.xlane.f32.xlu1 %v9875_v54  ;;  %v9862_v13 = vmul.f32 %v19398_v41, %v19398_v41  ;;  %v9987_v37 = vand.u32 4294901760, %v9940_v5  ;;  %14137 = vmatprep.subr.bf16.mxu0 %v19421_v47  ;;  %v10135_v35 = vand.u32 4294901760, %v10134_v1  ;;  %v10155_v51 = vsub.f32 %v9938_v31, %v9981_v10 }
0x1099   : > { %v9861_v3 = vmul.f32 %v19401_v34, %v19401_v34  ;;  %v10122_v36 = vsub.f32 %v10120_v61, %v10121_v2  ;;  %v10144_v0 = vand.u32 4294901760, %v10143_v50  ;;  %v10149_v48 = vand.u32 4294901760, %v10148_v39 }
0x109a   : > { %v9884_v12 = vsel %vm5027_vm3, %v9862_v13, 0.0  ;;  %v19428_v58 = vpack.c.bf16 %v9987_v37, %v9984_v59  ;;  %v10136_v32 = vsub.f32 %v10134_v1, %v10135_v35  ;;  %v10156_v20 = vand.u32 4294901760, %v10155_v51 }
0x109b   : > { %9885 = vadd.xlane.f32.xlu0 %v9884_v12  ;;  %v9881_v24 = vsel %vm5027_vm3, %v9861_v3, 0.0  ;;  %14139 = vmatpush3.bf16.msra.mxu0 %v19421_v47  ;;  %v10123_v29 = vand.u32 4294901760, %v10122_v36  ;;  %v10150_v22 = vsub.f32 %v10148_v39, %v10149_v48  ;;  %v10162_v54 = vsub.f32 %v9939_v27, %v9984_v59 }
0x109c   : > { %9882 = vadd.xlane.f32.xlu1 %v9881_v24  ;;  %14141 = vmatprep.subr.bf16.mxu0 %v19425_v46  ;;  %v10137_v38 = vand.u32 4294901760, %v10136_v32  ;;  %v10169_v13 = vsub.f32 %v9940_v5, %v9987_v37  ;;  %v10157_v3 = vsub.f32 %v10155_v51, %v10156_v20  ;;  %v19439_v52 = vpack.c.bf16 %v10127_v45, %v10120_v61 }
0x109d   : > { %v19433_v21 = vpack.c.bf16 %v10130_v63, %v10123_v29  ;;  %v10151_v12 = vand.u32 4294901760, %v10150_v22  ;;  %v10163_v24 = vand.u32 4294901760, %v10162_v54  ;;  %v19443_v60 = vpack.c.bf16 %v10141_v16, %v10134_v1 }
0x109e   : > { %v19435_v30 = vpack.c.bf16 %v10144_v0, %v10137_v38  ;;  %v10170_v57 = vand.u32 4294901760, %v10169_v13  ;;  %v10158_v23 = vand.u32 4294901760, %v10157_v3  ;;  %v19447_v26 = vpack.c.bf16 %v10155_v51, %v10148_v39  ;;  %v11094_v3 = vld [vmem:[%s684_s5] ss:$0 sm:$0xff]  ;;  %s20749_s5 = sld [smem:[#allocation9_spill]] }
0x109f   : > { %14143 = vmatpush3.bf16.msra.mxu0 %v19425_v46  ;;  %v10164_v33 = vsub.f32 %v10162_v54, %v10163_v24  ;;  %v19449_v27 = vpack.c.bf16 %v10169_v13, %v10162_v54  ;;  %v19451_v5 = vpack.c.bf16 %v10128_v53, %v10121_v2  ;;  %v19453_v10 = vpack.c.bf16 %v10142_v6, %v10135_v35 }
0x10a0   : > { %14145 = vmatprep.subr.bf16.mxu0 %v19428_v58  ;;  %v10171_v8 = vsub.f32 %v10169_v13, %v10170_v57  ;;  %v19441_v17 = vpack.c.bf16 %v10158_v23, %v10151_v12  ;;  %v19455_v61 = vpack.c.bf16 %v10156_v20, %v10149_v48  ;;  %v19457_v45 = vpack.c.bf16 %v10170_v57, %v10163_v24 }
0x10a1   : > { %v10165_v25 = vand.u32 4294901760, %v10164_v33 }
0x10a2   : > { %v10172_v28 = vand.u32 4294901760, %v10171_v8 }
0x10a3   : > { %14147 = vmatpush3.bf16.msra.mxu0 %v19428_v58 }
0x10a4   : > { %14149 = vmatprep.subr.bf16.mxu0 %v19433_v21  ;;  %v19445_v31 = vpack.c.bf16 %v10172_v28, %v10165_v25  ;;  %p11095_p1 = scmp.ne.s32.totalorder %s20749_s5, 1 }
0x111c   : > { %v9868_v59 = vpop.xlane.xlu0 %9867 }
0x111d   : > { %v9888_v37 = vmul.f32 0.015625, %v9868_v59  ;;  %v9865_v36 = vpop.xlane.xlu1 %9864 }
0x111e   : > { %v9887_v55 = vmul.f32 0.015625, %v9865_v36 }
0x111f   : > { %v9896_v1 = vadd.f32 1e-05, %v9888_v37 }
0x1120   : > { %v9895_v16 = vadd.f32 1e-05, %v9887_v55  ;;  %v9874_v29 = vpop.xlane.xlu0 %9873 }
0x1121   : > { %15172 = vrsqrt.f32 %v9896_v1  ;;  %v9890_v63 = vmul.f32 0.015625, %v9874_v29  ;;  %v9871_v32 = vpop.xlane.xlu1 %9870 }
0x1122   : > { %15174 = vrsqrt.f32 %v9895_v16  ;;  %v9889_v50 = vmul.f32 0.015625, %v9871_v32 }
0x1123   : > { %v9898_v2 = vadd.f32 1e-05, %v9890_v63 }
0x1124   : > { %v9897_v53 = vadd.f32 1e-05, %v9889_v50  ;;  %v9880_v35 = vpop.xlane.xlu0 %9879 }
0x1125   : > { %15176 = vrsqrt.f32 %v9898_v2  ;;  %v9892_v6 = vmul.f32 0.015625, %v9880_v35  ;;  %v9877_v39 = vpop.xlane.xlu1 %9876 }
0x1126   : > { %15178 = vrsqrt.f32 %v9897_v53  ;;  %v9891_v51 = vmul.f32 0.015625, %v9877_v39 }
0x1127   : > { %v9900_v38 = vadd.f32 1e-05, %v9892_v6 }
0x1128   : > { %v9899_v0 = vadd.f32 1e-05, %v9891_v51  ;;  %v9886_v48 = vpop.xlane.xlu0 %9885 }
0x1129   : > { %15180 = vrsqrt.f32 %v9900_v38  ;;  %v9894_v20 = vmul.f32 0.015625, %v9886_v48  ;;  %v9883_v22 = vpop.xlane.xlu1 %9882 }
0x112a   : > { %15182 = vrsqrt.f32 %v9899_v0  ;;  %v9893_v54 = vmul.f32 0.015625, %v9883_v22 }
0x112b   : > { %v15173_v13 = vpop.eup %15172  ;;  %v9902_v12 = vadd.f32 1e-05, %v9894_v20 }
0x112c   : > { %v15175_v24 = vpop.eup %15174  ;;  %v9912_v57 = vmul.f32 %v15173_v13, %v19370_v7  ;;  %v9901_v23 = vadd.f32 1e-05, %v9893_v54 }
0x112d   : > { %v9911_v33 = vmul.f32 %v15175_v24, %v19372_v4  ;;  %15184 = vrsqrt.f32 %v9902_v12 }
0x112e   : > { %v9926_v8 = vmul.f32 %v11094_v3, %v9912_v57  ;;  %15186 = vrsqrt.f32 %v9901_v23 }
0x112f   : > { %v15177_v25 = vpop.eup %15176  ;;  %v9925_v28 = vmul.f32 %v11094_v3, %v9911_v33 }
0x1130   : > { %v15179_v59 = vpop.eup %15178  ;;  %v9945_v37 = vsel %vm5027_vm3, %v9926_v8, 0  ;;  %v9914_v36 = vmul.f32 %v15177_v25, %v19378_v14 }
0x1131   : > { %v19468_v55 = vand.u32 4294901760, %v9945_v37  ;;  %v9913_v1 = vmul.f32 %v15179_v59, %v19381_v44  ;;  %v9942_v16 = vsel %vm5027_vm3, %v9925_v28, 0 }
0x1132   : > { %v19472_v7 = vand.u32 4294901760, %v9942_v16  ;;  %v9928_v29 = vmul.f32 %v11094_v3, %v9914_v36 }
0x1133   : > { %v15181_v4 = vpop.eup %15180  ;;  %v19475_v63 = vsub.f32 %v9945_v37, %v19468_v55  ;;  %v9927_v32 = vmul.f32 %v11094_v3, %v9913_v1 }
0x1134   : > { %v15183_v50 = vpop.eup %15182  ;;  %v9916_v2 = vmul.f32 %v15181_v4, %v19388_v62  ;;  %v19479_v53 = vsub.f32 %v9942_v16, %v19472_v7  ;;  %v9951_v14 = vsel %vm5027_vm3, %v9928_v29, 0 }
0x1135   : > { %v9915_v44 = vmul.f32 %v15183_v50, %v19391_v18  ;;  %v10050_v35 = vand.u32 4294901760, %v19475_v63  ;;  %v9948_v6 = vsel %vm5027_vm3, %v9927_v32, 0  ;;  %v19485_v39 = vand.u32 4294901760, %v9951_v14 }
0x1136   : > { %v10040_v51 = vand.u32 4294901760, %v19479_v53  ;;  %v19488_v38 = vand.u32 4294901760, %v9948_v6  ;;  %v9930_v0 = vmul.f32 %v11094_v3, %v9916_v2 }
0x1137   : > { %v15185_v48 = vpop.eup %15184  ;;  %v10051_v62 = vsub.f32 %v19475_v63, %v10050_v35  ;;  %v19494_v20 = vsub.f32 %v9951_v14, %v19485_v39  ;;  %v9929_v18 = vmul.f32 %v11094_v3, %v9915_v44 }
0x1138   : > { %v15187_v22 = vpop.eup %15186  ;;  %v9918_v54 = vmul.f32 %v15185_v48, %v19398_v41  ;;  %v10041_v13 = vsub.f32 %v19479_v53, %v10040_v51  ;;  %v19501_v12 = vsub.f32 %v9948_v6, %v19488_v38  ;;  %v9957_v24 = vsel %vm5027_vm3, %v9930_v0, 0 }
0x1139   : > { %v9917_v57 = vmul.f32 %v15187_v22, %v19401_v34  ;;  %v10070_v23 = vand.u32 4294901760, %v19494_v20  ;;  %v9954_v33 = vsel %vm5027_vm3, %v9929_v18, 0  ;;  %v19510_v41 = vand.u32 4294901760, %v9957_v24 }
0x113a   : > { %v10042_v8 = vand.u32 4294901760, %v10041_v13  ;;  %v10060_v25 = vand.u32 4294901760, %v19501_v12  ;;  %v19508_v28 = vand.u32 4294901760, %v9954_v33  ;;  %v10052_v59 = vand.u32 4294901760, %v10051_v62 }
0x113b   : > { %v10071_v37 = vsub.f32 %v19494_v20, %v10070_v23  ;;  %v9931_v36 = vmul.f32 %v11094_v3, %v9917_v57  ;;  %v9932_v1 = vmul.f32 %v11094_v3, %v9918_v54  ;;  %v19522_v29 = vsub.f32 %v9957_v24, %v19510_v41 }
0x113c   : > { %13452 = vmatprep.mubr.f32.mxu0 %v10042_v8  ;;  %v10061_v34 = vsub.f32 %v19501_v12, %v10060_v25  ;;  %v19519_v16 = vsub.f32 %v9954_v33, %v19508_v28 }
0x113d   : > { %13453 = vmatmul.mubr.f32.vlgmr.msra.gmra.mrb[48].mxu0 %v10052_v59  ;;  %v9960_v4 = vsel %vm5027_vm3, %v9931_v36, 0  ;;  %v9963_v32 = vsel %vm5027_vm3, %v9932_v1, 0  ;;  %v10090_v2 = vand.u32 4294901760, %v19522_v29  ;;  %v10072_v44 = vand.u32 4294901760, %v10071_v37 }
0x113e   : > { %14151 = vmatpush3.bf16.msra.mxu0 %v19433_v21  ;;  %v10062_v50 = vand.u32 4294901760, %v10061_v34  ;;  %v10080_v3 = vand.u32 4294901760, %v19519_v16  ;;  %v19529_v14 = vand.u32 4294901760, %v9960_v4  ;;  %v19532_v6 = vand.u32 4294901760, %v9963_v32 }
0x113f   : > { %14153 = vmatprep.subr.bf16.mxu0 %v19435_v30  ;;  %v10091_v21 = vsub.f32 %v19522_v29, %v10090_v2 }
0x1140   : > { %13455 = vmatprep.mubr.f32.mxu0 %v10062_v50  ;;  %v10081_v0 = vsub.f32 %v19519_v16, %v10080_v3  ;;  %v19541_v48 = vsub.f32 %v9960_v4, %v19529_v14  ;;  %v19544_v62 = vsub.f32 %v9963_v32, %v19532_v6 }
0x1141   : > { %13456 = vmatmul.mubr.f32.gmra.mrb[50].mxu0 %v10072_v44  ;;  %v10092_v54 = vand.u32 4294901760, %v10091_v21 }
0x1142   : > { %14155 = vmatpush3.bf16.msra.mxu0 %v19435_v30  ;;  %v10082_v18 = vand.u32 4294901760, %v10081_v0  ;;  %v10100_v22 = vand.u32 4294901760, %v19541_v48  ;;  %v10110_v13 = vand.u32 4294901760, %v19544_v62 }
0x1143   : > { %14157 = vmatprep.subr.bf16.mxu0 %v19441_v17 }
0x1144   : > { %13458 = vmatprep.mubr.f32.mxu0 %v10082_v18  ;;  %v10101_v24 = vsub.f32 %v19541_v48, %v10100_v22  ;;  %v10111_v57 = vsub.f32 %v19544_v62, %v10110_v13 }
0x1145   : > { %13459 = vmatmul.mubr.f32.gmra.mrb[52].mxu0 %v10092_v54 }
0x1146   : > { %14159 = vmatpush3.bf16.msra.mxu0 %v19441_v17  ;;  %v10102_v33 = vand.u32 4294901760, %v10101_v24  ;;  %v10112_v30 = vand.u32 4294901760, %v10111_v57 }
0x1147   : > { %14161 = vmatprep.subr.bf16.mxu0 %v19445_v31 }
0x1148   : > { %13461 = vmatprep.mubr.f32.mxu0 %v10102_v33 }
0x1149   : > { %13462 = vmatmul.mubr.f32.gmra.mrb[54].mxu0 %v10112_v30 }
0x114a   : > { %14163 = vmatpush3.bf16.msra.mxu0 %v19445_v31  ;;  %13480 = vmatprep.mubr.f32.mxu0 %v19472_v7 }
0x114b   : > { %14165 = vmatprep.subr.bf16.mxu0 %v19439_v52 }
0x114d   : > { %13481 = vmatmul.mubr.f32.vlgmr.msra.gmra.mrb[48].mxu0 %v19468_v55 }
0x114e   : > { %14167 = vmatpush3.bf16.msra.mxu0 %v19439_v52  ;;  %13483 = vmatprep.mubr.f32.mxu0 %v19488_v38 }
0x114f   : > { %14169 = vmatprep.subr.bf16.mxu0 %v19443_v60 }
0x1151   : > { %13484 = vmatmul.mubr.f32.gmra.mrb[50].mxu0 %v19485_v39 }
0x1152   : > { %14171 = vmatpush3.bf16.msra.mxu0 %v19443_v60  ;;  %13486 = vmatprep.mubr.f32.mxu0 %v19508_v28 }
0x1153   : > { %14173 = vmatprep.subr.bf16.mxu0 %v19447_v26 }
0x1155   : > { %13487 = vmatmul.mubr.f32.gmra.mrb[52].mxu0 %v19510_v41 }
0x1156   : > { %14175 = vmatpush3.bf16.msra.mxu0 %v19447_v26  ;;  %13489 = vmatprep.mubr.f32.mxu0 %v19529_v14 }
0x1157   : > { %14177 = vmatprep.subr.bf16.mxu0 %v19449_v27 }
0x1159   : > { %13490 = vmatmul.mubr.f32.gmra.mrb[54].mxu0 %v19532_v6 }
0x115a   : > { %14179 = vmatpush3.bf16.msra.mxu0 %v19449_v27  ;;  %13508 = vmatprep.mubr.f32.mxu0 %v19479_v53 }
0x115b   : > { %14181 = vmatprep.subr.bf16.mxu0 %v19415_v15 }
0x115d   : > { %13509 = vmatmul.mubr.f32.vlgmr.msra.gmra.mrb[48].mxu0 %v19475_v63 }
0x115e   : > { %14183 = vmatpush3.bf16.msra.mxu0 %v19415_v15  ;;  %13511 = vmatprep.mubr.f32.mxu0 %v19501_v12 }
0x115f   : > { %14185 = vmatprep.subr.bf16.mxu0 %v19421_v47 }
0x1161   : > { %13512 = vmatmul.mubr.f32.gmra.mrb[50].mxu0 %v19494_v20 }
0x1162   : > { %14187 = vmatpush3.bf16.msra.mxu0 %v19421_v47  ;;  %13514 = vmatprep.mubr.f32.mxu0 %v19519_v16 }
0x1163   : > { %14189 = vmatprep.subr.bf16.mxu0 %v19425_v46 }
0x1165   : > { %13515 = vmatmul.mubr.f32.gmra.mrb[52].mxu0 %v19522_v29 }
0x1166   : > { %14191 = vmatpush3.bf16.msra.mxu0 %v19425_v46  ;;  %13517 = vmatprep.mubr.f32.mxu0 %v19541_v48 }
0x1167   : > { %14193 = vmatprep.subr.bf16.mxu0 %v19428_v58 }
0x1169   : > { %13518 = vmatmul.mubr.f32.gmra.mrb[54].mxu0 %v19544_v62 }
0x116a   : > { %14195 = vmatpush3.bf16.msra.mxu0 %v19428_v58  ;;  %13536 = vmatprep.mubr.f32.mxu0 %v10040_v51 }
0x116b   : > { %14197 = vmatprep.subr.bf16.mxu0 %v19451_v5 }
0x116d   : > { %13537 = vmatmul.mubr.f32.vlgmr.msra.gmra.mrb[48].mxu0 %v10050_v35 }
0x116e   : > { %14199 = vmatpush3.bf16.msra.mxu0 %v19451_v5  ;;  %13539 = vmatprep.mubr.f32.mxu0 %v10060_v25 }
0x116f   : > { %14201 = vmatprep.subr.bf16.mxu0 %v19453_v10 }
0x1171   : > { %13540 = vmatmul.mubr.f32.gmra.mrb[50].mxu0 %v10070_v23 }
0x1172   : > { %14203 = vmatpush3.bf16.msra.mxu0 %v19453_v10  ;;  %13542 = vmatprep.mubr.f32.mxu0 %v10080_v3 }
0x1173   : > { %14205 = vmatprep.subr.bf16.mxu0 %v19455_v61 }
0x1175   : > { %13543 = vmatmul.mubr.f32.gmra.mrb[52].mxu0 %v10090_v2 }
0x1176   : > { %14207 = vmatpush3.bf16.msra.mxu0 %v19455_v61  ;;  %13545 = vmatprep.mubr.f32.mxu0 %v10100_v22 }
0x1177   : > { %14209 = vmatprep.subr.bf16.mxu0 %v19457_v45 }
0x1179   : > { %13546 = vmatmul.mubr.f32.gmra.mrb[54].mxu0 %v10110_v13 }
0x117a   : > { %14211 = vmatpush3.bf16.msra.mxu0 %v19457_v45  ;;  %13564 = vmatprep.mubr.f32.mxu0 %v19472_v7 }
0x117b   : > { %14213 = vmatprep.subr.bf16.mxu0 %v19415_v15 }
0x117d   : > { %13565 = vmatmul.mubr.f32.vlgmr.msra.gmra.mrb[48].mxu0 %v19468_v55 }
0x117e   : > { %14215 = vmatpush3.bf16.msra.mxu0 %v19415_v15  ;;  %13567 = vmatprep.mubr.f32.mxu0 %v19488_v38 }
0x117f   : > { %14217 = vmatprep.subr.bf16.mxu0 %v19421_v47 }
0x1181   : > { %13568 = vmatmul.mubr.f32.gmra.mrb[50].mxu0 %v19485_v39 }
0x1182   : > { %14219 = vmatpush3.bf16.msra.mxu0 %v19421_v47  ;;  %13570 = vmatprep.mubr.f32.mxu0 %v19508_v28 }
0x1183   : > { %14221 = vmatprep.subr.bf16.mxu0 %v19425_v46 }
0x1185   : > { %13571 = vmatmul.mubr.f32.gmra.mrb[52].mxu0 %v19510_v41 }
0x1186   : > { %14223 = vmatpush3.bf16.msra.mxu0 %v19425_v46  ;;  %13573 = vmatprep.mubr.f32.mxu0 %v19529_v14 }
0x1187   : > { %14225 = vmatprep.subr.bf16.mxu0 %v19428_v58 }
0x1189   : > { %13574 = vmatmul.mubr.f32.gmra.mrb[54].mxu0 %v19532_v6 }
0x118a   : > { %14227 = vmatpush3.bf16.msra.mxu0 %v19428_v58  ;;  %13592 = vmatprep.mubr.f32.mxu0 %v19472_v7 }
0x118d   : > { %13593 = vmatmul.mubr.f32.vlgmr.msra.gmra.mrb[48].mxu0 %v19468_v55 }
0x118e   : > { %13595 = vmatprep.mubr.f32.mxu0 %v19488_v38 }
0x1191   : > { %13596 = vmatmul.mubr.f32.gmra.mrb[50].mxu0 %v19485_v39 }
0x1192   : > { %13598 = vmatprep.mubr.f32.mxu0 %v19508_v28 }
0x1195   : > { %13599 = vmatmul.mubr.f32.gmra.mrb[52].mxu0 %v19510_v41 }
0x1196   : > { %13601 = vmatprep.mubr.f32.mxu0 %v19529_v14 }
0x1199   : > { %13602 = vmatmul.mubr.f32.gmra.mrb[54].mxu0 %v19532_v6 }
0x1260   : > { %v13594_v15 = vpop.f32.mrb[48].mxu0 }
0x1261   : > { %v14236_v47 = vadd.f32 %v13594_v15, %v19102_v56  ;;  %v10757_v46 = vpop.f32.mrb[49].mxu0 }
0x1262   : > { %v14237_v58 = vadd.f32 %v10757_v46, %v19104_v42 }
0x1263   : > { %10804 = vst.msk [vmem:[#allocation2 + $0x8] sm:$0xff] %vm748_vm1, %v14236_v47 }
0x1264   : > { %10803 = vst.msk [vmem:[#allocation2] sm:$0xff] %vm748_vm1, %v14237_v58  ;;  %v13597_v52 = vpop.f32.mrb[50].mxu0  ;;  %10815 = vxpose.xlu0.b32.start [1/8] (short) (narrow) (!%p11095_p1), %v14237_v58, 32 }
0x1265   : > { %v14238_v17 = vadd.f32 %v13597_v52, %v19117_v49  ;;  %v10769_v60 = vpop.f32.mrb[51].mxu0 }
0x1266   : > { %v14239_v31 = vadd.f32 %v10769_v60, %v19111_v19 }
0x1267   : > { %10806 = vst.msk [vmem:[#allocation2 + $0x18] sm:$0xff] %vm748_vm1, %v14238_v17 }
0x1268   : > { %10805 = vst.msk [vmem:[#allocation2 + $0x10] sm:$0xff] %vm748_vm1, %v14239_v31  ;;  %v13600_v26 = vpop.f32.mrb[52].mxu0  ;;  %10816 = vxpose.xlu0.b32.cont [2/8] (short) (narrow) (!%p11095_p1), %v14236_v47, 32 }
0x1269   : > { %v14240_v56 = vadd.f32 %v13600_v26, %v19127_v43  ;;  %v10781_v27 = vpop.f32.mrb[53].mxu0 }
0x126a   : > { %v14241_v42 = vadd.f32 %v10781_v27, %v19120_v9  ;;  %10814 = sbr.rel (%p11095_p1) target bundleno = 4850 (0x12f2), region = 84 }
0x126b   : > { %10808 = vst.msk [vmem:[#allocation2 + $0x28] sm:$0xff] %vm748_vm1, %v14240_v56 }
0x126c   : > { %10807 = vst.msk [vmem:[#allocation2 + $0x20] sm:$0xff] %vm748_vm1, %v14241_v42  ;;  %v13603_v5 = vpop.f32.mrb[54].mxu0  ;;  %10817 = vxpose.xlu0.b32.cont [3/8] (short) (narrow) (!%p11095_p1), %v14239_v31, 32 }
0x126d   : > { %v14242_v49 = vadd.f32 %v13603_v5, %v19136_v11  ;;  %v10793_v10 = vpop.f32.mrb[55].mxu0 }
0x126e   : > { %v14243_v19 = vadd.f32 %v10793_v10, %v19130_v40 }
0x126f   : > { %10810 = vst.msk [vmem:[#allocation2 + $0x38] sm:$0xff] %vm748_vm1, %v14242_v49 }
0x1270   : > { %10809 = vst.msk [vmem:[#allocation2 + $0x30] sm:$0xff] %vm748_vm1, %v14243_v19  ;;  %10818 = vxpose.xlu0.b32.cont [4/8] (short) (narrow) (!%p11095_p1), %v14238_v17, 32 }
0x1274   : > { %10819 = vxpose.xlu0.b32.cont [5/8] (short) (narrow) %v14241_v42, 32 }
0x1278   : > { %10820 = vxpose.xlu0.b32.cont [6/8] (short) (narrow) %v14240_v56, 32 }
0x127c   : > { %10821 = vxpose.xlu0.b32.cont [7/8] (short) (narrow) %v14243_v19, 32 }
0x1280   : > { %10822 = vxpose.xlu0.b32.end [8/8] (short) (narrow) %v14242_v49, 32 }
0x12e4   : > { %v10831_v9 = vpop.trf.xlu0 }
0x12e5   : > { %10847 = vst.msk [vmem:[%s15518_s3] sm:$0xff] %vm5027_vm3, %v10831_v9 }
0x12e8   : > { %v10832_v43 = vpop.trf.xlu0 }
0x12e9   : > { %10848 = vst.msk [vmem:[%s15518_s3 + $0x8] sm:$0xff] %vm5027_vm3, %v10832_v43 }
0x12ec   : > { %v10833_v40 = vpop.trf.xlu0 }
0x12ed   : > { %10849 = vst.msk [vmem:[%s15518_s3 + $0x10] sm:$0xff] %vm5027_vm3, %v10833_v40 }
0x12f0   : > { %v10834_v11 = vpop.trf.xlu0 }
0x12f1   : > { %10850 = vst.msk [vmem:[%s15518_s3 + $0x18] sm:$0xff] %vm5027_vm3, %v10834_v11 }
0x12f2 PF: > { %s20750_s26 = sld [smem:[#allocation10_spill]]  ;;  %s20751_s8 = sld [smem:[#allocation7_spill]] }
0x12f3   : > { %s20753_s24 = sld [smem:[#allocation143_spill]]  ;;  %s10865_s28 = sshll.u32 %s15518_s3, 4  ;;  %s19663_s28 = int_to_ptr.vmem [resolvable:$true] %s10865_s28 }
0x12f4   : > { %s15198_s25 = scalar_lea.vmem %s19663_s28, 512  ;;  %s15297_s2 = smov [#allocation3]  }
0x12f5   : > { %p15199_p2 = scmp.ne.s32.totalorder %s19663_s28, %s15198_s25  ;;  %s15202_s30 = sshll.u32 %s15297_s2, 4  ;;  %s15203_s30 = int_to_ptr.vmem [resolvable:$false] %s15202_s30 }
0x12f6   : > { %s15204_s17 = scalar_lea.vmem %s15203_s30, 1024  ;;  %p15205_p6 = scmp.lt.s32.totalorder %s19663_s28, %s15203_s30 }
0x12f7   : > { %p15200_p4 = pnand %p15199_p2, %p15424_p3  ;;  %p15206_p7 = scmp.lt.s32.totalorder %s15204_s17, %s15198_s25 }
0x12f8   : > { %s11107_s16 = sshll.u32 %s20750_s26, 9  ;;  %s20754_s21 = sand.u32 1, %s20751_s8  }
0x12f9   : > { %s19660_s19 = scalar_lea.hbm %s20753_s24, %s11107_s16  ;;  %s19667_s20 = scalar_lea.sflag [#allocation4], %s20754_s21 }
0x12fa   : > { %p15201_p5 = pneg %p15200_p4  ;;  %p15207_p8 = por %p15206_p7, %p15205_p6 }
0x12fc   : > { %p15208_p10 = pnand %p15207_p8, %p15201_p5 }
0x12fe   : > { %15211 = shalt.err (!%p15208_p10)
}
0x12ff   : > { %s15212_s3 = scalar_lea.hbm %s19660_s19, 512  ;;  %s15216_s7 = scalar_lea.hbm %s20753_s24, 1024 }
0x1300   : > { %p15213_p11 = scmp.ne.s32.totalorder %s19660_s19, %s15212_s3  ;;  %p15217_p0 = scmp.lt.u32.totalorder %s19660_s19, %s20753_s24 }
0x1301   : > { %p15218_p1 = scmp.lt.u32.totalorder %s15216_s7, %s15212_s3  ;;  %p15220_p4 = scmp.lt.u32.totalorder %s15212_s3, %s19660_s19 }
0x1302   : > { %p15214_p12 = pnand %p15213_p11, %p15424_p3 }
0x1303   : > { %p15219_p2 = por %p15218_p1, %p15217_p0 }
0x1304   : > { %p15215_p13 = pneg %p15214_p12 }
0x1305   : > { %p15221_p5 = por %p15220_p4, %p15219_p2 }
0x1307   : > { %p15222_p6 = pnand %p15221_p5, %p15215_p13 }
0x1309   : > { %15225 = shalt.err (!%p15222_p6)
}
0x130a   : > { %s15298_s13 = smov 128   ;;  %s15299_s15 = smov 8  }
0x130b   : > { %14756 = dma.vmem_to_hbm [thread:$0]  (%p15424_p3), %s19663_s28, 512, %s19660_s19, %s19667_s20, %s15298_s13, %s15298_s13, %s15299_s15  }
0x130c PF: > { %s20755_s5 = sld [smem:[#allocation13_spill]]  ;;  %s20756_s26 = sld [smem:[#allocation6_spill]] }
0x1312   : > { %p14762_p7 = scmp.ge.s32.totalorder %s20755_s5, 2  ;;  %s10880_s16 = sand.u32 1, %s20756_s26  }
0x1313   : > { %s10881_s23 = scalar_lea.sflag [#allocation4], %s10880_s16 }
0x1314   : > { %p14759_p8 = pnand %p14762_p7, %p15434_p9 }
0x1316   : > { %15259 = dma.done.wait (!%p14759_p8), %s10881_s23, 512  }
0x1317   : > { %15261 = vsyncadd (!%p14759_p8), %s10881_s23, 4294966784  ;;  %s27_s20 = sadd.s32 1, %s20755_s5   ;;  %s20758_s29 = sld [smem:[#allocation7_spill]] }
0x1318   : > { %p24_p10 = scmp.ge.s32.totalorder %s27_s20, 6   ;;  %s20759_s30 = sld [smem:[#allocation8_spill]] }
0x1319   : > { %s20760_s15 = sld [smem:[#allocation18_spill]]  ;;  %s20761_s16 = sld [smem:[#allocation11_spill]] }
0x131a   : > { %s20762_s17 = sld [smem:[#allocation12_spill]]  ;;  %s20763_s18 = sld [smem:[#allocation14_spill]] }
0x131b   : > { %s20764_s19 = sld [smem:[#allocation16_spill]]  ;;  %26 = sbr.rel (!%p24_p10) target bundleno = 14 (0xe), region = 158 }
0x1322   :  { %10886 = vsyncpa [#allocation4], 1 }
0x1323   :  { %10888 = vsyncpa [#allocation4 + $0x1], 1 }

</bundles_post_ra>
